<compile_context>
chip_gen: v5e
topology: v5e:2x2
jax: 0.10.0
libtpu: 0.0.40
codegen_flags: <defaults>
</compile_context>

<pallas_src>
import jax
import jax.numpy as jnp
from jax.experimental import pallas as pl
from jax.experimental.pallas import tpu as pltpu


# ------------------------------ fused Pallas kernel -------------------------------

def _fused_autoencoder_kernel(xp_ref,
                              w1_ref, b1_ref, w2_ref, b2_ref, w3_ref, b3_ref,
                              t1w_ref, t1b_ref, t2w_ref, t2b_ref, t3w_ref, t3b_ref,
                              recon_ref, z_ref,
                              pad2_ref, pad3_ref):
    f32 = jnp.float32

    def conv3x3_relu(load_slab, H, W, Cin, w_ref, b_ref):
        # im2col: 9 shifted (H, W, Cin) slabs -> one (H*W, 9*Cin) tile -> 1 MXU matmul.
        cols = [load_slab(dy, dx).reshape(H * W, Cin)
                for dy in range(3) for dx in range(3)]
        patches = jnp.concatenate(cols, axis=1)                       # (H*W, 9*Cin)
        acc = jnp.dot(patches, w_ref[...], preferred_element_type=f32)
        return jnp.maximum(acc + b_ref[...], 0.0)                     # (H*W, Cout)

    def maxpool2(v, H, W):
        # v: (H*W, C) row-major spatial -> (H//2 * W//2, C)   (MaxPool2d(2, 2))
        C = v.shape[1]
        v = jnp.max(v.reshape(H, W // 2, 2, C), axis=2)               # pool along W
        v = jnp.max(v.reshape(H // 2, 2, W // 2, C), axis=1)          # pool along H
        return v.reshape((H // 2) * (W // 2), C)

    def tconv2x2(v, w_ref, b_ref, act):
        # ConvTranspose2d(kernel=2, stride=2) in blocked-pixel layout:
        # input rows are independent pixels; output rows ordered (pixel, di, dj).
        # No in-kernel spatial interleave (pixel shuffle happens in the wrapper).
        M = v.shape[0]
        Cout = w_ref.shape[3]
        ys = [jnp.dot(v, w_ref[di, dj], preferred_element_type=f32)
              for di in range(2) for dj in range(2)]
        y = jnp.stack(ys, axis=1) + b_ref[...].reshape(1, 1, Cout)    # (M, 4, Cout)
        y = y.reshape(4 * M, Cout)
        return jnp.maximum(y, 0.0) if act == "relu" else jax.nn.sigmoid(y)

    Cin0 = xp_ref.shape[3]

    # ----------------- encoder: conv + ReLU with fused 2x2 max-pool ----------------
    h1 = conv3x3_relu(lambda dy, dx: xp_ref[0, dy:dy + 16, dx:dx + 16, :],
                      16, 16, Cin0, w1_ref, b1_ref)                   # (256, 16)
    p1 = maxpool2(h1, 16, 16)                                         # (64, 16) = 8x8

    pad2_ref[...] = jnp.zeros(pad2_ref.shape, f32)
    pad2_ref[1:9, 1:9, :] = p1.reshape(8, 8, 16)
    h2 = conv3x3_relu(lambda dy, dx: pad2_ref[dy:dy + 8, dx:dx + 8, :],
                      8, 8, 16, w2_ref, b2_ref)                       # (64, 4)
    p2 = maxpool2(h2, 8, 8)                                           # (16, 4) = 4x4

    pad3_ref[...] = jnp.zeros(pad3_ref.shape, f32)
    pad3_ref[1:5, 1:5, :] = p2.reshape(4, 4, 4)
    h3 = conv3x3_relu(lambda dy, dx: pad3_ref[dy:dy + 4, dx:dx + 4, :],
                      4, 4, 4, w3_ref, b3_ref)                        # (16, 4)
    z = maxpool2(h3, 4, 4)                                            # (4, 4) latent (2x2x4)

    z_ref[...] = z.reshape(1, 4, 4)

    # ----------------- decoder: blocked-pixel transposed convolutions ---------------
    d1 = tconv2x2(z, t1w_ref, t1b_ref, "relu")                        # (16, 4)
    d2 = tconv2x2(d1, t2w_ref, t2b_ref, "relu")                       # (64, 4)
    d3 = tconv2x2(d2, t3w_ref, t3b_ref, "sigmoid")                    # (256, n_channels)

    recon_ref[...] = d3.reshape(1, 256, d3.shape[1])


# ------------------------------ wrapper (one pallas_call) --------------------------

def conv_autoencoder_forward(params, x_nchw):
    # x_nchw: (N, C, 16, 16) float32 -> (recon NCHW, latent NCHW)
    N, C, H, W = x_nchw.shape
    assert (H, W) == (16, 16)
    x = jnp.transpose(x_nchw, (0, 2, 3, 1)).astype(jnp.float32)       # NHWC
    xp = jnp.pad(x, ((0, 0), (1, 1), (1, 1), (0, 0)))                 # (N, 18, 18, C)

    # conv weights pre-flattened to im2col form (9*Cin, Cout); row order (dy, dx, cin)
    w1 = params["conv1_w"].reshape(-1, params["conv1_w"].shape[-1])   # (9*C, 16)
    w2 = params["conv2_w"].reshape(-1, params["conv2_w"].shape[-1])   # (144, 4)
    w3 = params["conv3_w"].reshape(-1, params["conv3_w"].shape[-1])   # (36, 4)

    def full(shape):
        return pl.BlockSpec(shape, lambda n, _s=len(shape): (0,) * _s)

    recon_blk, z_blk = pl.pallas_call(
        _fused_autoencoder_kernel,
        out_shape=(jax.ShapeDtypeStruct((N, 256, C), jnp.float32),    # blocked recon
                   jax.ShapeDtypeStruct((N, 4, 4), jnp.float32)),     # latent (i*2+j, c)
        grid=(N,),
        in_specs=[
            pl.BlockSpec((1, H + 2, W + 2, C), lambda n: (n, 0, 0, 0)),
            full(w1.shape), full(params["conv1_b"].shape),
            full(w2.shape), full(params["conv2_b"].shape),
            full(w3.shape), full(params["conv3_b"].shape),
            full(params["t1_w"].shape), full(params["t1_b"].shape),
            full(params["t2_w"].shape), full(params["t2_b"].shape),
            full(params["t3_w"].shape), full(params["t3_b"].shape),
        ],
        out_specs=(
            pl.BlockSpec((1, 256, C), lambda n: (n, 0, 0)),
            pl.BlockSpec((1, 4, 4), lambda n: (n, 0, 0)),
        ),
        scratch_shapes=[
            pltpu.VMEM((10, 10, 16), jnp.float32),   # zero-padded input of conv2
            pltpu.VMEM((6, 6, 4), jnp.float32),      # zero-padded input of conv3
        ],
        compiler_params=pltpu.CompilerParams(dimension_semantics=("parallel",)),
    )(xp, w1, params["conv1_b"], w2, params["conv2_b"], w3, params["conv3_b"],
      params["t1_w"], params["t1_b"], params["t2_w"], params["t2_b"],
      params["t3_w"], params["t3_b"])

    # Pixel shuffle: blocked decoder rows (i, j, di1, dj1, di2, dj2, di3, dj3) -> 16x16.
    # Pure layout plumbing in XLA, outside the kernel.
    y = recon_blk.reshape(N, 2, 2, 2, 2, 2, 2, 2, 2, C)
    y = jnp.transpose(y, (0, 1, 3, 5, 7, 2, 4, 6, 8, 9)).reshape(N, 16, 16, C)
    z = z_blk.reshape(N, 2, 2, 4)
    return jnp.transpose(y, (0, 3, 1, 2)), jnp.transpose(z, (0, 3, 1, 2))


# ------------------------------ parameters -----------------------------------------

def init_params(key, n_channels=3):
    # Deterministic synthetic init (PyTorch-shaped tensors -> kernel layout).
    ks = jax.random.split(key, 12)
    s = 0.1

    def conv(kw, kb, cout, cin, k):
        w = s * jax.random.normal(kw, (cout, cin, k, k), jnp.float32)   # (Cout,Cin,kh,kw)
        b = s * jax.random.normal(kb, (cout,), jnp.float32)
        return jnp.transpose(w, (2, 3, 1, 0)), b.reshape(1, cout)       # (kh,kw,Cin,Cout)

    def tconv(kw, kb, cin, cout, k):
        w = s * jax.random.normal(kw, (cin, cout, k, k), jnp.float32)   # (Cin,Cout,kh,kw)
        b = s * jax.random.normal(kb, (cout,), jnp.float32)
        return jnp.transpose(w, (2, 3, 0, 1)), b.reshape(1, cout)       # (kh,kw,Cin,Cout)

    p = {}
    p["conv1_w"], p["conv1_b"] = conv(ks[0], ks[1], 16, n_channels, 3)
    p["conv2_w"], p["conv2_b"] = conv(ks[2], ks[3], 4, 16, 3)
    p["conv3_w"], p["conv3_b"] = conv(ks[4], ks[5], 4, 4, 3)
    p["t1_w"], p["t1_b"] = tconv(ks[6], ks[7], 4, 4, 2)
    p["t2_w"], p["t2_b"] = tconv(ks[8], ks[9], 4, 4, 2)
    p["t3_w"], p["t3_b"] = tconv(ks[10], ks[11], 4, n_channels, 2)
    return p


# ------------------------------ pure-JAX reference ---------------------------------

def _ref_conv3x3_relu(x, w, b):
    N, H, W, _ = x.shape
    xp = jnp.pad(x, ((0, 0), (1, 1), (1, 1), (0, 0)))
    acc = jnp.zeros((N, H, W, w.shape[-1]), jnp.float32)
    for dy in range(3):
        for dx in range(3):
            acc = acc + jnp.einsum("nhwc,cd->nhwd",
                                   xp[:, dy:dy + H, dx:dx + W, :], w[dy, dx])
    return jnp.maximum(acc + b.reshape(1, 1, 1, -1), 0.0)


def _ref_maxpool2(x):
    N, H, W, C = x.shape
    return jnp.max(x.reshape(N, H // 2, 2, W // 2, 2, C), axis=(2, 4))


def _ref_tconv(x, w, b, activation):
    N, H, W, _ = x.shape
    Cout = w.shape[-1]
    y = jnp.einsum("nhwc,ijcd->nhiwjd", x, w).reshape(N, 2 * H, 2 * W, Cout)
    y = y + b.reshape(1, 1, 1, -1)
    return jnp.maximum(y, 0.0) if activation == "relu" else jax.nn.sigmoid(y)


def reference_forward(params, x_nchw):
    x = jnp.transpose(x_nchw, (0, 2, 3, 1)).astype(jnp.float32)
    x = _ref_maxpool2(_ref_conv3x3_relu(x, params["conv1_w"], params["conv1_b"]))
    x = _ref_maxpool2(_ref_conv3x3_relu(x, params["conv2_w"], params["conv2_b"]))
    z = _ref_maxpool2(_ref_conv3x3_relu(x, params["conv3_w"], params["conv3_b"]))
    y = _ref_tconv(z, params["t1_w"], params["t1_b"], "relu")
    y = _ref_tconv(y, params["t2_w"], params["t2_b"], "relu")
    y = _ref_tconv(y, params["t3_w"], params["t3_b"], "sigmoid")
    return jnp.transpose(y, (0, 3, 1, 2)), jnp.transpose(z, (0, 3, 1, 2))


# ------------------------------ main ------------------------------------------------

if __name__ == "__main__":
    key = jax.random.PRNGKey(0)
    pkey, xkey = jax.random.split(key)
    params = init_params(pkey, n_channels=3)

    x = jax.random.normal(xkey, (2, 3, 16, 16), jnp.float32)   # NCHW, like PyTorch

    fwd = jax.jit(conv_autoencoder_forward)
    out, latent = fwd(params, x)
    out = jax.block_until_ready(out)
    latent = jax.block_until_ready(latent)

    assert out.shape == (2, 3, 16, 16), out.shape
    assert latent.shape == (2, 4, 2, 2), latent.shape

    ref_out, ref_latent = reference_forward(params, x)
    assert jnp.allclose(out, ref_out, atol=1e-4, rtol=1e-4)
    assert jnp.allclose(latent, ref_latent, atol=1e-4, rtol=1e-4)

    print("KERNEL_OK")
</pallas_src>

<mosaic_0001>
module attributes {stable_mosaic.version = 11 : i64} {
  func.func @_fused_autoencoder_kernel(%arg0: i32, %arg1: memref<1x18x18x3xf32, #tpu.memory_space<vmem>>, %arg2: memref<27x16xf32, #tpu.memory_space<vmem>>, %arg3: memref<1x16xf32, #tpu.memory_space<vmem>>, %arg4: memref<144x4xf32, #tpu.memory_space<vmem>>, %arg5: memref<1x4xf32, #tpu.memory_space<vmem>>, %arg6: memref<36x4xf32, #tpu.memory_space<vmem>>, %arg7: memref<1x4xf32, #tpu.memory_space<vmem>>, %arg8: memref<2x2x4x4xf32, #tpu.memory_space<vmem>>, %arg9: memref<1x4xf32, #tpu.memory_space<vmem>>, %arg10: memref<2x2x4x4xf32, #tpu.memory_space<vmem>>, %arg11: memref<1x4xf32, #tpu.memory_space<vmem>>, %arg12: memref<2x2x4x3xf32, #tpu.memory_space<vmem>>, %arg13: memref<1x3xf32, #tpu.memory_space<vmem>>, %arg14: memref<1x256x3xf32, #tpu.memory_space<vmem>>, %arg15: memref<1x4x4xf32, #tpu.memory_space<vmem>>, %arg16: memref<10x10x16xf32, #tpu.memory_space<vmem>>, %arg17: memref<6x6x4xf32, #tpu.memory_space<vmem>>) attributes {dimension_semantics = [#tpu.dimension_semantics<parallel>], iteration_bounds = array<i64: 2>, scalar_prefetch = 0 : i64, scratch_operands = 2 : i64, tpu.core_type = #tpu.core_type<tc>, window_params = [{transform_indices = @transform_0, window_bounds = array<i64: 1, 18, 18, 3>}, {pipeline_mode = #tpu.pipeline_mode<synchronous>, transform_indices = @transform_1, window_bounds = array<i64: 27, 16>}, {pipeline_mode = #tpu.pipeline_mode<synchronous>, transform_indices = @transform_2, window_bounds = array<i64: 1, 16>}, {pipeline_mode = #tpu.pipeline_mode<synchronous>, transform_indices = @transform_3, window_bounds = array<i64: 144, 4>}, {pipeline_mode = #tpu.pipeline_mode<synchronous>, transform_indices = @transform_4, window_bounds = array<i64: 1, 4>}, {pipeline_mode = #tpu.pipeline_mode<synchronous>, transform_indices = @transform_5, window_bounds = array<i64: 36, 4>}, {pipeline_mode = #tpu.pipeline_mode<synchronous>, transform_indices = @transform_6, window_bounds = array<i64: 1, 4>}, {pipeline_mode = #tpu.pipeline_mode<synchronous>, transform_indices = @transform_7, window_bounds = array<i64: 2, 2, 4, 4>}, {pipeline_mode = #tpu.pipeline_mode<synchronous>, transform_indices = @transform_8, window_bounds = array<i64: 1, 4>}, {pipeline_mode = #tpu.pipeline_mode<synchronous>, transform_indices = @transform_9, window_bounds = array<i64: 2, 2, 4, 4>}, {pipeline_mode = #tpu.pipeline_mode<synchronous>, transform_indices = @transform_10, window_bounds = array<i64: 1, 4>}, {pipeline_mode = #tpu.pipeline_mode<synchronous>, transform_indices = @transform_11, window_bounds = array<i64: 2, 2, 4, 3>}, {pipeline_mode = #tpu.pipeline_mode<synchronous>, transform_indices = @transform_12, window_bounds = array<i64: 1, 3>}, {transform_indices = @transform_13, window_bounds = array<i64: 1, 256, 3>}, {transform_indices = @transform_14, window_bounds = array<i64: 1, 4, 4>}]} {
    %c0 = arith.constant 0 : index
    %c0_0 = arith.constant 0 : index
    %c0_1 = arith.constant 0 : index
    %c0_2 = arith.constant 0 : index
    %0 = vector.load %arg1[%c0, %c0_0, %c0_1, %c0_2] : memref<1x18x18x3xf32, #tpu.memory_space<vmem>>, vector<1x16x16x3xf32>
    %1 = vector.shape_cast %0 : vector<1x16x16x3xf32> to vector<16x16x3xf32>
    %2 = vector.shape_cast %1 : vector<16x16x3xf32> to vector<256x3xf32>
    %c0_3 = arith.constant 0 : index
    %c0_4 = arith.constant 0 : index
    %c1 = arith.constant 1 : index
    %c0_5 = arith.constant 0 : index
    %3 = vector.load %arg1[%c0_3, %c0_4, %c1, %c0_5] : memref<1x18x18x3xf32, #tpu.memory_space<vmem>>, vector<1x16x16x3xf32>
    %4 = vector.shape_cast %3 : vector<1x16x16x3xf32> to vector<16x16x3xf32>
    %5 = vector.shape_cast %4 : vector<16x16x3xf32> to vector<256x3xf32>
    %c0_6 = arith.constant 0 : index
    %c0_7 = arith.constant 0 : index
    %c2 = arith.constant 2 : index
    %c0_8 = arith.constant 0 : index
    %6 = vector.load %arg1[%c0_6, %c0_7, %c2, %c0_8] : memref<1x18x18x3xf32, #tpu.memory_space<vmem>>, vector<1x16x16x3xf32>
    %7 = vector.shape_cast %6 : vector<1x16x16x3xf32> to vector<16x16x3xf32>
    %8 = vector.shape_cast %7 : vector<16x16x3xf32> to vector<256x3xf32>
    %c0_9 = arith.constant 0 : index
    %c1_10 = arith.constant 1 : index
    %c0_11 = arith.constant 0 : index
    %c0_12 = arith.constant 0 : index
    %9 = vector.load %arg1[%c0_9, %c1_10, %c0_11, %c0_12] : memref<1x18x18x3xf32, #tpu.memory_space<vmem>>, vector<1x16x16x3xf32>
    %10 = vector.shape_cast %9 : vector<1x16x16x3xf32> to vector<16x16x3xf32>
    %11 = vector.shape_cast %10 : vector<16x16x3xf32> to vector<256x3xf32>
    %c0_13 = arith.constant 0 : index
    %c1_14 = arith.constant 1 : index
    %c1_15 = arith.constant 1 : index
    %c0_16 = arith.constant 0 : index
    %12 = vector.load %arg1[%c0_13, %c1_14, %c1_15, %c0_16] : memref<1x18x18x3xf32, #tpu.memory_space<vmem>>, vector<1x16x16x3xf32>
    %13 = vector.shape_cast %12 : vector<1x16x16x3xf32> to vector<16x16x3xf32>
    %14 = vector.shape_cast %13 : vector<16x16x3xf32> to vector<256x3xf32>
    %c0_17 = arith.constant 0 : index
    %c1_18 = arith.constant 1 : index
    %c2_19 = arith.constant 2 : index
    %c0_20 = arith.constant 0 : index
    %15 = vector.load %arg1[%c0_17, %c1_18, %c2_19, %c0_20] : memref<1x18x18x3xf32, #tpu.memory_space<vmem>>, vector<1x16x16x3xf32>
    %16 = vector.shape_cast %15 : vector<1x16x16x3xf32> to vector<16x16x3xf32>
    %17 = vector.shape_cast %16 : vector<16x16x3xf32> to vector<256x3xf32>
    %c0_21 = arith.constant 0 : index
    %c2_22 = arith.constant 2 : index
    %c0_23 = arith.constant 0 : index
    %c0_24 = arith.constant 0 : index
    %18 = vector.load %arg1[%c0_21, %c2_22, %c0_23, %c0_24] : memref<1x18x18x3xf32, #tpu.memory_space<vmem>>, vector<1x16x16x3xf32>
    %19 = vector.shape_cast %18 : vector<1x16x16x3xf32> to vector<16x16x3xf32>
    %20 = vector.shape_cast %19 : vector<16x16x3xf32> to vector<256x3xf32>
    %c0_25 = arith.constant 0 : index
    %c2_26 = arith.constant 2 : index
    %c1_27 = arith.constant 1 : index
    %c0_28 = arith.constant 0 : index
    %21 = vector.load %arg1[%c0_25, %c2_26, %c1_27, %c0_28] : memref<1x18x18x3xf32, #tpu.memory_space<vmem>>, vector<1x16x16x3xf32>
    %22 = vector.shape_cast %21 : vector<1x16x16x3xf32> to vector<16x16x3xf32>
    %23 = vector.shape_cast %22 : vector<16x16x3xf32> to vector<256x3xf32>
    %c0_29 = arith.constant 0 : index
    %c2_30 = arith.constant 2 : index
    %c2_31 = arith.constant 2 : index
    %c0_32 = arith.constant 0 : index
    %24 = vector.load %arg1[%c0_29, %c2_30, %c2_31, %c0_32] : memref<1x18x18x3xf32, #tpu.memory_space<vmem>>, vector<1x16x16x3xf32>
    %25 = vector.shape_cast %24 : vector<1x16x16x3xf32> to vector<16x16x3xf32>
    %26 = vector.shape_cast %25 : vector<16x16x3xf32> to vector<256x3xf32>
    %27 = tpu.concatenate %2, %5, %8, %11, %14, %17, %20, %23, %26 in 1 : vector<256x3xf32>, vector<256x3xf32>, vector<256x3xf32>, vector<256x3xf32>, vector<256x3xf32>, vector<256x3xf32>, vector<256x3xf32>, vector<256x3xf32>, vector<256x3xf32> -> vector<256x27xf32>
    %c0_33 = arith.constant 0 : index
    %c0_34 = arith.constant 0 : index
    %28 = vector.load %arg2[%c0_33, %c0_34] : memref<27x16xf32, #tpu.memory_space<vmem>>, vector<27x16xf32>
    %cst = arith.constant dense<0.000000e+00> : vector<256x16xf32>
    %29 = tpu.matmul %27, %28, %cst {dimension_numbers = #tpu.dot_dimension_numbers<[1], [0], [0], [1], [0, 0, 1, 1], [], []>} : vector<256x27xf32>, vector<27x16xf32>, vector<256x16xf32> -> vector<256x16xf32>
    %c0_35 = arith.constant 0 : index
    %c0_36 = arith.constant 0 : index
    %30 = vector.load %arg3[%c0_35, %c0_36] : memref<1x16xf32, #tpu.memory_space<vmem>>, vector<1x16xf32>
    %31 = vector.broadcast %30 : vector<1x16xf32> to vector<256x16xf32>
    %32 = arith.addf %29, %31 : vector<256x16xf32>
    %cst_37 = arith.constant 0.000000e+00 : f32
    %33 = vector.broadcast %cst_37 : f32 to vector<256x16xf32>
    %34 = arith.maximumf %32, %33 : vector<256x16xf32>
    %35 = vector.shape_cast %34 : vector<256x16xf32> to vector<16x8x2x16xf32>
    %cst_38 = arith.constant dense<0xFF800000> : vector<16x8x16xf32>
    %36 = vector.multi_reduction <maximumf>, %35, %cst_38 [2] : vector<16x8x2x16xf32> to vector<16x8x16xf32>
    %37 = vector.shape_cast %36 : vector<16x8x16xf32> to vector<8x2x8x16xf32>
    %cst_39 = arith.constant dense<0xFF800000> : vector<8x8x16xf32>
    %38 = vector.multi_reduction <maximumf>, %37, %cst_39 [1] : vector<8x2x8x16xf32> to vector<8x8x16xf32>
    %39 = vector.shape_cast %38 : vector<8x8x16xf32> to vector<64x16xf32>
    %cst_40 = arith.constant 0.000000e+00 : f32
    %40 = vector.broadcast %cst_40 : f32 to vector<10x10x16xf32>
    %c0_41 = arith.constant 0 : index
    %c0_42 = arith.constant 0 : index
    %c0_43 = arith.constant 0 : index
    %41 = vector.load %arg16[%c0_41, %c0_42, %c0_43] : memref<10x10x16xf32, #tpu.memory_space<vmem>>, vector<10x10x16xf32>
    tpu.vector_store %arg16[%c0_41, %c0_42, %c0_43], %40 {strides = array<i32>} : memref<10x10x16xf32, #tpu.memory_space<vmem>>, vector<10x10x16xf32>,
    %42 = vector.shape_cast %39 : vector<64x16xf32> to vector<8x8x16xf32>
    %c1_44 = arith.constant 1 : index
    %c1_45 = arith.constant 1 : index
    %c0_46 = arith.constant 0 : index
    %43 = vector.load %arg16[%c1_44, %c1_45, %c0_46] : memref<10x10x16xf32, #tpu.memory_space<vmem>>, vector<8x8x16xf32>
    tpu.vector_store %arg16[%c1_44, %c1_45, %c0_46], %42 {strides = array<i32>} : memref<10x10x16xf32, #tpu.memory_space<vmem>>, vector<8x8x16xf32>,
    %c0_47 = arith.constant 0 : index
    %c0_48 = arith.constant 0 : index
    %c0_49 = arith.constant 0 : index
    %44 = vector.load %arg16[%c0_47, %c0_48, %c0_49] : memref<10x10x16xf32, #tpu.memory_space<vmem>>, vector<8x8x16xf32>
    %45 = vector.shape_cast %44 : vector<8x8x16xf32> to vector<64x16xf32>
    %c0_50 = arith.constant 0 : index
    %c1_51 = arith.constant 1 : index
    %c0_52 = arith.constant 0 : index
    %46 = vector.load %arg16[%c0_50, %c1_51, %c0_52] : memref<10x10x16xf32, #tpu.memory_space<vmem>>, vector<8x8x16xf32>
    %47 = vector.shape_cast %46 : vector<8x8x16xf32> to vector<64x16xf32>
    %c0_53 = arith.constant 0 : index
    %c2_54 = arith.constant 2 : index
    %c0_55 = arith.constant 0 : index
    %48 = vector.load %arg16[%c0_53, %c2_54, %c0_55] : memref<10x10x16xf32, #tpu.memory_space<vmem>>, vector<8x8x16xf32>
    %49 = vector.shape_cast %48 : vector<8x8x16xf32> to vector<64x16xf32>
    %c1_56 = arith.constant 1 : index
    %c0_57 = arith.constant 0 : index
    %c0_58 = arith.constant 0 : index
    %50 = vector.load %arg16[%c1_56, %c0_57, %c0_58] : memref<10x10x16xf32, #tpu.memory_space<vmem>>, vector<8x8x16xf32>
    %51 = vector.shape_cast %50 : vector<8x8x16xf32> to vector<64x16xf32>
    %c1_59 = arith.constant 1 : index
    %c1_60 = arith.constant 1 : index
    %c0_61 = arith.constant 0 : index
    %52 = vector.load %arg16[%c1_59, %c1_60, %c0_61] : memref<10x10x16xf32, #tpu.memory_space<vmem>>, vector<8x8x16xf32>
    %53 = vector.shape_cast %52 : vector<8x8x16xf32> to vector<64x16xf32>
    %c1_62 = arith.constant 1 : index
    %c2_63 = arith.constant 2 : index
    %c0_64 = arith.constant 0 : index
    %54 = vector.load %arg16[%c1_62, %c2_63, %c0_64] : memref<10x10x16xf32, #tpu.memory_space<vmem>>, vector<8x8x16xf32>
    %55 = vector.shape_cast %54 : vector<8x8x16xf32> to vector<64x16xf32>
    %c2_65 = arith.constant 2 : index
    %c0_66 = arith.constant 0 : index
    %c0_67 = arith.constant 0 : index
    %56 = vector.load %arg16[%c2_65, %c0_66, %c0_67] : memref<10x10x16xf32, #tpu.memory_space<vmem>>, vector<8x8x16xf32>
    %57 = vector.shape_cast %56 : vector<8x8x16xf32> to vector<64x16xf32>
    %c2_68 = arith.constant 2 : index
    %c1_69 = arith.constant 1 : index
    %c0_70 = arith.constant 0 : index
    %58 = vector.load %arg16[%c2_68, %c1_69, %c0_70] : memref<10x10x16xf32, #tpu.memory_space<vmem>>, vector<8x8x16xf32>
    %59 = vector.shape_cast %58 : vector<8x8x16xf32> to vector<64x16xf32>
    %c2_71 = arith.constant 2 : index
    %c2_72 = arith.constant 2 : index
    %c0_73 = arith.constant 0 : index
    %60 = vector.load %arg16[%c2_71, %c2_72, %c0_73] : memref<10x10x16xf32, #tpu.memory_space<vmem>>, vector<8x8x16xf32>
    %61 = vector.shape_cast %60 : vector<8x8x16xf32> to vector<64x16xf32>
    %62 = tpu.concatenate %45, %47, %49, %51, %53, %55, %57, %59, %61 in 1 : vector<64x16xf32>, vector<64x16xf32>, vector<64x16xf32>, vector<64x16xf32>, vector<64x16xf32>, vector<64x16xf32>, vector<64x16xf32>, vector<64x16xf32>, vector<64x16xf32> -> vector<64x144xf32>
    %c0_74 = arith.constant 0 : index
    %c0_75 = arith.constant 0 : index
    %63 = vector.load %arg4[%c0_74, %c0_75] : memref<144x4xf32, #tpu.memory_space<vmem>>, vector<144x4xf32>
    %cst_76 = arith.constant dense<0.000000e+00> : vector<64x4xf32>
    %64 = tpu.matmul %62, %63, %cst_76 {dimension_numbers = #tpu.dot_dimension_numbers<[1], [0], [0], [1], [0, 0, 1, 1], [], []>} : vector<64x144xf32>, vector<144x4xf32>, vector<64x4xf32> -> vector<64x4xf32>
    %c0_77 = arith.constant 0 : index
    %c0_78 = arith.constant 0 : index
    %65 = vector.load %arg5[%c0_77, %c0_78] : memref<1x4xf32, #tpu.memory_space<vmem>>, vector<1x4xf32>
    %66 = vector.broadcast %65 : vector<1x4xf32> to vector<64x4xf32>
    %67 = arith.addf %64, %66 : vector<64x4xf32>
    %cst_79 = arith.constant 0.000000e+00 : f32
    %68 = vector.broadcast %cst_79 : f32 to vector<64x4xf32>
    %69 = arith.maximumf %67, %68 : vector<64x4xf32>
    %70 = vector.shape_cast %69 : vector<64x4xf32> to vector<8x4x2x4xf32>
    %cst_80 = arith.constant dense<0xFF800000> : vector<8x4x4xf32>
    %71 = vector.multi_reduction <maximumf>, %70, %cst_80 [2] : vector<8x4x2x4xf32> to vector<8x4x4xf32>
    %72 = vector.shape_cast %71 : vector<8x4x4xf32> to vector<4x2x4x4xf32>
    %cst_81 = arith.constant dense<0xFF800000> : vector<4x4x4xf32>
    %73 = vector.multi_reduction <maximumf>, %72, %cst_81 [1] : vector<4x2x4x4xf32> to vector<4x4x4xf32>
    %74 = vector.shape_cast %73 : vector<4x4x4xf32> to vector<16x4xf32>
    %cst_82 = arith.constant 0.000000e+00 : f32
    %75 = vector.broadcast %cst_82 : f32 to vector<6x6x4xf32>
    %c0_83 = arith.constant 0 : index
    %c0_84 = arith.constant 0 : index
    %c0_85 = arith.constant 0 : index
    %76 = vector.load %arg17[%c0_83, %c0_84, %c0_85] : memref<6x6x4xf32, #tpu.memory_space<vmem>>, vector<6x6x4xf32>
    tpu.vector_store %arg17[%c0_83, %c0_84, %c0_85], %75 {strides = array<i32>} : memref<6x6x4xf32, #tpu.memory_space<vmem>>, vector<6x6x4xf32>,
    %77 = vector.shape_cast %74 : vector<16x4xf32> to vector<4x4x4xf32>
    %c1_86 = arith.constant 1 : index
    %c1_87 = arith.constant 1 : index
    %c0_88 = arith.constant 0 : index
    %78 = vector.load %arg17[%c1_86, %c1_87, %c0_88] : memref<6x6x4xf32, #tpu.memory_space<vmem>>, vector<4x4x4xf32>
    tpu.vector_store %arg17[%c1_86, %c1_87, %c0_88], %77 {strides = array<i32>} : memref<6x6x4xf32, #tpu.memory_space<vmem>>, vector<4x4x4xf32>,
    %c0_89 = arith.constant 0 : index
    %c0_90 = arith.constant 0 : index
    %c0_91 = arith.constant 0 : index
    %79 = vector.load %arg17[%c0_89, %c0_90, %c0_91] : memref<6x6x4xf32, #tpu.memory_space<vmem>>, vector<4x4x4xf32>
    %80 = vector.shape_cast %79 : vector<4x4x4xf32> to vector<16x4xf32>
    %c0_92 = arith.constant 0 : index
    %c1_93 = arith.constant 1 : index
    %c0_94 = arith.constant 0 : index
    %81 = vector.load %arg17[%c0_92, %c1_93, %c0_94] : memref<6x6x4xf32, #tpu.memory_space<vmem>>, vector<4x4x4xf32>
    %82 = vector.shape_cast %81 : vector<4x4x4xf32> to vector<16x4xf32>
    %c0_95 = arith.constant 0 : index
    %c2_96 = arith.constant 2 : index
    %c0_97 = arith.constant 0 : index
    %83 = vector.load %arg17[%c0_95, %c2_96, %c0_97] : memref<6x6x4xf32, #tpu.memory_space<vmem>>, vector<4x4x4xf32>
    %84 = vector.shape_cast %83 : vector<4x4x4xf32> to vector<16x4xf32>
    %c1_98 = arith.constant 1 : index
    %c0_99 = arith.constant 0 : index
    %c0_100 = arith.constant 0 : index
    %85 = vector.load %arg17[%c1_98, %c0_99, %c0_100] : memref<6x6x4xf32, #tpu.memory_space<vmem>>, vector<4x4x4xf32>
    %86 = vector.shape_cast %85 : vector<4x4x4xf32> to vector<16x4xf32>
    %c1_101 = arith.constant 1 : index
    %c1_102 = arith.constant 1 : index
    %c0_103 = arith.constant 0 : index
    %87 = vector.load %arg17[%c1_101, %c1_102, %c0_103] : memref<6x6x4xf32, #tpu.memory_space<vmem>>, vector<4x4x4xf32>
    %88 = vector.shape_cast %87 : vector<4x4x4xf32> to vector<16x4xf32>
    %c1_104 = arith.constant 1 : index
    %c2_105 = arith.constant 2 : index
    %c0_106 = arith.constant 0 : index
    %89 = vector.load %arg17[%c1_104, %c2_105, %c0_106] : memref<6x6x4xf32, #tpu.memory_space<vmem>>, vector<4x4x4xf32>
    %90 = vector.shape_cast %89 : vector<4x4x4xf32> to vector<16x4xf32>
    %c2_107 = arith.constant 2 : index
    %c0_108 = arith.constant 0 : index
    %c0_109 = arith.constant 0 : index
    %91 = vector.load %arg17[%c2_107, %c0_108, %c0_109] : memref<6x6x4xf32, #tpu.memory_space<vmem>>, vector<4x4x4xf32>
    %92 = vector.shape_cast %91 : vector<4x4x4xf32> to vector<16x4xf32>
    %c2_110 = arith.constant 2 : index
    %c1_111 = arith.constant 1 : index
    %c0_112 = arith.constant 0 : index
    %93 = vector.load %arg17[%c2_110, %c1_111, %c0_112] : memref<6x6x4xf32, #tpu.memory_space<vmem>>, vector<4x4x4xf32>
    %94 = vector.shape_cast %93 : vector<4x4x4xf32> to vector<16x4xf32>
    %c2_113 = arith.constant 2 : index
    %c2_114 = arith.constant 2 : index
    %c0_115 = arith.constant 0 : index
    %95 = vector.load %arg17[%c2_113, %c2_114, %c0_115] : memref<6x6x4xf32, #tpu.memory_space<vmem>>, vector<4x4x4xf32>
    %96 = vector.shape_cast %95 : vector<4x4x4xf32> to vector<16x4xf32>
    %97 = tpu.concatenate %80, %82, %84, %86, %88, %90, %92, %94, %96 in 1 : vector<16x4xf32>, vector<16x4xf32>, vector<16x4xf32>, vector<16x4xf32>, vector<16x4xf32>, vector<16x4xf32>, vector<16x4xf32>, vector<16x4xf32>, vector<16x4xf32> -> vector<16x36xf32>
    %c0_116 = arith.constant 0 : index
    %c0_117 = arith.constant 0 : index
    %98 = vector.load %arg6[%c0_116, %c0_117] : memref<36x4xf32, #tpu.memory_space<vmem>>, vector<36x4xf32>
    %cst_118 = arith.constant dense<0.000000e+00> : vector<16x4xf32>
    %99 = tpu.matmul %97, %98, %cst_118 {dimension_numbers = #tpu.dot_dimension_numbers<[1], [0], [0], [1], [0, 0, 1, 1], [], []>} : vector<16x36xf32>, vector<36x4xf32>, vector<16x4xf32> -> vector<16x4xf32>
    %c0_119 = arith.constant 0 : index
    %c0_120 = arith.constant 0 : index
    %100 = vector.load %arg7[%c0_119, %c0_120] : memref<1x4xf32, #tpu.memory_space<vmem>>, vector<1x4xf32>
    %101 = vector.broadcast %100 : vector<1x4xf32> to vector<16x4xf32>
    %102 = arith.addf %99, %101 : vector<16x4xf32>
    %cst_121 = arith.constant 0.000000e+00 : f32
    %103 = vector.broadcast %cst_121 : f32 to vector<16x4xf32>
    %104 = arith.maximumf %102, %103 : vector<16x4xf32>
    %105 = vector.shape_cast %104 : vector<16x4xf32> to vector<4x2x2x4xf32>
    %cst_122 = arith.constant dense<0xFF800000> : vector<4x2x4xf32>
    %106 = vector.multi_reduction <maximumf>, %105, %cst_122 [2] : vector<4x2x2x4xf32> to vector<4x2x4xf32>
    %107 = vector.shape_cast %106 : vector<4x2x4xf32> to vector<2x2x2x4xf32>
    %cst_123 = arith.constant dense<0xFF800000> : vector<2x2x4xf32>
    %108 = vector.multi_reduction <maximumf>, %107, %cst_123 [1] : vector<2x2x2x4xf32> to vector<2x2x4xf32>
    %109 = vector.shape_cast %108 : vector<2x2x4xf32> to vector<4x4xf32>
    %110 = vector.shape_cast %109 : vector<4x4xf32> to vector<1x4x4xf32>
    %c0_124 = arith.constant 0 : index
    %c0_125 = arith.constant 0 : index
    %c0_126 = arith.constant 0 : index
    %111 = vector.load %arg15[%c0_124, %c0_125, %c0_126] : memref<1x4x4xf32, #tpu.memory_space<vmem>>, vector<1x4x4xf32>
    tpu.vector_store %arg15[%c0_124, %c0_125, %c0_126], %110 {strides = array<i32>} : memref<1x4x4xf32, #tpu.memory_space<vmem>>, vector<1x4x4xf32>,
    %c0_127 = arith.constant 0 : index
    %c0_128 = arith.constant 0 : index
    %c0_129 = arith.constant 0 : index
    %c0_130 = arith.constant 0 : index
    %112 = vector.load %arg8[%c0_127, %c0_128, %c0_129, %c0_130] : memref<2x2x4x4xf32, #tpu.memory_space<vmem>>, vector<1x1x4x4xf32>
    %113 = vector.shape_cast %112 : vector<1x1x4x4xf32> to vector<4x4xf32>
    %cst_131 = arith.constant dense<0.000000e+00> : vector<4x4xf32>
    %114 = tpu.matmul %109, %113, %cst_131 {dimension_numbers = #tpu.dot_dimension_numbers<[1], [0], [0], [1], [0, 0, 1, 1], [], []>} : vector<4x4xf32>, vector<4x4xf32>, vector<4x4xf32> -> vector<4x4xf32>
    %c0_132 = arith.constant 0 : index
    %c1_133 = arith.constant 1 : index
    %c0_134 = arith.constant 0 : index
    %c0_135 = arith.constant 0 : index
    %115 = vector.load %arg8[%c0_132, %c1_133, %c0_134, %c0_135] : memref<2x2x4x4xf32, #tpu.memory_space<vmem>>, vector<1x1x4x4xf32>
    %116 = vector.shape_cast %115 : vector<1x1x4x4xf32> to vector<4x4xf32>
    %cst_136 = arith.constant dense<0.000000e+00> : vector<4x4xf32>
    %117 = tpu.matmul %109, %116, %cst_136 {dimension_numbers = #tpu.dot_dimension_numbers<[1], [0], [0], [1], [0, 0, 1, 1], [], []>} : vector<4x4xf32>, vector<4x4xf32>, vector<4x4xf32> -> vector<4x4xf32>
    %c1_137 = arith.constant 1 : index
    %c0_138 = arith.constant 0 : index
    %c0_139 = arith.constant 0 : index
    %c0_140 = arith.constant 0 : index
    %118 = vector.load %arg8[%c1_137, %c0_138, %c0_139, %c0_140] : memref<2x2x4x4xf32, #tpu.memory_space<vmem>>, vector<1x1x4x4xf32>
    %119 = vector.shape_cast %118 : vector<1x1x4x4xf32> to vector<4x4xf32>
    %cst_141 = arith.constant dense<0.000000e+00> : vector<4x4xf32>
    %120 = tpu.matmul %109, %119, %cst_141 {dimension_numbers = #tpu.dot_dimension_numbers<[1], [0], [0], [1], [0, 0, 1, 1], [], []>} : vector<4x4xf32>, vector<4x4xf32>, vector<4x4xf32> -> vector<4x4xf32>
    %c1_142 = arith.constant 1 : index
    %c1_143 = arith.constant 1 : index
    %c0_144 = arith.constant 0 : index
    %c0_145 = arith.constant 0 : index
    %121 = vector.load %arg8[%c1_142, %c1_143, %c0_144, %c0_145] : memref<2x2x4x4xf32, #tpu.memory_space<vmem>>, vector<1x1x4x4xf32>
    %122 = vector.shape_cast %121 : vector<1x1x4x4xf32> to vector<4x4xf32>
    %cst_146 = arith.constant dense<0.000000e+00> : vector<4x4xf32>
    %123 = tpu.matmul %109, %122, %cst_146 {dimension_numbers = #tpu.dot_dimension_numbers<[1], [0], [0], [1], [0, 0, 1, 1], [], []>} : vector<4x4xf32>, vector<4x4xf32>, vector<4x4xf32> -> vector<4x4xf32>
    %124 = vector.shape_cast %114 : vector<4x4xf32> to vector<4x1x4xf32>
    %125 = vector.shape_cast %117 : vector<4x4xf32> to vector<4x1x4xf32>
    %126 = vector.shape_cast %120 : vector<4x4xf32> to vector<4x1x4xf32>
    %127 = vector.shape_cast %123 : vector<4x4xf32> to vector<4x1x4xf32>
    %128 = tpu.concatenate %124, %125, %126, %127 in 1 : vector<4x1x4xf32>, vector<4x1x4xf32>, vector<4x1x4xf32>, vector<4x1x4xf32> -> vector<4x4x4xf32>
    %c0_147 = arith.constant 0 : index
    %c0_148 = arith.constant 0 : index
    %129 = vector.load %arg9[%c0_147, %c0_148] : memref<1x4xf32, #tpu.memory_space<vmem>>, vector<1x4xf32>
    %130 = vector.shape_cast %129 : vector<1x4xf32> to vector<1x1x4xf32>
    %131 = vector.broadcast %130 : vector<1x1x4xf32> to vector<4x4x4xf32>
    %132 = arith.addf %128, %131 : vector<4x4x4xf32>
    %133 = vector.shape_cast %132 : vector<4x4x4xf32> to vector<16x4xf32>
    %cst_149 = arith.constant 0.000000e+00 : f32
    %134 = vector.broadcast %cst_149 : f32 to vector<16x4xf32>
    %135 = arith.maximumf %133, %134 : vector<16x4xf32>
    %c0_150 = arith.constant 0 : index
    %c0_151 = arith.constant 0 : index
    %c0_152 = arith.constant 0 : index
    %c0_153 = arith.constant 0 : index
    %136 = vector.load %arg10[%c0_150, %c0_151, %c0_152, %c0_153] : memref<2x2x4x4xf32, #tpu.memory_space<vmem>>, vector<1x1x4x4xf32>
    %137 = vector.shape_cast %136 : vector<1x1x4x4xf32> to vector<4x4xf32>
    %cst_154 = arith.constant dense<0.000000e+00> : vector<16x4xf32>
    %138 = tpu.matmul %135, %137, %cst_154 {dimension_numbers = #tpu.dot_dimension_numbers<[1], [0], [0], [1], [0, 0, 1, 1], [], []>} : vector<16x4xf32>, vector<4x4xf32>, vector<16x4xf32> -> vector<16x4xf32>
    %c0_155 = arith.constant 0 : index
    %c1_156 = arith.constant 1 : index
    %c0_157 = arith.constant 0 : index
    %c0_158 = arith.constant 0 : index
    %139 = vector.load %arg10[%c0_155, %c1_156, %c0_157, %c0_158] : memref<2x2x4x4xf32, #tpu.memory_space<vmem>>, vector<1x1x4x4xf32>
    %140 = vector.shape_cast %139 : vector<1x1x4x4xf32> to vector<4x4xf32>
    %cst_159 = arith.constant dense<0.000000e+00> : vector<16x4xf32>
    %141 = tpu.matmul %135, %140, %cst_159 {dimension_numbers = #tpu.dot_dimension_numbers<[1], [0], [0], [1], [0, 0, 1, 1], [], []>} : vector<16x4xf32>, vector<4x4xf32>, vector<16x4xf32> -> vector<16x4xf32>
    %c1_160 = arith.constant 1 : index
    %c0_161 = arith.constant 0 : index
    %c0_162 = arith.constant 0 : index
    %c0_163 = arith.constant 0 : index
    %142 = vector.load %arg10[%c1_160, %c0_161, %c0_162, %c0_163] : memref<2x2x4x4xf32, #tpu.memory_space<vmem>>, vector<1x1x4x4xf32>
    %143 = vector.shape_cast %142 : vector<1x1x4x4xf32> to vector<4x4xf32>
    %cst_164 = arith.constant dense<0.000000e+00> : vector<16x4xf32>
    %144 = tpu.matmul %135, %143, %cst_164 {dimension_numbers = #tpu.dot_dimension_numbers<[1], [0], [0], [1], [0, 0, 1, 1], [], []>} : vector<16x4xf32>, vector<4x4xf32>, vector<16x4xf32> -> vector<16x4xf32>
    %c1_165 = arith.constant 1 : index
    %c1_166 = arith.constant 1 : index
    %c0_167 = arith.constant 0 : index
    %c0_168 = arith.constant 0 : index
    %145 = vector.load %arg10[%c1_165, %c1_166, %c0_167, %c0_168] : memref<2x2x4x4xf32, #tpu.memory_space<vmem>>, vector<1x1x4x4xf32>
    %146 = vector.shape_cast %145 : vector<1x1x4x4xf32> to vector<4x4xf32>
    %cst_169 = arith.constant dense<0.000000e+00> : vector<16x4xf32>
    %147 = tpu.matmul %135, %146, %cst_169 {dimension_numbers = #tpu.dot_dimension_numbers<[1], [0], [0], [1], [0, 0, 1, 1], [], []>} : vector<16x4xf32>, vector<4x4xf32>, vector<16x4xf32> -> vector<16x4xf32>
    %148 = vector.shape_cast %138 : vector<16x4xf32> to vector<16x1x4xf32>
    %149 = vector.shape_cast %141 : vector<16x4xf32> to vector<16x1x4xf32>
    %150 = vector.shape_cast %144 : vector<16x4xf32> to vector<16x1x4xf32>
    %151 = vector.shape_cast %147 : vector<16x4xf32> to vector<16x1x4xf32>
    %152 = tpu.concatenate %148, %149, %150, %151 in 1 : vector<16x1x4xf32>, vector<16x1x4xf32>, vector<16x1x4xf32>, vector<16x1x4xf32> -> vector<16x4x4xf32>
    %c0_170 = arith.constant 0 : index
    %c0_171 = arith.constant 0 : index
    %153 = vector.load %arg11[%c0_170, %c0_171] : memref<1x4xf32, #tpu.memory_space<vmem>>, vector<1x4xf32>
    %154 = vector.shape_cast %153 : vector<1x4xf32> to vector<1x1x4xf32>
    %155 = vector.broadcast %154 : vector<1x1x4xf32> to vector<16x4x4xf32>
    %156 = arith.addf %152, %155 : vector<16x4x4xf32>
    %157 = vector.shape_cast %156 : vector<16x4x4xf32> to vector<64x4xf32>
    %cst_172 = arith.constant 0.000000e+00 : f32
    %158 = vector.broadcast %cst_172 : f32 to vector<64x4xf32>
    %159 = arith.maximumf %157, %158 : vector<64x4xf32>
    %c0_173 = arith.constant 0 : index
    %c0_174 = arith.constant 0 : index
    %c0_175 = arith.constant 0 : index
    %c0_176 = arith.constant 0 : index
    %160 = vector.load %arg12[%c0_173, %c0_174, %c0_175, %c0_176] : memref<2x2x4x3xf32, #tpu.memory_space<vmem>>, vector<1x1x4x3xf32>
    %161 = vector.shape_cast %160 : vector<1x1x4x3xf32> to vector<4x3xf32>
    %cst_177 = arith.constant dense<0.000000e+00> : vector<64x3xf32>
    %162 = tpu.matmul %159, %161, %cst_177 {dimension_numbers = #tpu.dot_dimension_numbers<[1], [0], [0], [1], [0, 0, 1, 1], [], []>} : vector<64x4xf32>, vector<4x3xf32>, vector<64x3xf32> -> vector<64x3xf32>
    %c0_178 = arith.constant 0 : index
    %c1_179 = arith.constant 1 : index
    %c0_180 = arith.constant 0 : index
    %c0_181 = arith.constant 0 : index
    %163 = vector.load %arg12[%c0_178, %c1_179, %c0_180, %c0_181] : memref<2x2x4x3xf32, #tpu.memory_space<vmem>>, vector<1x1x4x3xf32>
    %164 = vector.shape_cast %163 : vector<1x1x4x3xf32> to vector<4x3xf32>
    %cst_182 = arith.constant dense<0.000000e+00> : vector<64x3xf32>
    %165 = tpu.matmul %159, %164, %cst_182 {dimension_numbers = #tpu.dot_dimension_numbers<[1], [0], [0], [1], [0, 0, 1, 1], [], []>} : vector<64x4xf32>, vector<4x3xf32>, vector<64x3xf32> -> vector<64x3xf32>
    %c1_183 = arith.constant 1 : index
    %c0_184 = arith.constant 0 : index
    %c0_185 = arith.constant 0 : index
    %c0_186 = arith.constant 0 : index
    %166 = vector.load %arg12[%c1_183, %c0_184, %c0_185, %c0_186] : memref<2x2x4x3xf32, #tpu.memory_space<vmem>>, vector<1x1x4x3xf32>
    %167 = vector.shape_cast %166 : vector<1x1x4x3xf32> to vector<4x3xf32>
    %cst_187 = arith.constant dense<0.000000e+00> : vector<64x3xf32>
    %168 = tpu.matmul %159, %167, %cst_187 {dimension_numbers = #tpu.dot_dimension_numbers<[1], [0], [0], [1], [0, 0, 1, 1], [], []>} : vector<64x4xf32>, vector<4x3xf32>, vector<64x3xf32> -> vector<64x3xf32>
    %c1_188 = arith.constant 1 : index
    %c1_189 = arith.constant 1 : index
    %c0_190 = arith.constant 0 : index
    %c0_191 = arith.constant 0 : index
    %169 = vector.load %arg12[%c1_188, %c1_189, %c0_190, %c0_191] : memref<2x2x4x3xf32, #tpu.memory_space<vmem>>, vector<1x1x4x3xf32>
    %170 = vector.shape_cast %169 : vector<1x1x4x3xf32> to vector<4x3xf32>
    %cst_192 = arith.constant dense<0.000000e+00> : vector<64x3xf32>
    %171 = tpu.matmul %159, %170, %cst_192 {dimension_numbers = #tpu.dot_dimension_numbers<[1], [0], [0], [1], [0, 0, 1, 1], [], []>} : vector<64x4xf32>, vector<4x3xf32>, vector<64x3xf32> -> vector<64x3xf32>
    %172 = vector.shape_cast %162 : vector<64x3xf32> to vector<64x1x3xf32>
    %173 = vector.shape_cast %165 : vector<64x3xf32> to vector<64x1x3xf32>
    %174 = vector.shape_cast %168 : vector<64x3xf32> to vector<64x1x3xf32>
    %175 = vector.shape_cast %171 : vector<64x3xf32> to vector<64x1x3xf32>
    %176 = tpu.concatenate %172, %173, %174, %175 in 1 : vector<64x1x3xf32>, vector<64x1x3xf32>, vector<64x1x3xf32>, vector<64x1x3xf32> -> vector<64x4x3xf32>
    %c0_193 = arith.constant 0 : index
    %c0_194 = arith.constant 0 : index
    %177 = vector.load %arg13[%c0_193, %c0_194] : memref<1x3xf32, #tpu.memory_space<vmem>>, vector<1x3xf32>
    %178 = vector.shape_cast %177 : vector<1x3xf32> to vector<1x1x3xf32>
    %179 = vector.broadcast %178 : vector<1x1x3xf32> to vector<64x4x3xf32>
    %180 = arith.addf %176, %179 : vector<64x4x3xf32>
    %181 = vector.shape_cast %180 : vector<64x4x3xf32> to vector<256x3xf32>
    %182 = arith.negf %181 : vector<256x3xf32>
    %183 = math.exp %182 : vector<256x3xf32>
    %cst_195 = arith.constant 1.000000e+00 : f32
    %184 = vector.broadcast %cst_195 : f32 to vector<256x3xf32>
    %185 = arith.addf %184, %183 : vector<256x3xf32>
    %186 = arith.divf %184, %185 : vector<256x3xf32>
    %187 = vector.shape_cast %186 : vector<256x3xf32> to vector<1x256x3xf32>
    %c0_196 = arith.constant 0 : index
    %c0_197 = arith.constant 0 : index
    %c0_198 = arith.constant 0 : index
    %188 = vector.load %arg14[%c0_196, %c0_197, %c0_198] : memref<1x256x3xf32, #tpu.memory_space<vmem>>, vector<1x256x3xf32>
    tpu.vector_store %arg14[%c0_196, %c0_197, %c0_198], %187 {strides = array<i32>} : memref<1x256x3xf32, #tpu.memory_space<vmem>>, vector<1x256x3xf32>,
    return
  }
  func.func @transform_0(%arg0: i32) -> (i32, i32, i32, i32) {
    %c0_i32 = arith.constant 0 : i32
    %c0_i32_0 = arith.constant 0 : i32
    %c0_i32_1 = arith.constant 0 : i32
    %c0_i32_2 = arith.constant 0 : i32
    return %arg0, %c0_i32, %c0_i32_0, %c0_i32_1 : i32, i32, i32, i32
  }
  func.func @transform_1(%arg0: i32) -> (i32, i32) {
    %c0_i32 = arith.constant 0 : i32
    %c0_i32_0 = arith.constant 0 : i32
    %c0_i32_1 = arith.constant 0 : i32
    return %c0_i32, %c0_i32_0 : i32, i32
  }
  func.func @transform_2(%arg0: i32) -> (i32, i32) {
    %c0_i32 = arith.constant 0 : i32
    %c0_i32_0 = arith.constant 0 : i32
    %c0_i32_1 = arith.constant 0 : i32
    return %c0_i32, %c0_i32_0 : i32, i32
  }
  func.func @transform_3(%arg0: i32) -> (i32, i32) {
    %c0_i32 = arith.constant 0 : i32
    %c0_i32_0 = arith.constant 0 : i32
    %c0_i32_1 = arith.constant 0 : i32
    return %c0_i32, %c0_i32_0 : i32, i32
  }
  func.func @transform_4(%arg0: i32) -> (i32, i32) {
    %c0_i32 = arith.constant 0 : i32
    %c0_i32_0 = arith.constant 0 : i32
    %c0_i32_1 = arith.constant 0 : i32
    return %c0_i32, %c0_i32_0 : i32, i32
  }
  func.func @transform_5(%arg0: i32) -> (i32, i32) {
    %c0_i32 = arith.constant 0 : i32
    %c0_i32_0 = arith.constant 0 : i32
    %c0_i32_1 = arith.constant 0 : i32
    return %c0_i32, %c0_i32_0 : i32, i32
  }
  func.func @transform_6(%arg0: i32) -> (i32, i32) {
    %c0_i32 = arith.constant 0 : i32
    %c0_i32_0 = arith.constant 0 : i32
    %c0_i32_1 = arith.constant 0 : i32
    return %c0_i32, %c0_i32_0 : i32, i32
  }
  func.func @transform_7(%arg0: i32) -> (i32, i32, i32, i32) {
    %c0_i32 = arith.constant 0 : i32
    %c0_i32_0 = arith.constant 0 : i32
    %c0_i32_1 = arith.constant 0 : i32
    %c0_i32_2 = arith.constant 0 : i32
    %c0_i32_3 = arith.constant 0 : i32
    return %c0_i32, %c0_i32_0, %c0_i32_1, %c0_i32_2 : i32, i32, i32, i32
  }
  func.func @transform_8(%arg0: i32) -> (i32, i32) {
    %c0_i32 = arith.constant 0 : i32
    %c0_i32_0 = arith.constant 0 : i32
    %c0_i32_1 = arith.constant 0 : i32
    return %c0_i32, %c0_i32_0 : i32, i32
  }
  func.func @transform_9(%arg0: i32) -> (i32, i32, i32, i32) {
    %c0_i32 = arith.constant 0 : i32
    %c0_i32_0 = arith.constant 0 : i32
    %c0_i32_1 = arith.constant 0 : i32
    %c0_i32_2 = arith.constant 0 : i32
    %c0_i32_3 = arith.constant 0 : i32
    return %c0_i32, %c0_i32_0, %c0_i32_1, %c0_i32_2 : i32, i32, i32, i32
  }
  func.func @transform_10(%arg0: i32) -> (i32, i32) {
    %c0_i32 = arith.constant 0 : i32
    %c0_i32_0 = arith.constant 0 : i32
    %c0_i32_1 = arith.constant 0 : i32
    return %c0_i32, %c0_i32_0 : i32, i32
  }
  func.func @transform_11(%arg0: i32) -> (i32, i32, i32, i32) {
    %c0_i32 = arith.constant 0 : i32
    %c0_i32_0 = arith.constant 0 : i32
    %c0_i32_1 = arith.constant 0 : i32
    %c0_i32_2 = arith.constant 0 : i32
    %c0_i32_3 = arith.constant 0 : i32
    return %c0_i32, %c0_i32_0, %c0_i32_1, %c0_i32_2 : i32, i32, i32, i32
  }
  func.func @transform_12(%arg0: i32) -> (i32, i32) {
    %c0_i32 = arith.constant 0 : i32
    %c0_i32_0 = arith.constant 0 : i32
    %c0_i32_1 = arith.constant 0 : i32
    return %c0_i32, %c0_i32_0 : i32, i32
  }
  func.func @transform_13(%arg0: i32) -> (i32, i32, i32) {
    %c0_i32 = arith.constant 0 : i32
    %c0_i32_0 = arith.constant 0 : i32
    %c0_i32_1 = arith.constant 0 : i32
    return %arg0, %c0_i32, %c0_i32_0 : i32, i32, i32
  }
  func.func @transform_14(%arg0: i32) -> (i32, i32, i32) {
    %c0_i32 = arith.constant 0 : i32
    %c0_i32_0 = arith.constant 0 : i32
    %c0_i32_1 = arith.constant 0 : i32
    return %arg0, %c0_i32, %c0_i32_0 : i32, i32, i32
  }
}

</mosaic_0001>

<bundles_post_ra>
// kernel: conv_autoencoder_forward.1
= control target key start
LH: loop header
LB: loop body
LE: loop exit
PB: predicated region body
PF: predicated region fallthrough
CT: control target
= control target key end

     0   :  { %s14271_s0 = inlined_call_operand.vmem [shape: f32[2,18,18,3], index: 0, kind: input, shape index: {}]   ;;  %s14272_s1 = inlined_call_operand.vmem [shape: f32[27,16], index: 1, kind: input, shape index: {}]   ;;  %s14273_s2 = inlined_call_operand.vmem [shape: f32[1,16], index: 2, kind: input, shape index: {}]   ;;  %s14274_s3 = inlined_call_operand.vmem [shape: f32[144,4], index: 3, kind: input, shape index: {}]   ;;  %s14275_s4 = inlined_call_operand.vmem [shape: f32[1,4], index: 4, kind: input, shape index: {}]   ;;  %s14276_s5 = inlined_call_operand.vmem [shape: f32[36,4], index: 5, kind: input, shape index: {}]   ;;  %s14277_s6 = inlined_call_operand.vmem [shape: f32[1,4], index: 6, kind: input, shape index: {}]   ;;  %s14278_s7 = inlined_call_operand.vmem [shape: f32[2,2,4,4], index: 7, kind: input, shape index: {}]   ;;  %s14279_s8 = inlined_call_operand.vmem [shape: f32[1,4], index: 8, kind: input, shape index: {}]   ;;  %s14280_s9 = inlined_call_operand.vmem [shape: f32[2,2,4,4], index: 9, kind: input, shape index: {}]   ;;  %s14281_s10 = inlined_call_operand.vmem [shape: f32[1,4], index: 10, kind: input, shape index: {}]   ;;  %s14282_s11 = inlined_call_operand.vmem [shape: f32[2,2,4,3], index: 11, kind: input, shape index: {}]   ;;  %s14283_s12 = inlined_call_operand.vmem [shape: f32[1,3], index: 12, kind: input, shape index: {}]   ;;  %s14284_s13 = inlined_call_operand.vmem [shape: f32[2,256,3], index: 13, kind: output, shape index: {0}]   ;;  %s14285_s14 = inlined_call_operand.hbm [shape: f32[2,4,4], index: 14, kind: output, shape index: {1}]  }
   0x1   :  { %14327 = sst [smem:[#allocation37_spill]] %s14271_s0 }
   0x2   :  { %14328 = sst [smem:[#allocation38_spill]] %s14272_s1 }
   0x3   :  { %20 = vsyncpa [#allocation5], 0 }
   0x4   :  { %22 = vsyncpa [#allocation5 + $0x1], 0  ;;  %s9508_s29 = smov 0   ;;  %s9510_s30 = smov 0  }
   0x5   :  { %s9512_s15 = smov 0   ;;  %s9514_s16 = smov 0  }
   0x6 LB: > { %14329 = sst [smem:[#allocation7_spill]] %s9399_s29  ;;  %s9529_s17 = sadd.s32 4294967295, %s9411_s16   ;;  %s9411_s16 = sphi %s9514_s16, %s14817_s16   ;;  %s9407_s15 = sphi %s9512_s15, %s14819_s15   ;;  %s9403_s30 = sphi %s9510_s30, %s14821_s30   ;;  %s9399_s29 = sphi %s9508_s29, %s14820_s29  }
   0x7   : > { %14330 = sst [smem:[#allocation8_spill]] %s9407_s15  ;;  %s8511_s18 = sadd.s32 4294967294, %s9411_s16  }
   0x8   : > { %s9533_s19 = sadd.s32 1, %s9411_s16   ;;  %s339_s20 = sadd.s32 1, %s9407_s15 }
   0x9   : > { %14331 = sst [smem:[#allocation9_spill]] %s9533_s19  ;;  %s336_s21 = ssub.s32 %s9411_s16, %s9533_s19 }
   0xa   : > { %p349_p0 = scmp.ne.s32.totalorder %s9407_s15, %s9403_s30  ;;  %p337_p1 = scmp.eq.s32.totalorder %s336_s21, 0 }
   0xb   : > { %p350_p2 = scmp.eq.s32.totalorder %s9529_s17, 1  ;;  %p355_p3 = scmp.ne.s32.totalorder %s9403_s30, %s9399_s29 }
   0xc   : > { %p356_p4 = scmp.eq.s32.totalorder %s8511_s18, 1  ;;  %p8514_p7 = scmp.ge.s32.totalorder %s9411_s16, 1 }
   0xd   : > { %s9544_s22 = scalar_select %p337_p1, %s9407_s15, %s339_s20  }
   0xe   : > { %p9546_p5 = por %p350_p2, %p349_p0  ;;  %p9550_p6 = por %p356_p4, %p355_p3 }
   0xf   : > { %14332 = sst [smem:[#allocation10_spill]] %s9544_s22  ;;  %p418_p8 = scmp.lt.s32.totalorder %s9411_s16, 3 }
  0x10   : > { %s14334_s24 = scalar_select %p9550_p6, 1, 0 }
  0x11   : > { %p419_p9 = pnand %p8514_p7, %p418_p8 }
  0x12   : > { %14335 = sst [smem:[#allocation11_spill]] %s14334_s24 }
  0x13   : > { %422 = sbr.rel (%p419_p9) target bundleno = 2564 (0xa04), region = 72 }
  0x18   : > { %p469_p10 = scmp.lt.s32.totalorder %s9529_s17, 1  ;;  %s14336_s0 = sld [smem:[#allocation37_spill]]  ;;  %vm14307_vm0 = vcmask 1042432   ;;  %vm14326_vm1 = vcmask 23552   ;;  %vm1826_vm2 = vcmask 48128   ;;  %vm1859_vm3 = vcmask 72704  }
  0x19   : > { %s14286_s20 = smov 15   ;;  %s14288_s21 = smov 9   ;;  %vm1892_vm4 = vcmask 97280   ;;  %vm1925_vm5 = vcmask 121856   ;;  %vm1958_vm6 = vcmask 146432   ;;  %vm1991_vm7 = vcmask 171008  }
  0x1a   : > { %s9558_s25 = scalar_select %p469_p10, %s9529_s17, 1  ;;  %vm2024_vm8 = vcmask 195584   ;;  %vm2065_vm9 = vcmask 220160   ;;  %vm14313_vm10 = vcmask 123904   ;;  %vm3432_vm11 = vcmask 130048  }
  0x1b   : > { %s14290_s27 = smov 18   ;;  %s14296_s28 = smov 12   ;;  %vm14310_vm12 = vcmask 1041409   ;;  %vm14308_vm13 = vcmask 1042434   ;;  %vm14309_vm14 = vcmask 1043459   ;;  %vm14323_vm15 = vcmask 1044484  }
  0x1c   : > { %s8893_s26 = smul.u32 432, %s9558_s25  ;;  %s14340_s22 = smov 3  }
  0x1d   : > { %s14342_s15 = smov 12   ;;  %s14343_s1 = sld [smem:[#allocation38_spill]] }
  0x1e   : > { %s9564_s18 = scalar_lea.vmem %s14336_s0, %s8893_s26  ;;  %s14294_s26 = smov 3  }
  0x1f   : > { %v8583_v0 = vld [vmem:[%s9564_s18 + $0x1a] sm:$0xff]  ;;  %v9576_v3 = vld [vmem:[%s9564_s18 + $0x30] sm:$0xff]  ;;  %v543_v5 = vld [vmem:[%s9564_s18 + $0x2] sm:$0xff]  ;;  %s14302_s0 = smov 21   ;;  %s14345_s19 = smov 6  }
  0x20   : > { %v9568_v1 = vld [vmem:[%s9564_s18 + $0x18] sm:$0xff]  ;;  %v511_v2 = vld [vmem:[%s9564_s18 + $0x1] sm:$0xff]  ;;  %1313 = vrot.lane.b32.xlu2 %v8583_v0, %s14286_s20  ;;  %s14305_s20 = smov 6   ;;  %v512_v7 = vld [vmem:[%s9564_s18 + $0x9] sm:$0xff]  ;;  %s14400_s24 = smov 96  }
  0x21   : > { %1057 = vrot.lane.b32.xlu1 %v9568_v1, %s14288_s21  ;;  %801 = vrot.lane.b32.xlu0 %v511_v2, %s14294_s26  ;;  %v8551_v4 = vld [vmem:[%s9564_s18 + $0x19] sm:$0xff]  ;;  %v8647_v8 = vld [vmem:[%s9564_s18 + $0x31] sm:$0xff]  ;;  %s14292_s21 = smov 24  }
  0x22   : > { %v8679_v6 = vld [vmem:[%s9564_s18 + $0x32] sm:$0xff]  ;;  %v9591_v9 = vld [vmem:[%s9564_s18 + $0x20] sm:$0xff]  ;;  %v544_v11 = vld [vmem:[%s9564_s18 + $0xa] sm:$0xff] }
  0x23   : > { %v8552_v10 = vld [vmem:[%s9564_s18 + $0x21] sm:$0xff]  ;;  %v9600_v12 = vld [vmem:[%s9564_s18 + $0x38] sm:$0xff]  ;;  %v9617_v16 = vld [vmem:[%s9564_s18 + $0x49] sm:$0xff] }
  0x24   : > { %v8648_v13 = vld [vmem:[%s9564_s18 + $0x39] sm:$0xff]  ;;  %v8584_v14 = vld [vmem:[%s9564_s18 + $0x22] sm:$0xff]  ;;  %v9620_v17 = vld [vmem:[%s9564_s18 + $0x4a] sm:$0xff] }
  0x25   : > { %v8680_v15 = vld [vmem:[%s9564_s18 + $0x3a] sm:$0xff]  ;;  %v9623_v18 = vld [vmem:[%s9564_s18 + $0x48] sm:$0xff]  ;;  %v9636_v19 = vld [vmem:[%s9564_s18 + $0x50] sm:$0xff] }
  0x26   : > { %v9643_v20 = vld [vmem:[%s9564_s18 + $0x52] sm:$0xff]  ;;  %v9659_v23 = vld [vmem:[%s9564_s18 + $0x60] sm:$0xff]  ;;  %v2058_v27 = vld [vmem:[%s14343_s1 + $0x8] sm:$0xff] }
  0x27   : > { %v9646_v21 = vld [vmem:[%s9564_s18 + $0x51] sm:$0xff]  ;;  %v9662_v24 = vld [vmem:[%s9564_s18 + $0x61] sm:$0xff]  ;;  %v9698_v35 = vld [vmem:[%s9564_s18 + $0x69] sm:$0xff] }
  0x28   : > { %1441 = vrot.lane.b32.xlu2 %v9576_v3, %s14290_s27  ;;  %s14337_s27 = smov 9   ;;  %v2060_v25 = vld [vmem:[%s14343_s1 + $0x18] sm:$0x7]  ;;  %v2059_v26 = vld [vmem:[%s14343_s1 + $0x10] sm:$0xff]  ;;  %v2057_v29 = vld [vmem:[%s14343_s1] sm:$0xff]  ;;  %s14319_s1 = smov 96  }
  0x29   : > { %1185 = vrot.lane.b32.xlu1 %v8551_v4, %s14296_s28  ;;  %929 = vrot.lane.b32.xlu0 %v543_v5, %s14305_s20  ;;  %v9685_v30 = vld [vmem:[%s9564_s18 + $0x62] sm:$0xff]  ;;  %v9701_v36 = vld [vmem:[%s9564_s18 + $0x6a] sm:$0xff] }
  0x2a   : > { %8711 = vmatpush.msk.msra.mxu0 %vm14307_vm0, %v2060_v25  ;;  %8889 = vmatpush.msk.msra.mxu1 %vm14307_vm0, %v2060_v25  ;;  %v9704_v37 = vld [vmem:[%s9564_s18 + $0x68] sm:$0xff]  ;;  %v479_v38 = vld [vmem:[%s9564_s18] sm:$0xff]  ;;  %v9728_v53 = vld [vmem:[%s9564_s18 + $0x78] sm:$0xff]  ;;  %vm14322_vm0 = vcmask 1045509  }
  0x2b   : > { %v480_v54 = vld [vmem:[%s9564_s18 + $0x8] sm:$0xff]  ;;  %v9740_v59 = vld [vmem:[%s9564_s18 + $0x7a] sm:$0xff] }
  0x2c   : > { %2179 = vmatpush.msra.mxu0 %v2059_v26  ;;  %8890 = vmatpush.msra.mxu1 %v2059_v26  ;;  %v9744_v61 = vld [vmem:[%s9564_s18 + $0x79] sm:$0xff]  ;;  %v9779_v26 = vld [vmem:[%s9564_s18 + $0x82] sm:$0xff] }
  0x2e   : > { %2180 = vmatpush.msra.mxu0 %v2058_v27  ;;  %8891 = vmatpush.msra.mxu1 %v2058_v27 }
  0x30   : > { %803 = vrot.lane.b32.xlu2 %v512_v7, %s14294_s26  ;;  %s14339_s26 = smov 15   ;;  %2181 = vmatpush.msra.mxu0 %v2057_v29 }
  0x31   : > { %1697 = vrot.lane.b32.xlu1 %v8679_v6, %s14292_s21  ;;  %1569 = vrot.lane.b32.xlu0 %v8647_v8, %s14302_s0  ;;  %s14338_s21 = smov 18  }
  0x32   : > { %8892 = vmatpush.msra.mxu1 %v2057_v29 }
  0x38   : > { %1187 = vrot.lane.b32.xlu2 %v8552_v10, %s14296_s28  ;;  %s14341_s28 = smov 24  }
  0x39   : > { %1059 = vrot.lane.b32.xlu1 %v9591_v9, %s14337_s27  ;;  %931 = vrot.lane.b32.xlu0 %v544_v11, %s14305_s20 }
  0x40   : > { %1571 = vrot.lane.b32.xlu2 %v8648_v13, %s14302_s0 }
  0x41   : > { %1443 = vrot.lane.b32.xlu1 %v9600_v12, %s14338_s21  ;;  %1315 = vrot.lane.b32.xlu0 %v8584_v14, %s14339_s26 }
  0x48   : > { %933 = vrot.lane.b32.xlu2 %v8583_v0, %s14305_s20 }
  0x49   : > { %805 = vrot.lane.b32.xlu1 %v8551_v4, %s14340_s22  ;;  %1699 = vrot.lane.b32.xlu0 %v8680_v15, %s14341_s28 }
  0x50   : > { %1317 = vrot.lane.b32.xlu2 %v8679_v6, %s14339_s26 }
  0x51   : > { %1189 = vrot.lane.b32.xlu1 %v8647_v8, %s14342_s15  ;;  %1061 = vrot.lane.b32.xlu0 %v9576_v3, %s14337_s27 }
  0x58   : > { %1701 = vrot.lane.b32.xlu2 %v9620_v17, %s14341_s28 }
  0x59   : > { %1573 = vrot.lane.b32.xlu1 %v9617_v16, %s14302_s0  ;;  %1445 = vrot.lane.b32.xlu0 %v9623_v18, %s14338_s21 }
  0x60   : > { %1063 = vrot.lane.b32.xlu2 %v9600_v12, %s14337_s27 }
  0x61   : > { %935 = vrot.lane.b32.xlu1 %v8584_v14, %s14305_s20  ;;  %807 = vrot.lane.b32.xlu0 %v8552_v10, %s14340_s22  ;;  %v8622_v14 = vld [vmem:[%s9564_s18 + $0x80] sm:$0xff] }
  0x68   : > { %1447 = vrot.lane.b32.xlu2 %v9636_v19, %s14338_s21 }
  0x69   : > { %1319 = vrot.lane.b32.xlu1 %v8680_v15, %s14339_s26  ;;  %1191 = vrot.lane.b32.xlu0 %v8648_v13, %s14342_s15 }
  0x70   : > { %809 = vrot.lane.b32.xlu2 %v8647_v8, %s14340_s22 }
  0x71   : > { %1703 = vrot.lane.b32.xlu1 %v9643_v20, %s14341_s28  ;;  %1575 = vrot.lane.b32.xlu0 %v9646_v21, %s14302_s0  ;;  %s14401_s0 = smov 16  }
  0x78   : > { %1193 = vrot.lane.b32.xlu2 %v9617_v16, %s14342_s15 }
  0x79   : > { %1065 = vrot.lane.b32.xlu1 %v9623_v18, %s14337_s27  ;;  %937 = vrot.lane.b32.xlu0 %v8679_v6, %s14305_s20  ;;  %s14344_s20 = smov 21  }
  0x7a   : > { %v1314_v22 = vpop.permute.xlu2 %1313 }
  0x80   : > { %1577 = vrot.lane.b32.xlu2 %v9662_v24, %s14344_s20 }
  0x81   : > { %1449 = vrot.lane.b32.xlu1 %v9659_v23, %s14338_s21  ;;  %1321 = vrot.lane.b32.xlu0 %v9620_v17, %s14339_s26 }
  0x82   : > { %v1442_v28 = vpop.permute.xlu2 %1441 }
  0x88   : > { %939 = vrot.lane.b32.xlu2 %v8680_v15, %s14345_s19  ;;  %v9767_v15 = vld [vmem:[%s9564_s18 + $0x81] sm:$0xff] }
  0x89   : > { %811 = vrot.lane.b32.xlu1 %v8648_v13, %s14340_s22  ;;  %1705 = vrot.lane.b32.xlu0 %v9685_v30, %s14341_s28 }
  0x8a   : > { %v804_v31 = vpop.permute.xlu2 %803 }
  0x8b   : > { %v1795_v57 = vsel %vm14326_vm1, %v480_v54, %v804_v31 }
  0x90   : > { %1323 = vrot.lane.b32.xlu2 %v9643_v20, %s14339_s26 }
  0x91   : > { %1195 = vrot.lane.b32.xlu1 %v9646_v21, %s14342_s15  ;;  %1067 = vrot.lane.b32.xlu0 %v9636_v19, %s14337_s27 }
  0x92   : > { %v1188_v33 = vpop.permute.xlu2 %1187 }
  0x93   : > { %v1058_v32 = vpop.permute.xlu1 %1057  ;;  %v802_v34 = vpop.permute.xlu0 %801 }
  0x94   : > { %v1794_v41 = vsel %vm14326_vm1, %v479_v38, %v802_v34 }
  0x98   : > { %1707 = vrot.lane.b32.xlu2 %v9701_v36, %s14341_s28 }
  0x99   : > { %1579 = vrot.lane.b32.xlu1 %v9698_v35, %s14344_s20  ;;  %1451 = vrot.lane.b32.xlu0 %v9704_v37, %s14338_s21 }
  0x9a   : > { %v1572_v40 = vpop.permute.xlu2 %1571 }
  0x9b   : > { %v1186_v39 = vpop.permute.xlu1 %1185  ;;  %v930_v42 = vpop.permute.xlu0 %929 }
  0x9c   : > { %v1827_v43 = vsel %vm1826_vm2, %v1794_v41, %v930_v42  ;;  %v8623_v42 = vld [vmem:[%s9564_s18 + $0x90] sm:$0xff] }
  0x9d   : > { %v1860_v44 = vsel %vm1859_vm3, %v1827_v43, %v1058_v32 }
  0x9e   : > { %v1893_v45 = vsel %vm1892_vm4, %v1860_v44, %v1186_v39  ;;  %v9800_v39 = vld [vmem:[%s9564_s18 + $0x91] sm:$0xff] }
  0x9f   : > { %v1926_v46 = vsel %vm1925_vm5, %v1893_v45, %v1314_v22 }
  0xa0   : > { %1069 = vrot.lane.b32.xlu2 %v9659_v23, %s14337_s27  ;;  %v1959_v50 = vsel %vm1958_vm6, %v1926_v46, %v1442_v28 }
  0xa1   : > { %941 = vrot.lane.b32.xlu1 %v9620_v17, %s14345_s19  ;;  %813 = vrot.lane.b32.xlu0 %v9617_v16, %s14340_s22 }
  0xa2   : > { %v934_v48 = vpop.permute.xlu2 %933 }
  0xa3   : > { %v1698_v47 = vpop.permute.xlu1 %1697  ;;  %v1570_v49 = vpop.permute.xlu0 %1569 }
  0xa4   : > { %v1992_v51 = vsel %vm1991_vm7, %v1959_v50, %v1570_v49 }
  0xa5   : > { %v2025_v52 = vsel %vm2024_vm8, %v1992_v51, %v1698_v47 }
  0xa6   : > { %8712 = vmatmul.msk.f32.vlgmr.msra.gmra.mxu0 %vm2065_vm9, %v2025_v52 }
  0xa8   : > { %1453 = vrot.lane.b32.xlu2 %v9728_v53, %s14338_s21 }
  0xa9   : > { %1325 = vrot.lane.b32.xlu1 %v9685_v30, %s14339_s26  ;;  %1197 = vrot.lane.b32.xlu0 %v9662_v24, %s14342_s15 }
  0xaa   : > { %v1318_v56 = vpop.permute.xlu2 %1317 }
  0xab   : > { %v1060_v55 = vpop.permute.xlu1 %1059  ;;  %v932_v58 = vpop.permute.xlu0 %931 }
  0xac   : > { %v1828_v60 = vsel %vm1826_vm2, %v1795_v57, %v932_v58 }
  0xad   : > { %v1861_v62 = vsel %vm1859_vm3, %v1828_v60, %v1060_v55  ;;  %v9838_v60 = vld [vmem:[%s9564_s18 + $0x9a] sm:$0xff] }
  0xae   : > { %v1894_v4 = vsel %vm1892_vm4, %v1861_v62, %v1188_v33 }
  0xb0   : > { %815 = vrot.lane.b32.xlu2 %v9646_v21, %s14340_s22 }
  0xb1   : > { %1709 = vrot.lane.b32.xlu1 %v9740_v59, %s14341_s28  ;;  %1581 = vrot.lane.b32.xlu0 %v9744_v61, %s14344_s20 }
  0xb2   : > { %v1702_v0 = vpop.permute.xlu2 %1701 }
  0xb3   : > { %v1444_v63 = vpop.permute.xlu1 %1443  ;;  %v1316_v2 = vpop.permute.xlu0 %1315 }
  0xb4   : > { %v1927_v5 = vsel %vm1925_vm5, %v1894_v4, %v1316_v2 }
  0xb5   : > { %v1960_v6 = vsel %vm1958_vm6, %v1927_v5, %v1444_v63  ;;  %v9842_v63 = vld [vmem:[%s9564_s18 + $0x99] sm:$0xff] }
  0xb6   : > { %v1993_v11 = vsel %vm1991_vm7, %v1960_v6, %v1572_v40  ;;  %v9803_v40 = vld [vmem:[%s9564_s18 + $0x92] sm:$0xff] }
  0xb8   : > { %1199 = vrot.lane.b32.xlu2 %v9698_v35, %s14342_s15 }
  0xb9   : > { %1071 = vrot.lane.b32.xlu1 %v9704_v37, %s14337_s27  ;;  %943 = vrot.lane.b32.xlu0 %v9643_v20, %s14345_s19 }
  0xba   : > { %v1064_v8 = vpop.permute.xlu2 %1063 }
  0xbb   : > { %v806_v7 = vpop.permute.xlu1 %805  ;;  %v1700_v10 = vpop.permute.xlu0 %1699 }
  0xbc   : > { %v2026_v13 = vsel %vm2024_vm8, %v1993_v11, %v1700_v10  ;;  %v1796_v16 = vsel %vm14326_vm1, %v9568_v1, %v806_v7 }
  0xbd   : > { %8713 = vmatmul.msk.f32.gmra.mxu0 %vm2065_vm9, %v2026_v13  ;;  %v1829_v21 = vsel %vm1826_vm2, %v1796_v16, %v934_v48  ;;  %v9864_v16 = vld [vmem:[%s9564_s18 + $0xa9] sm:$0xff] }
  0xc0   : > { %1583 = vrot.lane.b32.xlu2 %v9767_v15, %s14344_s20 }
  0xc1   : > { %1455 = vrot.lane.b32.xlu1 %v8622_v14, %s14338_s21  ;;  %1327 = vrot.lane.b32.xlu0 %v9701_v36, %s14339_s26 }
  0xc2   : > { %v1448_v20 = vpop.permute.xlu2 %1447 }
  0xc3   : > { %v1190_v17 = vpop.permute.xlu1 %1189  ;;  %v1062_v22 = vpop.permute.xlu0 %1061 }
  0xc4   : > { %v1862_v25 = vsel %vm1859_vm3, %v1829_v21, %v1062_v22 }
  0xc5   : > { %v1895_v27 = vsel %vm1892_vm4, %v1862_v25, %v1190_v17 }
  0xc6   : > { %v1928_v31 = vsel %vm1925_vm5, %v1895_v27, %v1318_v56  ;;  %v9826_v56 = vld [vmem:[%s9564_s18 + $0x98] sm:$0xff]  ;;  %v9876_v27 = vld [vmem:[%s9564_s18 + $0xaa] sm:$0xff] }
  0xc8   : > { %945 = vrot.lane.b32.xlu2 %v9685_v30, %s14345_s19 }
  0xc9   : > { %817 = vrot.lane.b32.xlu1 %v9662_v24, %s14340_s22  ;;  %1711 = vrot.lane.b32.xlu0 %v9779_v26, %s14341_s28 }
  0xca   : > { %v810_v28 = vpop.permute.xlu2 %809 }
  0xcb   : > { %v1574_v1 = vpop.permute.xlu1 %1573  ;;  %v1446_v29 = vpop.permute.xlu0 %1445  ;;  %v1798_v57 = vsel %vm14326_vm1, %v9576_v3, %v810_v28 }
  0xcc   : > { %v1961_v32 = vsel %vm1958_vm6, %v1928_v31, %v1446_v29 }
  0xcd   : > { %v1994_v33 = vsel %vm1991_vm7, %v1961_v32, %v1574_v1 }
  0xce   : > { %v2027_v24 = vsel %vm2024_vm8, %v1994_v33, %v1702_v0 }
  0xcf   : > { %8714 = vmatmul.msk.f32.gmra.mxu0 %vm2065_vm9, %v2027_v24 }
  0xd0   : > { %1329 = vrot.lane.b32.xlu2 %v9740_v59, %s14339_s26 }
  0xd1   : > { %1201 = vrot.lane.b32.xlu1 %v9744_v61, %s14342_s15  ;;  %1073 = vrot.lane.b32.xlu0 %v9728_v53, %s14337_s27 }
  0xd2   : > { %v1194_v34 = vpop.permute.xlu2 %1193 }
  0xd3   : > { %v936_v30 = vpop.permute.xlu1 %935  ;;  %v808_v38 = vpop.permute.xlu0 %807 }
  0xd4   : > { %v1797_v41 = vsel %vm14326_vm1, %v9591_v9, %v808_v38  ;;  %v9900_v38 = vld [vmem:[%s9564_s18 + $0xb2] sm:$0xff] }
  0xd5   : > { %v1830_v43 = vsel %vm1826_vm2, %v1797_v41, %v936_v30 }
  0xd6   : > { %v1863_v47 = vsel %vm1859_vm3, %v1830_v43, %v1064_v8 }
  0xd8   : > { %1713 = vrot.lane.b32.xlu2 %v9803_v40, %s14341_s28 }
  0xd9   : > { %1585 = vrot.lane.b32.xlu1 %v9800_v39, %s14344_s20  ;;  %1457 = vrot.lane.b32.xlu0 %v8623_v42, %s14338_s21 }
  0xda   : > { %v1578_v45 = vpop.permute.xlu2 %1577 }
  0xdb   : > { %v1320_v44 = vpop.permute.xlu1 %1319  ;;  %v1192_v46 = vpop.permute.xlu0 %1191 }
  0xdc   : > { %v1896_v48 = vsel %vm1892_vm4, %v1863_v47, %v1192_v46 }
  0xdd   : > { %v1929_v9 = vsel %vm1925_vm5, %v1896_v48, %v1320_v44 }
  0xde   : > { %v1962_v52 = vsel %vm1958_vm6, %v1929_v9, %v1448_v20 }
  0xe0   : > { %1075 = vrot.lane.b32.xlu2 %v8622_v14, %s14337_s27  ;;  %v8625_v14 = vld [vmem:[%s9564_s18 + $0xa8] sm:$0xff] }
  0xe1   : > { %947 = vrot.lane.b32.xlu1 %v9701_v36, %s14345_s19  ;;  %819 = vrot.lane.b32.xlu0 %v9698_v35, %s14340_s22 }
  0xe2   : > { %v940_v50 = vpop.permute.xlu2 %939 }
  0xe3   : > { %v1704_v49 = vpop.permute.xlu1 %1703  ;;  %v1576_v51 = vpop.permute.xlu0 %1575 }
  0xe4   : > { %v1995_v54 = vsel %vm1991_vm7, %v1962_v52, %v1576_v51 }
  0xe5   : > { %v2028_v55 = vsel %vm2024_vm8, %v1995_v54, %v1704_v49 }
  0xe6   : > { %8715 = vmatmul.msk.f32.gmra.mxu0 %vm2065_vm9, %v2028_v55  ;;  %v9923_v55 = vld [vmem:[%s9564_s18 + $0xc0] sm:$0xff] }
  0xe8   : > { %1459 = vrot.lane.b32.xlu2 %v9826_v56, %s14338_s21 }
  0xe9   : > { %1331 = vrot.lane.b32.xlu1 %v9779_v26, %s14339_s26  ;;  %1203 = vrot.lane.b32.xlu0 %v9767_v15, %s14342_s15 }
  0xea   : > { %v1324_v36 = vpop.permute.xlu2 %1323 }
  0xeb   : > { %v1066_v35 = vpop.permute.xlu1 %1065  ;;  %v938_v58 = vpop.permute.xlu0 %937 }
  0xec   : > { %v1831_v62 = vsel %vm1826_vm2, %v1798_v57, %v938_v58  ;;  %v9937_v57 = vld [vmem:[%s9564_s18 + $0xc2] sm:$0xff] }
  0xed   : > { %v1864_v0 = vsel %vm1859_vm3, %v1831_v62, %v1066_v35  ;;  %v9941_v62 = vld [vmem:[%s9564_s18 + $0xc1] sm:$0xff] }
  0xee   : > { %v1897_v5 = vsel %vm1892_vm4, %v1864_v0, %v1194_v34  ;;  %v9897_v34 = vld [vmem:[%s9564_s18 + $0xb1] sm:$0xff] }
  0xf0   : > { %821 = vrot.lane.b32.xlu2 %v9744_v61, %s14340_s22 }
  0xf1   : > { %1715 = vrot.lane.b32.xlu1 %v9838_v60, %s14341_s28  ;;  %1587 = vrot.lane.b32.xlu0 %v9842_v63, %s14344_s20 }
  0xf2   : > { %v1708_v2 = vpop.permute.xlu2 %1707 }
  0xf3   : > { %v1450_v3 = vpop.permute.xlu1 %1449  ;;  %v1322_v4 = vpop.permute.xlu0 %1321 }
  0xf4   : > { %v1930_v6 = vsel %vm1925_vm5, %v1897_v5, %v1322_v4 }
  0xf5   : > { %v1963_v7 = vsel %vm1958_vm6, %v1930_v6, %v1450_v3  ;;  %v9955_v6 = vld [vmem:[%s14273_s2] ss:$0 sm:$0xff] }
  0xf6   : > { %v1996_v11 = vsel %vm1991_vm7, %v1963_v7, %v1578_v45 }
  0xf8   : > { %1205 = vrot.lane.b32.xlu2 %v9800_v39, %s14342_s15 }
  0xf9   : > { %1077 = vrot.lane.b32.xlu1 %v8623_v42, %s14337_s27  ;;  %949 = vrot.lane.b32.xlu0 %v9740_v59, %s14345_s19  ;;  %v8626_v42 = vld [vmem:[%s9564_s18 + $0xb0] sm:$0xff] }
  0xfa   : > { %v1070_v8 = vpop.permute.xlu2 %1069 }
  0xfb   : > { %v812_v61 = vpop.permute.xlu1 %811  ;;  %v1706_v10 = vpop.permute.xlu0 %1705 }
  0xfc   : > { %v2029_v13 = vsel %vm2024_vm8, %v1996_v11, %v1706_v10  ;;  %v1799_v17 = vsel %vm14326_vm1, %v9600_v12, %v812_v61 }
  0xfd   : > { %8716 = vmatmul.msk.f32.gmra.mxu0 %vm2065_vm9, %v2029_v13  ;;  %v1832_v21 = vsel %vm1826_vm2, %v1799_v17, %v940_v50  ;;  %v9970_v17 = vld [vmem:[%s9564_s18 + $0xc8] sm:$0xff] }
 0x100   : > { %1589 = vrot.lane.b32.xlu2 %v9864_v16, %s14344_s20 }
 0x101   : > { %1461 = vrot.lane.b32.xlu1 %v8625_v14, %s14338_s21  ;;  %1333 = vrot.lane.b32.xlu0 %v9803_v40, %s14339_s26 }
 0x102   : > { %v1454_v20 = vpop.permute.xlu2 %1453 }
 0x103   : > { %v1196_v59 = vpop.permute.xlu1 %1195  ;;  %v1068_v22 = vpop.permute.xlu0 %1067 }
 0x104   : > { %v1865_v25 = vsel %vm1859_vm3, %v1832_v21, %v1068_v22 }
 0x105   : > { %v1898_v1 = vsel %vm1892_vm4, %v1865_v25, %v1196_v59  ;;  %v9973_v59 = vld [vmem:[%s9564_s18 + $0xc9] sm:$0xff] }
 0x106   : > { %v1931_v31 = vsel %vm1925_vm5, %v1898_v1, %v1324_v36 }
 0x108   : > { %951 = vrot.lane.b32.xlu2 %v9779_v26, %s14345_s19 }
 0x109   : > { %823 = vrot.lane.b32.xlu1 %v9767_v15, %s14340_s22  ;;  %1717 = vrot.lane.b32.xlu0 %v9876_v27, %s14341_s28 }
 0x10a   : > { %v816_v28 = vpop.permute.xlu2 %815 }
 0x10b   : > { %v1580_v12 = vpop.permute.xlu1 %1579  ;;  %v1452_v29 = vpop.permute.xlu0 %1451  ;;  %v1801_v35 = vsel %vm14326_vm1, %v9636_v19, %v816_v28 }
 0x10c   : > { %v1964_v32 = vsel %vm1958_vm6, %v1931_v31, %v1452_v29 }
 0x10d   : > { %v1997_v33 = vsel %vm1991_vm7, %v1964_v32, %v1580_v12  ;;  %v9988_v32 = vld [vmem:[%s9564_s18 + $0xca] sm:$0xff] }
 0x10e   : > { %v2030_v15 = vsel %vm2024_vm8, %v1997_v33, %v1708_v2 }
 0x10f   : > { %8717 = vmatmul.msk.f32.gmra.mxu0 %vm2065_vm9, %v2030_v15 }
 0x110   : > { %1335 = vrot.lane.b32.xlu2 %v9838_v60, %s14339_s26 }
 0x111   : > { %1207 = vrot.lane.b32.xlu1 %v9842_v63, %s14342_s15  ;;  %1079 = vrot.lane.b32.xlu0 %v9826_v56, %s14337_s27 }
 0x112   : > { %v1200_v24 = vpop.permute.xlu2 %1199 }
 0x113   : > { %v942_v26 = vpop.permute.xlu1 %941  ;;  %v814_v30 = vpop.permute.xlu0 %813 }
 0x114   : > { %v1800_v41 = vsel %vm14326_vm1, %v9623_v18, %v814_v30 }
 0x115   : > { %v1833_v43 = vsel %vm1826_vm2, %v1800_v41, %v942_v26 }
 0x116   : > { %v1866_v47 = vsel %vm1859_vm3, %v1833_v43, %v1070_v8 }
 0x118   : > { %1719 = vrot.lane.b32.xlu2 %v9900_v38, %s14341_s28 }
 0x119   : > { %1591 = vrot.lane.b32.xlu1 %v9897_v34, %s14344_s20  ;;  %1463 = vrot.lane.b32.xlu0 %v8626_v42, %s14338_s21 }
 0x11a   : > { %v1584_v45 = vpop.permute.xlu2 %1583 }
 0x11b   : > { %v1326_v44 = vpop.permute.xlu1 %1325  ;;  %v1198_v46 = vpop.permute.xlu0 %1197 }
 0x11c   : > { %v1899_v48 = vsel %vm1892_vm4, %v1866_v47, %v1198_v46 }
 0x11d   : > { %v1932_v18 = vsel %vm1925_vm5, %v1899_v48, %v1326_v44 }
 0x11e   : > { %v1965_v51 = vsel %vm1958_vm6, %v1932_v18, %v1454_v20 }
 0x120   : > { %1081 = vrot.lane.b32.xlu2 %v8625_v14, %s14337_s27 }
 0x121   : > { %953 = vrot.lane.b32.xlu1 %v9803_v40, %s14345_s19  ;;  %825 = vrot.lane.b32.xlu0 %v9800_v39, %s14340_s22 }
 0x122   : > { %v946_v49 = vpop.permute.xlu2 %945 }
 0x123   : > { %v1710_v9 = vpop.permute.xlu1 %1709  ;;  %v1582_v50 = vpop.permute.xlu0 %1581 }
 0x124   : > { %v1998_v52 = vsel %vm1991_vm7, %v1965_v51, %v1582_v50  ;;  %v2183_v7 = vpop.f32.mrf.mxu0 }
 0x125   : > { %v2031_v54 = vsel %vm2024_vm8, %v1998_v52, %v1710_v9  ;;  %v2184_v13 = vadd.f32 %v9955_v6, %v2183_v7 }
 0x126   : > { %8718 = vmatmul.msk.f32.gmra.mxu0 %vm2065_vm9, %v2031_v54 }
 0x127   : > { %v2279_v20 = vmax.f32 %v2184_v13, 0.0 }
 0x128   : > { %1465 = vrot.lane.b32.xlu2 %v9923_v55, %s14338_s21 }
 0x129   : > { %1337 = vrot.lane.b32.xlu1 %v9876_v27, %s14339_s26  ;;  %1209 = vrot.lane.b32.xlu0 %v9864_v16, %s14342_s15  ;;  %v2343_v12 = vrot.slane %v2279_v20, 2  ;;  %v2344_v29 = vrot.slane %v2279_v20, 4  ;;  %v2536_v33 = vsel %vm14313_vm10, %v2279_v20, -inf }
 0x12a   : > { %v9932_v40 = vpop.permute.xlu2 %1329 }
 0x12b   : > { %v1072_v39 = vpop.permute.xlu1 %1071  ;;  %v944_v36 = vpop.permute.xlu0 %943  ;;  %v2543_v15 = vsel %vm14313_vm10, %v2343_v12, -inf }
 0x12c   : > { %v1834_v58 = vsel %vm1826_vm2, %v1801_v35, %v944_v36  ;;  %v2544_v44 = vrot.slane %v2543_v15, 4 }
 0x12d   : > { %v1867_v0 = vsel %vm1859_vm3, %v1834_v58, %v1072_v39 }
 0x12e   : > { %v1900_v4 = vsel %vm1892_vm4, %v1867_v0, %v1200_v24  ;;  %v2550_v24 = vsel %vm14313_vm10, %v2344_v29, -inf  ;;  %v2545_v52 = vmax.f32 %v2543_v15, %v2544_v44  ;;  %v10026_v29 = vld [vmem:[%s9564_s18 + $0xd9] sm:$0xff] }
 0x12f   : > { %v2551_v47 = vrot.slane %v2550_v24, 4 }
 0x130   : > { %827 = vrot.lane.b32.xlu2 %v9842_v63, %s14340_s22 }
 0x131   : > { %1721 = vrot.lane.b32.xlu1 %v9937_v57, %s14341_s28  ;;  %1593 = vrot.lane.b32.xlu0 %v9941_v62, %s14344_s20  ;;  %v2552_v35 = vmax.f32 %v2550_v24, %v2551_v47  ;;  %v10034_v24 = vld [vmem:[%s9564_s18 + $0xd8] sm:$0xff] }
 0x132   : > { %v1714_v19 = vpop.permute.xlu2 %1713 }
 0x133   : > { %v1456_v3 = vpop.permute.xlu1 %1455  ;;  %v1328_v2 = vpop.permute.xlu0 %1327 }
 0x134   : > { %v1933_v5 = vsel %vm1925_vm5, %v1900_v4, %v1328_v2 }
 0x135   : > { %v1966_v63 = vsel %vm1958_vm6, %v1933_v5, %v1456_v3 }
 0x136   : > { %v1999_v11 = vsel %vm1991_vm7, %v1966_v63, %v1584_v45 }
 0x138   : > { %1211 = vrot.lane.b32.xlu2 %v9897_v34, %s14342_s15 }
 0x139   : > { %1083 = vrot.lane.b32.xlu1 %v8626_v42, %s14337_s27  ;;  %955 = vrot.lane.b32.xlu0 %v9838_v60, %s14345_s19  ;;  %v2537_v42 = vrot.slane %v2536_v33, 4 }
 0x13a   : > { %v9963_v8 = vpop.permute.xlu2 %1075  ;;  %v2186_v28 = vpop.f32.mrf.mxu0 }
 0x13b   : > { %v818_v61 = vpop.permute.xlu1 %817  ;;  %v1712_v10 = vpop.permute.xlu0 %1711  ;;  %v2187_v26 = vadd.f32 %v9955_v6, %v2186_v28  ;;  %v2538_v50 = vmax.f32 %v2536_v33, %v2537_v42 }
 0x13c   : > { %v2032_v14 = vsel %vm2024_vm8, %v1999_v11, %v1712_v10  ;;  %v1802_v60 = vsel %vm14326_vm1, %v9659_v23, %v818_v61  ;;  %v2345_v23 = vrot.slane %v2279_v20, 6  ;;  %v2546_v20 = vrot.slane %v2545_v52, 2 }
 0x13d   : > { %8719 = vmatmul.msk.f32.gmra.mxu0 %vm2065_vm9, %v2032_v14  ;;  %v1835_v1 = vsel %vm1826_vm2, %v1802_v60, %v946_v49  ;;  %v2280_v48 = vmax.f32 %v2187_v26, 0.0  ;;  %v10031_v26 = vld [vmem:[%s9564_s18 + $0xda] sm:$0xff] }
 0x13e   : > { %v2557_v30 = vsel %vm14313_vm10, %v2345_v23, -inf }
 0x13f   : > { %v2346_v58 = vrot.slane %v2280_v48, 2  ;;  %v2564_v0 = vsel %vm14313_vm10, %v2280_v48, -inf  ;;  %v2347_v7 = vrot.slane %v2280_v48, 4  ;;  %v2348_v60 = vrot.slane %v2280_v48, 6 }
 0x140   : > { %1595 = vrot.lane.b32.xlu2 %v9973_v59, %s14344_s20  ;;  %v2565_v61 = vrot.slane %v2564_v0, 4 }
 0x141   : > { %1467 = vrot.lane.b32.xlu1 %v9970_v17, %s14338_s21  ;;  %1339 = vrot.lane.b32.xlu0 %v9900_v38, %s14339_s26  ;;  %v2571_v12 = vsel %vm14313_vm10, %v2346_v58, -inf }
 0x142   : > { %v9983_v22 = vpop.permute.xlu2 %1459  ;;  %v2572_v42 = vrot.slane %v2571_v12, 4 }
 0x143   : > { %v1202_v21 = vpop.permute.xlu1 %1201  ;;  %v1074_v25 = vpop.permute.xlu0 %1073 }
 0x144   : > { %v1868_v31 = vsel %vm1859_vm3, %v1835_v1, %v1074_v25 }
 0x145   : > { %v1901_v41 = vsel %vm1892_vm4, %v1868_v31, %v1202_v21 }
 0x148   : > { %957 = vrot.lane.b32.xlu2 %v9876_v27, %s14345_s19  ;;  %v1934_v27 = vsel %vm1925_vm5, %v1901_v41, %v9932_v40  ;;  %v2578_v41 = vsel %vm14313_vm10, %v2347_v7, -inf }
 0x149   : > { %829 = vrot.lane.b32.xlu1 %v9864_v16, %s14340_s22  ;;  %1723 = vrot.lane.b32.xlu0 %v9988_v32, %s14341_s28  ;;  %v2558_v16 = vrot.slane %v2557_v30, 4 }
 0x14a   : > { %v10002_v45 = vpop.permute.xlu2 %821 }
 0x14b   : > { %v1586_v43 = vpop.permute.xlu1 %1585  ;;  %v1458_v46 = vpop.permute.xlu0 %1457  ;;  %v2559_v36 = vmax.f32 %v2557_v30, %v2558_v16  ;;  %v2566_v30 = vmax.f32 %v2564_v0, %v2565_v61  ;;  %v2547_v16 = vmax.f32 %v2545_v52, %v2546_v20  ;;  %v2573_v0 = vmax.f32 %v2571_v12, %v2572_v42 }
 0x14c   : > { %v2189_v18 = vpop.f32.mrf.mxu0  ;;  %v1967_v9 = vsel %vm1958_vm6, %v1934_v27, %v1458_v46 }
 0x14d   : > { %v2190_v49 = vadd.f32 %v9955_v6, %v2189_v18  ;;  %v2000_v51 = vsel %vm1991_vm7, %v1967_v9, %v1586_v43  ;;  %v2560_v1 = vrot.slane %v2559_v36, 2  ;;  %v2585_v43 = vsel %vm14313_vm10, %v2348_v60, -inf }
 0x14e   : > { %v2033_v39 = vsel %vm2024_vm8, %v2000_v51, %v1714_v19  ;;  %v2539_v19 = vrot.slane %v2538_v50, 2  ;;  %v14311_v51 = vmov 0.0   ;;  %v2586_v52 = vrot.slane %v2585_v43, 4 }
 0x14f   : > { %v2281_v54 = vmax.f32 %v2190_v49, 0.0  ;;  %8720 = vmatmul.msk.f32.gmra.mxu0 %vm2065_vm9, %v2033_v39  ;;  %v2561_v27 = vmax.f32 %v2559_v36, %v2560_v1  ;;  %3627 = vst.msk [vmem:[#allocation2 + $0x10] sm:$0xff] %vm3432_vm11, %v14311_v51 }
 0x150   : > { %1341 = vrot.lane.b32.xlu2 %v9937_v57, %s14339_s26  ;;  %v2540_v47 = vmax.f32 %v2538_v50, %v2539_v19  ;;  %v2579_v50 = vrot.slane %v2578_v41, 4  ;;  %3628 = vst.msk [vmem:[#allocation2 + $0x18] sm:$0x3] %vm14313_vm10, %v14311_v51 }
 0x151   : > { %1213 = vrot.lane.b32.xlu1 %v9941_v62, %s14342_s15  ;;  %v2349_v40 = vrot.slane %v2281_v54, 2  ;;  %v2350_v3 = vrot.slane %v2281_v54, 4  ;;  %v2351_v2 = vrot.slane %v2281_v54, 6  ;;  %v2592_v4 = vsel %vm14313_vm10, %v2281_v54, -inf  ;;  %1085 = vrot.lane.b32.xlu0 %v9923_v55, %s14337_s27  ;;  %3625 = vst.msk [vmem:[#allocation2] sm:$0xff] %vm3432_vm11, %v14311_v51 }
 0x152   : > { %v2593_v5 = vrot.slane %v2592_v4, 4  ;;  %v10021_v13 = vpop.permute.xlu2 %1205  ;;  %v2553_v55 = vrot.slane %v2552_v35, 2  ;;  %v2567_v54 = vrot.slane %v2566_v30, 2  ;;  %3626 = vst.msk [vmem:[#allocation2 + $0x8] sm:$0x3] %vm14313_vm10, %v14311_v51 }
 0x153   : > { %v948_v63 = vpop.permute.xlu1 %947  ;;  %v2599_v10 = vsel %vm14313_vm10, %v2349_v40, -inf  ;;  %v2606_v11 = vsel %vm14313_vm10, %v2350_v3, -inf  ;;  %v820_v14 = vpop.permute.xlu0 %819  ;;  %v2613_v28 = vsel %vm14313_vm10, %v2351_v2, -inf  ;;  %v2541_v3 = vrot.slane %v2540_v47, 1  ;;  %3629 = vst.msk [vmem:[#allocation2 + $0x20] sm:$0xff] %vm3432_vm11, %v14311_v51 }
 0x154   : > { %v2600_v21 = vrot.slane %v2599_v10, 4  ;;  %v2607_v25 = vrot.slane %v2606_v11, 4  ;;  %v2594_v23 = vmax.f32 %v2592_v4, %v2593_v5  ;;  %v1803_v15 = vsel %vm14326_vm1, %v9704_v37, %v820_v14  ;;  %3630 = vst.msk [vmem:[#allocation2 + $0x28] sm:$0x3] %vm14313_vm10, %v14311_v51 }
 0x155   : > { %v2614_v46 = vrot.slane %v2613_v28, 4  ;;  %v1836_v37 = vsel %vm1826_vm2, %v1803_v15, %v948_v63  ;;  %v2554_v48 = vmax.f32 %v2552_v35, %v2553_v55  ;;  %v2548_v2 = vrot.slane %v2547_v16, 1  ;;  %3631 = vst.msk [vmem:[#allocation2 + $0x30] sm:$0xff] %vm3432_vm11, %v14311_v51 }
 0x156   : > { %v2601_v31 = vmax.f32 %v2599_v10, %v2600_v21  ;;  %v2608_v33 = vmax.f32 %v2606_v11, %v2607_v25  ;;  %v2595_v18 = vrot.slane %v2594_v23, 2  ;;  %v1869_v36 = vsel %vm1859_vm3, %v1836_v37, %v9963_v8  ;;  %3632 = vst.msk [vmem:[#allocation2 + $0x38] sm:$0x3] %vm14313_vm10, %v14311_v51 }
 0x157   : > { %v2615_v35 = vmax.f32 %v2613_v28, %v2614_v46  ;;  %v2555_v19 = vrot.slane %v2554_v48, 1  ;;  %v2562_v5 = vrot.slane %v2561_v27, 1  ;;  %v2568_v61 = vmax.f32 %v2566_v30, %v2567_v54  ;;  %3633 = vst.msk [vmem:[#allocation2 + $0x40] sm:$0xff] %vm3432_vm11, %v14311_v51 }
 0x158   : > { %v2602_v44 = vrot.slane %v2601_v31, 2  ;;  %1725 = vrot.lane.b32.xlu2 %v10031_v26, %s14341_s28  ;;  %v2609_v9 = vrot.slane %v2608_v33, 2  ;;  %v2596_v63 = vmax.f32 %v2594_v23, %v2595_v18  ;;  %v2580_v10 = vmax.f32 %v2578_v41, %v2579_v50  ;;  %3634 = vst.msk [vmem:[#allocation2 + $0x48] sm:$0x3] %vm14313_vm10, %v14311_v51 }
 0x159   : > { %1597 = vrot.lane.b32.xlu1 %v10026_v29, %s14344_s20  ;;  %1469 = vrot.lane.b32.xlu0 %v10034_v24, %s14338_s21  ;;  %v2587_v8 = vmax.f32 %v2585_v43, %v2586_v52  ;;  %v2574_v11 = vrot.slane %v2573_v0, 2  ;;  %v2616_v20 = vrot.slane %v2615_v35, 2  ;;  %v2542_v21 = vmax.f32 %v2540_v47, %v2541_v3  ;;  %3635 = vst.msk [vmem:[#allocation2 + $0x50] sm:$0xff] %vm3432_vm11, %v14311_v51 }
 0x15a   : > { %v10047_v39 = vpop.permute.xlu2 %1589  ;;  %v2603_v40 = vmax.f32 %v2601_v31, %v2602_v44  ;;  %v2610_v7 = vmax.f32 %v2608_v33, %v2609_v9  ;;  %v2549_v25 = vmax.f32 %v2547_v16, %v2548_v2  ;;  %v2556_v55 = vmax.f32 %v2554_v48, %v2555_v19  ;;  %3636 = vst.msk [vmem:[#allocation2 + $0x58] sm:$0x3] %vm14313_vm10, %v14311_v51  ;;  %v10106_v9 = vld [vmem:[%s9564_s18 + $0xe0] sm:$0xff] }
 0x15b   : > { %v1332_v49 = vpop.permute.xlu1 %1331  ;;  %v1204_v58 = vpop.permute.xlu0 %1203  ;;  %v2563_v1 = vmax.f32 %v2561_v27, %v2562_v5  ;;  %v2597_v12 = vrot.slane %v2596_v63, 1  ;;  %v2581_v31 = vrot.slane %v2580_v10, 2  ;;  %v2588_v33 = vrot.slane %v2587_v8, 2  ;;  %3637 = vst.msk [vmem:[#allocation2 + $0x60] sm:$0xff] %vm3432_vm11, %v14311_v51 }
 0x15c   : > { %v1902_v4 = vsel %vm1892_vm4, %v1869_v36, %v1204_v58  ;;  %v2604_v14 = vrot.slane %v2603_v40, 1  ;;  %v2611_v28 = vrot.slane %v2610_v7, 1  ;;  %v10081_v30 = vmax.f32 %v2573_v0, %v2574_v11  ;;  %3638 = vst.msk [vmem:[#allocation2 + $0x68] sm:$0x3] %vm14313_vm10, %v14311_v51 }
 0x15d   : > { %v1935_v60 = vsel %vm1925_vm5, %v1902_v4, %v1332_v49  ;;  %v2617_v42 = vmax.f32 %v2615_v35, %v2616_v20  ;;  %v10087_v46 = vsel %vm3432_vm11, %v2542_v21, -inf  ;;  %v10090_v47 = vsel %vm3432_vm11, %v2549_v25, -inf  ;;  %3639 = vst.msk [vmem:[#allocation2 + $0x70] sm:$0xff] %vm3432_vm11, %v14311_v51 }
 0x15e   : > { %v2605_v41 = vmax.f32 %v2603_v40, %v2604_v14  ;;  %v10097_v37 = vsel %vm3432_vm11, %v2556_v55, -inf  ;;  %v10100_v48 = vsel %vm3432_vm11, %v2563_v1, -inf  ;;  %v2598_v27 = vmax.f32 %v2596_v63, %v2597_v12  ;;  %3640 = vst.msk [vmem:[#allocation2 + $0x78] sm:$0x3] %vm14313_vm10, %v14311_v51 }
 0x15f   : > { %v2612_v18 = vmax.f32 %v2610_v7, %v2611_v28  ;;  %v2582_v49 = vmax.f32 %v2580_v10, %v2581_v31  ;;  %v10108_v54 = vmax.f32 %v2587_v8, %v2588_v33  ;;  %v2576_v58 = vrot.slane %v10081_v30, 1  ;;  %3641 = vst.msk [vmem:[#allocation2 + $0x80] sm:$0xff] %vm3432_vm11, %v14311_v51  ;;  %v10149_v28 = vld [vmem:[%s9564_s18 + $0xe2] sm:$0xff] }
 0x160   : > { %1087 = vrot.lane.b32.xlu2 %v9970_v17, %s14337_s27  ;;  %v2618_v0 = vrot.slane %v2617_v42, 1  ;;  %v3437_v40 = vsel %vm3432_vm11, %v2605_v41, -inf  ;;  %v1804_v4 = vsel %vm14326_vm1, %v9728_v53, %v10002_v45  ;;  %v3434_v19 = vsel %vm3432_vm11, %v2598_v27, -inf  ;;  %3642 = vst.msk [vmem:[#allocation2 + $0x88] sm:$0x3] %vm14313_vm10, %v14311_v51 }
 0x161   : > { %959 = vrot.lane.b32.xlu1 %v9900_v38, %s14345_s19  ;;  %831 = vrot.lane.b32.xlu0 %v9897_v34, %s14340_s22  ;;  %v2569_v38 = vrot.slane %v2568_v61, 1  ;;  %v1968_v34 = vsel %vm1958_vm6, %v1935_v60, %v9983_v22  ;;  %v3440_v5 = vsel %vm3432_vm11, %v2612_v18, -inf  ;;  %3643 = vst.msk [vmem:[#allocation2 + $0x90] sm:$0xff] %vm3432_vm11, %v14311_v51  ;;  %v2583_v25 = vrot.slane %v2582_v49, 1 }
 0x162   : > { %v10075_v15 = vpop.permute.xlu2 %951  ;;  %v2619_v55 = vmax.f32 %v2617_v42, %v2618_v0  ;;  %v3435_v1 = vmax.f32 %v10087_v46, %v3434_v19  ;;  %3644 = vst.msk [vmem:[#allocation2 + $0x98] sm:$0x3] %vm14313_vm10, %v14311_v51  ;;  %v3441_v41 = vmax.f32 %v10097_v37, %v3440_v5 }
 0x163   : > { %v1716_v23 = vpop.permute.xlu1 %1715  ;;  %v1588_v17 = vpop.permute.xlu0 %1587  ;;  %v10112_v52 = vmax.f32 %v2568_v61, %v2569_v38  ;;  %v3438_v61 = vmax.f32 %v10090_v47, %v3437_v40  ;;  %v2584_v27 = vmax.f32 %v2582_v49, %v2583_v25 }
 0x164   : > { %v2001_v43 = vsel %vm1991_vm7, %v1968_v34, %v1588_v17  ;;  %v2192_v44 = vpop.f32.mrf.mxu0  ;;  %v10152_v17 = vld [vmem:[%s9564_s18 + $0xe1] sm:$0xff]  ;;  %v2590_v34 = vrot.slane %v10108_v54, 1  ;;  %v3443_v18 = vsel %vm3432_vm11, %v2619_v55, -inf }
 0x165   : > { %v2193_v22 = vadd.f32 %v9955_v6, %v2192_v44  ;;  %v2034_v16 = vsel %vm2024_vm8, %v2001_v43, %v1716_v23  ;;  %v3710_v42 = vsel %vm14310_vm12, %v3438_v61, %v3435_v1 }
 0x166   : > { %8721 = vmatmul.msk.f32.gmra.mxu0 %vm2065_vm9, %v2034_v16  ;;  %v2577_v16 = vmax.f32 %v10081_v30, %v2576_v58  ;;  %v3445_v30 = vsel %vm3432_vm11, %v10112_v52, -inf  ;;  %v3712_v49 = vsel %vm14308_vm13, %v3441_v41, %v3710_v42  ;;  %vm14321_vm13 = vcmask 1046534  }
 0x167   : > { %v2282_v50 = vmax.f32 %v2193_v22, 0.0 }
 0x168   : > { %1471 = vrot.lane.b32.xlu2 %v10106_v9, %s14338_s21 }
 0x169   : > { %1343 = vrot.lane.b32.xlu1 %v9988_v32, %s14339_s26  ;;  %v2352_v35 = vrot.slane %v2282_v50, 2  ;;  %v2353_v36 = vrot.slane %v2282_v50, 4  ;;  %v2354_v3 = vrot.slane %v2282_v50, 6  ;;  %v2620_v2 = vsel %vm14313_vm10, %v2282_v50, -inf  ;;  %1215 = vrot.lane.b32.xlu0 %v9973_v59, %s14342_s15 }
 0x16a   : > { %v2621_v63 = vrot.slane %v2620_v2, 4  ;;  %v10140_v53 = vpop.permute.xlu2 %1335 }
 0x16b   : > { %v1078_v7 = vpop.permute.xlu1 %1077  ;;  %v2627_v10 = vsel %vm14313_vm10, %v2352_v35, -inf  ;;  %v2634_v8 = vsel %vm14313_vm10, %v2353_v36, -inf  ;;  %v2641_v11 = vsel %vm14313_vm10, %v2354_v3, -inf  ;;  %v950_v45 = vpop.permute.xlu0 %949  ;;  %v2591_v36 = vmax.f32 %v10108_v54, %v2590_v34 }
 0x16c   : > { %v2622_v14 = vmax.f32 %v2620_v2, %v2621_v63  ;;  %v2628_v20 = vrot.slane %v2627_v10, 4  ;;  %v2635_v60 = vrot.slane %v2634_v8, 4  ;;  %v2642_v21 = vrot.slane %v2641_v11, 4 }
 0x16d   : > { %v1837_v12 = vsel %vm1826_vm2, %v1804_v4, %v950_v45  ;;  %v3448_v63 = vsel %vm3432_vm11, %v2577_v16, -inf  ;;  %v3454_v1 = vsel %vm3432_vm11, %v2591_v36, -inf }
 0x16e   : > { %v2623_v23 = vrot.slane %v2622_v14, 2  ;;  %v2629_v38 = vmax.f32 %v2627_v10, %v2628_v20  ;;  %v2636_v31 = vmax.f32 %v2634_v8, %v2635_v60  ;;  %v2643_v33 = vmax.f32 %v2641_v11, %v2642_v21 }
 0x16f   : > { %v1870_v43 = vsel %vm1859_vm3, %v1837_v12, %v1078_v7  ;;  %v3444_v7 = vmax.f32 %v10100_v48, %v3443_v18  ;;  %v3451_v11 = vsel %vm3432_vm11, %v2584_v27, -inf  ;;  %v10215_v18 = vld [vmem:[%s9564_s18 + $0xf2] sm:$0xff] }
 0x170   : > { %v2624_v44 = vmax.f32 %v2622_v14, %v2623_v23  ;;  %v2630_v46 = vrot.slane %v2629_v38, 2  ;;  %v2637_v47 = vrot.slane %v2636_v31, 2  ;;  %v2644_v22 = vrot.slane %v2643_v33, 2  ;;  %833 = vrot.lane.b32.xlu2 %v9941_v62, %s14340_s22 }
 0x171   : > { %1727 = vrot.lane.b32.xlu1 %v10149_v28, %s14341_s28  ;;  %1599 = vrot.lane.b32.xlu0 %v10152_v17, %s14344_s20  ;;  %v1903_v62 = vsel %vm1892_vm4, %v1870_v43, %v10021_v13  ;;  %v3714_v13 = vsel %vm14309_vm14, %v3444_v7, %v3712_v49  ;;  %vm14314_vm14 = vcmask 1047559   ;;  %v490_v43 = vld [vmem:[%s9564_s18 + $0x80] sm:$0xff] }
 0x172   : > { %v2625_v37 = vrot.slane %v2624_v44, 1  ;;  %v2631_v50 = vmax.f32 %v2629_v38, %v2630_v46  ;;  %v2638_v0 = vmax.f32 %v2636_v31, %v2637_v47  ;;  %v2645_v40 = vmax.f32 %v2643_v33, %v2644_v22  ;;  %v10170_v58 = vpop.permute.xlu2 %1719 }
 0x173   : > { %v1462_v35 = vpop.permute.xlu1 %1461  ;;  %v1334_v3 = vpop.permute.xlu0 %1333 }
 0x174   : > { %v2626_v2 = vmax.f32 %v2624_v44, %v2625_v37  ;;  %v2632_v4 = vrot.slane %v2631_v50, 1  ;;  %v2639_v19 = vrot.slane %v2638_v0, 1  ;;  %v2646_v5 = vrot.slane %v2645_v40, 1  ;;  %v10203_v44 = vld [vmem:[%s9564_s18 + $0xf1] sm:$0xff] }
 0x175   : > { %v1936_v54 = vsel %vm1925_vm5, %v1903_v62, %v1334_v3  ;;  %v491_v62 = vld [vmem:[%s9564_s18 + $0x90] sm:$0xff] }
 0x176   : > { %v2633_v52 = vmax.f32 %v2631_v50, %v2632_v4  ;;  %v2640_v61 = vmax.f32 %v2638_v0, %v2639_v19  ;;  %v2647_v10 = vmax.f32 %v2645_v40, %v2646_v5  ;;  %v3446_v8 = vsel %vm3432_vm11, %v2626_v2, -inf  ;;  %v10248_v4 = vld [vmem:[%s9564_s18 + $0xfa] sm:$0xff] }
 0x177   : > { %v3447_v45 = vmax.f32 %v3445_v30, %v3446_v8  ;;  %v1969_v60 = vsel %vm1958_vm6, %v1936_v54, %v1462_v35  ;;  %v10251_v5 = vld [vmem:[%s9564_s18 + $0xf8] sm:$0xff] }
 0x178   : > { %v3449_v14 = vsel %vm3432_vm11, %v2633_v52, -inf  ;;  %v3452_v20 = vsel %vm3432_vm11, %v2640_v61, -inf  ;;  %v3455_v48 = vsel %vm3432_vm11, %v2647_v10, -inf  ;;  %1217 = vrot.lane.b32.xlu2 %v10026_v29, %s14342_s15  ;;  %v2002_v33 = vsel %vm1991_vm7, %v1969_v60, %v10047_v39 }
 0x179   : > { %1089 = vrot.lane.b32.xlu1 %v10034_v24, %s14337_s27  ;;  %v3450_v21 = vmax.f32 %v3448_v63, %v3449_v14  ;;  %v3453_v25 = vmax.f32 %v3451_v11, %v3452_v20  ;;  %v3716_v55 = vsel %vm14323_vm15, %v3447_v45, %v3714_v13  ;;  %961 = vrot.lane.b32.xlu0 %v9937_v57, %s14345_s19  ;;  %v8631_v57 = vld [vmem:[%s9564_s18 + $0xf0] sm:$0xff] }
 0x17a   : > { %v3456_v23 = vmax.f32 %v3454_v1, %v3455_v48  ;;  %v1082_v38 = vpop.permute.xlu2 %1081  ;;  %v2195_v36 = vpop.f32.mrf.mxu0 }
 0x17b   : > { %v824_v12 = vpop.permute.xlu1 %823  ;;  %v3718_v24 = vsel %vm14322_vm0, %v3450_v21, %v3716_v55  ;;  %v1718_v31 = vpop.permute.xlu0 %1717  ;;  %v2196_v30 = vadd.f32 %v9955_v6, %v2195_v36 }
 0x17c   : > { %v3720_v34 = vsel %vm14321_vm13, %v3453_v25, %v3718_v24  ;;  %v2035_v41 = vsel %vm2024_vm8, %v2002_v33, %v1718_v31  ;;  %v1805_v46 = vsel %vm14326_vm1, %v490_v43, %v824_v12 }
 0x17d   : > { %v3722_v42 = vsel %vm14314_vm14, %v3456_v23, %v3720_v34  ;;  %8722 = vmatmul.msk.f32.gmra.mxu0 %vm2065_vm9, %v2035_v41  ;;  %v1838_v16 = vsel %vm1826_vm2, %v1805_v46, %v10075_v15  ;;  %v2283_v19 = vmax.f32 %v2196_v30, 0.0 }
 0x17e   : > { %3781 = vst.msk [vmem:[#allocation2 + $0x11] sm:$0xff] %vm3432_vm11, %v3722_v42 }
 0x17f   : > { %v2355_v7 = vrot.slane %v2283_v19, 2  ;;  %v2356_v61 = vrot.slane %v2283_v19, 4  ;;  %v2357_v11 = vrot.slane %v2283_v19, 6  ;;  %v2648_v45 = vsel %vm14313_vm10, %v2283_v19, -inf }
 0x180   : > { %1601 = vrot.lane.b32.xlu2 %v10203_v44, %s14344_s20  ;;  %v2649_v25 = vrot.slane %v2648_v45, 4 }
 0x181   : > { %1473 = vrot.lane.b32.xlu1 %v8631_v57, %s14338_s21  ;;  %1345 = vrot.lane.b32.xlu0 %v10031_v26, %s14339_s26  ;;  %v2655_v14 = vsel %vm14313_vm10, %v2355_v7, -inf  ;;  %v2662_v20 = vsel %vm14313_vm10, %v2356_v61, -inf  ;;  %v2669_v21 = vsel %vm14313_vm10, %v2357_v11, -inf  ;;  %v10304_v11 = vld [vmem:[%s9564_s18 + $0x10a] sm:$0xff] }
 0x182   : > { %v1466_v47 = vpop.permute.xlu2 %1465  ;;  %v2656_v55 = vrot.slane %v2655_v14, 4  ;;  %v2663_v12 = vrot.slane %v2662_v20, 4  ;;  %v2670_v31 = vrot.slane %v2669_v21, 4  ;;  %v2650_v43 = vmax.f32 %v2648_v45, %v2649_v25  ;;  %v10309_v25 = vld [vmem:[%s9564_s18 + $0x109] sm:$0xff] }
 0x183   : > { %v1208_v39 = vpop.permute.xlu1 %1207  ;;  %v1080_v22 = vpop.permute.xlu0 %1079 }
 0x184   : > { %v1871_v27 = vsel %vm1859_vm3, %v1838_v16, %v1080_v22  ;;  %v2664_v46 = vmax.f32 %v2662_v20, %v2663_v12  ;;  %v2671_v22 = vmax.f32 %v2669_v21, %v2670_v31 }
 0x185   : > { %v1904_v37 = vsel %vm1892_vm4, %v1871_v27, %v1208_v39 }
 0x186   : > { %v1937_v40 = vsel %vm1925_vm5, %v1904_v37, %v10140_v53  ;;  %v2672_v61 = vrot.slane %v2671_v22, 2 }
 0x188   : > { %963 = vrot.lane.b32.xlu2 %v9988_v32, %s14345_s19 }
 0x189   : > { %835 = vrot.lane.b32.xlu1 %v9973_v59, %s14340_s22  ;;  %1729 = vrot.lane.b32.xlu0 %v10215_v18, %s14341_s28 }
 0x18a   : > { %v10224_v0 = vpop.permute.xlu2 %827 }
 0x18b   : > { %v1592_v50 = vpop.permute.xlu1 %1591  ;;  %v1464_v15 = vpop.permute.xlu0 %1463 }
 0x18c   : > { %v1970_v59 = vsel %vm1958_vm6, %v1937_v40, %v1464_v15  ;;  %v2198_v10 = vpop.f32.mrf.mxu0 }
 0x18d   : > { %v2003_v35 = vsel %vm1991_vm7, %v1970_v59, %v1592_v50  ;;  %v2199_v48 = vadd.f32 %v9955_v6, %v2198_v10  ;;  %v2651_v59 = vrot.slane %v2650_v43, 2 }
 0x18e   : > { %v2036_v32 = vsel %vm2024_vm8, %v2003_v35, %v10170_v58  ;;  %v10244_v58 = vld [vmem:[%s9564_s18 + $0xf9] sm:$0xff] }
 0x18f   : > { %8723 = vmatmul.msk.f32.gmra.mxu0 %vm2065_vm9, %v2036_v32  ;;  %v2284_v33 = vmax.f32 %v2199_v48, 0.0  ;;  %v1807_v32 = vsel %vm14326_vm1, %v9826_v56, %v10224_v0  ;;  %v2652_v48 = vmax.f32 %v2650_v43, %v2651_v59 }
 0x190   : > { %1347 = vrot.lane.b32.xlu2 %v10149_v28, %s14339_s26 }
 0x191   : > { %1219 = vrot.lane.b32.xlu1 %v10152_v17, %s14342_s15  ;;  %1091 = vrot.lane.b32.xlu0 %v10106_v9, %s14337_s27  ;;  %v2358_v16 = vrot.slane %v2284_v33, 2  ;;  %v2676_v27 = vsel %vm14313_vm10, %v2284_v33, -inf  ;;  %v2360_v30 = vrot.slane %v2284_v33, 6 }
 0x192   : > { %v10240_v49 = vpop.permute.xlu2 %1211 }
 0x193   : > { %v954_v53 = vpop.permute.xlu1 %953  ;;  %v826_v3 = vpop.permute.xlu0 %825  ;;  %v2683_v10 = vsel %vm14313_vm10, %v2358_v16, -inf  ;;  %v2697_v21 = vsel %vm14313_vm10, %v2360_v30, -inf }
 0x194   : > { %v1806_v2 = vsel %vm14326_vm1, %v491_v62, %v826_v3 }
 0x195   : > { %v1839_v9 = vsel %vm1826_vm2, %v1806_v2, %v954_v53 }
 0x196   : > { %v1872_v8 = vsel %vm1859_vm3, %v1839_v9, %v1082_v38 }
 0x198   : > { %1731 = vrot.lane.b32.xlu2 %v10248_v4, %s14341_s28 }
 0x199   : > { %1603 = vrot.lane.b32.xlu1 %v10244_v58, %s14344_s20  ;;  %1475 = vrot.lane.b32.xlu0 %v10251_v5, %s14338_s21 }
 0x19a   : > { %v10260_v54 = vpop.permute.xlu2 %1595 }
 0x19b   : > { %v1338_v63 = vpop.permute.xlu1 %1337  ;;  %v1210_v52 = vpop.permute.xlu0 %1209 }
 0x19c   : > { %v1905_v13 = vsel %vm1892_vm4, %v1872_v8, %v1210_v52  ;;  %v2665_v52 = vrot.slane %v2664_v46, 2 }
 0x19d   : > { %v1938_v60 = vsel %vm1925_vm5, %v1905_v13, %v1338_v63  ;;  %v2677_v63 = vrot.slane %v2676_v27, 4 }
 0x19e   : > { %v1971_v38 = vsel %vm1958_vm6, %v1938_v60, %v1466_v47  ;;  %v2359_v47 = vrot.slane %v2284_v33, 4 }
 0x1a0   : > { %1093 = vrot.lane.b32.xlu2 %v8631_v57, %s14337_s27  ;;  %v2657_v57 = vmax.f32 %v2655_v14, %v2656_v55  ;;  %v2690_v8 = vsel %vm14313_vm10, %v2359_v47, -inf  ;;  %v2678_v55 = vmax.f32 %v2676_v27, %v2677_v63 }
 0x1a1   : > { %965 = vrot.lane.b32.xlu1 %v10031_v26, %s14345_s19  ;;  %837 = vrot.lane.b32.xlu0 %v10026_v29, %s14340_s22  ;;  %v10283_v29 = vld [vmem:[%s9564_s18 + $0x108] sm:$0xff]  ;;  %v2691_v31 = vrot.slane %v2690_v8, 4 }
 0x1a2   : > { %v10275_v23 = vpop.permute.xlu2 %957  ;;  %v2658_v35 = vrot.slane %v2657_v57, 2  ;;  %v2679_v47 = vrot.slane %v2678_v55, 2 }
 0x1a3   : > { %v1722_v1 = vpop.permute.xlu1 %1721  ;;  %v1594_v24 = vpop.permute.xlu0 %1593 }
 0x1a4   : > { %v2004_v26 = vsel %vm1991_vm7, %v1971_v38, %v1594_v24  ;;  %v2201_v34 = vpop.f32.mrf.mxu0  ;;  %v2659_v60 = vmax.f32 %v2657_v57, %v2658_v35  ;;  %v2666_v24 = vmax.f32 %v2664_v46, %v2665_v52  ;;  %v2684_v38 = vrot.slane %v2683_v10, 4 }
 0x1a5   : > { %v2202_v41 = vadd.f32 %v9955_v6, %v2201_v34  ;;  %v2037_v42 = vsel %vm2024_vm8, %v2004_v26, %v1722_v1  ;;  %v2673_v26 = vmax.f32 %v2671_v22, %v2672_v61  ;;  %v2698_v34 = vrot.slane %v2697_v21, 4 }
 0x1a6   : > { %8724 = vmatmul.msk.f32.gmra.mxu0 %vm2065_vm9, %v2037_v42  ;;  %v2653_v57 = vrot.slane %v2652_v48, 1  ;;  %v2667_v22 = vrot.slane %v2666_v24, 1 }
 0x1a7   : > { %v2285_v39 = vmax.f32 %v2202_v41, 0.0  ;;  %v2674_v59 = vrot.slane %v2673_v26, 1  ;;  %v2699_v35 = vmax.f32 %v2697_v21, %v2698_v34 }
 0x1a8   : > { %1477 = vrot.lane.b32.xlu2 %v10283_v29, %s14338_s21  ;;  %v2654_v30 = vmax.f32 %v2652_v48, %v2653_v57  ;;  %v493_v48 = vld [vmem:[%s9564_s18 + $0xa8] sm:$0xff] }
 0x1a9   : > { %1349 = vrot.lane.b32.xlu1 %v10215_v18, %s14339_s26  ;;  %v2361_v37 = vrot.slane %v2285_v39, 2  ;;  %v2362_v50 = vrot.slane %v2285_v39, 4  ;;  %v2363_v15 = vrot.slane %v2285_v39, 6  ;;  %v2704_v40 = vsel %vm14313_vm10, %v2285_v39, -inf  ;;  %1221 = vrot.lane.b32.xlu0 %v10203_v44, %s14342_s15 }
 0x1aa   : > { %v2705_v36 = vrot.slane %v2704_v40, 4  ;;  %v10299_v19 = vpop.permute.xlu2 %1341  ;;  %v2660_v39 = vrot.slane %v2659_v60, 1  ;;  %v10334_v52 = vmax.f32 %v2673_v26, %v2674_v59  ;;  %v2700_v61 = vrot.slane %v2699_v35, 2 }
 0x1ab   : > { %v1084_v53 = vpop.permute.xlu1 %1083  ;;  %v2711_v3 = vsel %vm14313_vm10, %v2361_v37, -inf  ;;  %v2718_v62 = vsel %vm14313_vm10, %v2362_v50, -inf  ;;  %v2725_v2 = vsel %vm14313_vm10, %v2363_v15, -inf  ;;  %v956_v9 = vpop.permute.xlu0 %955  ;;  %v2685_v50 = vmax.f32 %v2683_v10, %v2684_v38 }
 0x1ac   : > { %v2706_v7 = vmax.f32 %v2704_v40, %v2705_v36  ;;  %v2712_v56 = vrot.slane %v2711_v3, 4  ;;  %v2719_v0 = vrot.slane %v2718_v62, 4  ;;  %v2726_v14 = vrot.slane %v2725_v2, 4 }
 0x1ad   : > { %v1840_v20 = vsel %vm1826_vm2, %v1807_v32, %v956_v9  ;;  %v2692_v15 = vmax.f32 %v2690_v8, %v2691_v31 }
 0x1ae   : > { %v2713_v13 = vmax.f32 %v2711_v3, %v2712_v56  ;;  %v2720_v45 = vmax.f32 %v2718_v62, %v2719_v0  ;;  %v2707_v1 = vrot.slane %v2706_v7, 2  ;;  %v1873_v33 = vsel %vm1859_vm3, %v1840_v20, %v1084_v53  ;;  %v10324_v53 = vld [vmem:[%s9564_s18 + $0x122] sm:$0xff] }
 0x1af   : > { %v2727_v42 = vmax.f32 %v2725_v2, %v2726_v14  ;;  %v2661_v3 = vmax.f32 %v2659_v60, %v2660_v39  ;;  %v10327_v62 = vld [vmem:[%s9564_s18 + $0x121] sm:$0xff]  ;;  %v2680_v2 = vmax.f32 %v2678_v55, %v2679_v47  ;;  %v2686_v56 = vrot.slane %v2685_v50, 2 }
 0x1b0   : > { %v2714_v12 = vrot.slane %v2713_v13, 2  ;;  %839 = vrot.lane.b32.xlu2 %v10152_v17, %s14340_s22  ;;  %v2721_v41 = vrot.slane %v2720_v45, 2  ;;  %v2708_v27 = vmax.f32 %v2706_v7, %v2707_v1  ;;  %v1906_v17 = vsel %vm1892_vm4, %v1873_v33, %v10240_v49  ;;  %v4165_v1 = vld [vmem:[%s14274_s3 + $0x88] sm:$0xff] }
 0x1b1   : > { %1733 = vrot.lane.b32.xlu1 %v10304_v11, %s14341_s28  ;;  %1605 = vrot.lane.b32.xlu0 %v10309_v25, %s14344_s20  ;;  %v2728_v36 = vrot.slane %v2727_v42, 2  ;;  %v2668_v7 = vmax.f32 %v2666_v24, %v2667_v22  ;;  %v2693_v0 = vrot.slane %v2692_v15, 2  ;;  %v10339_v14 = vsel %vm3432_vm11, %v2654_v30, -inf }
 0x1b2   : > { %v10318_v16 = vpop.permute.xlu2 %1725  ;;  %v2715_v37 = vmax.f32 %v2713_v13, %v2714_v12  ;;  %v2722_v32 = vmax.f32 %v2720_v45, %v2721_v41  ;;  %v2709_v9 = vrot.slane %v2708_v27, 1  ;;  %v2681_v12 = vrot.slane %v2680_v2, 1  ;;  %4249 = vmatpush.msra.mxu2 %v4165_v1  ;;  %v8543_v41 = vld [vmem:[%s9564_s18 + $0x138] sm:$0xff] }
 0x1b3   : > { %v1468_v43 = vpop.permute.xlu1 %1467  ;;  %v1340_v46 = vpop.permute.xlu0 %1339  ;;  %v2729_v8 = vmax.f32 %v2727_v42, %v2728_v36  ;;  %v2687_v33 = vmax.f32 %v2685_v50, %v2686_v56  ;;  %v2694_v26 = vmax.f32 %v2692_v15, %v2693_v0  ;;  %v2701_v42 = vmax.f32 %v2699_v35, %v2700_v61 }
 0x1b4   : > { %v1939_v40 = vsel %vm1925_vm5, %v1906_v17, %v1340_v46  ;;  %v2716_v63 = vrot.slane %v2715_v37, 1  ;;  %v2723_v10 = vrot.slane %v2722_v32, 1  ;;  %v2710_v24 = vmax.f32 %v2708_v27, %v2709_v9 }
 0x1b5   : > { %v1972_v49 = vsel %vm1958_vm6, %v1939_v40, %v1468_v43  ;;  %v2730_v57 = vrot.slane %v2729_v8, 1  ;;  %v2682_v17 = vmax.f32 %v2680_v2, %v2681_v12  ;;  %v10383_v12 = vld [vmem:[%s9564_s18 + $0x13a] sm:$0xff] }
 0x1b6   : > { %v2005_v55 = vsel %vm1991_vm7, %v1972_v49, %v10260_v54  ;;  %v2717_v38 = vmax.f32 %v2715_v37, %v2716_v63  ;;  %v4164_v54 = vld [vmem:[%s14274_s3 + $0x80] sm:$0xff]  ;;  %v2724_v43 = vmax.f32 %v2722_v32, %v2723_v10  ;;  %v3458_v22 = vsel %vm3432_vm11, %v2710_v24, -inf }
 0x1b7   : > { %4250 = vmatpush.msra.mxu2 %v4164_v54  ;;  %v2688_v63 = vrot.slane %v2687_v33, 1  ;;  %v2731_v49 = vmax.f32 %v2729_v8, %v2730_v57 }
 0x1b8   : > { %977 = vrot.lane.b32.xlu2 %v10324_v53, %s14345_s19  ;;  %v3461_v50 = vsel %vm3432_vm11, %v2717_v38, -inf  ;;  %v3464_v56 = vsel %vm3432_vm11, %v2724_v43, -inf }
 0x1b9   : > { %967 = vrot.lane.b32.xlu1 %v10149_v28, %s14345_s19  ;;  %849 = vrot.lane.b32.xlu0 %v10327_v62, %s14340_s22  ;;  %v10342_v28 = vsel %vm3432_vm11, %v2661_v3, -inf  ;;  %v3467_v38 = vsel %vm3432_vm11, %v2731_v49, -inf }
 0x1ba   : > { %v2204_v13 = vpop.f32.mrf.mxu0  ;;  %v10346_v60 = vpop.permute.xlu2 %1087 }
 0x1bb   : > { %v830_v45 = vpop.permute.xlu1 %829  ;;  %v2205_v20 = vadd.f32 %v9955_v6, %v2204_v13  ;;  %v1724_v21 = vpop.permute.xlu0 %1723  ;;  %v10355_v6 = vsel %vm3432_vm11, %v2668_v7, -inf  ;;  %v3462_v7 = vmax.f32 %v10342_v28, %v3461_v50 }
 0x1bc   : > { %v2038_v31 = vsel %vm2024_vm8, %v2005_v55, %v1724_v21  ;;  %v1808_v39 = vsel %vm14326_vm1, %v493_v48, %v830_v45  ;;  %v2702_v48 = vrot.slane %v2701_v42, 1  ;;  %v3465_v24 = vmax.f32 %v10355_v6, %v3464_v56 }
 0x1bd   : > { %v2286_v34 = vmax.f32 %v2205_v20, 0.0  ;;  %8725 = vmatmul.msk.f32.gmra.mxu0 %vm2065_vm9, %v2038_v31  ;;  %v1841_v32 = vsel %vm1826_vm2, %v1808_v39, %v10275_v23  ;;  %v2695_v20 = vrot.slane %v2694_v26, 1  ;;  %v3466_v39 = vsel %vm3432_vm11, %v10334_v52, -inf }
 0x1bf   : > { %v2364_v46 = vrot.slane %v2286_v34, 2  ;;  %v2365_v47 = vrot.slane %v2286_v34, 4  ;;  %v2366_v27 = vrot.slane %v2286_v34, 6  ;;  %v2732_v37 = vsel %vm14313_vm10, %v2286_v34, -inf }
 0x1c0   : > { %v2733_v15 = vrot.slane %v2732_v37, 4  ;;  %1223 = vrot.lane.b32.xlu2 %v10244_v58, %s14342_s15  ;;  %v2696_v6 = vmax.f32 %v2694_v26, %v2695_v20 }
 0x1c1   : > { %1105 = vrot.lane.b32.xlu1 %v8543_v41, %s14337_s27  ;;  %v2739_v40 = vsel %vm14313_vm10, %v2364_v46, -inf  ;;  %v2746_v59 = vsel %vm14313_vm10, %v2365_v47, -inf  ;;  %v2753_v35 = vsel %vm14313_vm10, %v2366_v27, -inf  ;;  %1095 = vrot.lane.b32.xlu0 %v10251_v5, %s14337_s27  ;;  %v3459_v5 = vmax.f32 %v10339_v14, %v3458_v22  ;;  %v10390_v41 = vld [vmem:[%s9564_s18 + $0x139] sm:$0xff] }
 0x1c2   : > { %v2734_v36 = vmax.f32 %v2732_v37, %v2733_v15  ;;  %v2740_v30 = vrot.slane %v2739_v40, 4  ;;  %v2747_v3 = vrot.slane %v2746_v59, 4  ;;  %v2754_v2 = vrot.slane %v2753_v35, 4  ;;  %v10378_v0 = vpop.permute.xlu2 %1471 }
 0x1c3   : > { %v1214_v9 = vpop.permute.xlu1 %1213  ;;  %v1086_v61 = vpop.permute.xlu0 %1085  ;;  %v3723_v31 = vsel %vm14310_vm12, %v3462_v7, %v3459_v5  ;;  %v2689_v46 = vmax.f32 %v2687_v33, %v2688_v63  ;;  %v2703_v47 = vmax.f32 %v2701_v42, %v2702_v48  ;;  %vm14346_vm12 = vcmask 1042434   ;;  %v10411_v63 = vld [vmem:[%s9564_s18 + $0x150] sm:$0xff] }
 0x1c4   : > { %v2735_v10 = vrot.slane %v2734_v36, 2  ;;  %v2741_v23 = vmax.f32 %v2739_v40, %v2740_v30  ;;  %v2748_v13 = vmax.f32 %v2746_v59, %v2747_v3  ;;  %v2755_v45 = vmax.f32 %v2753_v35, %v2754_v2 }
 0x1c5   : > { %v1874_v21 = vsel %vm1859_vm3, %v1841_v32, %v1086_v61  ;;  %v3469_v40 = vsel %vm3432_vm11, %v2682_v17, -inf  ;;  %v3468_v59 = vmax.f32 %v3466_v39, %v3467_v38  ;;  %v3724_v52 = vsel %vm14346_vm12, %v3465_v24, %v3723_v31  ;;  %v10418_v61 = vld [vmem:[%s9564_s18 + $0x111] sm:$0xff] }
 0x1c6   : > { %v2736_v8 = vmax.f32 %v2734_v36, %v2735_v10  ;;  %v2742_v55 = vrot.slane %v2741_v23, 2  ;;  %v2749_v28 = vrot.slane %v2748_v13, 2  ;;  %v2756_v1 = vrot.slane %v2755_v45, 2  ;;  %v494_v31 = vld [vmem:[%s9564_s18 + $0xb0] sm:$0xff] }
 0x1c7   : > { %v1907_v34 = vsel %vm1892_vm4, %v1874_v21, %v1214_v9  ;;  %v3472_v3 = vsel %vm3432_vm11, %v2689_v46, -inf  ;;  %v3475_v17 = vsel %vm3432_vm11, %v2696_v6, -inf  ;;  %vm14347_vm12 = vcmask 1043459  }
 0x1c8   : > { %v2737_v54 = vrot.slane %v2736_v8, 1  ;;  %v2743_v14 = vmax.f32 %v2741_v23, %v2742_v55  ;;  %v2750_v43 = vmax.f32 %v2748_v13, %v2749_v28  ;;  %v2757_v57 = vmax.f32 %v2755_v45, %v2756_v1  ;;  %1361 = vrot.lane.b32.xlu2 %v10383_v12, %s14339_s26  ;;  %v10422_v45 = vld [vmem:[%s9564_s18 + $0x110] sm:$0xff] }
 0x1c9   : > { %1351 = vrot.lane.b32.xlu1 %v10248_v4, %s14339_s26  ;;  %1233 = vrot.lane.b32.xlu0 %v10390_v41, %s14342_s15  ;;  %v1940_v42 = vsel %vm1925_vm5, %v1907_v34, %v10299_v19  ;;  %v3725_v49 = vsel %vm14347_vm12, %v3468_v59, %v3724_v52  ;;  %v3478_v20 = vsel %vm3432_vm11, %v2703_v47, -inf  ;;  %vm14348_vm12 = vcmask 1041409  }
 0x1ca   : > { %v2738_v27 = vmax.f32 %v2736_v8, %v2737_v54  ;;  %v2744_v37 = vrot.slane %v2743_v14, 1  ;;  %v2751_v22 = vrot.slane %v2750_v43, 1  ;;  %v2758_v50 = vrot.slane %v2757_v57, 1  ;;  %v10402_v33 = vpop.permute.xlu2 %833  ;;  %v10447_v54 = vld [vmem:[%s9564_s18 + $0x152] sm:$0xff] }
 0x1cb   : > { %v1598_v15 = vpop.permute.xlu1 %1597  ;;  %v1470_v26 = vpop.permute.xlu0 %1469 }
 0x1cc   : > { %v2745_v35 = vmax.f32 %v2743_v14, %v2744_v37  ;;  %v2752_v32 = vmax.f32 %v2750_v43, %v2751_v22  ;;  %v2759_v36 = vmax.f32 %v2757_v57, %v2758_v50  ;;  %v3470_v30 = vsel %vm3432_vm11, %v2738_v27, -inf  ;;  %v10450_v14 = vld [vmem:[%s9564_s18 + $0x151] sm:$0xff]  ;;  %v10466_v37 = vld [vmem:[%s9564_s18 + $0x129] sm:$0xff]  ;;  %v2207_v50 = vpop.f32.mrf.mxu0 }
 0x1cd   : > { %v3471_v2 = vmax.f32 %v3469_v40, %v3470_v30  ;;  %v1973_v9 = vsel %vm1958_vm6, %v1940_v42, %v1470_v26  ;;  %v10483_v26 = vld [vmem:[%s14273_s2] ss:$0 sm:$0xff] }
 0x1ce   : > { %v3473_v7 = vsel %vm3432_vm11, %v2745_v35, -inf  ;;  %v3476_v19 = vsel %vm3432_vm11, %v2752_v32, -inf  ;;  %v3479_v56 = vsel %vm3432_vm11, %v2759_v36, -inf  ;;  %v2006_v48 = vsel %vm1991_vm7, %v1973_v9, %v1598_v15  ;;  %v10490_v35 = vld [vmem:[%s9564_s18 + $0x12a] sm:$0xff]  ;;  %v10503_v9 = vld [vmem:[%s9564_s18 + $0x141] sm:$0xff] }
 0x1cf   : > { %v3474_v10 = vmax.f32 %v3472_v3, %v3473_v7  ;;  %v3477_v23 = vmax.f32 %v3475_v17, %v3476_v19  ;;  %v3726_v13 = vsel %vm14323_vm15, %v3471_v2, %v3725_v49  ;;  %v3480_v5 = vmax.f32 %v3478_v20, %v3479_v56 }
 0x1d0   : > { %v2039_v8 = vsel %vm2024_vm8, %v2006_v48, %v10318_v16  ;;  %1607 = vrot.lane.b32.xlu2 %v10418_v61, %s14344_s20  ;;  %v10443_v16 = vld [vmem:[%s9564_s18 + $0x112] sm:$0xff] }
 0x1d1   : > { %1489 = vrot.lane.b32.xlu1 %v10411_v63, %s14338_s21  ;;  %v3727_v21 = vsel %vm14322_vm0, %v3474_v10, %v3726_v13  ;;  %8726 = vmatmul.msk.f32.gmra.mxu0 %vm2065_vm9, %v2039_v8 }
 0x1d2   : > { %v3728_v55 = vsel %vm14321_vm13, %v3477_v23, %v3727_v21  ;;  %1479 = vrot.lane.b32.xlu0 %v10422_v45, %s14338_s21  ;;  %v10438_v24 = vpop.permute.xlu2 %1217 }
 0x1d3   : > { %v960_v28 = vpop.permute.xlu1 %959  ;;  %v3729_v1 = vsel %vm14314_vm14, %v3480_v5, %v3728_v55  ;;  %v832_v38 = vpop.permute.xlu0 %831 }
 0x1d4   : > { %3782 = vst.msk [vmem:[#allocation2 + $0x21] sm:$0xff] %vm3432_vm11, %v3729_v1  ;;  %v1809_v34 = vsel %vm14326_vm1, %v494_v31, %v832_v38  ;;  %v10523_v38 = vld [vmem:[%s9564_s18 + $0x120] sm:$0xff] }
 0x1d5   : > { %v1842_v43 = vsel %vm1826_vm2, %v1809_v34, %v960_v28 }
 0x1d6   : > { %v1875_v47 = vsel %vm1859_vm3, %v1842_v43, %v10346_v60 }
 0x1d8   : > { %1745 = vrot.lane.b32.xlu2 %v10447_v54, %s14341_s28 }
 0x1d9   : > { %1735 = vrot.lane.b32.xlu1 %v10443_v16, %s14341_s28 }
 0x1da   : > { %1617 = vrot.lane.b32.xlu0 %v10450_v14, %s14344_s20  ;;  %v10459_v39 = vpop.permute.xlu2 %1601 }
 0x1db   : > { %v1344_v57 = vpop.permute.xlu1 %1343  ;;  %v1216_v46 = vpop.permute.xlu0 %1215  ;;  %v3854_v6 = vld [vmem:[#allocation2 + $0x22] sm:$0xff] }
 0x1dc   : > { %8744 = vmatmul.msk.f32.vlgmr.msra.gmra.mxu2 %vm3432_vm11, %v3854_v6  ;;  %v1908_v27 = vsel %vm1892_vm4, %v1875_v47, %v1216_v46  ;;  %v10527_v46 = vld [vmem:[%s9564_s18 + $0x158] sm:$0xff]  ;;  %v10530_v6 = vld [vmem:[%s9564_s18 + $0x142] sm:$0xff] }
 0x1dd   : > { %v1941_v22 = vsel %vm1925_vm5, %v1908_v27, %v1344_v57 }
 0x1de   : > { %v1974_v59 = vsel %vm1958_vm6, %v1941_v22, %v10378_v0  ;;  %v495_v0 = vld [vmem:[%s9564_s18 + $0xc0] sm:$0xff] }
 0x1df   : > { %v1810_v3 = vsel %vm14326_vm1, %v495_v0, %v10402_v33 }
 0x1e0   : > { %969 = vrot.lane.b32.xlu2 %v10215_v18, %s14345_s19  ;;  %v2208_v18 = vadd.f32 %v10483_v26, %v2207_v50 }
 0x1e1   : > { %851 = vrot.lane.b32.xlu1 %v10466_v37, %s14340_s22 }
 0x1e2   : > { %841 = vrot.lane.b32.xlu0 %v10203_v44, %s14340_s22  ;;  %v10475_v15 = vpop.permute.xlu2 %963  ;;  %v8544_v44 = vld [vmem:[%s9564_s18 + $0x140] sm:$0xff]  ;;  %v2287_v32 = vmax.f32 %v2208_v18, 0.0 }
 0x1e3   : > { %v1728_v60 = vpop.permute.xlu1 %1727  ;;  %v1600_v40 = vpop.permute.xlu0 %1599 }
 0x1e4   : > { %v2007_v52 = vsel %vm1991_vm7, %v1974_v59, %v1600_v40  ;;  %v2367_v2 = vrot.slane %v2287_v32, 2  ;;  %v2368_v49 = vrot.slane %v2287_v32, 4  ;;  %v2369_v7 = vrot.slane %v2287_v32, 6  ;;  %v2210_v19 = vpop.f32.mrf.mxu0 }
 0x1e5   : > { %v2040_v42 = vsel %vm2024_vm8, %v2007_v52, %v1728_v60  ;;  %v2211_v13 = vadd.f32 %v10483_v26, %v2210_v19 }
 0x1e6   : > { %8727 = vmatmul.msk.f32.gmra.mxu0 %vm2065_vm9, %v2040_v42  ;;  %v2767_v10 = vsel %vm14313_vm10, %v2367_v2, -inf  ;;  %v2774_v23 = vsel %vm14313_vm10, %v2368_v49, -inf  ;;  %v2781_v5 = vsel %vm14313_vm10, %v2369_v7, -inf  ;;  %v496_v49 = vld [vmem:[%s9564_s18 + $0xc8] sm:$0xff] }
 0x1e7   : > { %v2768_v8 = vrot.slane %v2767_v10, 4  ;;  %v2775_v28 = vrot.slane %v2774_v23, 4  ;;  %v2782_v34 = vrot.slane %v2781_v5, 4  ;;  %v2288_v43 = vmax.f32 %v2211_v13, 0.0 }
 0x1e8   : > { %1107 = vrot.lane.b32.xlu2 %v8544_v44, %s14337_s27 }
 0x1e9   : > { %1097 = vrot.lane.b32.xlu1 %v10283_v29, %s14337_s27  ;;  %v2760_v29 = vsel %vm14313_vm10, %v2287_v32, -inf  ;;  %v2769_v47 = vmax.f32 %v2767_v10, %v2768_v8  ;;  %v2776_v27 = vmax.f32 %v2774_v23, %v2775_v28  ;;  %v2783_v50 = vmax.f32 %v2781_v5, %v2782_v34 }
 0x1ea   : > { %979 = vrot.lane.b32.xlu0 %v10490_v35, %s14345_s19  ;;  %v10498_v30 = vpop.permute.xlu2 %1347  ;;  %v2761_v33 = vrot.slane %v2760_v29, 4  ;;  %v2370_v60 = vrot.slane %v2288_v43, 2  ;;  %v2788_v40 = vsel %vm14313_vm10, %v2288_v43, -inf  ;;  %v2371_v0 = vrot.slane %v2288_v43, 4 }
 0x1eb   : > { %v1090_v36 = vpop.permute.xlu1 %1089  ;;  %v962_v17 = vpop.permute.xlu0 %961  ;;  %v2770_v44 = vrot.slane %v2769_v47, 2  ;;  %v2372_v10 = vrot.slane %v2288_v43, 6 }
 0x1ec   : > { %v1843_v56 = vsel %vm1826_vm2, %v1810_v3, %v962_v17  ;;  %v2762_v31 = vmax.f32 %v2760_v29, %v2761_v33  ;;  %v2777_v3 = vrot.slane %v2776_v27, 2  ;;  %v2789_v17 = vrot.slane %v2788_v40, 4  ;;  %v10548_v29 = vld [vmem:[%s9564_s18 + $0x159] sm:$0xff] }
 0x1ed   : > { %v1876_v20 = vsel %vm1859_vm3, %v1843_v56, %v1090_v36  ;;  %v2784_v56 = vrot.slane %v2783_v50, 2  ;;  %v2795_v33 = vsel %vm14313_vm10, %v2370_v60, -inf  ;;  %v2802_v5 = vsel %vm14313_vm10, %v2371_v0, -inf }
 0x1ee   : > { %v1909_v1 = vsel %vm1892_vm4, %v1876_v20, %v10438_v24  ;;  %v2763_v24 = vrot.slane %v2762_v31, 2  ;;  %v2790_v28 = vmax.f32 %v2788_v40, %v2789_v17  ;;  %v2796_v43 = vrot.slane %v2795_v33, 4 }
 0x1ef   : > { %v2778_v60 = vmax.f32 %v2776_v27, %v2777_v3 }
 0x1f0   : > { %1353 = vrot.lane.b32.xlu2 %v10304_v11, %s14339_s26  ;;  %v2764_v19 = vmax.f32 %v2762_v31, %v2763_v24 }
 0x1f1   : > { %1235 = vrot.lane.b32.xlu1 %v10503_v9, %s14342_s15 }
 0x1f2   : > { %1225 = vrot.lane.b32.xlu0 %v10309_v25, %s14342_s15  ;;  %v10518_v21 = vpop.permute.xlu2 %1731  ;;  %v2765_v17 = vrot.slane %v2764_v19, 1 }
 0x1f3   : > { %v1474_v48 = vpop.permute.xlu1 %1473  ;;  %v1346_v55 = vpop.permute.xlu0 %1345 }
 0x1f4   : > { %v1942_v57 = vsel %vm1925_vm5, %v1909_v1, %v1346_v55 }
 0x1f5   : > { %v1975_v22 = vsel %vm1958_vm6, %v1942_v57, %v1474_v48  ;;  %v2771_v48 = vmax.f32 %v2769_v47, %v2770_v44  ;;  %v2809_v57 = vsel %vm14313_vm10, %v2372_v10, -inf  ;;  %v2785_v44 = vmax.f32 %v2783_v50, %v2784_v56 }
 0x1f6   : > { %v2008_v36 = vsel %vm1991_vm7, %v1975_v22, %v10459_v39 }
 0x1f8   : > { %1491 = vrot.lane.b32.xlu2 %v10527_v46, %s14338_s21 }
 0x1f9   : > { %1481 = vrot.lane.b32.xlu1 %v10523_v38, %s14338_s21 }
 0x1fa   : > { %1363 = vrot.lane.b32.xlu0 %v10530_v6, %s14339_s26  ;;  %v2213_v59 = vpop.f32.mrf.mxu0  ;;  %v10541_v42 = vpop.permute.xlu2 %1093 }
 0x1fb   : > { %v836_v52 = vpop.permute.xlu1 %835  ;;  %v2214_v18 = vadd.f32 %v10483_v26, %v2213_v59  ;;  %v1730_v32 = vpop.permute.xlu0 %1729 }
 0x1fc   : > { %v2041_v7 = vsel %vm2024_vm8, %v2008_v36, %v1730_v32  ;;  %v1811_v55 = vsel %vm14326_vm1, %v496_v49, %v836_v52  ;;  %v2810_v49 = vrot.slane %v2809_v57, 4 }
 0x1fd   : > { %v2289_v2 = vmax.f32 %v2214_v18, 0.0  ;;  %8728 = vmatmul.msk.f32.gmra.mxu0 %vm2065_vm9, %v2041_v7  ;;  %v1844_v18 = vsel %vm1826_vm2, %v1811_v55, %v10475_v15  ;;  %v2772_v7 = vrot.slane %v2771_v48, 1  ;;  %v2779_v15 = vrot.slane %v2778_v60, 1 }
 0x1ff   : > { %v2373_v23 = vrot.slane %v2289_v2, 2  ;;  %v2374_v13 = vrot.slane %v2289_v2, 4  ;;  %v2375_v20 = vrot.slane %v2289_v2, 6  ;;  %v2816_v39 = vsel %vm14313_vm10, %v2289_v2, -inf }
 0x200   : > { %v2817_v8 = vrot.slane %v2816_v39, 4  ;;  %1737 = vrot.lane.b32.xlu2 %v10324_v53, %s14341_s28  ;;  %v2803_v53 = vrot.slane %v2802_v5, 4  ;;  %v2791_v2 = vrot.slane %v2790_v28, 2 }
 0x201   : > { %1619 = vrot.lane.b32.xlu1 %v10548_v29, %s14344_s20  ;;  %v2823_v1 = vsel %vm14313_vm10, %v2373_v23, -inf  ;;  %v2830_v31 = vsel %vm14313_vm10, %v2374_v13, -inf  ;;  %v2837_v34 = vsel %vm14313_vm10, %v2375_v20, -inf  ;;  %v10571_v20 = vld [vmem:[%s9564_s18 + $0x15a] sm:$0xff] }
 0x202   : > { %v2824_v47 = vrot.slane %v2823_v1, 4  ;;  %v2831_v22 = vrot.slane %v2830_v31, 4  ;;  %1609 = vrot.lane.b32.xlu0 %v10327_v62, %s14344_s20  ;;  %v2818_v40 = vmax.f32 %v2816_v39, %v2817_v8  ;;  %v2838_v59 = vrot.slane %v2837_v34, 4  ;;  %v10565_v52 = vpop.permute.xlu2 %1477 }
 0x203   : > { %v1220_v24 = vpop.permute.xlu1 %1219  ;;  %v1092_v36 = vpop.permute.xlu0 %1091  ;;  %v2797_v62 = vmax.f32 %v2795_v33, %v2796_v43  ;;  %v2786_v39 = vrot.slane %v2785_v44, 1  ;;  %v2804_v50 = vmax.f32 %v2802_v5, %v2803_v53  ;;  %v2792_v56 = vmax.f32 %v2790_v28, %v2791_v2 }
 0x204   : > { %v2825_v0 = vmax.f32 %v2823_v1, %v2824_v47  ;;  %v2832_v32 = vmax.f32 %v2830_v31, %v2831_v22  ;;  %v1877_v27 = vsel %vm1859_vm3, %v1844_v18, %v1092_v36  ;;  %v2819_v3 = vrot.slane %v2818_v40, 2 }
 0x205   : > { %v2839_v13 = vmax.f32 %v2837_v34, %v2838_v59  ;;  %v2811_v8 = vmax.f32 %v2809_v57, %v2810_v49  ;;  %v1910_v1 = vsel %vm1892_vm4, %v1877_v27, %v1220_v24  ;;  %v2766_v33 = vmax.f32 %v2764_v19, %v2765_v17 }
 0x206   : > { %v2826_v10 = vrot.slane %v2825_v0, 2  ;;  %v2833_v23 = vrot.slane %v2832_v32, 2  ;;  %v2773_v31 = vmax.f32 %v2771_v48, %v2772_v7  ;;  %v2798_v43 = vrot.slane %v2797_v62, 2 }
 0x207   : > { %v2820_v47 = vmax.f32 %v2818_v40, %v2819_v3  ;;  %v2840_v22 = vrot.slane %v2839_v13, 2  ;;  %v2787_v28 = vmax.f32 %v2785_v44, %v2786_v39  ;;  %v2805_v57 = vrot.slane %v2804_v50, 2 }
 0x208   : > { %v2827_v55 = vmax.f32 %v2825_v0, %v2826_v10  ;;  %853 = vrot.lane.b32.xlu2 %v10390_v41, %s14340_s22  ;;  %v2834_v5 = vmax.f32 %v2832_v32, %v2833_v23  ;;  %v1943_v24 = vsel %vm1925_vm5, %v1910_v1, %v10498_v30  ;;  %v2793_v41 = vrot.slane %v2792_v56, 1 }
 0x209   : > { %843 = vrot.lane.b32.xlu1 %v10244_v58, %s14340_s22  ;;  %v2780_v58 = vmax.f32 %v2778_v60, %v2779_v15  ;;  %v2812_v19 = vrot.slane %v2811_v8, 2  ;;  %v10586_v36 = vsel %vm3432_vm11, %v2766_v33, -inf  ;;  %v10589_v40 = vsel %vm3432_vm11, %v2773_v31, -inf }
 0x20a   : > { %1747 = vrot.lane.b32.xlu0 %v10571_v20, %s14341_s28  ;;  %v10580_v59 = vpop.permute.xlu2 %839  ;;  %v2828_v48 = vrot.slane %v2827_v55, 1  ;;  %v2799_v32 = vmax.f32 %v2797_v62, %v2798_v43  ;;  %v2821_v44 = vrot.slane %v2820_v47, 1  ;;  %v2835_v17 = vrot.slane %v2834_v5, 1 }
 0x20b   : > { %v1604_v34 = vpop.permute.xlu1 %1603  ;;  %v1476_v18 = vpop.permute.xlu0 %1475  ;;  %v2841_v2 = vmax.f32 %v2839_v13, %v2840_v22  ;;  %v10594_v49 = vsel %vm3432_vm11, %v2780_v58, -inf  ;;  %v2806_v7 = vmax.f32 %v2804_v50, %v2805_v57  ;;  %v10601_v62 = vsel %vm3432_vm11, %v2787_v28, -inf }
 0x20c   : > { %v1976_v53 = vsel %vm1958_vm6, %v1943_v24, %v1476_v18  ;;  %v2216_v0 = vpop.f32.mrf.mxu0  ;;  %v10603_v3 = vmax.f32 %v2792_v56, %v2793_v41  ;;  %v10605_v23 = vmax.f32 %v2811_v8, %v2812_v19  ;;  %v2829_v13 = vmax.f32 %v2827_v55, %v2828_v48  ;;  %v497_v55 = vld [vmem:[%s9564_s18 + $0xd8] sm:$0xff] }
 0x20d   : > { %v2217_v60 = vadd.f32 %v10483_v26, %v2216_v0  ;;  %v2009_v30 = vsel %vm1991_vm7, %v1976_v53, %v1604_v34  ;;  %v2800_v15 = vrot.slane %v2799_v32, 1  ;;  %v2822_v1 = vmax.f32 %v2820_v47, %v2821_v44 }
 0x20e   : > { %v2042_v27 = vsel %vm2024_vm8, %v2009_v30, %v10518_v21  ;;  %v2836_v56 = vmax.f32 %v2834_v5, %v2835_v17  ;;  %v2842_v33 = vrot.slane %v2841_v2, 1  ;;  %v3485_v28 = vsel %vm3432_vm11, %v2829_v13, -inf }
 0x20f   : > { %v2290_v10 = vmax.f32 %v2217_v60, 0.0  ;;  %8729 = vmatmul.msk.f32.gmra.mxu0 %vm2065_vm9, %v2042_v27  ;;  %v2807_v5 = vrot.slane %v2806_v7, 1  ;;  %v2814_v18 = vrot.slane %v10605_v23, 1  ;;  %v3482_v19 = vsel %vm3432_vm11, %v2822_v1, -inf }
 0x210   : > { %1099 = vrot.lane.b32.xlu2 %v10422_v45, %s14337_s27  ;;  %v2843_v60 = vmax.f32 %v2841_v2, %v2842_v33  ;;  %v3486_v44 = vmax.f32 %v10589_v40, %v3485_v28  ;;  %v3488_v17 = vsel %vm3432_vm11, %v2836_v56, -inf  ;;  %v3483_v2 = vmax.f32 %v10586_v36, %v3482_v19 }
 0x211   : > { %981 = vrot.lane.b32.xlu1 %v10383_v12, %s14345_s19  ;;  %v2376_v39 = vrot.slane %v2290_v10, 2  ;;  %v2377_v21 = vrot.slane %v2290_v10, 4  ;;  %v2378_v50 = vrot.slane %v2290_v10, 6  ;;  %v2844_v8 = vsel %vm14313_vm10, %v2290_v10, -inf }
 0x212   : > { %971 = vrot.lane.b32.xlu0 %v10248_v4, %s14345_s19  ;;  %v10613_v31 = vpop.permute.xlu2 %977  ;;  %v2845_v43 = vrot.slane %v2844_v8, 4  ;;  %v3489_v56 = vmax.f32 %v10594_v49, %v3488_v17 }
 0x213   : > { %v966_v12 = vpop.permute.xlu1 %965  ;;  %v2851_v34 = vsel %vm14313_vm10, %v2376_v39, -inf  ;;  %v2858_v45 = vsel %vm14313_vm10, %v2377_v21, -inf  ;;  %v2865_v22 = vsel %vm14313_vm10, %v2378_v50, -inf  ;;  %v838_v58 = vpop.permute.xlu0 %837  ;;  %v2801_v21 = vmax.f32 %v2799_v32, %v2800_v15 }
 0x214   : > { %v2852_v4 = vrot.slane %v2851_v34, 4  ;;  %v2859_v57 = vrot.slane %v2858_v45, 4  ;;  %v2866_v47 = vrot.slane %v2865_v22, 4  ;;  %v2846_v24 = vmax.f32 %v2844_v8, %v2845_v43 }
 0x215   : > { %v1812_v41 = vsel %vm14326_vm1, %v497_v55, %v838_v58  ;;  %v2808_v50 = vmax.f32 %v2806_v7, %v2807_v5  ;;  %v3730_v32 = vsel %vm14348_vm12, %v3486_v44, %v3483_v2  ;;  %v3493_v58 = vsel %vm3432_vm11, %v10603_v3, -inf }
 0x216   : > { %v2853_v48 = vmax.f32 %v2851_v34, %v2852_v4  ;;  %v2860_v53 = vmax.f32 %v2858_v45, %v2859_v57  ;;  %v2867_v0 = vmax.f32 %v2865_v22, %v2866_v47  ;;  %v2847_v30 = vrot.slane %v2846_v24, 2  ;;  %v10646_v57 = vld [vmem:[%s9564_s18 + $0x128] sm:$0xff] }
 0x217   : > { %v1845_v39 = vsel %vm1826_vm2, %v1812_v41, %v966_v12  ;;  %v3491_v12 = vsel %vm3432_vm11, %v2843_v60, -inf  ;;  %v2815_v22 = vmax.f32 %v10605_v23, %v2814_v18  ;;  %v3496_v28 = vsel %vm3432_vm11, %v2801_v21, -inf }
 0x218   : > { %v2854_v10 = vrot.slane %v2853_v48, 2  ;;  %v2861_v27 = vrot.slane %v2860_v53, 2  ;;  %v2868_v13 = vrot.slane %v2867_v0, 2  ;;  %1237 = vrot.lane.b32.xlu2 %v10450_v14, %s14342_s15  ;;  %v2848_v1 = vmax.f32 %v2846_v24, %v2847_v30 }
 0x219   : > { %1227 = vrot.lane.b32.xlu1 %v10418_v61, %s14342_s15  ;;  %v1878_v36 = vsel %vm1859_vm3, %v1845_v39, %v10541_v42  ;;  %vm14349_vm12 = vcmask 1042434   ;;  %v3499_v41 = vsel %vm3432_vm11, %v2808_v50, -inf  ;;  %v3492_v19 = vmax.f32 %v10601_v62, %v3491_v12  ;;  %v10689_v12 = vld [vmem:[%s9564_s18 + $0x16a] sm:$0xff] }
 0x21a   : > { %1109 = vrot.lane.b32.xlu0 %v10411_v63, %s14337_s27  ;;  %v2855_v33 = vmax.f32 %v2853_v48, %v2854_v10  ;;  %v2862_v8 = vmax.f32 %v2860_v53, %v2861_v27  ;;  %v2869_v55 = vmax.f32 %v2867_v0, %v2868_v13  ;;  %v10634_v43 = vpop.permute.xlu2 %1223  ;;  %v2849_v7 = vrot.slane %v2848_v1, 1 }
 0x21b   : > { %v1350_v40 = vpop.permute.xlu1 %1349  ;;  %v1222_v15 = vpop.permute.xlu0 %1221  ;;  %v3731_v47 = vsel %vm14349_vm12, %v3489_v56, %v3730_v32  ;;  %vm14350_vm12 = vcmask 1043459   ;;  %v3502_v17 = vsel %vm3432_vm11, %v2815_v22, -inf  ;;  %v10675_v56 = vld [vmem:[%s9564_s18 + $0x169] sm:$0xff] }
 0x21c   : > { %v2856_v34 = vrot.slane %v2855_v33, 1  ;;  %v2863_v63 = vrot.slane %v2862_v8, 1  ;;  %v2870_v45 = vrot.slane %v2869_v55, 1  ;;  %v1911_v49 = vsel %vm1892_vm4, %v1878_v36, %v1222_v15 }
 0x21d   : > { %v2850_v4 = vmax.f32 %v2848_v1, %v2849_v7  ;;  %v1944_v23 = vsel %vm1925_vm5, %v1911_v49, %v1350_v40  ;;  %v3732_v60 = vsel %vm14350_vm12, %v3492_v19, %v3731_v47  ;;  %vm14351_vm12 = vcmask 1041409  }
 0x21e   : > { %v2857_v5 = vmax.f32 %v2855_v33, %v2856_v34  ;;  %v2864_v24 = vmax.f32 %v2862_v8, %v2863_v63  ;;  %v2871_v42 = vmax.f32 %v2869_v55, %v2870_v45  ;;  %v1977_v21 = vsel %vm1958_vm6, %v1944_v23, %v10565_v52  ;;  %v10680_v33 = vld [vmem:[%s9564_s18 + $0x168] sm:$0xff]  ;;  %v498_v63 = vld [vmem:[%s9564_s18 + $0xe0] sm:$0xff] }
 0x21f   : > { %v3494_v48 = vsel %vm3432_vm11, %v2850_v4, -inf  ;;  %v1813_v22 = vsel %vm14326_vm1, %v498_v63, %v10580_v59 }
 0x220   : > { %v3495_v3 = vmax.f32 %v3493_v58, %v3494_v48  ;;  %v3497_v18 = vsel %vm3432_vm11, %v2857_v5, -inf  ;;  %v3500_v53 = vsel %vm3432_vm11, %v2864_v24, -inf  ;;  %v3503_v0 = vsel %vm3432_vm11, %v2871_v42, -inf  ;;  %1483 = vrot.lane.b32.xlu2 %v10646_v57, %s14338_s21  ;;  %v8573_v58 = vld [vmem:[%s9564_s18 + $0x121] sm:$0xff] }
 0x221   : > { %1365 = vrot.lane.b32.xlu1 %v10447_v54, %s14339_s26  ;;  %v3498_v62 = vmax.f32 %v3496_v28, %v3497_v18  ;;  %v3501_v44 = vmax.f32 %v3499_v41, %v3500_v53  ;;  %v3504_v27 = vmax.f32 %v3502_v17, %v3503_v0  ;;  %v8605_v41 = vld [vmem:[%s9564_s18 + $0x122] sm:$0xff] }
 0x222   : > { %1355 = vrot.lane.b32.xlu0 %v10443_v16, %s14339_s26  ;;  %v3733_v30 = vsel %vm14323_vm15, %v3495_v3, %v3732_v60  ;;  %v10665_v10 = vpop.permute.xlu2 %1361 }
 0x223   : > { %v1734_v54 = vpop.permute.xlu1 %1733  ;;  %v3734_v13 = vsel %vm14322_vm0, %v3498_v62, %v3733_v30  ;;  %v1606_v39 = vpop.permute.xlu0 %1605 }
 0x224   : > { %v3735_v50 = vsel %vm14321_vm13, %v3501_v44, %v3734_v13  ;;  %v2010_v2 = vsel %vm1991_vm7, %v1977_v21, %v1606_v39  ;;  %v2219_v36 = vpop.f32.mrf.mxu0 }
 0x225   : > { %v3736_v1 = vsel %vm14314_vm14, %v3504_v27, %v3735_v50  ;;  %v2043_v40 = vsel %vm2024_vm8, %v2010_v2, %v1734_v54 }
 0x226   : > { %3783 = vst.msk [vmem:[#allocation2 + $0x31] sm:$0xff] %vm3432_vm11, %v3736_v1  ;;  %8730 = vmatmul.msk.f32.gmra.mxu0 %vm2065_vm9, %v2043_v40 }
 0x228   : > { %1621 = vrot.lane.b32.xlu2 %v10675_v56, %s14344_s20 }
 0x229   : > { %1611 = vrot.lane.b32.xlu1 %v10466_v37, %s14344_s20 }
 0x22a   : > { %1493 = vrot.lane.b32.xlu0 %v10680_v33, %s14338_s21  ;;  %v1608_v8 = vpop.permute.xlu2 %1607 }
 0x22b   : > { %v968_v52 = vpop.permute.xlu1 %967  ;;  %v850_v55 = vpop.permute.xlu0 %849 }
 0x22c   : > { %v1818_v4 = vsel %vm14326_vm1, %v10523_v38, %v850_v55 }
 0x22d   : > { %v3855_v32 = vld [vmem:[#allocation2 + $0x32] sm:$0xff]  ;;  %v1851_v48 = vsel %vm1826_vm2, %v1818_v4, %v10613_v31 }
 0x22e   : > { %8745 = vmatmul.msk.f32.gmra.mxu2 %vm3432_vm11, %v3855_v32  ;;  %v8669_v32 = vld [vmem:[%s9564_s18 + $0x139] sm:$0xff] }
 0x230   : > { %845 = vrot.lane.b32.xlu2 %v10309_v25, %s14340_s22  ;;  %v2220_v25 = vadd.f32 %v10483_v26, %v2219_v36 }
 0x231   : > { %1749 = vrot.lane.b32.xlu1 %v10689_v12, %s14341_s28 }
 0x232   : > { %1739 = vrot.lane.b32.xlu0 %v10490_v35, %s14341_s28  ;;  %v1746_v7 = vpop.permute.xlu2 %1745 }
 0x233   : > { %v1106_v37 = vpop.permute.xlu1 %1105  ;;  %v1096_v15 = vpop.permute.xlu0 %1095 }
 0x234   : > { %v1884_v18 = vsel %vm1859_vm3, %v1851_v48, %v1106_v37 }
 0x238   : > { %983 = vrot.lane.b32.xlu2 %v10530_v6, %s14345_s19  ;;  %v1846_v6 = vsel %vm1826_vm2, %v1813_v22, %v968_v52  ;;  %v10751_v52 = vld [vmem:[%s9564_s18 + $0x170] sm:$0xff] }
 0x239   : > { %973 = vrot.lane.b32.xlu1 %v10304_v11, %s14345_s19  ;;  %v2291_v11 = vmax.f32 %v2220_v25, 0.0  ;;  %v10758_v25 = vld [vmem:[%s9564_s18 + $0x138] sm:$0xff] }
 0x23a   : > { %855 = vrot.lane.b32.xlu0 %v10503_v9, %s14340_s22  ;;  %v10705_v45 = vpop.permute.xlu2 %969  ;;  %v1879_v9 = vsel %vm1859_vm3, %v1846_v6, %v1096_v15  ;;  %v2222_v59 = vpop.f32.mrf.mxu0 }
 0x23b   : > { %v1352_v34 = vpop.permute.xlu1 %1351  ;;  %v1234_v49 = vpop.permute.xlu0 %1233  ;;  %v2379_v5 = vrot.slane %v2291_v11, 2  ;;  %v2380_v24 = vrot.slane %v2291_v11, 4  ;;  %v2381_v19 = vrot.slane %v2291_v11, 6  ;;  %v2223_v23 = vadd.f32 %v10483_v26, %v2222_v59 }
 0x23d   : > { %v2879_v0 = vsel %vm14313_vm10, %v2379_v5, -inf  ;;  %v2886_v60 = vsel %vm14313_vm10, %v2380_v24, -inf  ;;  %v2893_v62 = vsel %vm14313_vm10, %v2381_v19, -inf  ;;  %v2292_v44 = vmax.f32 %v2223_v23, 0.0 }
 0x23e   : > { %v2880_v30 = vrot.slane %v2879_v0, 4  ;;  %v2887_v27 = vrot.slane %v2886_v60, 4  ;;  %v2894_v1 = vrot.slane %v2893_v62, 4 }
 0x23f   : > { %v2900_v55 = vsel %vm14313_vm10, %v2292_v44, -inf  ;;  %v2382_v36 = vrot.slane %v2292_v44, 2 }
 0x240   : > { %1229 = vrot.lane.b32.xlu2 %v8573_v58, %s14342_s15  ;;  %v2881_v37 = vmax.f32 %v2879_v0, %v2880_v30  ;;  %v2888_v15 = vmax.f32 %v2886_v60, %v2887_v27  ;;  %v2895_v22 = vmax.f32 %v2893_v62, %v2894_v1  ;;  %v2384_v58 = vrot.slane %v2292_v44, 6  ;;  %v10781_v62 = vld [vmem:[%s9564_s18 + $0x172] sm:$0xff] }
 0x241   : > { %1111 = vrot.lane.b32.xlu1 %v10527_v46, %s14337_s27  ;;  %v1912_v46 = vsel %vm1892_vm4, %v1879_v9, %v10634_v43  ;;  %v1917_v43 = vsel %vm1892_vm4, %v1884_v18, %v1234_v49  ;;  %v2907_v59 = vsel %vm14313_vm10, %v2382_v36, -inf  ;;  %v10784_v27 = vld [vmem:[%s9564_s18 + $0x171] sm:$0xff] }
 0x242   : > { %1101 = vrot.lane.b32.xlu0 %v10523_v38, %s14337_s27  ;;  %v10720_v47 = vpop.permute.xlu2 %1107  ;;  %v1945_v3 = vsel %vm1925_vm5, %v1912_v46, %v1352_v34  ;;  %v2872_v38 = vsel %vm14313_vm10, %v2291_v11, -inf  ;;  %v1950_v13 = vsel %vm1925_vm5, %v1917_v43, %v10665_v10  ;;  %v2383_v34 = vrot.slane %v2292_v44, 4 }
 0x243   : > { %v1490_v28 = vpop.permute.xlu1 %1489  ;;  %v2873_v31 = vrot.slane %v2872_v38, 4  ;;  %v2901_v11 = vrot.slane %v2900_v55, 4  ;;  %v2889_v4 = vrot.slane %v2888_v15, 2  ;;  %v2896_v23 = vrot.slane %v2895_v22, 2 }
 0x244   : > { %v1480_v42 = vpop.permute.xlu0 %1479  ;;  %v1983_v50 = vsel %vm1958_vm6, %v1950_v13, %v1490_v28  ;;  %v2882_v28 = vrot.slane %v2881_v37, 2  ;;  %v2914_v5 = vsel %vm14313_vm10, %v2383_v34, -inf  ;;  %v2908_v0 = vrot.slane %v2907_v59, 4 }
 0x245   : > { %v1978_v53 = vsel %vm1958_vm6, %v1945_v3, %v1480_v42  ;;  %v2902_v3 = vmax.f32 %v2900_v55, %v2901_v11  ;;  %v2915_v44 = vrot.slane %v2914_v5, 4  ;;  %v2890_v55 = vmax.f32 %v2888_v15, %v2889_v4 }
 0x246   : > { %v2011_v17 = vsel %vm1991_vm7, %v1978_v53, %v1608_v8  ;;  %v2874_v8 = vmax.f32 %v2872_v38, %v2873_v31  ;;  %v2921_v38 = vsel %vm14313_vm10, %v2384_v58, -inf  ;;  %v8701_v53 = vld [vmem:[%s9564_s18 + $0x13a] sm:$0xff] }
 0x247   : > { %v2922_v13 = vrot.slane %v2921_v38, 4  ;;  %v2891_v4 = vrot.slane %v2890_v55, 1 }
 0x248   : > { %1367 = vrot.lane.b32.xlu2 %v10571_v20, %s14339_s26 }
 0x249   : > { %1357 = vrot.lane.b32.xlu1 %v8605_v41, %s14339_s26 }
 0x24a   : > { %1239 = vrot.lane.b32.xlu0 %v10548_v29, %s14342_s15  ;;  %v10744_v39 = vpop.permute.xlu2 %1353 }
 0x24b   : > { %v1736_v54 = vpop.permute.xlu1 %1735 }
 0x24c   : > { %v2044_v21 = vsel %vm2024_vm8, %v2011_v17, %v1736_v54  ;;  %v1618_v2 = vpop.permute.xlu0 %1617 }
 0x24d   : > { %8731 = vmatmul.msk.f32.gmra.mxu0 %vm2065_vm9, %v2044_v21  ;;  %v2016_v40 = vsel %vm1991_vm7, %v1983_v50, %v1618_v2  ;;  %v2883_v2 = vmax.f32 %v2881_v37, %v2882_v28  ;;  %v2923_v37 = vmax.f32 %v2921_v38, %v2922_v13 }
 0x24e   : > { %v2049_v10 = vsel %vm2024_vm8, %v2016_v40, %v1746_v7  ;;  %v2225_v63 = vpop.f32.mrf.mxu0  ;;  %v2875_v7 = vrot.slane %v2874_v8, 2 }
 0x24f   : > { %8736 = vmatmul.msk.f32.vlgmr.msra.gmra.mxu1 %vm2065_vm9, %v2049_v10  ;;  %v2226_v49 = vadd.f32 %v10483_v26, %v2225_v63  ;;  %v2897_v10 = vmax.f32 %v2895_v22, %v2896_v23  ;;  %v2909_v63 = vmax.f32 %v2907_v59, %v2908_v0  ;;  %v2884_v15 = vrot.slane %v2883_v2, 1 }
 0x250   : > { %1613 = vrot.lane.b32.xlu2 %v8669_v32, %s14344_s20  ;;  %v2876_v50 = vmax.f32 %v2874_v8, %v2875_v7  ;;  %v2903_v32 = vrot.slane %v2902_v3, 2 }
 0x251   : > { %1495 = vrot.lane.b32.xlu1 %v10751_v52, %s14338_s21  ;;  %v2293_v6 = vmax.f32 %v2226_v49, 0.0  ;;  %v2916_v49 = vmax.f32 %v2914_v5, %v2915_v44  ;;  %v2910_v23 = vrot.slane %v2909_v63, 2  ;;  %v2924_v5 = vrot.slane %v2923_v37, 2 }
 0x252   : > { %1485 = vrot.lane.b32.xlu0 %v10758_v25, %s14338_s21  ;;  %v10770_v24 = vpop.permute.xlu2 %1491  ;;  %v2877_v28 = vrot.slane %v2876_v50, 1  ;;  %v2885_v0 = vmax.f32 %v2883_v2, %v2884_v15 }
 0x253   : > { %v10766_v9 = vpop.permute.xlu1 %851  ;;  %v2385_v42 = vrot.slane %v2293_v6, 2  ;;  %v2386_v46 = vrot.slane %v2293_v6, 4  ;;  %v2387_v41 = vrot.slane %v2293_v6, 6  ;;  %v2928_v19 = vsel %vm14313_vm10, %v2293_v6, -inf }
 0x254   : > { %v10773_v48 = vpop.permute.xlu0 %841  ;;  %v2929_v18 = vrot.slane %v2928_v19, 4  ;;  %v2917_v59 = vrot.slane %v2916_v49, 2  ;;  %v2878_v38 = vmax.f32 %v2876_v50, %v2877_v28  ;;  %v2925_v50 = vmax.f32 %v2923_v37, %v2924_v5  ;;  %v571_v28 = vld [vmem:[%s9564_s18 + $0x152] sm:$0xff] }
 0x255   : > { %v2935_v60 = vsel %vm14313_vm10, %v2385_v42, -inf  ;;  %v2942_v43 = vsel %vm14313_vm10, %v2386_v46, -inf  ;;  %v2949_v31 = vsel %vm14313_vm10, %v2387_v41, -inf  ;;  %v2898_v42 = vrot.slane %v2897_v10, 1 }
 0x256   : > { %v2930_v54 = vmax.f32 %v2928_v19, %v2929_v18  ;;  %v2936_v17 = vrot.slane %v2935_v60, 4  ;;  %v2943_v30 = vrot.slane %v2942_v43, 4  ;;  %v2950_v21 = vrot.slane %v2949_v31, 4 }
 0x257   : > { %v2904_v19 = vmax.f32 %v2902_v3, %v2903_v32  ;;  %v2918_v13 = vmax.f32 %v2916_v49, %v2917_v59  ;;  %v2926_v15 = vrot.slane %v2925_v50, 1 }
 0x258   : > { %v2937_v1 = vmax.f32 %v2935_v60, %v2936_v17  ;;  %v2944_v40 = vmax.f32 %v2942_v43, %v2943_v30  ;;  %1751 = vrot.lane.b32.xlu2 %v10781_v62, %s14341_s28  ;;  %v2931_v36 = vrot.slane %v2930_v54, 2  ;;  %v2951_v7 = vmax.f32 %v2949_v31, %v2950_v21 }
 0x259   : > { %1741 = vrot.lane.b32.xlu1 %v8701_v53, %s14341_s28  ;;  %v2892_v60 = vmax.f32 %v2890_v55, %v2891_v4  ;;  %v2899_v43 = vmax.f32 %v2897_v10, %v2898_v42  ;;  %v2905_v17 = vrot.slane %v2904_v19, 1  ;;  %v2911_v30 = vmax.f32 %v2909_v63, %v2910_v23 }
 0x25a   : > { %1623 = vrot.lane.b32.xlu0 %v10784_v27, %s14344_s20  ;;  %v2938_v58 = vrot.slane %v2937_v1, 2  ;;  %v2945_v11 = vrot.slane %v2944_v40, 2  ;;  %v10793_v8 = vpop.permute.xlu2 %1737  ;;  %v2932_v46 = vmax.f32 %v2930_v54, %v2931_v36  ;;  %v2952_v53 = vrot.slane %v2951_v7, 2  ;;  %v499_v54 = vld [vmem:[%s9564_s18 + $0xf0] sm:$0xff] }
 0x25b   : > { %v10791_v34 = vpop.permute.xlu1 %1097  ;;  %v3508_v55 = vsel %vm3432_vm11, %v2885_v0, -inf  ;;  %v10814_v32 = vsel %vm3432_vm11, %v2892_v60, -inf  ;;  %v10817_v36 = vsel %vm3432_vm11, %v2899_v43, -inf  ;;  %v2919_v37 = vrot.slane %v2918_v13, 1 }
 0x25c   : > { %v10795_v6 = vpop.permute.xlu0 %979  ;;  %v2939_v22 = vmax.f32 %v2937_v1, %v2938_v58  ;;  %v2946_v41 = vmax.f32 %v2944_v40, %v2945_v11  ;;  %v2933_v31 = vrot.slane %v2932_v46, 1  ;;  %v3505_v40 = vsel %vm3432_vm11, %v2878_v38, -inf }
 0x25d   : > { %v2906_v58 = vmax.f32 %v2904_v19, %v2905_v17  ;;  %v2912_v11 = vrot.slane %v2911_v30, 1 }
 0x25e   : > { %v2940_v18 = vrot.slane %v2939_v22, 1  ;;  %v2947_v44 = vrot.slane %v2946_v41, 1  ;;  %v2934_v63 = vmax.f32 %v2932_v46, %v2933_v31 }
 0x260   : > { %975 = vrot.lane.b32.xlu2 %v10443_v16, %s14345_s19  ;;  %v2941_v2 = vmax.f32 %v2939_v22, %v2940_v18  ;;  %v2953_v16 = vmax.f32 %v2951_v7, %v2952_v53  ;;  %v2948_v49 = vmax.f32 %v2946_v41, %v2947_v44  ;;  %v3506_v41 = vsel %vm3432_vm11, %v2934_v63, -inf }
 0x261   : > { %857 = vrot.lane.b32.xlu1 %v10450_v14, %s14340_s22  ;;  %v3507_v17 = vmax.f32 %v3505_v40, %v3506_v41 }
 0x262   : > { %847 = vrot.lane.b32.xlu0 %v10418_v61, %s14340_s22  ;;  %v10806_v21 = vpop.permute.xlu2 %853  ;;  %v1814_v61 = vsel %vm14326_vm1, %v499_v54, %v10773_v48  ;;  %v2954_v22 = vrot.slane %v2953_v16, 1  ;;  %v3509_v4 = vsel %vm3432_vm11, %v2941_v2, -inf  ;;  %v3512_v19 = vsel %vm3432_vm11, %v2948_v49, -inf }
 0x263   : > { %v10804_v3 = vpop.permute.xlu1 %1235  ;;  %v2228_v14 = vpop.f32.mrf.mxu0  ;;  %v3510_v18 = vmax.f32 %v3508_v55, %v3509_v4  ;;  %v2913_v49 = vmax.f32 %v2911_v30, %v2912_v11 }
 0x264   : > { %v1226_v1 = vpop.permute.xlu0 %1225  ;;  %v2229_v10 = vadd.f32 %v10483_v26, %v2228_v14  ;;  %v1847_v26 = vsel %vm1826_vm2, %v1814_v61, %v10705_v45  ;;  %v1819_v14 = vsel %vm14326_vm1, %v10646_v57, %v10766_v9 }
 0x265   : > { %v1880_v59 = vsel %vm1859_vm3, %v1847_v26, %v10791_v34  ;;  %v2955_v34 = vmax.f32 %v2953_v16, %v2954_v22  ;;  %v3737_v4 = vsel %vm14351_vm12, %v3510_v18, %v3507_v17  ;;  %v8574_v26 = vld [vmem:[%s9564_s18 + $0x129] sm:$0xff]  ;;  %vm14352_vm12 = vcmask 1042434  }
 0x266   : > { %v2294_v7 = vmax.f32 %v2229_v10, 0.0  ;;  %v1913_v2 = vsel %vm1892_vm4, %v1880_v59, %v1226_v1  ;;  %v1852_v1 = vsel %vm1826_vm2, %v1819_v14, %v10795_v6 }
 0x267   : > { %v3515_v9 = vsel %vm3432_vm11, %v2955_v34, -inf  ;;  %v1946_v30 = vsel %vm1925_vm5, %v1913_v2, %v10744_v39 }
 0x268   : > { %v2388_v48 = vrot.slane %v2294_v7, 2  ;;  %v2389_v42 = vrot.slane %v2294_v7, 4  ;;  %v2390_v23 = vrot.slane %v2294_v7, 6  ;;  %v2956_v46 = vsel %vm14313_vm10, %v2294_v7, -inf  ;;  %1113 = vrot.lane.b32.xlu2 %v10680_v33, %s14337_s27 }
 0x269   : > { %1103 = vrot.lane.b32.xlu1 %v10646_v57, %s14337_s27  ;;  %v2957_v5 = vrot.slane %v2956_v46, 4  ;;  %v2920_v7 = vmax.f32 %v2918_v13, %v2919_v37  ;;  %v2927_v57 = vmax.f32 %v2925_v50, %v2926_v15  ;;  %v3517_v50 = vsel %vm3432_vm11, %v2906_v58, -inf }
 0x26a   : > { %985 = vrot.lane.b32.xlu0 %v571_v28, %s14345_s19  ;;  %v2963_v53 = vsel %vm14313_vm10, %v2388_v48, -inf  ;;  %v2970_v38 = vsel %vm14313_vm10, %v2389_v42, -inf  ;;  %v2977_v0 = vsel %vm14313_vm10, %v2390_v23, -inf  ;;  %v10836_v60 = vpop.permute.xlu2 %1099  ;;  %v3513_v28 = vmax.f32 %v10814_v32, %v3512_v19 }
 0x26b   : > { %v1482_v45 = vpop.permute.xlu1 %1481  ;;  %v2958_v33 = vmax.f32 %v2956_v46, %v2957_v5  ;;  %v2964_v43 = vrot.slane %v2963_v53, 4  ;;  %v2971_v31 = vrot.slane %v2970_v38, 4  ;;  %v2978_v44 = vrot.slane %v2977_v0, 4 }
 0x26c   : > { %v1364_v54 = vpop.permute.xlu0 %1363  ;;  %v3520_v15 = vsel %vm3432_vm11, %v2913_v49, -inf  ;;  %v3738_v23 = vsel %vm14352_vm12, %v3513_v28, %v3737_v4  ;;  %v1979_v6 = vsel %vm1958_vm6, %v1946_v30, %v1482_v45  ;;  %v3523_v5 = vsel %vm3432_vm11, %v2920_v7, -inf }
 0x26d   : > { %v2959_v55 = vrot.slane %v2958_v33, 2  ;;  %v2965_v61 = vmax.f32 %v2963_v53, %v2964_v43  ;;  %v2972_v10 = vmax.f32 %v2970_v38, %v2971_v31  ;;  %v2979_v63 = vmax.f32 %v2977_v0, %v2978_v44  ;;  %v10868_v43 = vld [vmem:[%s9564_s18 + $0x180] sm:$0xff] }
 0x26e   : > { %v3516_v18 = vmax.f32 %v10817_v36, %v3515_v9  ;;  %v1885_v58 = vsel %vm1859_vm3, %v1852_v1, %v10720_v47  ;;  %vm14353_vm12 = vcmask 1043459  }
 0x26f   : > { %v2960_v48 = vmax.f32 %v2958_v33, %v2959_v55  ;;  %v2966_v16 = vrot.slane %v2965_v61, 2  ;;  %v2973_v40 = vrot.slane %v2972_v10, 2  ;;  %v2980_v22 = vrot.slane %v2979_v63, 2  ;;  %v9341_v55 = vld [vmem:[%s9564_s18 + $0x140] sm:$0xff] }
 0x270   : > { %1359 = vrot.lane.b32.xlu2 %v10490_v35, %s14339_s26  ;;  %v3739_v31 = vsel %vm14353_vm12, %v3516_v18, %v3738_v23  ;;  %v1918_v44 = vsel %vm1892_vm4, %v1885_v58, %v10804_v3  ;;  %v500_v23 = vld [vmem:[%s9564_s18 + $0xf8] sm:$0xff]  ;;  %vm14355_vm12 = vcmask 1041409  }
 0x271   : > { %1241 = vrot.lane.b32.xlu1 %v10675_v56, %s14342_s15  ;;  %v2961_v13 = vrot.slane %v2960_v48, 1  ;;  %v2967_v32 = vmax.f32 %v2965_v61, %v2966_v16  ;;  %v2974_v11 = vmax.f32 %v2972_v10, %v2973_v40  ;;  %v2981_v37 = vmax.f32 %v2979_v63, %v2980_v22  ;;  %v10898_v22 = vld [vmem:[%s9564_s18 + $0x181] sm:$0xff] }
 0x272   : > { %1231 = vrot.lane.b32.xlu0 %v8574_v26, %s14342_s15  ;;  %v10859_v39 = vpop.permute.xlu2 %1237  ;;  %v1951_v2 = vsel %vm1925_vm5, %v1918_v44, %v1364_v54 }
 0x273   : > { %v1620_v42 = vpop.permute.xlu1 %1619  ;;  %v2962_v46 = vmax.f32 %v2960_v48, %v2961_v13  ;;  %v2968_v35 = vrot.slane %v2967_v32, 1  ;;  %v2975_v41 = vrot.slane %v2974_v11, 1  ;;  %v2982_v19 = vrot.slane %v2981_v37, 1 }
 0x274   : > { %v1610_v59 = vpop.permute.xlu0 %1609  ;;  %v1984_v7 = vsel %vm1958_vm6, %v1951_v2, %v10770_v24  ;;  %v8670_v24 = vld [vmem:[%s9564_s18 + $0x141] sm:$0xff] }
 0x275   : > { %v2012_v53 = vsel %vm1991_vm7, %v1979_v6, %v1610_v59  ;;  %v2969_v38 = vmax.f32 %v2967_v32, %v2968_v35  ;;  %v2976_v0 = vmax.f32 %v2974_v11, %v2975_v41  ;;  %v2983_v45 = vmax.f32 %v2981_v37, %v2982_v19  ;;  %v8707_v32 = vld [vmem:[%s9564_s18 + $0x182] sm:$0xff]  ;;  %v10936_v35 = vld [vmem:[%s9564_s18 + $0x18a] sm:$0xff] }
 0x276   : > { %v3518_v33 = vsel %vm3432_vm11, %v2962_v46, -inf  ;;  %v2045_v36 = vsel %vm2024_vm8, %v2012_v53, %v10793_v8  ;;  %v3526_v8 = vsel %vm3432_vm11, %v2927_v57, -inf  ;;  %v2017_v26 = vsel %vm1991_vm7, %v1984_v7, %v1620_v42  ;;  %v8702_v57 = vld [vmem:[%s9564_s18 + $0x142] sm:$0xff] }
 0x277   : > { %v3519_v34 = vmax.f32 %v3517_v50, %v3518_v33  ;;  %v3521_v47 = vsel %vm3432_vm11, %v2969_v38, -inf  ;;  %v3524_v17 = vsel %vm3432_vm11, %v2976_v0, -inf  ;;  %v3527_v14 = vsel %vm3432_vm11, %v2983_v45, -inf  ;;  %8732 = vmatmul.msk.f32.gmra.mxu0 %vm2065_vm9, %v2045_v36  ;;  %v10930_v6 = vld [vmem:[%s9564_s18 + $0x189] sm:$0xff] }
 0x278   : > { %v3522_v61 = vmax.f32 %v3520_v15, %v3521_v47  ;;  %v3525_v3 = vmax.f32 %v3523_v5, %v3524_v17  ;;  %1497 = vrot.lane.b32.xlu2 %v10868_v43, %s14338_s21  ;;  %v3528_v63 = vmax.f32 %v3526_v8, %v3527_v14  ;;  %v1820_v46 = vsel %vm14326_vm1, %v10758_v25, %v10806_v21  ;;  %v10939_v41 = vld [vmem:[%s9564_s18 + $0x188] sm:$0xff] }
 0x279   : > { %1487 = vrot.lane.b32.xlu1 %v9341_v55, %s14338_s21  ;;  %v3740_v10 = vsel %vm14323_vm15, %v3519_v34, %v3739_v31  ;;  %v10963_v31 = vld [vmem:[%s14273_s2] ss:$0 sm:$0xff] }
 0x27a   : > { %1369 = vrot.lane.b32.xlu0 %v10689_v12, %s14339_s26  ;;  %v3741_v49 = vsel %vm14322_vm0, %v3522_v61, %v3740_v10  ;;  %v10891_v28 = vpop.permute.xlu2 %1483  ;;  %v2231_v15 = vpop.f32.mrf.mxu0 }
 0x27b   : > { %v844_v54 = vpop.permute.xlu1 %843  ;;  %v3742_v4 = vsel %vm14321_vm13, %v3525_v3, %v3741_v49  ;;  %v2232_v44 = vadd.f32 %v10963_v31, %v2231_v15 }
 0x27c   : > { %v1748_v48 = vpop.permute.xlu0 %1747  ;;  %v3743_v16 = vsel %vm14314_vm14, %v3528_v63, %v3742_v4  ;;  %v1815_v19 = vsel %vm14326_vm1, %v500_v23, %v844_v54 }
 0x27d   : > { %v2050_v40 = vsel %vm2024_vm8, %v2017_v26, %v1748_v48  ;;  %3784 = vst.msk [vmem:[#allocation2 + $0x41] sm:$0xff] %vm3432_vm11, %v3743_v16  ;;  %v2295_v14 = vmax.f32 %v2232_v44, 0.0  ;;  %v8709_v48 = vld [vmem:[%s9564_s18 + $0x19a] sm:$0xff] }
 0x27e   : > { %8737 = vmatmul.msk.f32.gmra.mxu1 %vm2065_vm9, %v2050_v40 }
 0x27f   : > { %v2391_v61 = vrot.slane %v2295_v14, 2  ;;  %v2392_v10 = vrot.slane %v2295_v14, 4  ;;  %v2393_v54 = vrot.slane %v2295_v14, 6  ;;  %v2984_v49 = vsel %vm14313_vm10, %v2295_v14, -inf }
 0x280   : > { %1743 = vrot.lane.b32.xlu2 %v8702_v57, %s14341_s28  ;;  %v2985_v16 = vrot.slane %v2984_v49, 4 }
 0x281   : > { %1625 = vrot.lane.b32.xlu1 %v10898_v22, %s14344_s20  ;;  %v2991_v7 = vsel %vm14313_vm10, %v2391_v61, -inf  ;;  %v2998_v26 = vsel %vm14313_vm10, %v2392_v10, -inf  ;;  %v3005_v57 = vsel %vm14313_vm10, %v2393_v54, -inf  ;;  %v11044_v54 = vld [vmem:[#allocation2 + $0x21] sm:$0xff] }
 0x282   : > { %1615 = vrot.lane.b32.xlu0 %v8670_v24, %s14344_s20  ;;  %v1622_v1 = vpop.permute.xlu2 %1621  ;;  %v2992_v40 = vrot.slane %v2991_v7, 4  ;;  %v2999_v24 = vrot.slane %v2998_v26, 4 }
 0x283   : > { %v982_v9 = vpop.permute.xlu1 %981 }
 0x284   : > { %v972_v30 = vpop.permute.xlu0 %971  ;;  %v10908_v13 = vld [vmem:[#allocation2 + $0x42] sm:$0xff]  ;;  %v3000_v15 = vmax.f32 %v2998_v26, %v2999_v24 }
 0x285   : > { %8746 = vmatmul.msk.f32.gmra.mxu2 %vm3432_vm11, %v10908_v13  ;;  %v1848_v21 = vsel %vm1826_vm2, %v1815_v19, %v972_v30  ;;  %v3006_v30 = vrot.slane %v3005_v57, 4 }
 0x286   : > { %v1881_v38 = vsel %vm1859_vm3, %v1848_v21, %v10836_v60  ;;  %v11015_v21 = vld [vmem:[#allocation2 + $0x2] sm:$0xff] }
 0x288   : > { %987 = vrot.lane.b32.xlu2 %v10571_v20, %s14345_s19 }
 0x289   : > { %859 = vrot.lane.b32.xlu1 %v10548_v29, %s14340_s22 }
 0x28a   : > { %1753 = vrot.lane.b32.xlu0 %v8707_v32, %s14341_s28  ;;  %v10918_v37 = vpop.permute.xlu2 %845 }
 0x28b   : > { %v1228_v11 = vpop.permute.xlu1 %1227 }
 0x28c   : > { %v1110_v42 = vpop.permute.xlu0 %1109  ;;  %v2234_v58 = vpop.f32.mrf.mxu0  ;;  %v1914_v45 = vsel %vm1892_vm4, %v1881_v38, %v1228_v11 }
 0x290   : > { %1371 = vrot.lane.b32.xlu2 %v10781_v62, %s14339_s26 }
 0x291   : > { %1243 = vrot.lane.b32.xlu1 %v10784_v27, %s14342_s15 }
 0x292   : > { %1115 = vrot.lane.b32.xlu0 %v10751_v52, %s14337_s27  ;;  %v10926_v50 = vpop.permute.xlu2 %983  ;;  %v1853_v52 = vsel %vm1826_vm2, %v1820_v46, %v982_v9 }
 0x293   : > { %v1366_v29 = vpop.permute.xlu1 %1365  ;;  %v1886_v59 = vsel %vm1859_vm3, %v1853_v52, %v1110_v42  ;;  %v2986_v42 = vmax.f32 %v2984_v49, %v2985_v16 }
 0x294   : > { %v1356_v20 = vpop.permute.xlu0 %1355  ;;  %v1919_v53 = vsel %vm1892_vm4, %v1886_v59, %v10859_v39  ;;  %v3007_v59 = vmax.f32 %v3005_v57, %v3006_v30  ;;  %v8646_v57 = vld [vmem:[%s9564_s18 + $0x1a0] sm:$0xff] }
 0x295   : > { %v1952_v0 = vsel %vm1925_vm5, %v1919_v53, %v1366_v29  ;;  %v1947_v34 = vsel %vm1925_vm5, %v1914_v45, %v1356_v20  ;;  %v2993_v29 = vmax.f32 %v2991_v7, %v2992_v40  ;;  %v11021_v45 = vld [vmem:[#allocation2 + $0x11] sm:$0xff] }
 0x296   : > { %v1980_v36 = vsel %vm1958_vm6, %v1947_v34, %v10891_v28 }
 0x297   : > { %v2994_v53 = vrot.slane %v2993_v29, 2 }
 0x298   : > { %1755 = vrot.lane.b32.xlu2 %v10936_v35, %s14341_s28 }
 0x299   : > { %1627 = vrot.lane.b32.xlu1 %v10930_v6, %s14344_s20 }
 0x29a   : > { %1499 = vrot.lane.b32.xlu0 %v10939_v41, %s14338_s21  ;;  %v10951_v5 = vpop.permute.xlu2 %1229 }
 0x29b   : > { %v1612_v25 = vpop.permute.xlu1 %1611 }
 0x29c   : > { %v1494_v18 = vpop.permute.xlu0 %1493  ;;  %v2013_v2 = vsel %vm1991_vm7, %v1980_v36, %v1612_v25  ;;  %v3008_v36 = vrot.slane %v3007_v59, 2 }
 0x29d   : > { %v1985_v33 = vsel %vm1958_vm6, %v1952_v0, %v1494_v18  ;;  %v11017_v18 = vld [vmem:[#allocation2 + $0x12] sm:$0xff]  ;;  %v11019_v0 = vld [vmem:[#allocation2 + $0x1] sm:$0xff] }
 0x29e   : > { %v2018_v39 = vsel %vm1991_vm7, %v1985_v33, %v1622_v1  ;;  %v2235_v1 = vadd.f32 %v10963_v31, %v2234_v58  ;;  %v2987_v58 = vrot.slane %v2986_v42, 2  ;;  %v3001_v33 = vrot.slane %v3000_v15, 2 }
 0x2a0   : > { %1117 = vrot.lane.b32.xlu2 %v10868_v43, %s14337_s27  ;;  %v2296_v19 = vmax.f32 %v2235_v1, 0.0 }
 0x2a1   : > { %989 = vrot.lane.b32.xlu1 %v10689_v12, %s14345_s19 }
 0x2a2   : > { %861 = vrot.lane.b32.xlu0 %v10675_v56, %s14340_s22  ;;  %v10976_v47 = vpop.permute.xlu2 %1367  ;;  %v8645_v56 = vld [vmem:[%s9564_s18 + $0x198] sm:$0xff]  ;;  %v3012_v34 = vsel %vm14313_vm10, %v2296_v19, -inf  ;;  %v2395_v61 = vrot.slane %v2296_v19, 4  ;;  %v2396_v49 = vrot.slane %v2296_v19, 6 }
 0x2a3   : > { %v1750_v60 = vpop.permute.xlu1 %1749  ;;  %v2237_v43 = vpop.f32.mrf.mxu0  ;;  %v3013_v7 = vrot.slane %v3012_v34, 4 }
 0x2a4   : > { %v2051_v17 = vsel %vm2024_vm8, %v2018_v39, %v1750_v60  ;;  %v1740_v12 = vpop.permute.xlu0 %1739  ;;  %v2238_v3 = vadd.f32 %v10963_v31, %v2237_v43  ;;  %v8958_v39 = vpack.i.bf16 %v11017_v18, %v11015_v21  ;;  %v11039_v43 = vld [vmem:[#allocation2 + $0x22] sm:$0xff] }
 0x2a5   : > { %8738 = vmatmul.msk.f32.gmra.mxu1 %vm2065_vm9, %v2051_v17  ;;  %v2046_v55 = vsel %vm2024_vm8, %v2013_v2, %v1740_v12  ;;  %v2394_v17 = vrot.slane %v2296_v19, 2  ;;  %v11037_v12 = vld [vmem:[#allocation2 + $0x20] sm:$0xff]  ;;  %v8973_v24 = vpack.i.bf16 %v11039_v43, %v11017_v18 }
 0x2a6   : > { %8733 = vmatmul.msk.f32.gmra.mxu0 %vm2065_vm9, %v2046_v55  ;;  %v2297_v28 = vmax.f32 %v2238_v3, 0.0  ;;  %v2995_v55 = vmax.f32 %v2993_v29, %v2994_v53  ;;  %v506_v53 = vld [vmem:[%s9564_s18 + $0x140] sm:$0xff] }
 0x2a7   : > { %v3019_v30 = vsel %vm14313_vm10, %v2394_v17, -inf }
 0x2a8   : > { %1501 = vrot.lane.b32.xlu2 %v8645_v56, %s14338_s21  ;;  %v2397_v9 = vrot.slane %v2297_v28, 2  ;;  %v3040_v52 = vsel %vm14313_vm10, %v2297_v28, -inf  ;;  %v501_v56 = vld [vmem:[%s9564_s18 + $0x108] sm:$0xff] }
 0x2a9   : > { %1373 = vrot.lane.b32.xlu1 %v8707_v32, %s14339_s26  ;;  %v2398_v32 = vrot.slane %v2297_v28, 4  ;;  %v3041_v44 = vrot.slane %v3040_v52, 4  ;;  %v1816_v1 = vsel %vm14326_vm1, %v501_v56, %v10918_v37  ;;  %v3020_v37 = vrot.slane %v3019_v30, 4 }
 0x2aa   : > { %1245 = vrot.lane.b32.xlu0 %v10898_v22, %s14342_s15  ;;  %v10991_v63 = vpop.permute.xlu2 %1613  ;;  %v8677_v22 = vld [vmem:[%s9564_s18 + $0x199] sm:$0xff]  ;;  %v3047_v23 = vsel %vm14313_vm10, %v2397_v9, -inf  ;;  %v3009_v9 = vmax.f32 %v3007_v59, %v3008_v36  ;;  %v3033_v59 = vsel %vm14313_vm10, %v2396_v49, -inf }
 0x2ab   : > { %v10989_v8 = vpop.permute.xlu1 %973  ;;  %v3054_v25 = vsel %vm14313_vm10, %v2398_v32, -inf  ;;  %v3048_v38 = vrot.slane %v3047_v23, 4  ;;  %v8678_v32 = vld [vmem:[%s9564_s18 + $0x1a1] sm:$0xff] }
 0x2ac   : > { %v10995_v4 = vpop.permute.xlu0 %855  ;;  %v3055_v60 = vrot.slane %v3054_v25, 4 }
 0x2ad   : > { %v3049_v3 = vmax.f32 %v3047_v23, %v3048_v38  ;;  %v3026_v23 = vsel %vm14313_vm10, %v2395_v61, -inf }
 0x2ae   : > { %v3056_v16 = vmax.f32 %v3054_v25, %v3055_v60  ;;  %v3014_v25 = vmax.f32 %v3012_v34, %v3013_v7  ;;  %v3010_v60 = vrot.slane %v3009_v9, 1  ;;  %v3027_v36 = vrot.slane %v3026_v23, 4 }
 0x2af   : > { %v3050_v19 = vrot.slane %v3049_v3, 2 }
 0x2b0   : > { %863 = vrot.lane.b32.xlu2 %v10784_v27, %s14340_s22  ;;  %v2399_v27 = vrot.slane %v2297_v28, 6  ;;  %v3042_v28 = vmax.f32 %v3040_v52, %v3041_v44  ;;  %v11060_v52 = vld [vmem:[#allocation2 + $0x31] sm:$0xff]  ;;  %v3057_v38 = vrot.slane %v3056_v16, 2  ;;  %v1849_v44 = vsel %vm1826_vm2, %v1816_v1, %v10989_v8  ;;  %s14317_s22 = smov 16  }
 0x2b1   : > { %1757 = vrot.lane.b32.xlu1 %v8709_v48, %s14341_s28  ;;  %v11046_v48 = vld [vmem:[#allocation2 + $0x10] sm:$0xff]  ;;  %v11074_v56 = vpack.i.bf16 %v11060_v52, %v11044_v54  ;;  %v3051_v49 = vmax.f32 %v3049_v3, %v3050_v19  ;;  %v1821_v8 = vsel %vm14326_vm1, %v506_v53, %v10995_v4  ;;  %v3028_v3 = vmax.f32 %v3026_v23, %v3027_v36 }
 0x2b2   : > { %1629 = vrot.lane.b32.xlu0 %v8677_v22, %s14344_s20  ;;  %v11008_v20 = vpop.permute.xlu2 %1751  ;;  %v3061_v14 = vsel %vm14313_vm10, %v2399_v27, -inf  ;;  %v1854_v4 = vsel %vm1826_vm2, %v1821_v8, %v10926_v50 }
 0x2b3   : > { %v11006_v11 = vpop.permute.xlu1 %1111  ;;  %v3062_v40 = vrot.slane %v3061_v14, 4 }
 0x2b4   : > { %v11011_v46 = vpop.permute.xlu0 %1101 }
 0x2b5   : > { %v1882_v17 = vsel %vm1859_vm3, %v1849_v44, %v11011_v46  ;;  %v3058_v44 = vmax.f32 %v3056_v16, %v3057_v38  ;;  %v1887_v16 = vsel %vm1859_vm3, %v1854_v4, %v11006_v11 }
 0x2b6   : > { %v1915_v51 = vsel %vm1892_vm4, %v1882_v17, %v10951_v5 }
 0x2b7   : > { %v3059_v11 = vrot.slane %v3058_v44, 1 }
 0x2b8   : > { %1247 = vrot.lane.b32.xlu2 %v10930_v6, %s14342_s15  ;;  %v2988_v6 = vmax.f32 %v2986_v42, %v2987_v58  ;;  %v8968_v42 = vpack.i.bf16 %v11044_v54, %v11021_v45  ;;  %v3043_v58 = vrot.slane %v3042_v28, 2 }
 0x2b9   : > { %1119 = vrot.lane.b32.xlu1 %v10939_v41, %s14337_s27  ;;  %v8953_v41 = vpack.i.bf16 %v11021_v45, %v11019_v0  ;;  %v3060_v17 = vmax.f32 %v3058_v44, %v3059_v11  ;;  %s9426_s27 = smov 48   ;;  %v14354_v45 = vpack.i.bf16 %v11037_v12, %v11046_v48 }
 0x2ba   : > { %991 = vrot.lane.b32.xlu0 %v10781_v62, %s14345_s19  ;;  %v11042_v10 = vpop.permute.xlu2 %975  ;;  %v3002_v62 = vmax.f32 %v3000_v15, %v3001_v33  ;;  %v2989_v29 = vrot.slane %v2988_v6, 1  ;;  %v2996_v15 = vrot.slane %v2995_v55, 1  ;;  %v3063_v33 = vmax.f32 %v3061_v14, %v3062_v40  ;;  %s9427_s19 = smov 112  }
 0x2bb   : > { %v11033_v2 = vpop.permute.xlu1 %1357  ;;  %v3034_v14 = vrot.slane %v3033_v59, 4  ;;  %v3044_v1 = vmax.f32 %v3042_v28, %v3043_v58  ;;  %v3052_v28 = vrot.slane %v3051_v49, 1 }
 0x2bc   : > { %v1240_v26 = vpop.permute.xlu0 %1239  ;;  %v3003_v27 = vrot.slane %v3002_v62, 1  ;;  %v2990_v61 = vmax.f32 %v2988_v6, %v2989_v29  ;;  %v2997_v7 = vmax.f32 %v2995_v55, %v2996_v15  ;;  %v11082_v6 = vmax.f32 %v3009_v9, %v3010_v60  ;;  %v8710_v29 = vld [vmem:[%s9564_s18 + $0x1a2] sm:$0xff] }
 0x2bd   : > { %v1948_v55 = vsel %vm1925_vm5, %v1915_v51, %v11033_v2  ;;  %v3045_v15 = vrot.slane %v3044_v1, 1  ;;  %v1920_v23 = vsel %vm1892_vm4, %v1887_v16, %v1240_v26  ;;  %v3053_v58 = vmax.f32 %v3051_v49, %v3052_v28 }
 0x2be   : > { %v3004_v40 = vmax.f32 %v3002_v62, %v3003_v27  ;;  %v3035_v62 = vmax.f32 %v3033_v59, %v3034_v14  ;;  %v11093_v5 = vsel %vm3432_vm11, %v2990_v61, -inf  ;;  %v11103_v51 = vsel %vm3432_vm11, %v2997_v7, -inf }
 0x2bf   : > { %v3029_v27 = vrot.slane %v3028_v3, 2  ;;  %v1953_v53 = vsel %vm1925_vm5, %v1920_v23, %v10976_v47 }
 0x2c0   : > { %1631 = vrot.lane.b32.xlu2 %v8678_v32, %s14344_s20  ;;  %v3021_v32 = vmax.f32 %v3019_v30, %v3020_v37  ;;  %s14315_s20 = smov 32   ;;  %v11110_v26 = vsel %vm3432_vm11, %v3004_v40, -inf  ;;  %v3036_v59 = vrot.slane %v3035_v62, 2  ;;  %v3046_v37 = vmax.f32 %v3044_v1, %v3045_v15 }
 0x2c1   : > { %1503 = vrot.lane.b32.xlu1 %v8646_v57, %s14338_s21  ;;  %v3015_v57 = vrot.slane %v3014_v25, 2  ;;  %v3030_v7 = vmax.f32 %v3028_v3, %v3029_v27  ;;  %v3533_v40 = vsel %vm3432_vm11, %v3053_v58, -inf  ;;  %s9424_s21 = smov 64  }
 0x2c2   : > { %1375 = vrot.lane.b32.xlu0 %v10936_v35, %s14339_s26  ;;  %v3064_v35 = vrot.slane %v3063_v33, 2  ;;  %v11080_v22 = vpop.permute.xlu2 %1113  ;;  %v3022_v50 = vrot.slane %v3021_v32, 2  ;;  %s9425_s26 = smov 80   ;;  %v3037_v28 = vmax.f32 %v3035_v62, %v3036_v59 }
 0x2c3   : > { %v1496_v34 = vpop.permute.xlu1 %1495  ;;  %v11095_v9 = vmax.f32 %v3014_v25, %v3015_v57  ;;  %v3031_v62 = vrot.slane %v3030_v7, 1 }
 0x2c4   : > { %v1486_v46 = vpop.permute.xlu0 %1485  ;;  %v3065_v2 = vmax.f32 %v3063_v33, %v3064_v35  ;;  %v1986_v38 = vsel %vm1958_vm6, %v1953_v53, %v1496_v34  ;;  %v3023_v36 = vmax.f32 %v3021_v32, %v3022_v50 }
 0x2c5   : > { %v1981_v30 = vsel %vm1958_vm6, %v1948_v55, %v1486_v46  ;;  %v3530_v46 = vsel %vm3432_vm11, %v3046_v37, -inf }
 0x2c6   : > { %v2014_v25 = vsel %vm1991_vm7, %v1981_v30, %v10991_v63  ;;  %v3066_v61 = vrot.slane %v3065_v2, 1  ;;  %v3534_v30 = vmax.f32 %v11103_v51, %v3533_v40  ;;  %v3531_v51 = vmax.f32 %v11093_v5, %v3530_v46 }
 0x2c7   : > { %v3538_v5 = vsel %vm3432_vm11, %v11082_v6, -inf }
 0x2c8   : > { %8959 = vrot.lane.b32.xlu2 %v8958_v39, %s14315_s20  ;;  %v3017_v39 = vrot.slane %v11095_v9, 1  ;;  %v3067_v16 = vmax.f32 %v3065_v2, %v3066_v61  ;;  %v3744_v53 = vsel %vm14355_vm12, %v3534_v30, %v3531_v51  ;;  %vm14356_vm12 = vcmask 1042434  }
 0x2c9   : > { %8954 = vrot.lane.b32.xlu1 %v8953_v41, %s14317_s22 }
 0x2ca   : > { %v2240_v19 = vpop.f32.mrf.mxu0  ;;  %1759 = vrot.lane.b32.xlu0 %v8710_v29, %s14341_s28  ;;  %v11125_v1 = vpop.permute.xlu2 %1359  ;;  %v3536_v29 = vsel %vm3432_vm11, %v3060_v17, -inf  ;;  %v3018_v18 = vmax.f32 %v11095_v9, %v3017_v39  ;;  %v3539_v58 = vsel %vm3432_vm11, %v3067_v16, -inf }
 0x2cb   : > { %v2241_v0 = vadd.f32 %v10963_v31, %v2240_v19  ;;  %v1742_v41 = vpop.permute.xlu1 %1741  ;;  %v3537_v59 = vmax.f32 %v11110_v26, %v3536_v29 }
 0x2cc   : > { %v2047_v21 = vsel %vm2024_vm8, %v2014_v25, %v1742_v41  ;;  %v1624_v60 = vpop.permute.xlu0 %1623  ;;  %v11154_v41 = vld [vmem:[#allocation2 + $0x30] sm:$0xff]  ;;  %v3038_v25 = vrot.slane %v3037_v28, 1  ;;  %v3541_v6 = vsel %vm3432_vm11, %v3018_v18, -inf }
 0x2cd   : > { %v2298_v33 = vmax.f32 %v2241_v0, 0.0  ;;  %8734 = vmatmul.msk.f32.gmra.mxu0 %vm2065_vm9, %v2047_v21  ;;  %v2019_v63 = vsel %vm1991_vm7, %v1986_v38, %v1624_v60  ;;  %v8978_v60 = vpack.i.bf16 %v11154_v41, %v11037_v12 }
 0x2ce   : > { %v2052_v34 = vsel %vm2024_vm8, %v2019_v63, %v11008_v20 }
 0x2cf   : > { %v2400_v14 = vrot.slane %v2298_v33, 2  ;;  %v2401_v49 = vrot.slane %v2298_v33, 4  ;;  %v2402_v8 = vrot.slane %v2298_v33, 6  ;;  %v3068_v47 = vsel %vm14313_vm10, %v2298_v33, -inf  ;;  %8739 = vmatmul.msk.f32.gmra.mxu1 %vm2065_vm9, %v2052_v34  ;;  %v3816_v34 = vld [vmem:[#allocation2 + $0x40] sm:$0xff] }
 0x2d0   : > { %v3069_v57 = vrot.slane %v3068_v47, 4  ;;  %8974 = vrot.lane.b32.xlu2 %v8973_v24, %s9425_s26  ;;  %v3024_v24 = vrot.slane %v3023_v36, 1  ;;  %v3032_v33 = vmax.f32 %v3030_v7, %v3031_v62 }
 0x2d1   : > { %v3075_v32 = vsel %vm14313_vm10, %v2400_v14, -inf  ;;  %v3082_v44 = vsel %vm14313_vm10, %v2401_v49, -inf  ;;  %v3089_v35 = vsel %vm14313_vm10, %v2402_v8, -inf  ;;  %8969 = vrot.lane.b32.xlu1 %v8968_v42, %s9424_s21  ;;  %v3039_v49 = vmax.f32 %v3037_v28, %v3038_v25  ;;  %v3808_v28 = vld [vmem:[#allocation2 + $0x32] sm:$0xff] }
 0x2d2   : > { %v3070_v3 = vmax.f32 %v3068_v47, %v3069_v57  ;;  %v3076_v4 = vrot.slane %v3075_v32, 4  ;;  %v3083_v55 = vrot.slane %v3082_v44, 4  ;;  %v3090_v20 = vrot.slane %v3089_v35, 4  ;;  %8964 = vrot.lane.b32.xlu0 %v14354_v45, %s9426_s27  ;;  %v11165_v14 = vpop.permute.xlu2 %1497 }
 0x2d3   : > { %v11148_v54 = vpop.permute.xlu1 %857  ;;  %v3025_v38 = vmax.f32 %v3023_v36, %v3024_v24  ;;  %v3540_v36 = vmax.f32 %v3538_v5, %v3539_v58  ;;  %v3745_v8 = vsel %vm14356_vm12, %v3537_v59, %v3744_v53  ;;  %vm14357_vm10 = vcmask 1043459  }
 0x2d4   : > { %v3071_v42 = vrot.slane %v3070_v3, 2  ;;  %v3077_v15 = vmax.f32 %v3075_v32, %v3076_v4  ;;  %v3084_v23 = vmax.f32 %v3082_v44, %v3083_v55  ;;  %v3091_v50 = vmax.f32 %v3089_v35, %v3090_v20  ;;  %v11152_v11 = vpop.permute.xlu0 %847  ;;  %v3824_v35 = vld [vmem:[#allocation2 + $0x41] sm:$0xff] }
 0x2d5   : > { %v3544_v46 = vsel %vm3432_vm11, %v3025_v38, -inf  ;;  %v8998_v45 = vpack.i.bf16 %v3816_v34, %v11154_v41  ;;  %v8993_v18 = vpack.i.bf16 %v3808_v28, %v11039_v43 }
 0x2d6   : > { %v3072_v2 = vmax.f32 %v3070_v3, %v3071_v42  ;;  %v3078_v19 = vrot.slane %v3077_v15, 2  ;;  %v3085_v27 = vrot.slane %v3084_v23, 2  ;;  %v3092_v0 = vrot.slane %v3091_v50, 2 }
 0x2d7   : > { %v3746_v3 = vsel %vm14357_vm10, %v3540_v36, %v3745_v8  ;;  %v3550_v42 = vsel %vm3432_vm11, %v3039_v49, -inf  ;;  %vm14358_vm10 = vcmask 123904  }
 0x2d8   : > { %v3073_v9 = vrot.slane %v3072_v2, 1  ;;  %v3079_v21 = vmax.f32 %v3077_v15, %v3078_v19  ;;  %v3086_v39 = vmax.f32 %v3084_v23, %v3085_v27  ;;  %v3093_v37 = vmax.f32 %v3091_v50, %v3092_v0  ;;  %8989 = vrot.lane.b32.xlu2 %v11074_v56, %s14317_s22  ;;  %v502_v19 = vld [vmem:[%s9564_s18 + $0x110] sm:$0xff]  ;;  %vm14359_vm12 = vmmov %vm14358_vm10 }
 0x2d9   : > { %8984 = vrot.lane.b32.xlu1 %v11074_v56, %s9427_s19  ;;  %v3547_v56 = vsel %vm3432_vm11, %v3032_v33, -inf  ;;  %v9003_v15 = vpack.i.bf16 %v3824_v35, %v11060_v52  ;;  %v9008_v27 = vpack.i.bf16 %v10908_v13, %v3808_v28  ;;  %v1817_v58 = vsel %vm14326_vm1, %v502_v19, %v11152_v11 }
 0x2da   : > { %v3074_v26 = vmax.f32 %v3072_v2, %v3073_v9  ;;  %v3080_v17 = vrot.slane %v3079_v21, 1  ;;  %v3087_v61 = vrot.slane %v3086_v39, 1  ;;  %v3094_v63 = vrot.slane %v3093_v37, 1  ;;  %8979 = vrot.lane.b32.xlu0 %v8978_v60, %s14319_s1  ;;  %v1744_v2 = vpop.permute.xlu2 %1743 }
 0x2db   : > { %v1104_v12 = vpop.permute.xlu1 %1103  ;;  %v1850_v5 = vsel %vm1826_vm2, %v1817_v58, %v11042_v10 }
 0x2dc   : > { %v3081_v47 = vmax.f32 %v3079_v21, %v3080_v17  ;;  %v3088_v7 = vmax.f32 %v3086_v39, %v3087_v61  ;;  %v3095_v40 = vmax.f32 %v3093_v37, %v3094_v63  ;;  %v3542_v57 = vsel %vm3432_vm11, %v3074_v26, -inf  ;;  %v986_v44 = vpop.permute.xlu0 %985  ;;  %v507_v37 = vld [vmem:[%s9564_s18 + $0x150] sm:$0xff] }
 0x2dd   : > { %v3543_v32 = vmax.f32 %v3541_v6, %v3542_v57  ;;  %v1883_v38 = vsel %vm1859_vm3, %v1850_v5, %v1104_v12  ;;  %v1822_v11 = vsel %vm14326_vm1, %v507_v37, %v11148_v54  ;;  %v508_v57 = vld [vmem:[%s9564_s18 + $0x158] sm:$0xff] }
 0x2de   : > { %v3545_v4 = vsel %vm3432_vm11, %v3081_v47, -inf  ;;  %v3548_v55 = vsel %vm3432_vm11, %v3088_v7, -inf  ;;  %v3551_v20 = vsel %vm3432_vm11, %v3095_v40, -inf  ;;  %v1855_v61 = vsel %vm1826_vm2, %v1822_v11, %v986_v44 }
 0x2df   : > { %v3546_v16 = vmax.f32 %v3544_v46, %v3545_v4  ;;  %v3549_v30 = vmax.f32 %v3547_v56, %v3548_v55  ;;  %v3747_v29 = vsel %vm14323_vm15, %v3543_v32, %v3746_v3  ;;  %v3552_v23 = vmax.f32 %v3550_v42, %v3551_v20  ;;  %v2255_v55 = vpop.f32.mrf.mxu1 }
 0x2e0   : > { %9004 = vrot.lane.b32.xlu2 %v9003_v15, %s9424_s21  ;;  %v1888_v6 = vsel %vm1859_vm3, %v1855_v61, %v11080_v22 }
 0x2e1   : > { %v3748_v50 = vsel %vm14322_vm0, %v3546_v16, %v3747_v29  ;;  %8999 = vrot.lane.b32.xlu1 %v8998_v45, %s9426_s27  ;;  %v2256_v16 = vadd.f32 %v10963_v31, %v2255_v55  ;;  %vm14365_vm0 = vmmov %vm14358_vm10 }
 0x2e2   : > { %v3749_v24 = vsel %vm14321_vm13, %v3549_v30, %v3748_v50  ;;  %8994 = vrot.lane.b32.xlu0 %v8993_v18, %s14315_s20  ;;  %v988_v39 = vpop.permute.xlu2 %987  ;;  %vm14364_vm13 = vmmov %vm14358_vm10 }
 0x2e3   : > { %v3750_v62 = vsel %vm14314_vm14, %v3552_v23, %v3749_v24  ;;  %v1242_v51 = vpop.permute.xlu1 %1241  ;;  %v2303_v42 = vmax.f32 %v2256_v16, 0.0  ;;  %v509_v23 = vld [vmem:[%s9564_s18 + $0x168] sm:$0xff]  ;;  %vm14360_vm14 = vmmov %vm14358_vm10 }
 0x2e4   : > { %3785 = vst.msk [vmem:[#allocation2 + $0x51] sm:$0xff] %vm3432_vm11, %v3750_v62  ;;  %v1232_v52 = vpop.permute.xlu0 %1231  ;;  %vm14366_vm15 = vmmov %vm14365_vm0 }
 0x2e5   : > { %v1916_v33 = vsel %vm1892_vm4, %v1883_v38, %v1232_v52  ;;  %v2415_v24 = vrot.slane %v2303_v42, 2  ;;  %v2416_v62 = vrot.slane %v2303_v42, 4  ;;  %v2417_v19 = vrot.slane %v2303_v42, 6  ;;  %v4161_v38 = vld [vmem:[%s14274_s3 + $0x68] sm:$0xff] }
 0x2e6   : > { %v1949_v26 = vsel %vm1925_vm5, %v1916_v33, %v11125_v1 }
 0x2e7   : > { %v3229_v37 = vsel %vm14358_vm10, %v2417_v19, -inf }
 0x2ea   : > { %9009 = vrot.lane.b32.xlu0 %v9008_v27, %s9425_s26  ;;  %v1372_v36 = vpop.permute.xlu2 %1371  ;;  %v3215_v27 = vsel %vm14359_vm12, %v2415_v24, -inf  ;;  %vm14362_vm12 = vmmov %vm14358_vm10 }
 0x2eb   : > { %v1488_v43 = vpop.permute.xlu1 %1487  ;;  %v3857_v0 = vld [vmem:[#allocation2 + $0x52] sm:$0xff] }
 0x2ec   : > { %v3849_v25 = vld [vmem:[#allocation2 + $0x51] sm:$0xff]  ;;  %8747 = vmatmul.msk.f32.gmra.mxu2 %vm3432_vm11, %v3857_v0  ;;  %v1370_v21 = vpop.permute.xlu0 %1369  ;;  %v9028_v17 = vpack.i.bf16 %v3857_v0, %v10908_v13  ;;  %v1982_v63 = vsel %vm1958_vm6, %v1949_v26, %v1488_v43  ;;  %v1921_v13 = vsel %vm1892_vm4, %v1888_v6, %v1242_v51  ;;  %v3208_v51 = vsel %vm14358_vm10, %v2303_v42, -inf }
 0x2ed   : > { %v3841_v59 = vld [vmem:[#allocation2 + $0x50] sm:$0xff]  ;;  %v9018_v53 = vpack.i.bf16 %v3849_v25, %v3824_v35  ;;  %v1954_v1 = vsel %vm1925_vm5, %v1921_v13, %v1370_v21  ;;  %v3209_v25 = vrot.slane %v3208_v51, 4  ;;  %v4160_v26 = vld [vmem:[%s14274_s3 + $0x60] sm:$0xff] }
 0x2ee   : > { %v9013_v9 = vpack.i.bf16 %v3841_v59, %v3816_v34  ;;  %v1987_v12 = vsel %vm1958_vm6, %v1954_v1, %v11165_v14  ;;  %v3222_v59 = vsel %vm14360_vm14, %v2416_v62, -inf  ;;  %vm14361_vm14 = vmmov %vm14358_vm10  ;;  %v4154_v62 = vld [vmem:[%s14274_s3 + $0x30] sm:$0xff] }
 0x2ef   : > { %9019 = vrot.lane.b32.xlu2 %v9018_v53, %s9427_s19  ;;  %v3223_v33 = vrot.slane %v3222_v59, 4  ;;  %v3210_v11 = vmax.f32 %v3208_v51, %v3209_v25 }
 0x2f0   : > { %9014 = vrot.lane.b32.xlu1 %v9013_v9, %s14319_s1  ;;  %v4162_v9 = vld [vmem:[%s14274_s3 + $0x70] sm:$0xff]  ;;  %s8885_s1 = sshll.u32 %s9529_s17, 2 }
 0x2f2   : > { %9024 = vrot.lane.b32.xlu0 %v9018_v53, %s14317_s22  ;;  %v1756_v22 = vpop.permute.xlu2 %1755  ;;  %v4163_v53 = vld [vmem:[%s14274_s3 + $0x78] sm:$0xff]  ;;  %s14406_s22 = smov 32  }
 0x2f3   : > { %v1626_v60 = vpop.permute.xlu1 %1625  ;;  %4194 = vmatpush.msrb.mxu1 %v4163_v53 }
 0x2f4   : > { %v1616_v10 = vpop.permute.xlu0 %1615  ;;  %v2020_v7 = vsel %vm1991_vm7, %v1987_v12, %v1626_v60 }
 0x2f5   : > { %v2015_v49 = vsel %vm1991_vm7, %v1982_v63, %v1616_v10  ;;  %4195 = vmatpush.msrb.mxu1 %v4162_v9  ;;  %v2243_v10 = vpop.f32.mrf.mxu0 }
 0x2f6   : > { %v2048_v54 = vsel %vm2024_vm8, %v2015_v49, %v1744_v2  ;;  %v4159_v49 = vld [vmem:[%s14274_s3 + $0x58] sm:$0xff] }
 0x2f7   : > { %8735 = vmatmul.msk.f32.gmra.mxu0 %vm2065_vm9, %v2048_v54  ;;  %4196 = vmatpush.msrb.mxu1 %v4161_v38  ;;  %v3224_v54 = vmax.f32 %v3222_v59, %v3223_v33  ;;  %v4152_v33 = vld [vmem:[%s14274_s3 + $0x20] sm:$0xff] }
 0x2f8   : > { %9029 = vrot.lane.b32.xlu1 %v9028_v17, %s14315_s20  ;;  %v3230_v17 = vrot.slane %v3229_v37, 4  ;;  %s9369_s20 = scalar_lea.hbm %s14285_s14, 8 }
 0x2f9   : > { %4197 = vmatpush.msrb.mxu1 %v4160_v26 }
 0x2fa   : > { %v1118_v14 = vpop.permute.xlu2 %1117 }
 0x2fb   : > { %v860_v8 = vpop.permute.xlu1 %859  ;;  %v2258_v43 = vpop.f32.mrf.mxu1  ;;  %4198 = vmatpush.msrb.mxu1 %v4159_v49 }
 0x2fc   : > { %v1754_v47 = vpop.permute.xlu0 %1753  ;;  %v1823_v46 = vsel %vm14326_vm1, %v508_v57, %v860_v8  ;;  %v2259_v6 = vadd.f32 %v10963_v31, %v2258_v43  ;;  %v3211_v8 = vrot.slane %v3210_v11, 2 }
 0x2fd   : > { %v2053_v40 = vsel %vm2024_vm8, %v2020_v7, %v1754_v47  ;;  %v1856_v32 = vsel %vm1826_vm2, %v1823_v46, %v988_v39  ;;  %v3216_v39 = vrot.slane %v3215_v27, 4  ;;  %v3231_v47 = vmax.f32 %v3229_v37, %v3230_v17  ;;  %v510_v37 = vld [vmem:[%s9564_s18 + $0x170] sm:$0xff]  ;;  %s8888_s18 = sshll.u32 %s9558_s25, 8 }
 0x2fe   : > { %8740 = vmatmul.msk.f32.gmra.mxu1 %vm2065_vm9, %v2053_v40  ;;  %v2244_v7 = vadd.f32 %v10963_v31, %v2243_v10  ;;  %v4158_v40 = vld [vmem:[%s14274_s3 + $0x50] sm:$0xff]  ;;  %v3225_v46 = vrot.slane %v3224_v54, 2 }
 0x2ff   : > { %v3217_v63 = vmax.f32 %v3215_v27, %v3216_v39  ;;  %4199 = vmatpush.msrb.mxu1 %v4158_v40 }
 0x301   : > { %v3218_v57 = vrot.slane %v3217_v63, 2 }
 0x302   : > { %v1502_v50 = vpop.permute.xlu2 %1501 }
 0x303   : > { %v1244_v34 = vpop.permute.xlu1 %1243  ;;  %v3219_v55 = vmax.f32 %v3217_v63, %v3218_v57 }
 0x304   : > { %v1116_v56 = vpop.permute.xlu0 %1115 }
 0x305   : > { %v1889_v44 = vsel %vm1859_vm3, %v1856_v32, %v1116_v56  ;;  %v2304_v56 = vmax.f32 %v2259_v6, 0.0  ;;  %v4157_v32 = vld [vmem:[%s14274_s3 + $0x48] sm:$0xff]  ;;  %v3220_v51 = vrot.slane %v3219_v55, 1 }
 0x306   : > { %v1922_v3 = vsel %vm1892_vm4, %v1889_v44, %v1244_v34  ;;  %v3212_v44 = vmax.f32 %v3210_v11, %v3211_v8  ;;  %4200 = vmatpush.msrb.mxu1 %v4157_v32  ;;  %v4150_v32 = vld [vmem:[%s14274_s3 + $0x10] sm:$0xff] }
 0x307   : > { %v1955_v20 = vsel %vm1925_vm5, %v1922_v3, %v1372_v36  ;;  %v2299_v3 = vmax.f32 %v2244_v7, 0.0  ;;  %v2418_v16 = vrot.slane %v2304_v56, 2  ;;  %v2420_v24 = vrot.slane %v2304_v56, 6 }
 0x308   : > { %v3213_v42 = vrot.slane %v3212_v44, 1  ;;  %v3221_v63 = vmax.f32 %v3219_v55, %v3220_v51 }
 0x309   : > { %v3243_v27 = vsel %vm14362_vm12, %v2418_v16, -inf  ;;  %v2405_v59 = vrot.slane %v2299_v3, 6  ;;  %v3257_v39 = vsel %vm14366_vm15, %v2420_v24, -inf  ;;  %vm14367_vm12 = vmmov %vm14365_vm0 }
 0x30a   : > { %v11251_v5 = vpop.permute.xlu2 %863  ;;  %v3214_v25 = vmax.f32 %v3212_v44, %v3213_v42  ;;  %v3244_v11 = vrot.slane %v3243_v27, 4  ;;  %v3258_v8 = vrot.slane %v3257_v39, 4  ;;  %vm14369_vm15 = vmmov %vm14365_vm0 }
 0x30b   : > { %v1628_v35 = vpop.permute.xlu1 %1627 }
 0x30c   : > { %v1500_v4 = vpop.permute.xlu0 %1499  ;;  %v3259_v55 = vmax.f32 %v3257_v39, %v3258_v8 }
 0x30d   : > { %v1988_v28 = vsel %vm1958_vm6, %v1955_v20, %v1500_v4 }
 0x30e   : > { %v2021_v30 = vsel %vm1991_vm7, %v1988_v28, %v1628_v35  ;;  %v3226_v28 = vmax.f32 %v3224_v54, %v3225_v46 }
 0x30f   : > { %v2054_v29 = vsel %vm2024_vm8, %v2021_v30, %v1756_v22  ;;  %v2419_v30 = vrot.slane %v2304_v56, 4 }
 0x310   : > { %8741 = vmatmul.msk.f32.gmra.mxu1 %vm2065_vm9, %v2054_v29 }
 0x311   : > { %v3250_v43 = vsel %vm14358_vm10, %v2419_v30, -inf }
 0x312   : > { %v11276_v35 = vpop.permute.xlu2 %1247 }
 0x313   : > { %v990_v45 = vpop.permute.xlu1 %989 }
 0x314   : > { %v862_v15 = vpop.permute.xlu0 %861 }
 0x315   : > { %v1824_v18 = vsel %vm14326_vm1, %v509_v23, %v862_v15  ;;  %v3236_v15 = vsel %vm14361_vm14, %v2304_v56, -inf  ;;  %vm14363_vm14 = vmmov %vm14358_vm10  ;;  %vm4139_vm10 = vcmask 916480  }
 0x316   : > { %v1857_v2 = vsel %vm1826_vm2, %v1824_v18, %v990_v45  ;;  %v4155_v45 = vld [vmem:[%s14274_s3 + $0x38] sm:$0xff]  ;;  %v2404_v18 = vrot.slane %v2299_v3, 4  ;;  %v3237_v19 = vrot.slane %v3236_v15, 4 }
 0x317   : > { %v1890_v58 = vsel %vm1859_vm3, %v1857_v2, %v1118_v14  ;;  %v3232_v14 = vrot.slane %v3231_v47, 2 }
 0x318   : > { %v3238_v54 = vmax.f32 %v3236_v15, %v3237_v19 }
 0x319   : > { %v3233_v23 = vmax.f32 %v3231_v47, %v3232_v14 }
 0x31a   : > { %v1632_v26 = vpop.permute.xlu2 %1631  ;;  %v3239_v14 = vrot.slane %v3238_v54, 2 }
 0x31b   : > { %v1374_v52 = vpop.permute.xlu1 %1373  ;;  %v3234_v53 = vrot.slane %v3233_v23, 1 }
 0x31c   : > { %v1246_v0 = vpop.permute.xlu0 %1245 }
 0x31d   : > { %v1923_v21 = vsel %vm1892_vm4, %v1890_v58, %v1246_v0  ;;  %v4153_v0 = vld [vmem:[%s14274_s3 + $0x28] sm:$0xff]  ;;  %v3096_v58 = vsel %vm14363_vm14, %v2299_v3, -inf  ;;  %v3235_v47 = vmax.f32 %v3233_v23, %v3234_v53  ;;  %vm14371_vm14 = vmmov %vm14365_vm0 }
 0x31e   : > { %v1956_v60 = vsel %vm1925_vm5, %v1923_v21, %v1374_v52  ;;  %v3227_v52 = vrot.slane %v3226_v28, 1  ;;  %v3110_v21 = vsel %vm14365_vm0, %v2404_v18, -inf  ;;  %v3097_v49 = vrot.slane %v3096_v58, 4 }
 0x31f   : > { %v1989_v1 = vsel %vm1958_vm6, %v1956_v60, %v1502_v50  ;;  %v2403_v50 = vrot.slane %v2299_v3, 2  ;;  %v3251_v60 = vrot.slane %v3250_v43, 4  ;;  %v3111_v7 = vrot.slane %v3110_v21, 4 }
 0x320   : > { %v3228_v10 = vmax.f32 %v3226_v28, %v3227_v52  ;;  %v3098_v44 = vmax.f32 %v3096_v58, %v3097_v49 }
 0x321   : > { %v3103_v9 = vsel %vm14364_vm13, %v2403_v50, -inf  ;;  %vm14368_vm13 = vmmov %vm14365_vm0  ;;  %v3112_v30 = vmax.f32 %v3110_v21, %v3111_v7 }
 0x322   : > { %v2261_v36 = vpop.f32.mrf.mxu1  ;;  %v3099_v51 = vrot.slane %v3098_v44, 2 }
 0x323   : > { %v1758_v61 = vpop.permute.xlu1 %1757  ;;  %v2262_v22 = vadd.f32 %v10963_v31, %v2261_v36  ;;  %v4156_v31 = vld [vmem:[%s14274_s3 + $0x40] sm:$0xff]  ;;  %v4151_v36 = vld [vmem:[%s14274_s3 + $0x18] sm:$0xff] }
 0x324   : > { %v1630_v13 = vpop.permute.xlu0 %1629  ;;  %4201 = vmatpush.msrb.mxu1 %v4156_v31 }
 0x325   : > { %v2022_v12 = vsel %vm1991_vm7, %v1989_v1, %v1630_v13  ;;  %v11283_v20 = vmax.f32 %v2262_v22, 0.0  ;;  %v3104_v13 = vrot.slane %v3103_v9, 4  ;;  %v3117_v1 = vsel %vm14365_vm0, %v2405_v59, -inf  ;;  %v11342_v59 = vpop.permute.xlu2 %8959 }
 0x326   : > { %v2055_v34 = vsel %vm2024_vm8, %v2022_v12, %v1758_v61  ;;  %4202 = vmatpush.msrb.mxu1 %v4155_v45  ;;  %v1825_v12 = vsel %vm14326_vm1, %v510_v37, %v11251_v5  ;;  %v3245_v22 = vmax.f32 %v3243_v27, %v3244_v11  ;;  %v3118_v5 = vrot.slane %v3117_v1, 4 }
 0x327   : > { %8742 = vmatmul.msk.f32.gmra.mxu1 %vm2065_vm9, %v2055_v34  ;;  %v2421_v2 = vrot.slane %v11283_v20, 2  ;;  %v2422_v17 = vrot.slane %v11283_v20, 4  ;;  %v3264_v40 = vsel %vm14368_vm13, %v11283_v20, -inf  ;;  %v3252_v34 = vmax.f32 %v3250_v43, %v3251_v60  ;;  %vm14373_vm13 = vmmov %vm14365_vm0 }
 0x328   : > { %4203 = vmatpush.msrb.mxu1 %v4154_v62  ;;  %v2423_v46 = vrot.slane %v11283_v20, 6  ;;  %v3105_v31 = vmax.f32 %v3103_v9, %v3104_v13  ;;  %v3265_v28 = vrot.slane %v3264_v40, 4  ;;  %v4149_v20 = vld [vmem:[%s14274_s3 + $0x8] sm:$0xff]  ;;  %v11337_v62 = vsel %vm3432_vm11, %v3214_v25, -inf }
 0x329   : > { %v3271_v61 = vsel %vm14367_vm12, %v2421_v2, -inf  ;;  %v3278_v56 = vsel %vm14369_vm15, %v2422_v17, -inf  ;;  %v3253_v50 = vrot.slane %v3252_v34, 2  ;;  %v3240_v2 = vmax.f32 %v3238_v54, %v3239_v14  ;;  %vm14372_vm12 = vmmov %vm14365_vm0 }
 0x32a   : > { %4204 = vmatpush.msrb.mxu1 %v4153_v0  ;;  %v3272_v57 = vrot.slane %v3271_v61, 4  ;;  %v3279_v42 = vrot.slane %v3278_v56, 4  ;;  %v3106_v19 = vrot.slane %v3105_v31, 2  ;;  %v11340_v27 = vmax.f32 %v3117_v1, %v3118_v5  ;;  %vm14374_vm15 = vmmov %vm14365_vm0 }
 0x32b   : > { %v11278_v4 = vpop.permute.xlu1 %1119  ;;  %v3260_v43 = vrot.slane %v3259_v55, 2  ;;  %v3266_v0 = vmax.f32 %v3264_v40, %v3265_v28  ;;  %v3113_v25 = vrot.slane %v3112_v30, 2  ;;  %v3254_v37 = vmax.f32 %v3252_v34, %v3253_v50  ;;  %v11377_v50 = vld [vmem:[%s14273_s2] ss:$0 sm:$0xff] }
 0x32c   : > { %v992_v29 = vpop.permute.xlu0 %991  ;;  %4205 = vmatpush.msrb.mxu1 %v4152_v33  ;;  %v3273_v45 = vmax.f32 %v3271_v61, %v3272_v57  ;;  %v3280_v53 = vmax.f32 %v3278_v56, %v3279_v42  ;;  %v11350_v11 = vsel %vm3432_vm11, %v3228_v10, -inf  ;;  %v3241_v60 = vrot.slane %v3240_v2, 1 }
 0x32d   : > { %v1858_v3 = vsel %vm1826_vm2, %v1825_v12, %v992_v29  ;;  %v3246_v29 = vrot.slane %v3245_v22, 2  ;;  %vm14370_vm2 = vmmov %vm14365_vm0  ;;  %v11355_v61 = vsel %vm3432_vm11, %v3235_v47, -inf  ;;  %v3120_v49 = vrot.slane %v11340_v27, 2 }
 0x32e   : > { %4206 = vmatpush.msrb.mxu1 %v4151_v36  ;;  %v1891_v16 = vsel %vm1859_vm3, %v1858_v3, %v11278_v4  ;;  %v3285_v18 = vsel %vm14370_vm2, %v2423_v46, -inf  ;;  %v4148_v4 = vld [vmem:[%s14274_s3] sm:$0xff]  ;;  %v3274_v58 = vrot.slane %v3273_v45, 2  ;;  %v3261_v54 = vmax.f32 %v3259_v55, %v3260_v43 }
 0x32f   : > { %v1924_v15 = vsel %vm1892_vm4, %v1891_v16, %v11276_v35  ;;  %v3286_v9 = vrot.slane %v3285_v18, 4  ;;  %v3247_v39 = vmax.f32 %v3245_v22, %v3246_v29  ;;  %v3267_v36 = vrot.slane %v3266_v0, 2  ;;  %v8975_v16 = vpop.permute.xlu2 %8974 }
 0x330   : > { %4207 = vmatpush.msrb.mxu1 %v4150_v32  ;;  %v3281_v13 = vrot.slane %v3280_v53, 2  ;;  %v11360_v8 = vmax.f32 %v3105_v31, %v3106_v19  ;;  %v11362_v12 = vmax.f32 %v3112_v30, %v3113_v25  ;;  %v3255_v40 = vrot.slane %v3254_v37, 1 }
 0x331   : > { %v3287_v1 = vmax.f32 %v3285_v18, %v3286_v9  ;;  %v3248_v7 = vrot.slane %v3247_v39, 1  ;;  %v3242_v57 = vmax.f32 %v3240_v2, %v3241_v60  ;;  %vm4094_vm3 = vcmask 261120  }
 0x332   : > { %4208 = vmatpush.msrb.mxu1 %v4149_v20  ;;  %v3262_v46 = vrot.slane %v3261_v54, 1  ;;  %v8961_v56 = vunpack.i.l.bf16 %v11342_v59  ;;  %v3268_v5 = vmax.f32 %v3266_v0, %v3267_v36  ;;  %v3282_v3 = vmax.f32 %v3280_v53, %v3281_v13 }
 0x333   : > { %v1504_v38 = vpop.permute.xlu1 %1503  ;;  %v3288_v31 = vrot.slane %v3287_v1, 2  ;;  %v3249_v55 = vmax.f32 %v3247_v39, %v3248_v7  ;;  %v3256_v28 = vmax.f32 %v3254_v37, %v3255_v40  ;;  %v11372_v29 = vsel %vm3432_vm11, %v3242_v57, -inf }
 0x334   : > { %v1376_v6 = vpop.permute.xlu0 %1375  ;;  %4209 = vmatpush.msrb.mxu1 %v4148_v4  ;;  %v3269_v4 = vrot.slane %v3268_v5, 1  ;;  %v8976_v0 = vunpack.i.l.bf16 %v8975_v16  ;;  %v8977_v7 = vunpack.i.h.bf16 %v8975_v16  ;;  %vm14375_vm2 = vcmask 1041409  }
 0x335   : > { %v1957_v24 = vsel %vm1925_vm5, %v1924_v15, %v1376_v6  ;;  %v3789_v6 = vld [vmem:[#allocation2] sm:$0xff]  ;;  %vm4103_vm5 = vcmask 392192   ;;  %v3289_v2 = vmax.f32 %v3287_v1, %v3288_v31  ;;  %v11394_v1 = vsel %vm3432_vm11, %v3256_v28, -inf }
 0x336   : > { %v1990_v35 = vsel %vm1958_vm6, %v1957_v24, %v1504_v38  ;;  %v11347_v38 = vsel %vm3432_vm11, %v3221_v63, -inf  ;;  %v3275_v63 = vmax.f32 %v3273_v45, %v3274_v58  ;;  %vm4112_vm6 = vcmask 523264  }
 0x337   : > { %v2023_v21 = vsel %vm1991_vm7, %v1990_v35, %v1632_v26  ;;  %v11357_v26 = vmax.f32 %v3098_v44, %v3099_v51  ;;  %v2246_v44 = vpop.f32.mrf.mxu0  ;;  %v8962_v24 = vunpack.i.h.bf16 %v11342_v59  ;;  %vm4121_vm7 = vcmask 654336  }
 0x338   : > { %v3276_v14 = vrot.slane %v3275_v63, 1  ;;  %v2247_v18 = vadd.f32 %v11377_v50, %v2246_v44  ;;  %v3270_v37 = vmax.f32 %v3268_v5, %v3269_v4  ;;  %v3290_v60 = vrot.slane %v3289_v2, 1 }
 0x33a   : > { %v3277_v51 = vmax.f32 %v3275_v63, %v3276_v14  ;;  %v11387_v59 = vmax.f32 %v2247_v18, 0.0 }
 0x33b   : > { %v11329_v23 = vpop.permute.xlu1 %8954 }
 0x33c   : > { %v1760_v52 = vpop.permute.xlu0 %1759  ;;  %v8956_v17 = vunpack.i.l.bf16 %v11329_v23  ;;  %v8957_v47 = vunpack.i.h.bf16 %v11329_v23  ;;  %v3263_v23 = vmax.f32 %v3261_v54, %v3262_v46 }
 0x33d   : > { %v2056_v33 = vsel %vm2024_vm8, %v2023_v21, %v1760_v52  ;;  %v11385_v21 = vsel %vm3432_vm11, %v3249_v55, -inf }
 0x33e   : > { %8743 = vmatmul.msk.f32.gmra.mxu1 %vm2065_vm9, %v2056_v33  ;;  %v4086_v22 = vsel %vm3432_vm11, %v3789_v6, %v8956_v17  ;;  %v4087_v45 = vsel %vm3432_vm11, %v11046_v48, %v8957_v47  ;;  %v3283_v48 = vrot.slane %v3282_v3, 1  ;;  %vm4130_vm9 = vcmask 785408  }
 0x33f   : > { %v4095_v20 = vsel %vm4094_vm3, %v4086_v22, %v8961_v56  ;;  %v4096_v52 = vsel %vm4094_vm3, %v4087_v45, %v8962_v24  ;;  %v11399_v57 = vsel %vm3432_vm11, %v3263_v23, -inf  ;;  %v2406_v47 = vrot.slane %v11387_v59, 2 }
 0x340   : > { %v3284_v33 = vmax.f32 %v3282_v3, %v3283_v48  ;;  %v2407_v22 = vrot.slane %v11387_v59, 4  ;;  %v3291_v56 = vmax.f32 %v3289_v2, %v3290_v60  ;;  %v2408_v45 = vrot.slane %v11387_v59, 6 }
 0x342   : > { %v3584_v3 = vsel %vm3432_vm11, %v3284_v33, -inf  ;;  %v3587_v48 = vsel %vm3432_vm11, %v3291_v56, -inf }
 0x343   : > { %v8970_v10 = vpop.permute.xlu1 %8969 }
 0x344   : > { %v8965_v34 = vpop.permute.xlu0 %8964  ;;  %v8971_v30 = vunpack.i.l.bf16 %v8970_v10  ;;  %v8972_v19 = vunpack.i.h.bf16 %v8970_v10  ;;  %v3581_v10 = vsel %vm3432_vm11, %v3277_v51, -inf  ;;  %v3585_v51 = vmax.f32 %v11350_v11, %v3584_v3 }
 0x345   : > { %v8966_v32 = vunpack.i.l.bf16 %v8965_v34  ;;  %v8967_v42 = vunpack.i.h.bf16 %v8965_v34  ;;  %v11403_v34 = vpop.permute.xlu2 %8989  ;;  %v3582_v14 = vmax.f32 %v11347_v38, %v3581_v10 }
 0x347   : > { %v4104_v15 = vsel %vm4103_vm5, %v4095_v20, %v8966_v32  ;;  %v4105_v58 = vsel %vm4103_vm5, %v4096_v52, %v8967_v42  ;;  %v3578_v32 = vsel %vm3432_vm11, %v3270_v37, -inf  ;;  %v11415_v42 = vsel %vm14372_vm12, %v11387_v59, -inf  ;;  %vm14377_vm12 = vmmov %vm14365_vm0 }
 0x348   : > { %v4113_v43 = vsel %vm4112_vm6, %v4104_v15, %v8971_v30  ;;  %v4114_v6 = vsel %vm4112_vm6, %v4105_v58, %v8972_v19  ;;  %v3579_v15 = vmax.f32 %v11337_v62, %v3578_v32  ;;  %v3125_v58 = vrot.slane %v11415_v42, 4 }
 0x349   : > { %v4122_v54 = vsel %vm4121_vm7, %v4113_v43, %v8976_v0  ;;  %v4123_v5 = vsel %vm4121_vm7, %v4114_v6, %v8977_v7  ;;  %v11433_v60 = vsel %vm14377_vm12, %v2407_v22, -inf }
 0x34a   : > { %v2249_v17 = vpop.f32.mrf.mxu0  ;;  %v3758_v2 = vsel %vm14375_vm2, %v3582_v14, %v3579_v15  ;;  %vm14381_vm2 = vmmov %vm14377_vm12 }
 0x34b   : > { %v8985_v35 = vpop.permute.xlu1 %8984  ;;  %v2250_v46 = vadd.f32 %v11377_v50, %v2249_v17  ;;  %v3588_v17 = vmax.f32 %v11355_v61, %v3587_v48 }
 0x34c   : > { %v8980_v53 = vpop.permute.xlu0 %8979  ;;  %v8986_v9 = vunpack.i.l.bf16 %v8985_v35  ;;  %v2264_v25 = vpop.f32.mrf.mxu1  ;;  %v8987_v31 = vunpack.i.h.bf16 %v8985_v35 }
 0x34d   : > { %v8981_v39 = vunpack.i.l.bf16 %v8980_v53  ;;  %v2265_v36 = vadd.f32 %v11377_v50, %v2264_v25  ;;  %v8982_v63 = vunpack.i.h.bf16 %v8980_v53  ;;  %v2301_v23 = vmax.f32 %v2250_v46, 0.0  ;;  %v11437_v6 = vpop.permute.xlu2 %9004 }
 0x34e   : > { %v9006_v32 = vunpack.i.l.bf16 %v11437_v6 }
 0x34f   : > { %v4131_v13 = vsel %vm4130_vm9, %v4122_v54, %v8981_v39  ;;  %v2306_v44 = vmax.f32 %v2265_v36, 0.0  ;;  %v4132_v55 = vsel %vm4130_vm9, %v4123_v5, %v8982_v63  ;;  %v2409_v11 = vrot.slane %v2301_v23, 2 }
 0x350   : > { %v4140_v40 = vsel %vm4139_vm10, %v4131_v13, %v8986_v9  ;;  %v4141_v52 = vsel %vm4139_vm10, %v4132_v55, %v8987_v31  ;;  %v8992_v9 = vunpack.i.h.bf16 %v11403_v34  ;;  %v2410_v36 = vrot.slane %v2301_v23, 4  ;;  %v9344_v55 = vld [vmem:[#allocation2 + $0x20] sm:$0xff] }
 0x351   : > { %4210 = vmatmul.f32.vlgmr.msrb.gmra.mxu1 %v4140_v40  ;;  %v2424_v28 = vrot.slane %v2306_v44, 2  ;;  %v2425_v16 = vrot.slane %v2306_v44, 4  ;;  %v2426_v20 = vrot.slane %v2306_v44, 6  ;;  %v3292_v30 = vsel %vm14371_vm14, %v2306_v44, -inf  ;;  %vm14376_vm14 = vmmov %vm14365_vm0 }
 0x352   : > { %v3293_v38 = vrot.slane %v3292_v30, 4  ;;  %v11429_v53 = vsel %vm14376_vm14, %v2406_v47, -inf  ;;  %v8991_v63 = vunpack.i.l.bf16 %v11403_v34  ;;  %v4089_v47 = vsel %vm3432_vm11, %v11154_v41, %v8992_v9  ;;  %vm14382_vm14 = vmmov %vm14381_vm2 }
 0x353   : > { %v3299_v18 = vsel %vm14365_vm0, %v2424_v28, -inf  ;;  %v3306_v24 = vsel %vm14373_vm13, %v2425_v16, -inf  ;;  %v3313_v4 = vsel %vm14374_vm15, %v2426_v20, -inf  ;;  %vm14378_vm0 = vcmask 1042434   ;;  %v11440_v40 = vpop.permute.xlu1 %8999  ;;  %vm14379_vm13 = vmmov %vm14377_vm12 }
 0x354   : > { %v11424_v35 = vpop.permute.xlu0 %8994  ;;  %v3294_v19 = vmax.f32 %v3292_v30, %v3293_v38  ;;  %v3300_v62 = vrot.slane %v3299_v18, 4  ;;  %v3307_v43 = vrot.slane %v3306_v24, 4  ;;  %v3314_v0 = vrot.slane %v3313_v4, 4  ;;  %vm14383_vm12 = vmmov %vm14381_vm2 }
 0x355   : > { %v3759_v54 = vsel %vm14378_vm0, %v3585_v51, %v3758_v2  ;;  %v2411_v46 = vrot.slane %v2301_v23, 6  ;;  %v3152_v22 = vsel %vm14379_vm13, %v2301_v23, -inf  ;;  %vm14380_vm15 = vcmask 1043459  }
 0x356   : > { %v3295_v25 = vrot.slane %v3294_v19, 2  ;;  %v3301_v39 = vmax.f32 %v3299_v18, %v3300_v62  ;;  %v3308_v37 = vmax.f32 %v3306_v24, %v3307_v43  ;;  %v3315_v33 = vmax.f32 %v3313_v4, %v3314_v0 }
 0x357   : > { %v3760_v61 = vsel %vm14380_vm15, %v3588_v17, %v3759_v54  ;;  %v3159_v44 = vsel %vm14381_vm2, %v2409_v11, -inf  ;;  %v3166_v34 = vsel %vm14382_vm14, %v2410_v36, -inf  ;;  %v4088_v28 = vsel %vm3432_vm11, %v9344_v55, %v8991_v63  ;;  %v9020_v54 = vpop.permute.xlu2 %9019  ;;  %vm14386_vm15 = vmmov %vm14381_vm2 }
 0x358   : > { %v3296_v13 = vmax.f32 %v3294_v19, %v3295_v25  ;;  %v3302_v10 = vrot.slane %v3301_v39, 2  ;;  %v3309_v7 = vrot.slane %v3308_v37, 2  ;;  %v3316_v56 = vrot.slane %v3315_v33, 2 }
 0x359   : > { %4213 = vmatmul.f32.gmra.mxu1 %v4141_v52  ;;  %v3153_v41 = vrot.slane %v3152_v22, 4  ;;  %v8996_v20 = vunpack.i.l.bf16 %v11424_v35  ;;  %v3173_v30 = vsel %vm14383_vm12, %v2411_v46, -inf  ;;  %v3160_v24 = vrot.slane %v3159_v44, 4 }
 0x35a   : > { %v3297_v5 = vrot.slane %v3296_v13, 1  ;;  %v3303_v14 = vmax.f32 %v3301_v39, %v3302_v10  ;;  %v3310_v3 = vmax.f32 %v3308_v37, %v3309_v7  ;;  %v3317_v31 = vmax.f32 %v3315_v33, %v3316_v56 }
 0x35b   : > { %v3167_v4 = vrot.slane %v3166_v34, 4  ;;  %v4097_v48 = vsel %vm4094_vm3, %v4088_v28, %v8996_v20  ;;  %v3154_v43 = vmax.f32 %v3152_v22, %v3153_v41  ;;  %v8997_v0 = vunpack.i.h.bf16 %v11424_v35 }
 0x35c   : > { %v3298_v16 = vmax.f32 %v3296_v13, %v3297_v5  ;;  %v3304_v15 = vrot.slane %v3303_v14, 1  ;;  %v3311_v23 = vrot.slane %v3310_v3, 1  ;;  %v3318_v38 = vrot.slane %v3317_v31, 1  ;;  %v9010_v18 = vpop.permute.xlu0 %9009 }
 0x35d   : > { %v9001_v9 = vunpack.i.l.bf16 %v11440_v40  ;;  %v9011_v11 = vunpack.i.l.bf16 %v9010_v18  ;;  %vm14384_vm0 = vcmask 1044484   ;;  %v3161_v36 = vmax.f32 %v3159_v44, %v3160_v24 }
 0x35e   : > { %v3590_v51 = vsel %vm3432_vm11, %v3298_v16, -inf  ;;  %v3305_v2 = vmax.f32 %v3303_v14, %v3304_v15  ;;  %v3312_v52 = vmax.f32 %v3310_v3, %v3311_v23  ;;  %v3319_v19 = vmax.f32 %v3317_v31, %v3318_v38 }
 0x35f   : > { %v3591_v62 = vmax.f32 %v11372_v29, %v3590_v51  ;;  %v4106_v35 = vsel %vm4103_vm5, %v4097_v48, %v9001_v9  ;;  %v3168_v13 = vmax.f32 %v3166_v34, %v3167_v4  ;;  %v3174_v10 = vrot.slane %v3173_v30, 4 }
 0x360   : > { %v3593_v39 = vsel %vm3432_vm11, %v3305_v2, -inf  ;;  %v3596_v37 = vsel %vm3432_vm11, %v3312_v52, -inf  ;;  %v3599_v33 = vsel %vm3432_vm11, %v3319_v19, -inf  ;;  %v9002_v7 = vunpack.i.h.bf16 %v11440_v40 }
 0x361   : > { %v3761_v17 = vsel %vm14384_vm0, %v3591_v62, %v3760_v61  ;;  %v3594_v63 = vmax.f32 %v11385_v21, %v3593_v39  ;;  %v3597_v29 = vmax.f32 %v11394_v1, %v3596_v37  ;;  %v3600_v22 = vmax.f32 %v11399_v57, %v3599_v33  ;;  %vm14389_vm0 = vmmov %vm14383_vm12 }
 0x362   : > { %v9015_v25 = vpop.permute.xlu1 %9014  ;;  %vm14385_vm13 = vcmask 1045509   ;;  %v4098_v5 = vsel %vm4094_vm3, %v4089_v47, %v8997_v0  ;;  %v4115_v61 = vsel %vm4112_vm6, %v4106_v35, %v9006_v32  ;;  %v3145_v21 = vsel %vm14386_vm15, %v2408_v45, -inf  ;;  %vm14391_vm15 = vmmov %vm14389_vm0 }
 0x363   : > { %v9016_v46 = vunpack.i.l.bf16 %v9015_v25  ;;  %v3762_v56 = vsel %vm14385_vm13, %v3594_v63, %v3761_v17  ;;  %v9021_v1 = vunpack.i.l.bf16 %v9020_v54  ;;  %vm14387_vm2 = vcmask 1046534   ;;  %vm14390_vm13 = vmmov %vm14389_vm0 }
 0x364   : > { %v3763_v44 = vsel %vm14387_vm2, %v3597_v29, %v3762_v56  ;;  %v4124_v34 = vsel %vm4121_vm7, %v4115_v61, %v9011_v11  ;;  %v3126_v40 = vmax.f32 %v11415_v42, %v3125_v58  ;;  %v3162_v57 = vrot.slane %v3161_v36, 2 }
 0x365   : > { %vm14388_vm14 = vcmask 1047559   ;;  %v4133_v47 = vsel %vm4130_vm9, %v4124_v34, %v9016_v46  ;;  %v3155_v3 = vrot.slane %v3154_v43, 2  ;;  %v4107_v59 = vsel %vm4103_vm5, %v4098_v5, %v9002_v7 }
 0x366   : > { %v3764_v14 = vsel %vm14388_vm14, %v3600_v22, %v3763_v44  ;;  %v9012_v45 = vunpack.i.h.bf16 %v9010_v18  ;;  %v4142_v32 = vsel %vm4139_vm10, %v4133_v47, %v9021_v1  ;;  %v9007_v31 = vunpack.i.h.bf16 %v11437_v6 }
 0x367   : > { %3787 = vst.msk [vmem:[#allocation2 + $0x71] sm:$0xff] %vm3432_vm11, %v3764_v14  ;;  %v3169_v55 = vrot.slane %v3168_v13, 2  ;;  %v3175_v28 = vmax.f32 %v3173_v30, %v3174_v10  ;;  %v9017_v41 = vunpack.i.h.bf16 %v9015_v25  ;;  %4216 = vmatmul.f32.gmra.mxu1 %v4142_v32  ;;  %v3101_v42 = vrot.slane %v11357_v26, 1 }
 0x368   : > { %v3108_v58 = vrot.slane %v11360_v8, 1  ;;  %v3121_v16 = vmax.f32 %v11340_v27, %v3120_v49  ;;  %v3132_v20 = vrot.slane %v11429_v53, 4  ;;  %v3139_v15 = vrot.slane %v11433_v60, 4 }
 0x369   : > { %v3163_v23 = vmax.f32 %v3161_v36, %v3162_v57  ;;  %v4116_v38 = vsel %vm4112_vm6, %v4107_v59, %v9007_v31  ;;  %v3115_v6 = vrot.slane %v11362_v12, 1  ;;  %v3146_v30 = vrot.slane %v3145_v21, 4 }
 0x36a   : > { %v3156_v18 = vmax.f32 %v3154_v43, %v3155_v3  ;;  %v4125_v24 = vsel %vm4121_vm7, %v4116_v38, %v9012_v45  ;;  %v3127_v4 = vrot.slane %v3126_v40, 2  ;;  %v3170_v51 = vmax.f32 %v3168_v13, %v3169_v55 }
 0x36b   : > { %v3176_v48 = vrot.slane %v3175_v28, 2  ;;  %v4134_v2 = vsel %vm4130_vm9, %v4125_v24, %v9017_v41  ;;  %v3122_v52 = vrot.slane %v3121_v16, 1  ;;  %v9022_v27 = vunpack.i.h.bf16 %v9020_v54 }
 0x36c   : > { %v3102_v49 = vmax.f32 %v11357_v26, %v3101_v42  ;;  %v3133_v19 = vmax.f32 %v11429_v53, %v3132_v20  ;;  %v3140_v62 = vmax.f32 %v11433_v60, %v3139_v15  ;;  %v3164_v0 = vrot.slane %v3163_v23, 1 }
 0x36d   : > { %v3109_v9 = vmax.f32 %v11360_v8, %v3108_v58  ;;  %v3116_v43 = vmax.f32 %v11362_v12, %v3115_v6  ;;  %v3157_v11 = vrot.slane %v3156_v18, 1  ;;  %v4143_v25 = vsel %vm4139_vm10, %v4134_v2, %v9022_v27 }
 0x36e   : > { %v3128_v39 = vmax.f32 %v3126_v40, %v3127_v4  ;;  %v3147_v37 = vmax.f32 %v3145_v21, %v3146_v30  ;;  %v3171_v33 = vrot.slane %v3170_v51, 1  ;;  %v3177_v17 = vmax.f32 %v3175_v28, %v3176_v48 }
 0x36f   : > { %4219 = vmatmul.f32.gmra.mxu1 %v4143_v25  ;;  %v3123_v36 = vmax.f32 %v3121_v16, %v3122_v52  ;;  %v3553_v53 = vsel %vm3432_vm11, %v3102_v49, -inf  ;;  %v3134_v60 = vrot.slane %v3133_v19, 2  ;;  %v3141_v63 = vrot.slane %v3140_v62, 2 }
 0x370   : > { %v3165_v29 = vmax.f32 %v3163_v23, %v3164_v0  ;;  %v3556_v8 = vsel %vm3432_vm11, %v3109_v9, -inf  ;;  %v3559_v12 = vsel %vm3432_vm11, %v3116_v43, -inf  ;;  %v3158_v35 = vmax.f32 %v3156_v18, %v3157_v11 }
 0x371   : > { %v3129_v10 = vrot.slane %v3128_v39, 1  ;;  %v3148_v7 = vrot.slane %v3147_v37, 2  ;;  %v3172_v46 = vmax.f32 %v3170_v51, %v3171_v33  ;;  %v3178_v22 = vrot.slane %v3177_v17, 1 }
 0x372   : > { %v3135_v1 = vmax.f32 %v3133_v19, %v3134_v60  ;;  %v3142_v44 = vmax.f32 %v3140_v62, %v3141_v63  ;;  %v3557_v34 = vsel %vm3432_vm11, %v3165_v29, -inf  ;;  %v3554_v57 = vsel %vm3432_vm11, %v3158_v35, -inf }
 0x373   : > { %v3149_v55 = vmax.f32 %v3147_v37, %v3148_v7  ;;  %v3179_v28 = vmax.f32 %v3177_v17, %v3178_v22  ;;  %v3558_v41 = vmax.f32 %v3556_v8, %v3557_v34  ;;  %v3560_v42 = vsel %vm3432_vm11, %v3172_v46, -inf }
 0x374   : > { %v2252_v54 = vpop.f32.mrf.mxu0  ;;  %v3130_v23 = vmax.f32 %v3128_v39, %v3129_v10  ;;  %v3136_v38 = vrot.slane %v3135_v1, 1  ;;  %v3143_v6 = vrot.slane %v3142_v44, 1  ;;  %v3555_v30 = vmax.f32 %v3553_v53, %v3554_v57 }
 0x375   : > { %v2253_v26 = vadd.f32 %v11377_v50, %v2252_v54  ;;  %v3150_v48 = vrot.slane %v3149_v55, 1  ;;  %v3561_v2 = vmax.f32 %v3559_v12, %v3560_v42  ;;  %v3563_v52 = vsel %vm3432_vm11, %v3179_v28, -inf }
 0x376   : > { %vm14392_vm2 = vcmask 1041409   ;;  %v3562_v9 = vsel %vm3432_vm11, %v3123_v36, -inf  ;;  %v3137_v43 = vmax.f32 %v3135_v1, %v3136_v38  ;;  %v3144_v11 = vmax.f32 %v3142_v44, %v3143_v6 }
 0x377   : > { %v2302_v13 = vmax.f32 %v2253_v26, 0.0  ;;  %v3751_v27 = vsel %vm14392_vm2, %v3558_v41, %v3555_v30  ;;  %v3151_v17 = vmax.f32 %v3149_v55, %v3150_v48  ;;  %v3565_v54 = vsel %vm3432_vm11, %v3130_v23, -inf }
 0x378   : > { %v3564_v26 = vmax.f32 %v3562_v9, %v3563_v52  ;;  %vm14393_vm14 = vcmask 1042434   ;;  %v3568_v12 = vsel %vm3432_vm11, %v3137_v43, -inf  ;;  %v3571_v36 = vsel %vm3432_vm11, %v3144_v11, -inf }
 0x379   : > { %v2412_v56 = vrot.slane %v2302_v13, 2  ;;  %v2413_v5 = vrot.slane %v2302_v13, 4  ;;  %v2414_v61 = vrot.slane %v2302_v13, 6  ;;  %v3180_v21 = vsel %vm14383_vm12, %v2302_v13, -inf }
 0x37a   : > { %v3181_v40 = vrot.slane %v3180_v21, 4  ;;  %v3752_v53 = vsel %vm14393_vm14, %v3561_v2, %v3751_v27  ;;  %vm14394_vm12 = vcmask 1043459   ;;  %vm14398_vm2 = vcmask 1047559  }
 0x37b   : > { %v3187_v14 = vsel %vm14389_vm0, %v2412_v56, -inf  ;;  %v3194_v47 = vsel %vm14390_vm13, %v2413_v5, -inf  ;;  %v3201_v3 = vsel %vm14391_vm15, %v2414_v61, -inf  ;;  %v3753_v13 = vsel %vm14394_vm12, %v3564_v26, %v3752_v53  ;;  %v2267_v57 = vpop.f32.mrf.mxu1 }
 0x37c   : > { %v3182_v59 = vmax.f32 %v3180_v21, %v3181_v40  ;;  %v3188_v45 = vrot.slane %v3187_v14, 4  ;;  %v3195_v32 = vrot.slane %v3194_v47, 4  ;;  %v3202_v31 = vrot.slane %v3201_v3, 4  ;;  %v3825_v40 = vld [vmem:[#allocation2 + $0x51] sm:$0xff] }
 0x37d   : > { %vm14395_vm0 = vcmask 1044484   ;;  %v3574_v61 = vsel %vm3432_vm11, %v3151_v17, -inf  ;;  %vm14396_vm13 = vcmask 1045509   ;;  %vm14397_vm15 = vcmask 1046534  }
 0x37e   : > { %v3183_v58 = vrot.slane %v3182_v59, 2  ;;  %v3189_v16 = vmax.f32 %v3187_v14, %v3188_v45  ;;  %v3196_v20 = vmax.f32 %v3194_v47, %v3195_v32  ;;  %v3203_v15 = vmax.f32 %v3201_v3, %v3202_v31  ;;  %v3817_v45 = vld [vmem:[#allocation2 + $0x50] sm:$0xff] }
 0x37f   : > { %v3833_v32 = vld [vmem:[#allocation2 + $0x52] sm:$0xff]  ;;  %v2268_v31 = vadd.f32 %v11377_v50, %v2267_v57  ;;  %vm14399_vm14 = vcmask 123904  }
 0x380   : > { %v3184_v18 = vmax.f32 %v3182_v59, %v3183_v58  ;;  %v3190_v24 = vrot.slane %v3189_v16, 2  ;;  %v3197_v4 = vrot.slane %v3196_v20, 2  ;;  %v3204_v51 = vrot.slane %v3203_v15, 2  ;;  %v3859_v58 = vld [vmem:[#allocation2 + $0x72] sm:$0xff]  ;;  %vm14402_vm12 = vmmov %vm14399_vm14 }
 0x381   : > { %v2307_v41 = vmax.f32 %v2268_v31, 0.0 }
 0x382   : > { %v3185_v49 = vrot.slane %v3184_v18, 1  ;;  %v3191_v19 = vmax.f32 %v3189_v16, %v3190_v24  ;;  %v3198_v62 = vmax.f32 %v3196_v20, %v3197_v4  ;;  %v3205_v0 = vmax.f32 %v3203_v15, %v3204_v51  ;;  %v11537_v16 = vld [vmem:[#allocation2 + $0x71] sm:$0xff] }
 0x383   : > { %v11541_v15 = vld [vmem:[#allocation2 + $0x70] sm:$0xff]  ;;  %v2427_v23 = vrot.slane %v2307_v41, 2  ;;  %v2428_v6 = vrot.slane %v2307_v41, 4  ;;  %v3320_v30 = vsel %vm14399_vm14, %v2307_v41, -inf }
 0x384   : > { %v3186_v25 = vmax.f32 %v3184_v18, %v3185_v49  ;;  %v3192_v39 = vrot.slane %v3191_v19, 1  ;;  %v3199_v37 = vrot.slane %v3198_v62, 1  ;;  %v3206_v33 = vrot.slane %v3205_v0, 1 }
 0x385   : > { %v2429_v18 = vrot.slane %v2307_v41, 6  ;;  %v3327_v24 = vsel %vm14402_vm12, %v2427_v23, -inf  ;;  %v3321_v4 = vrot.slane %v3320_v30, 4 }
 0x386   : > { %v3193_v60 = vmax.f32 %v3191_v19, %v3192_v39  ;;  %v3200_v63 = vmax.f32 %v3198_v62, %v3199_v37  ;;  %v3207_v29 = vmax.f32 %v3205_v0, %v3206_v33  ;;  %v3566_v8 = vsel %vm3432_vm11, %v3186_v25, -inf }
 0x387   : > { %v3567_v35 = vmax.f32 %v3565_v54, %v3566_v8  ;;  %v3328_v27 = vrot.slane %v3327_v24, 4  ;;  %v3322_v9 = vmax.f32 %v3320_v30, %v3321_v4 }
 0x388   : > { %v3569_v10 = vsel %vm3432_vm11, %v3193_v60, -inf  ;;  %v3572_v7 = vsel %vm3432_vm11, %v3200_v63, -inf  ;;  %v3575_v46 = vsel %vm3432_vm11, %v3207_v29, -inf }
 0x389   : > { %v3570_v22 = vmax.f32 %v3568_v12, %v3569_v10  ;;  %v3573_v56 = vmax.f32 %v3571_v36, %v3572_v7  ;;  %v3754_v5 = vsel %vm14395_vm0, %v3567_v35, %v3753_v13  ;;  %v3576_v21 = vmax.f32 %v3574_v61, %v3575_v46  ;;  %vm14403_vm0 = vmmov %vm14402_vm12 }
 0x38a   : > { %v3334_v51 = vsel %vm14403_vm0, %v2428_v6, -inf  ;;  %v3329_v33 = vmax.f32 %v3327_v24, %v3328_v27  ;;  %vm14408_vm14 = vmmov %vm14403_vm0  ;;  %v3323_v8 = vrot.slane %v3322_v9, 2 }
 0x38b   : > { %v3755_v1 = vsel %vm14396_vm13, %v3570_v22, %v3754_v5  ;;  %v3335_v49 = vrot.slane %v3334_v51, 4  ;;  %vm14404_vm13 = vmmov %vm14403_vm0 }
 0x38c   : > { %v3756_v44 = vsel %vm14397_vm15, %v3573_v56, %v3755_v1  ;;  %v3341_v19 = vsel %vm14404_vm13, %v2429_v18, -inf  ;;  %vm14405_vm15 = vmmov %vm14403_vm0  ;;  %v3330_v13 = vrot.slane %v3329_v33, 2 }
 0x38d   : > { %v3757_v34 = vsel %vm14398_vm2, %v3576_v21, %v3756_v44  ;;  %v2270_v42 = vpop.f32.mrf.mxu1  ;;  %v3342_v17 = vrot.slane %v3341_v19, 4  ;;  %v3336_v54 = vmax.f32 %v3334_v51, %v3335_v49  ;;  %vm14407_vm2 = vmmov %vm14403_vm0  ;;  %v3324_v44 = vmax.f32 %v3322_v9, %v3323_v8 }
 0x38e   : > { %3786 = vst.msk [vmem:[#allocation2 + $0x61] sm:$0xff] %vm3432_vm11, %v3757_v34  ;;  %v2271_v48 = vadd.f32 %v11377_v50, %v2270_v42  ;;  %vm14409_vm12 = vmmov %vm14403_vm0 }
 0x38f   : > { %v3343_v10 = vmax.f32 %v3341_v19, %v3342_v17  ;;  %v3337_v46 = vrot.slane %v3336_v54, 2  ;;  %vm14410_vm13 = vmmov %vm14403_vm0  ;;  %v3325_v42 = vrot.slane %v3324_v44, 1 }
 0x390   : > { %v2308_v43 = vmax.f32 %v2271_v48, 0.0 }
 0x391   : > { %v3344_v57 = vrot.slane %v3343_v10, 2 }
 0x392   : > { %v2430_v12 = vrot.slane %v2308_v43, 2  ;;  %v3348_v36 = vsel %vm14409_vm12, %v2308_v43, -inf  ;;  %v2431_v22 = vrot.slane %v2308_v43, 4  ;;  %v2432_v56 = vrot.slane %v2308_v43, 6  ;;  %vm14414_vm12 = vmmov %vm14403_vm0 }
 0x393   : > { %v3349_v61 = vrot.slane %v3348_v36, 4 }
 0x394   : > { %v3355_v34 = vsel %vm14410_vm13, %v2430_v12, -inf  ;;  %vm14415_vm13 = vmmov %vm14403_vm0 }
 0x395   : > { %v3858_v14 = vld [vmem:[#allocation2 + $0x62] sm:$0xff]  ;;  %v3350_v31 = vmax.f32 %v3348_v36, %v3349_v61 }
 0x396   : > { %v3826_v47 = vld [vmem:[#allocation2 + $0x61] sm:$0xff]  ;;  %8748 = vmatmul.msk.f32.gmra.mxu2 %vm3432_vm11, %v3858_v14  ;;  %v9043_v28 = vpack.i.bf16 %v3858_v14, %v3833_v32  ;;  %v9063_v0 = vpack.i.bf16 %v3859_v58, %v3858_v14 }
 0x397   : > { %v11529_v3 = vld [vmem:[#allocation2 + $0x60] sm:$0xff]  ;;  %v9038_v59 = vpack.i.bf16 %v3826_v47, %v3825_v40  ;;  %v9053_v20 = vpack.i.bf16 %v11537_v16, %v3826_v47  ;;  %v3331_v40 = vmax.f32 %v3329_v33, %v3330_v13  ;;  %v3338_v47 = vmax.f32 %v3336_v54, %v3337_v46 }
 0x398   : > { %v9033_v55 = vpack.i.bf16 %v11529_v3, %v3817_v45  ;;  %9044 = vrot.lane.b32.xlu1 %v9043_v28, %s9425_s26  ;;  %v9048_v38 = vpack.i.bf16 %v11541_v15, %v11529_v3  ;;  %v3351_v24 = vrot.slane %v3350_v31, 2 }
 0x399   : > { %9039 = vrot.lane.b32.xlu0 %v9038_v59, %s9424_s21  ;;  %v3332_v30 = vrot.slane %v3331_v40, 1 }
 0x39a   : > { %9034 = vrot.lane.b32.xlu2 %v9033_v55, %s9426_s27  ;;  %v3356_v55 = vrot.slane %v3355_v34, 4  ;;  %v3352_v43 = vmax.f32 %v3350_v31, %v3351_v24 }
 0x39c   : > { %v3357_v4 = vmax.f32 %v3355_v34, %v3356_v55  ;;  %v3353_v36 = vrot.slane %v3352_v43, 1 }
 0x39e   : > { %8749 = vmatmul.msk.f32.gmra.mxu2 %vm3432_vm11, %v3859_v58 }
 0x3a0   : > { %9059 = vrot.lane.b32.xlu1 %v9053_v20, %s14401_s0 }
 0x3a1   : > { %9054 = vrot.lane.b32.xlu0 %v9053_v20, %s9427_s19  ;;  %v3345_v20 = vmax.f32 %v3343_v10, %v3344_v57 }
 0x3a2   : > { %9049 = vrot.lane.b32.xlu2 %v9048_v38, %s14400_s24 }
 0x3a4   : > { %v2273_v2 = vpop.f32.mrf.mxu1 }
 0x3a5   : > { %v2274_v52 = vadd.f32 %v11377_v50, %v2273_v2  ;;  %v3326_v2 = vmax.f32 %v3324_v44, %v3325_v42 }
 0x3a7   : > { %v2309_v62 = vmax.f32 %v2274_v52, 0.0  ;;  %v3346_v52 = vrot.slane %v3345_v20, 1  ;;  %v3601_v33 = vsel %vm3432_vm11, %v3326_v2, -inf }
 0x3a9   : > { %v2433_v11 = vrot.slane %v2309_v62, 2  ;;  %v2434_v25 = vrot.slane %v2309_v62, 4  ;;  %v2435_v39 = vrot.slane %v2309_v62, 6  ;;  %v3376_v37 = vsel %vm14405_vm15, %v2309_v62, -inf  ;;  %vm14411_vm15 = vmmov %vm14403_vm0 }
 0x3aa   : > { %9064 = vrot.lane.b32.xlu2 %v9063_v0, %s14406_s22  ;;  %v3377_v26 = vrot.slane %v3376_v37, 4  ;;  %v3362_v59 = vsel %vm14411_vm15, %v2431_v22, -inf  ;;  %v3333_v62 = vmax.f32 %v3331_v40, %v3332_v30  ;;  %v3347_v54 = vmax.f32 %v3345_v20, %v3346_v52 }
 0x3ab   : > { %v3383_v53 = vsel %vm14407_vm2, %v2433_v11, -inf  ;;  %v3390_v60 = vsel %vm14408_vm14, %v2434_v25, -inf  ;;  %v3397_v35 = vsel %vm14403_vm0, %v2435_v39, -inf  ;;  %vm14412_vm2 = vmmov %vm14403_vm0  ;;  %v3363_v23 = vrot.slane %v3362_v59, 4 }
 0x3ac   : > { %v3384_v63 = vrot.slane %v3383_v53, 4  ;;  %v3391_v29 = vrot.slane %v3390_v60, 4  ;;  %v3378_v5 = vmax.f32 %v3376_v37, %v3377_v26  ;;  %v3398_v1 = vrot.slane %v3397_v35, 4  ;;  %vm14413_vm14 = vmmov %vm14403_vm0 }
 0x3ad   : > { %v3369_v45 = vsel %vm14412_vm2, %v2432_v56, -inf  ;;  %v3364_v27 = vmax.f32 %v3362_v59, %v3363_v23  ;;  %v3358_v11 = vrot.slane %v3357_v4, 2  ;;  %v3354_v23 = vmax.f32 %v3352_v43, %v3353_v36 }
 0x3ae   : > { %v3385_v7 = vmax.f32 %v3383_v53, %v3384_v63  ;;  %v3392_v21 = vmax.f32 %v3390_v60, %v3391_v29  ;;  %v3379_v32 = vrot.slane %v3378_v5, 2  ;;  %v3399_v41 = vmax.f32 %v3397_v35, %v3398_v1 }
 0x3af   : > { %v3370_v38 = vrot.slane %v3369_v45, 4  ;;  %v3365_v26 = vrot.slane %v3364_v27, 2  ;;  %v3604_v63 = vsel %vm3432_vm11, %v3333_v62, -inf  ;;  %v3359_v35 = vmax.f32 %v3357_v4, %v3358_v11  ;;  %v11581_v11 = vld [vmem:[%s14275_s4] ss:$0 sm:$0xff] }
 0x3b0   : > { %v3386_v14 = vrot.slane %v3385_v7, 2  ;;  %v3393_v28 = vrot.slane %v3392_v21, 2  ;;  %v3380_v18 = vmax.f32 %v3378_v5, %v3379_v32  ;;  %v3400_v48 = vrot.slane %v3399_v41, 2 }
 0x3b1   : > { %v3371_v49 = vmax.f32 %v3369_v45, %v3370_v38  ;;  %v3360_v45 = vrot.slane %v3359_v35, 1  ;;  %vm14416_vm15 = vcmask 1041409   ;;  %vm14417_vm2 = vcmask 1042434  }
 0x3b2   : > { %4010 = vrot.lane.b32.xlu2 %v3859_v58, %s9425_s26  ;;  %v3387_v6 = vmax.f32 %v3385_v7, %v3386_v14  ;;  %v3339_v58 = vrot.slane %v3338_v47, 1  ;;  %v3394_v51 = vmax.f32 %v3392_v21, %v3393_v28  ;;  %v3381_v9 = vrot.slane %v3380_v18, 1 }
 0x3b3   : > { %v3401_v39 = vmax.f32 %v3399_v41, %v3400_v48  ;;  %v3372_v53 = vrot.slane %v3371_v49, 2 }
 0x3b4   : > { %v3388_v19 = vrot.slane %v3387_v6, 1  ;;  %v3340_v0 = vmax.f32 %v3338_v47, %v3339_v58  ;;  %v3395_v25 = vrot.slane %v3394_v51, 1  ;;  %v3382_v8 = vmax.f32 %v3380_v18, %v3381_v9 }
 0x3b5   : > { %v3402_v10 = vrot.slane %v3401_v39, 1  ;;  %v3373_v5 = vmax.f32 %v3371_v49, %v3372_v53 }
 0x3b6   : > { %v3389_v60 = vmax.f32 %v3387_v6, %v3388_v19  ;;  %v3607_v29 = vsel %vm3432_vm11, %v3340_v0, -inf  ;;  %v3396_v13 = vmax.f32 %v3394_v51, %v3395_v25  ;;  %v3602_v1 = vsel %vm3432_vm11, %v3382_v8, -inf }
 0x3b7   : > { %v3403_v32 = vmax.f32 %v3401_v39, %v3402_v10  ;;  %v3374_v6 = vrot.slane %v3373_v5, 1  ;;  %v3603_v30 = vmax.f32 %v3601_v33, %v3602_v1  ;;  %v3361_v51 = vmax.f32 %v3359_v35, %v3360_v45 }
 0x3b8   : > { %v3605_v61 = vsel %vm3432_vm11, %v3389_v60, -inf  ;;  %v3608_v55 = vsel %vm3432_vm11, %v3396_v13, -inf  ;;  %v3610_v0 = vsel %vm3432_vm11, %v3347_v54, -inf }
 0x3b9   : > { %v3606_v31 = vmax.f32 %v3604_v63, %v3605_v61  ;;  %v3609_v48 = vmax.f32 %v3607_v29, %v3608_v55  ;;  %v3611_v2 = vsel %vm3432_vm11, %v3403_v32, -inf  ;;  %v3375_v43 = vmax.f32 %v3373_v5, %v3374_v6 }
 0x3ba   : > { %v3612_v53 = vmax.f32 %v3610_v0, %v3611_v2 }
 0x3bb   : > { %v2276_v37 = vpop.f32.mrf.mxu1  ;;  %v3765_v52 = vsel %vm14416_vm15, %v3606_v31, %v3603_v30  ;;  %v3622_v1 = vsel %vm3432_vm11, %v3375_v43, -inf  ;;  %vm4340_vm15 = vcmask 25600  }
 0x3bc   : > { %v2277_v17 = vadd.f32 %v11377_v50, %v2276_v37  ;;  %v3366_v50 = vmax.f32 %v3364_v27, %v3365_v26  ;;  %v3616_v26 = vsel %vm3432_vm11, %v3361_v51, -inf  ;;  %v3766_v60 = vsel %vm14417_vm2, %v3609_v48, %v3765_v52 }
 0x3bd   : > { %vm14422_vm2 = vcmask 1046534  }
 0x3be   : > { %v2310_v12 = vmax.f32 %v2277_v17, 0.0  ;;  %v3367_v38 = vrot.slane %v3366_v50, 1  ;;  %v3613_v17 = vsel %vm3432_vm11, %v3354_v23, -inf }
 0x3c0   : > { %v2436_v7 = vrot.slane %v2310_v12, 2  ;;  %v2437_v46 = vrot.slane %v2310_v12, 4  ;;  %v2438_v22 = vrot.slane %v2310_v12, 6  ;;  %v3404_v56 = vsel %vm14413_vm14, %v2310_v12, -inf }
 0x3c1   : > { %v3405_v21 = vrot.slane %v3404_v56, 4  ;;  %v3368_v9 = vmax.f32 %v3366_v50, %v3367_v38  ;;  %vm4614_vm14 = vcmask 29696   ;;  %v4252_v50 = vpop.f32.mrf.mxu2 }
 0x3c2   : > { %v3411_v44 = vsel %vm14414_vm12, %v2436_v7, -inf  ;;  %v3418_v34 = vsel %vm14403_vm0, %v2437_v46, -inf  ;;  %v3425_v40 = vsel %vm14415_vm13, %v2438_v22, -inf  ;;  %vm14418_vm12 = vcmask 1043459  }
 0x3c3   : > { %v3406_v57 = vmax.f32 %v3404_v56, %v3405_v21  ;;  %v3412_v14 = vrot.slane %v3411_v44, 4  ;;  %v3419_v47 = vrot.slane %v3418_v34, 4  ;;  %v3426_v59 = vrot.slane %v3425_v40, 4 }
 0x3c4   : > { %v3619_v36 = vsel %vm3432_vm11, %v3368_v9, -inf  ;;  %v3767_v10 = vsel %vm14418_vm12, %v3612_v53, %v3766_v60  ;;  %v14419_v56 = vmov 0.0   ;;  %vm14420_vm0 = vcmask 1044484  }
 0x3c5   : > { %v3407_v28 = vrot.slane %v3406_v57, 2  ;;  %v3413_v41 = vmax.f32 %v3411_v44, %v3412_v14  ;;  %v3420_v42 = vmax.f32 %v3418_v34, %v3419_v47  ;;  %v3427_v20 = vmax.f32 %v3425_v40, %v3426_v59  ;;  %4615 = vst.msk [vmem:[#allocation3] sm:$0x3f] %vm4614_vm14, %v14419_v56 }
 0x3c6   : > { %4616 = vst.msk [vmem:[#allocation3 + $0x8] sm:$0x3f] %vm4614_vm14, %v14419_v56  ;;  %vm14421_vm13 = vcmask 1045509   ;;  %vm14423_vm12 = vcmask 1047559  }
 0x3c7   : > { %v3408_v58 = vmax.f32 %v3406_v57, %v3407_v28  ;;  %v3414_v18 = vrot.slane %v3413_v41, 2  ;;  %v3421_v24 = vrot.slane %v3420_v42, 2  ;;  %v3428_v4 = vrot.slane %v3427_v20, 2  ;;  %4620 = vst.msk [vmem:[#allocation3 + $0x28] sm:$0x3f] %vm4614_vm14, %v14419_v56 }
 0x3c8   : > { %4617 = vst.msk [vmem:[#allocation3 + $0x10] sm:$0x3f] %vm4614_vm14, %v14419_v56 }
 0x3c9   : > { %v3409_v27 = vrot.slane %v3408_v58, 1  ;;  %v3415_v49 = vmax.f32 %v3413_v41, %v3414_v18  ;;  %v3422_v19 = vmax.f32 %v3420_v42, %v3421_v24  ;;  %v3429_v62 = vmax.f32 %v3427_v20, %v3428_v4  ;;  %4618 = vst.msk [vmem:[#allocation3 + $0x18] sm:$0x3f] %vm4614_vm14, %v14419_v56  ;;  %v4255_v6 = vpop.f32.mrf.mxu2 }
 0x3ca   : > { %4619 = vst.msk [vmem:[#allocation3 + $0x20] sm:$0x3f] %vm4614_vm14, %v14419_v56  ;;  %vm4565_vm14 = vcmask 31744  }
 0x3cb   : > { %v3410_v25 = vmax.f32 %v3408_v58, %v3409_v27  ;;  %v3416_v39 = vrot.slane %v3415_v49, 1  ;;  %v3423_v37 = vrot.slane %v3422_v19, 1  ;;  %v3430_v33 = vrot.slane %v3429_v62, 1 }
 0x3cc   : > { %v4659_v42 = vld [vmem:[#allocation3] sm:$0xf] }
 0x3cd   : > { %v3417_v54 = vmax.f32 %v3415_v49, %v3416_v39  ;;  %v3424_v29 = vmax.f32 %v3422_v19, %v3423_v37  ;;  %v3431_v8 = vmax.f32 %v3429_v62, %v3430_v33  ;;  %v3614_v12 = vsel %vm3432_vm11, %v3410_v25, -inf  ;;  %4700 = vst [vmem:[#allocation1] ss:$2 sm:$0xff] %v4659_v42 }
 0x3ce   : > { %v4211_v63 = vpop.f32.mrf.mxu1  ;;  %v3615_v35 = vmax.f32 %v3613_v17, %v3614_v12 }
 0x3cf   : > { %v4212_v13 = vadd.f32 %v11581_v11, %v4211_v63  ;;  %v3617_v7 = vsel %vm3432_vm11, %v3417_v54, -inf  ;;  %v3620_v46 = vsel %vm3432_vm11, %v3424_v29, -inf  ;;  %v3623_v22 = vsel %vm3432_vm11, %v3431_v8, -inf }
 0x3d0   : > { %v3618_v5 = vmax.f32 %v3616_v26, %v3617_v7  ;;  %v3621_v61 = vmax.f32 %v3619_v36, %v3620_v46  ;;  %v3768_v21 = vsel %vm14420_vm0, %v3615_v35, %v3767_v10  ;;  %v3624_v34 = vmax.f32 %v3622_v1, %v3623_v22 }
 0x3d1   : > { %v4253_v44 = vadd.f32 %v4252_v50, %v4212_v13  ;;  %vm4654_vm0 = vcmask 27648  }
 0x3d2   : > { %v3769_v40 = vsel %vm14421_vm13, %v3618_v5, %v3768_v21  ;;  %vm14424_vm13 = vcmask 1041409  }
 0x3d3   : > { %v3770_v57 = vsel %vm14422_vm2, %v3621_v61, %v3769_v40  ;;  %v4276_v14 = vmax.f32 %v4253_v44, 0.0  ;;  %vm14425_vm2 = vcmask 1042434  }
 0x3d4   : > { %v3771_v47 = vsel %vm14423_vm12, %v3624_v34, %v3770_v57  ;;  %vm14426_vm12 = vcmask 1043459  }
 0x3d5   : > { %3788 = vst.msk [vmem:[#allocation2 + $0x81] sm:$0xff] %vm3432_vm11, %v3771_v47  ;;  %v4292_v45 = vrot.slane %v4276_v14, 2  ;;  %v4293_v32 = vrot.slane %v4276_v14, 4  ;;  %v4294_v31 = vrot.slane %v4276_v14, 6  ;;  %v4341_v55 = vsel %vm4340_vm15, %v4276_v14, -inf }
 0x3d6   : > { %v4214_v59 = vpop.f32.mrf.mxu1  ;;  %v4342_v28 = vrot.slane %v4341_v55, 4 }
 0x3d7   : > { %v4215_v41 = vadd.f32 %v11581_v11, %v4214_v59  ;;  %v4348_v20 = vsel %vm4340_vm15, %v4292_v45, -inf  ;;  %v4355_v23 = vsel %vm4340_vm15, %v4293_v32, -inf  ;;  %v4362_v38 = vsel %vm4340_vm15, %v4294_v31, -inf }
 0x3d8   : > { %v4343_v30 = vmax.f32 %v4341_v55, %v4342_v28  ;;  %v4349_v58 = vrot.slane %v4348_v20, 4  ;;  %v4356_v18 = vrot.slane %v4355_v23, 4  ;;  %v4363_v24 = vrot.slane %v4362_v38, 4 }
 0x3d9   : > { %v4256_v4 = vadd.f32 %v4255_v6, %v4215_v41 }
 0x3da   : > { %v4344_v51 = vrot.slane %v4343_v30, 2  ;;  %v4350_v48 = vmax.f32 %v4348_v20, %v4349_v58  ;;  %v4357_v2 = vmax.f32 %v4355_v23, %v4356_v18  ;;  %v4364_v52 = vmax.f32 %v4362_v38, %v4363_v24  ;;  %v4258_v20 = vpop.f32.mrf.mxu2 }
 0x3db   : > { %v4277_v27 = vmax.f32 %v4256_v4, 0.0 }
 0x3dc   : > { %v4351_v49 = vrot.slane %v4350_v48, 2  ;;  %v4358_v19 = vrot.slane %v4357_v2, 2  ;;  %v4365_v62 = vrot.slane %v4364_v52, 2  ;;  %v3860_v0 = vld [vmem:[#allocation2 + $0x82] sm:$0xff]  ;;  %v4345_v37 = vmax.f32 %v4343_v30, %v4344_v51 }
 0x3dd   : > { %v4295_v9 = vrot.slane %v4277_v27, 2  ;;  %v4296_v43 = vrot.slane %v4277_v27, 4  ;;  %v4297_v25 = vrot.slane %v4277_v27, 6  ;;  %v4369_v39 = vsel %vm4340_vm15, %v4277_v27, -inf  ;;  %8750 = vmatmul.msk.f32.gmra.mxu2 %vm3432_vm11, %v3860_v0  ;;  %4012 = vrot.lane.b32.xlu2 %v3860_v0, %s9425_s26  ;;  %v3820_v35 = vld [vmem:[#allocation2 + $0x80] sm:$0xff]  ;;  %s9430_s26 = smov 8  }
 0x3de   : > { %v4370_v33 = vrot.slane %v4369_v39, 4  ;;  %v4352_v60 = vmax.f32 %v4350_v48, %v4351_v49  ;;  %v4359_v63 = vmax.f32 %v4357_v2, %v4358_v19  ;;  %v4366_v54 = vmax.f32 %v4364_v52, %v4365_v62  ;;  %v3828_v56 = vld [vmem:[#allocation2 + $0x81] sm:$0xff] }
 0x3df   : > { %v4376_v17 = vsel %vm4340_vm15, %v4295_v9, -inf  ;;  %v4383_v26 = vsel %vm4340_vm15, %v4296_v43, -inf  ;;  %v4390_v53 = vsel %vm4340_vm15, %v4297_v25, -inf  ;;  %v4346_v13 = vrot.slane %v4345_v37, 1 }
 0x3e0   : > { %v4371_v29 = vmax.f32 %v4369_v39, %v4370_v33  ;;  %v4377_v8 = vrot.slane %v4376_v17, 4  ;;  %v4384_v12 = vrot.slane %v4383_v26, 4  ;;  %v4391_v36 = vrot.slane %v4390_v53, 4 }
 0x3e1   : > { %v4353_v50 = vrot.slane %v4352_v60, 1  ;;  %v4360_v5 = vrot.slane %v4359_v63, 1  ;;  %v4367_v61 = vrot.slane %v4366_v54, 1  ;;  %v9068_v21 = vpack.i.bf16 %v3820_v35, %v11541_v15 }
 0x3e2   : > { %v4372_v10 = vrot.slane %v4371_v29, 2  ;;  %v4378_v7 = vmax.f32 %v4376_v17, %v4377_v8  ;;  %v4385_v46 = vmax.f32 %v4383_v26, %v4384_v12  ;;  %v4392_v22 = vmax.f32 %v4390_v53, %v4391_v36 }
 0x3e3   : > { %v4347_v57 = vmax.f32 %v4345_v37, %v4346_v13  ;;  %9069 = vrot.lane.b32.xlu0 %v9068_v21, %s9426_s27  ;;  %v9073_v14 = vpack.i.bf16 %v3828_v56, %v11537_v16  ;;  %v4354_v55 = vmax.f32 %v4352_v60, %v4353_v50  ;;  %v4361_v28 = vmax.f32 %v4359_v63, %v4360_v5  ;;  %v3845_v50 = vld [vmem:[#allocation2 + $0x90] sm:$0xff]  ;;  %s9431_s27 = smov 20  }
 0x3e4   : > { %v4373_v1 = vmax.f32 %v4371_v29, %v4372_v10  ;;  %v4379_v44 = vrot.slane %v4378_v7, 2  ;;  %v4386_v34 = vrot.slane %v4385_v46, 2  ;;  %v4393_v40 = vrot.slane %v4392_v22, 2  ;;  %v4217_v31 = vpop.f32.mrf.mxu1  ;;  %v3853_v21 = vld [vmem:[#allocation2 + $0x91] sm:$0xff] }
 0x3e5   : > { %v4368_v41 = vmax.f32 %v4366_v54, %v4367_v61  ;;  %9074 = vrot.lane.b32.xlu1 %v9073_v14, %s9424_s21  ;;  %v4218_v42 = vadd.f32 %v11581_v11, %v4217_v31  ;;  %v4566_v51 = vsel %vm4565_vm14, %v4347_v57, -inf  ;;  %v4569_v48 = vsel %vm4565_vm14, %v4354_v55, -inf  ;;  %s9429_s21 = smov 4  }
 0x3e6   : > { %v4374_v47 = vrot.slane %v4373_v1, 1  ;;  %v4380_v59 = vmax.f32 %v4378_v7, %v4379_v44  ;;  %v4387_v45 = vmax.f32 %v4385_v46, %v4386_v34  ;;  %v4394_v32 = vmax.f32 %v4392_v22, %v4393_v40 }
 0x3e7   : > { %v4259_v58 = vadd.f32 %v4258_v20, %v4218_v42  ;;  %v4572_v2 = vsel %vm4565_vm14, %v4361_v28, -inf  ;;  %v4575_v27 = vsel %vm4565_vm14, %v4368_v41, -inf }
 0x3e8   : > { %v4375_v23 = vmax.f32 %v4373_v1, %v4374_v47  ;;  %v4381_v38 = vrot.slane %v4380_v59, 1  ;;  %v4388_v6 = vrot.slane %v4387_v45, 1  ;;  %v4395_v30 = vrot.slane %v4394_v32, 1 }
 0x3e9   : > { %v4278_v52 = vmax.f32 %v4259_v58, 0.0 }
 0x3ea   : > { %v4382_v16 = vmax.f32 %v4380_v59, %v4381_v38  ;;  %v4389_v18 = vmax.f32 %v4387_v45, %v4388_v6  ;;  %v4396_v24 = vmax.f32 %v4394_v32, %v4395_v30  ;;  %v4567_v4 = vsel %vm4565_vm14, %v4375_v23, -inf }
 0x3eb   : > { %v4568_v0 = vmax.f32 %v4566_v51, %v4567_v4  ;;  %v4298_v25 = vrot.slane %v4278_v52, 2  ;;  %4042 = vrot.lane.b32.xlu0 %v3820_v35, %s14400_s24  ;;  %v4299_v37 = vrot.slane %v4278_v52, 4  ;;  %v4300_v33 = vrot.slane %v4278_v52, 6  ;;  %v4261_v35 = vpop.f32.mrf.mxu2 }
 0x3ec   : > { %v4570_v49 = vsel %vm4565_vm14, %v4382_v16, -inf  ;;  %v4573_v19 = vsel %vm4565_vm14, %v4389_v18, -inf  ;;  %v4576_v62 = vsel %vm4565_vm14, %v4396_v24, -inf  ;;  %v4397_v17 = vsel %vm4340_vm15, %v4278_v52, -inf  ;;  %v4220_v26 = vpop.f32.mrf.mxu1 }
 0x3ed   : > { %v4571_v9 = vmax.f32 %v4569_v48, %v4570_v49  ;;  %v4574_v43 = vmax.f32 %v4572_v2, %v4573_v19  ;;  %v4577_v39 = vmax.f32 %v4575_v27, %v4576_v62  ;;  %v4398_v60 = vrot.slane %v4397_v17, 4  ;;  %4074 = vrot.lane.b32.xlu1 %v3828_v56, %s9427_s19  ;;  %v11652_v2 = vpop.permute.xlu0 %9024  ;;  %v4663_v62 = vld [vmem:[#allocation3 + $0x1] sm:$0xf] }
 0x3ee   : > { %v4404_v63 = vsel %vm4340_vm15, %v4298_v25, -inf  ;;  %v4221_v54 = vadd.f32 %v11581_v11, %v4220_v26  ;;  %v4411_v12 = vsel %vm4340_vm15, %v4299_v37, -inf  ;;  %v4418_v36 = vsel %vm4340_vm15, %v4300_v33, -inf }
 0x3ef   : > { %v4637_v53 = vsel %vm14424_vm13, %v4571_v9, %v4568_v0  ;;  %v4405_v8 = vrot.slane %v4404_v63, 4  ;;  %v4412_v10 = vrot.slane %v4411_v12, 4  ;;  %v4419_v7 = vrot.slane %v4418_v36, 4 }
 0x3f0   : > { %v4638_v29 = vsel %vm14425_vm2, %v4574_v43, %v4637_v53  ;;  %v4399_v46 = vmax.f32 %v4397_v17, %v4398_v60  ;;  %v4262_v22 = vadd.f32 %v4261_v35, %v4221_v54  ;;  %v11654_v43 = vpop.permute.xlu1 %9029  ;;  %v9026_v33 = vunpack.i.l.bf16 %v11652_v2 }
 0x3f1   : > { %v4639_v13 = vsel %vm14426_vm12, %v4577_v39, %v4638_v29  ;;  %v4406_v56 = vmax.f32 %v4404_v63, %v4405_v8  ;;  %v4413_v5 = vmax.f32 %v4411_v12, %v4412_v10  ;;  %v4420_v1 = vmax.f32 %v4418_v36, %v4419_v7 }
 0x3f2   : > { %4655 = vst.msk [vmem:[#allocation3 + $0x9] sm:$0xf] %vm4654_vm0, %v4639_v13  ;;  %v4279_v61 = vmax.f32 %v4262_v22, 0.0  ;;  %v4400_v44 = vrot.slane %v4399_v46, 2  ;;  %v9031_v35 = vunpack.i.l.bf16 %v11654_v43 }
 0x3f3   : > { %4044 = vrot.lane.b32.xlu0 %v3845_v50, %s14400_s24  ;;  %v4407_v57 = vrot.slane %v4406_v56, 2  ;;  %v4414_v14 = vrot.slane %v4413_v5, 2  ;;  %v4421_v55 = vrot.slane %v4420_v1, 2  ;;  %v9345_v50 = vld [vmem:[#allocation2 + $0x40] sm:$0xff] }
 0x3f4   : > { %v4301_v34 = vrot.slane %v4279_v61, 2  ;;  %v4302_v40 = vrot.slane %v4279_v61, 4  ;;  %v4425_v47 = vsel %vm4340_vm15, %v4279_v61, -inf  ;;  %v4303_v59 = vrot.slane %v4279_v61, 6  ;;  %v11659_v63 = vpop.permute.xlu2 %9034 }
 0x3f5   : > { %4076 = vrot.lane.b32.xlu1 %v3853_v21, %s9427_s19  ;;  %v4426_v45 = vrot.slane %v4425_v47, 4  ;;  %v4401_v41 = vmax.f32 %v4399_v46, %v4400_v44  ;;  %v4408_v20 = vmax.f32 %v4406_v56, %v4407_v57  ;;  %v4415_v23 = vmax.f32 %v4413_v5, %v4414_v14  ;;  %s9432_s19 = smov 28  }
 0x3f6   : > { %v4432_v32 = vsel %vm4340_vm15, %v4301_v34, -inf  ;;  %v4439_v28 = vsel %vm4340_vm15, %v4302_v40, -inf  ;;  %v4446_v58 = vsel %vm4340_vm15, %v4303_v59, -inf  ;;  %v4422_v16 = vmax.f32 %v4420_v1, %v4421_v55 }
 0x3f7   : > { %v4427_v42 = vmax.f32 %v4425_v47, %v4426_v45  ;;  %v4433_v38 = vrot.slane %v4432_v32, 4  ;;  %v4440_v30 = vrot.slane %v4439_v28, 4  ;;  %v4447_v24 = vrot.slane %v4446_v58, 4 }
 0x3f8   : > { %v4402_v4 = vrot.slane %v4401_v41, 1  ;;  %v4409_v52 = vrot.slane %v4408_v20, 1  ;;  %v4416_v27 = vrot.slane %v4415_v23, 1  ;;  %v4423_v25 = vrot.slane %v4422_v16, 1 }
 0x3f9   : > { %v4660_v31 = vld [vmem:[#allocation3 + $0x8] sm:$0xf]  ;;  %v4428_v6 = vrot.slane %v4427_v42, 2  ;;  %v4434_v18 = vmax.f32 %v4432_v32, %v4433_v38  ;;  %v4441_v48 = vmax.f32 %v4439_v28, %v4440_v30  ;;  %v4448_v19 = vmax.f32 %v4446_v58, %v4447_v24 }
 0x3fa   : > { %4702 = vst [vmem:[#allocation1 + $0x1] ss:$2 sm:$0xff] %v4660_v31  ;;  %v4403_v26 = vmax.f32 %v4401_v41, %v4402_v4  ;;  %v4664_v54 = vld [vmem:[#allocation3 + $0x9] sm:$0xf]  ;;  %v4410_v29 = vmax.f32 %v4408_v20, %v4409_v52  ;;  %v4417_v8 = vmax.f32 %v4415_v23, %v4416_v27  ;;  %v4424_v10 = vmax.f32 %v4422_v16, %v4423_v25  ;;  %v4667_v31 = vld [vmem:[#allocation3 + $0x2] sm:$0xf] }
 0x3fb   : > { %v4429_v51 = vmax.f32 %v4427_v42, %v4428_v6  ;;  %v4435_v49 = vrot.slane %v4434_v18, 2  ;;  %v4442_v9 = vrot.slane %v4441_v48, 2  ;;  %v4449_v37 = vrot.slane %v4448_v19, 2  ;;  %v4668_v24 = vld [vmem:[#allocation3 + $0xa] sm:$0xf] }
 0x3fc   : > { %v4090_v56 = vsel %vm3432_vm11, %v9345_v50, %v9026_v33  ;;  %v4578_v5 = vsel %vm4565_vm14, %v4403_v26, -inf  ;;  %v9036_v21 = vunpack.i.l.bf16 %v11659_v63  ;;  %v4581_v1 = vsel %vm4565_vm14, %v4410_v29, -inf }
 0x3fd   : > { %v4430_v0 = vrot.slane %v4429_v51, 1  ;;  %v4436_v39 = vmax.f32 %v4434_v18, %v4435_v49  ;;  %v4443_v60 = vmax.f32 %v4441_v48, %v4442_v9  ;;  %v4450_v36 = vmax.f32 %v4448_v19, %v4449_v37 }
 0x3fe   : > { %v4584_v44 = vsel %vm4565_vm14, %v4417_v8, -inf  ;;  %v4099_v32 = vsel %vm4094_vm3, %v4090_v56, %v9031_v35  ;;  %v4587_v55 = vsel %vm4565_vm14, %v4424_v10, -inf  ;;  %v9027_v18 = vunpack.i.h.bf16 %v11652_v2 }
 0x3ff   : > { %v4431_v53 = vmax.f32 %v4429_v51, %v4430_v0  ;;  %v4437_v12 = vrot.slane %v4436_v39, 1  ;;  %v4444_v13 = vrot.slane %v4443_v60, 1  ;;  %v4451_v46 = vrot.slane %v4450_v36, 1  ;;  %v9050_v51 = vpop.permute.xlu2 %9049 }
 0x400   : > { %v4108_v38 = vsel %vm4103_vm5, %v4099_v32, %v9036_v21  ;;  %v9032_v48 = vunpack.i.h.bf16 %v11654_v43  ;;  %v9037_v52 = vunpack.i.h.bf16 %v11659_v63  ;;  %v9051_v49 = vunpack.i.l.bf16 %v9050_v51 }
 0x401   : > { %v11657_v17 = vld.sshfl [vmem:[#allocation1] sm:$0xff pattern:$0x75316420]  ;;  %v4438_v7 = vmax.f32 %v4436_v39, %v4437_v12  ;;  %v4579_v22 = vsel %vm4565_vm14, %v4431_v53, -inf  ;;  %v4445_v61 = vmax.f32 %v4443_v60, %v4444_v13  ;;  %v4452_v34 = vmax.f32 %v4450_v36, %v4451_v46  ;;  %v4671_v53 = vld [vmem:[#allocation3 + $0x8] sm:$0xf] }
 0x402   : > { %4715 = vst [vmem:[#allocation1] ss:$2 sm:$0xff] %v4663_v62  ;;  %v4580_v14 = vmax.f32 %v4578_v5, %v4579_v22  ;;  %v9346_v62 = vld [vmem:[#allocation2 + $0x50] sm:$0xff]  ;;  %v9052_v8 = vunpack.i.h.bf16 %v9050_v51  ;;  %v4675_v13 = vld [vmem:[#allocation3 + $0x9] sm:$0xf] }
 0x403   : > { %4717 = vst [vmem:[#allocation1 + $0x1] ss:$2 sm:$0xff] %v4664_v54  ;;  %v4582_v40 = vsel %vm4565_vm14, %v4438_v7, -inf  ;;  %v4585_v59 = vsel %vm4565_vm14, %v4445_v61, -inf  ;;  %v4588_v41 = vsel %vm4565_vm14, %v4452_v34, -inf  ;;  %v4091_v0 = vsel %vm3432_vm11, %v9346_v62, %v9027_v18  ;;  %v3861_v61 = vld [vmem:[#allocation2 + $0x92] sm:$0xff] }
 0x404   : > { %v4583_v47 = vmax.f32 %v4581_v1, %v4582_v40  ;;  %v4586_v28 = vmax.f32 %v4584_v44, %v4585_v59  ;;  %v4589_v20 = vmax.f32 %v4587_v55, %v4588_v41  ;;  %v4100_v25 = vsel %vm4094_vm3, %v4091_v0, %v9032_v48  ;;  %v4679_v46 = vld [vmem:[#allocation3 + $0xa] sm:$0xf]  ;;  %8751 = vmatmul.msk.f32.gmra.mxu2 %vm3432_vm11, %v3861_v61 }
 0x405   : > { %v4109_v43 = vsel %vm4103_vm5, %v4100_v25, %v9037_v52 }
 0x406   : > { %v4640_v23 = vsel %vm14424_vm13, %v4583_v47, %v4580_v14 }
 0x407   : > { %v4641_v30 = vsel %vm14425_vm2, %v4586_v28, %v4640_v23  ;;  %v9065_v44 = vpop.permute.xlu2 %9064 }
 0x408   : > { %v4642_v4 = vsel %vm14426_vm12, %v4589_v20, %v4641_v30  ;;  %v9066_v40 = vunpack.i.l.bf16 %v9065_v44 }
 0x409   : > { %4656 = vst.msk [vmem:[#allocation3 + $0x11] sm:$0xf] %vm4654_vm0, %v4642_v4 }
 0x40a   : > { %v9045_v42 = vpop.permute.xlu1 %9044  ;;  %v4722_v6 = vld.sshfl [vmem:[#allocation1] sm:$0xff pattern:$0x75316420] }
 0x40b   : > { %v9040_v57 = vpop.permute.xlu0 %9039  ;;  %v9046_v16 = vunpack.i.l.bf16 %v9045_v42  ;;  %4734 = vst [vmem:[#allocation1] ss:$2 sm:$0xff] %v4667_v31  ;;  %4724 = vrot.lane.b32.xlu2 %v4722_v6, %s9429_s21  ;;  %v9047_v37 = vunpack.i.h.bf16 %v9045_v42  ;;  %v9067_v42 = vunpack.i.h.bf16 %v9065_v44 }
 0x40c   : > { %v9041_v45 = vunpack.i.l.bf16 %v9040_v57  ;;  %4736 = vst [vmem:[#allocation1 + $0x1] ss:$2 sm:$0xff] %v4668_v24  ;;  %v9042_v19 = vunpack.i.h.bf16 %v9040_v57 }
 0x40e   : > { %v4117_v58 = vsel %vm4112_vm6, %v4108_v38, %v9041_v45  ;;  %v4118_v26 = vsel %vm4112_vm6, %v4109_v43, %v9042_v19 }
 0x40f   : > { %v4126_v27 = vsel %vm4121_vm7, %v4117_v58, %v9046_v16  ;;  %v4127_v29 = vsel %vm4121_vm7, %v4118_v26, %v9047_v37  ;;  %v4011_v20 = vpop.permute.xlu2 %4010 }
 0x410   : > { %v4135_v39 = vsel %vm4130_vm9, %v4126_v27, %v9051_v49  ;;  %v4661_v63 = vld [vmem:[#allocation3 + $0x10] sm:$0xf]  ;;  %v4136_v36 = vsel %vm4130_vm9, %v4127_v29, %v9052_v8 }
 0x411   : > { %v4672_v12 = vld [vmem:[#allocation3 + $0x10] sm:$0xf]  ;;  %4704 = vst [vmem:[#allocation1 + $0x10] ss:$2 sm:$0xff] %v4661_v63 }
 0x412   : > { %v4676_v7 = vld [vmem:[#allocation3 + $0x11] sm:$0xf]  ;;  %v9060_v21 = vpop.permute.xlu1 %9059 }
 0x413   : > { %v9055_v2 = vpop.permute.xlu0 %9054  ;;  %v4741_v60 = vld.sshfl [vmem:[#allocation1] sm:$0xff pattern:$0x75316420]  ;;  %v4680_v50 = vld [vmem:[#allocation3 + $0x12] sm:$0xf]  ;;  %v9061_v1 = vunpack.i.l.bf16 %v9060_v21  ;;  %v9062_v47 = vunpack.i.h.bf16 %v9060_v21 }
 0x414   : > { %v9056_v9 = vunpack.i.l.bf16 %v9055_v2  ;;  %4753 = vst [vmem:[#allocation1] ss:$2 sm:$0xff] %v4671_v53  ;;  %4743 = vrot.lane.b32.xlu0 %v4741_v60, %s9430_s26  ;;  %v9057_v54 = vunpack.i.h.bf16 %v9055_v2  ;;  %v4684_v56 = vld [vmem:[#allocation3 + $0x10] sm:$0xf] }
 0x415   : > { %4755 = vst [vmem:[#allocation1 + $0x1] ss:$2 sm:$0xff] %v4672_v12  ;;  %v4092_v34 = vsel %vm3432_vm11, %v11529_v3, %v9061_v1  ;;  %v4093_v28 = vsel %vm3432_vm11, %v11541_v15, %v9062_v47 }
 0x416   : > { %v4144_v33 = vsel %vm4139_vm10, %v4135_v39, %v9056_v9  ;;  %v4145_v35 = vsel %vm4139_vm10, %v4136_v36, %v9057_v54  ;;  %v4101_v59 = vsel %vm4094_vm3, %v4092_v34, %v9066_v40  ;;  %v4102_v38 = vsel %vm4094_vm3, %v4093_v28, %v9067_v42 }
 0x417   : > { %4222 = vmatmul.f32.gmra.mxu1 %v4144_v33 }
 0x419   : > { %v4264_v49 = vpop.f32.mrf.mxu2 }
 0x41c   : > { %v4760_v10 = vld.sshfl [vmem:[#allocation1] sm:$0xff pattern:$0x75316420] }
 0x41d   : > { %4772 = vst [vmem:[#allocation1] ss:$2 sm:$0xff] %v4675_v13  ;;  %4762 = vrot.lane.b32.xlu1 %v4760_v10, %s14342_s15 }
 0x41e   : > { %4774 = vst [vmem:[#allocation1 + $0x1] ss:$2 sm:$0xff] %v4676_v7 }
 0x41f   : > { %4225 = vmatmul.f32.gmra.mxu1 %v4145_v35 }
 0x421   : > { %v4267_v54 = vpop.f32.mrf.mxu2 }
 0x425   : > { %v4779_v22 = vld.sshfl [vmem:[#allocation1] sm:$0xff pattern:$0x75316420] }
 0x426   : > { %4791 = vst [vmem:[#allocation1] ss:$2 sm:$0xff] %v4679_v46  ;;  %4781 = vrot.lane.b32.xlu2 %v4779_v22, %s14401_s0 }
 0x427   : > { %4793 = vst [vmem:[#allocation1 + $0x1] ss:$2 sm:$0xff] %v4680_v50 }
 0x42e   : > { %v4798_v5 = vld.sshfl [vmem:[#allocation1] sm:$0xff pattern:$0x75316420] }
 0x42f   : > { %4810 = vst [vmem:[#allocation1] ss:$2 sm:$0xff] %v4684_v56  ;;  %4800 = vrot.lane.b32.xlu0 %v4798_v5, %s9431_s27 }
 0x437   : > { %v4013_v15 = vpop.permute.xlu2 %4012 }
 0x455   : > { %v9070_v57 = vpop.permute.xlu0 %9069 }
 0x456   : > { %v9071_v14 = vunpack.i.l.bf16 %v9070_v57  ;;  %v9072_v41 = vunpack.i.h.bf16 %v9070_v57 }
 0x457   : > { %v9075_v45 = vpop.permute.xlu1 %9074 }
 0x458   : > { %v4110_v32 = vsel %vm4103_vm5, %v4101_v59, %v9071_v14  ;;  %v9076_v31 = vunpack.i.l.bf16 %v9075_v45  ;;  %v9077_v6 = vunpack.i.h.bf16 %v9075_v45  ;;  %v4111_v58 = vsel %vm4103_vm5, %v4102_v38, %v9072_v41  ;;  %vm14427_vm5 = vmmov %vm14424_vm13 }
 0x45a   : > { %v4119_v55 = vsel %vm4112_vm6, %v4110_v32, %v9076_v31  ;;  %v4120_v24 = vsel %vm4112_vm6, %v4111_v58, %v9077_v6  ;;  %vm14428_vm6 = vmmov %vm14425_vm2 }
 0x45b   : > { %v4128_v3 = vsel %vm4121_vm7, %v4119_v55, %v4011_v20  ;;  %v4129_v51 = vsel %vm4121_vm7, %v4120_v24, %v4013_v15  ;;  %vm14429_vm7 = vmmov %vm14426_vm12  ;;  %vm4865_vm12 = vcmask 64512  }
 0x45c   : > { %vm14432_vm13 = vmmov %vm14429_vm7 }
 0x45d   : > { %v4043_v23 = vpop.permute.xlu0 %4042 }
 0x45e   : > { %v4137_v30 = vsel %vm4130_vm9, %v4128_v3, %v4043_v23 }
 0x45f   : > { %v4075_v16 = vpop.permute.xlu1 %4074 }
 0x460   : > { %v4146_v18 = vsel %vm4139_vm10, %v4137_v30, %v4075_v16 }
 0x461   : > { %4228 = vmatmul.f32.gmra.mxu1 %v4146_v18 }
 0x465   : > { %v4045_v4 = vpop.permute.xlu0 %4044 }
 0x466   : > { %v4138_v48 = vsel %vm4130_vm9, %v4129_v51, %v4045_v4  ;;  %vm14430_vm9 = vmmov %vm14427_vm5 }
 0x467   : > { %v4077_v52 = vpop.permute.xlu1 %4076 }
 0x468   : > { %v4147_v27 = vsel %vm4139_vm10, %v4138_v48, %v4077_v52  ;;  %vm14431_vm10 = vmmov %vm14425_vm2  ;;  %vm4898_vm2 = vcmask 1043456  }
 0x469   : > { %4231 = vmatmul.f32.gmra.mxu1 %v4147_v27 }
 0x494   : > { %v4223_v19 = vpop.f32.mrf.mxu1 }
 0x495   : > { %v4224_v2 = vadd.f32 %v11581_v11, %v4223_v19 }
 0x497   : > { %v4265_v62 = vadd.f32 %v4264_v49, %v4224_v2 }
 0x499   : > { %v4280_v0 = vmax.f32 %v4265_v62, 0.0 }
 0x49b   : > { %v4304_v9 = vrot.slane %v4280_v0, 2  ;;  %v4305_v25 = vrot.slane %v4280_v0, 4  ;;  %v4306_v39 = vrot.slane %v4280_v0, 6  ;;  %v4453_v43 = vsel %vm4340_vm15, %v4280_v0, -inf }
 0x49c   : > { %v4454_v37 = vrot.slane %v4453_v43, 4  ;;  %v4226_v33 = vpop.f32.mrf.mxu1 }
 0x49d   : > { %v4460_v26 = vsel %vm4340_vm15, %v4304_v9, -inf  ;;  %v4467_v53 = vsel %vm4340_vm15, %v4305_v25, -inf  ;;  %v4474_v60 = vsel %vm4340_vm15, %v4306_v39, -inf  ;;  %v4227_v63 = vadd.f32 %v11581_v11, %v4226_v33 }
 0x49e   : > { %v4455_v29 = vmax.f32 %v4453_v43, %v4454_v37  ;;  %v4461_v8 = vrot.slane %v4460_v26, 4  ;;  %v4468_v12 = vrot.slane %v4467_v53, 4  ;;  %v4475_v36 = vrot.slane %v4474_v60, 4 }
 0x49f   : > { %v4268_v35 = vadd.f32 %v4267_v54, %v4227_v63 }
 0x4a0   : > { %v4462_v13 = vmax.f32 %v4460_v26, %v4461_v8  ;;  %v4469_v10 = vmax.f32 %v4467_v53, %v4468_v12  ;;  %v4476_v7 = vmax.f32 %v4474_v60, %v4475_v36  ;;  %v4456_v22 = vrot.slane %v4455_v29, 2 }
 0x4a1   : > { %v4281_v46 = vmax.f32 %v4268_v35, 0.0 }
 0x4a2   : > { %v4463_v50 = vrot.slane %v4462_v13, 2  ;;  %v4470_v56 = vrot.slane %v4469_v10, 2  ;;  %v4477_v44 = vrot.slane %v4476_v7, 2  ;;  %v4457_v47 = vmax.f32 %v4455_v29, %v4456_v22 }
 0x4a3   : > { %v4307_v5 = vrot.slane %v4281_v46, 2  ;;  %v4308_v61 = vrot.slane %v4281_v46, 4  ;;  %v4309_v21 = vrot.slane %v4281_v46, 6  ;;  %v4481_v1 = vsel %vm4340_vm15, %v4281_v46, -inf }
 0x4a4   : > { %v4482_v34 = vrot.slane %v4481_v1, 4  ;;  %v4464_v59 = vmax.f32 %v4462_v13, %v4463_v50  ;;  %v4471_v45 = vmax.f32 %v4469_v10, %v4470_v56  ;;  %v4478_v41 = vmax.f32 %v4476_v7, %v4477_v44  ;;  %v4665_v56 = vld [vmem:[#allocation3 + $0x11] sm:$0xf] }
 0x4a5   : > { %v4488_v40 = vsel %vm4340_vm15, %v4307_v5, -inf  ;;  %v4495_v57 = vsel %vm4340_vm15, %v4308_v61, -inf  ;;  %v4502_v14 = vsel %vm4340_vm15, %v4309_v21, -inf  ;;  %v4458_v38 = vrot.slane %v4457_v47, 1 }
 0x4a6   : > { %v4483_v32 = vmax.f32 %v4481_v1, %v4482_v34  ;;  %v4489_v31 = vrot.slane %v4488_v40, 4  ;;  %v4496_v55 = vrot.slane %v4495_v57, 4  ;;  %v4503_v28 = vrot.slane %v4502_v14, 4  ;;  %v4688_v1 = vld [vmem:[#allocation3 + $0x11] sm:$0xf] }
 0x4a7   : > { %v4465_v6 = vrot.slane %v4464_v59, 1  ;;  %v4472_v30 = vrot.slane %v4471_v45, 1  ;;  %v4479_v15 = vrot.slane %v4478_v41, 1  ;;  %v4459_v27 = vmax.f32 %v4457_v47, %v4458_v38  ;;  %v4669_v34 = vld [vmem:[#allocation3 + $0x12] sm:$0xf] }
 0x4a8   : > { %v4484_v42 = vrot.slane %v4483_v32, 2  ;;  %v4490_v20 = vmax.f32 %v4488_v40, %v4489_v31  ;;  %v4497_v23 = vmax.f32 %v4495_v57, %v4496_v55  ;;  %v4504_v3 = vmax.f32 %v4502_v14, %v4503_v28  ;;  %v4692_v57 = vld [vmem:[#allocation3 + $0x12] sm:$0xf]  ;;  %v4270_v55 = vpop.f32.mrf.mxu2 }
 0x4a9   : > { %v4466_v49 = vmax.f32 %v4464_v59, %v4465_v6  ;;  %v4473_v19 = vmax.f32 %v4471_v45, %v4472_v30  ;;  %v4480_v25 = vmax.f32 %v4478_v41, %v4479_v15  ;;  %v4590_v26 = vsel %vm4565_vm14, %v4459_v27, -inf }
 0x4aa   : > { %v4485_v58 = vmax.f32 %v4483_v32, %v4484_v42  ;;  %v4491_v16 = vrot.slane %v4490_v20, 2  ;;  %v4498_v18 = vrot.slane %v4497_v23, 2  ;;  %v4505_v24 = vrot.slane %v4504_v3, 2 }
 0x4ab   : > { %v4593_v53 = vsel %vm4565_vm14, %v4466_v49, -inf  ;;  %v4596_v60 = vsel %vm4565_vm14, %v4473_v19, -inf  ;;  %v4599_v35 = vsel %vm4565_vm14, %v4480_v25, -inf }
 0x4ac   : > { %v4486_v4 = vrot.slane %v4485_v58, 1  ;;  %v4492_v51 = vmax.f32 %v4490_v20, %v4491_v16  ;;  %v4499_v48 = vmax.f32 %v4497_v23, %v4498_v18  ;;  %v4506_v52 = vmax.f32 %v4504_v3, %v4505_v24 }
 0x4ae   : > { %v4487_v2 = vmax.f32 %v4485_v58, %v4486_v4  ;;  %v4493_v62 = vrot.slane %v4492_v51, 1  ;;  %v4500_v0 = vrot.slane %v4499_v48, 1  ;;  %v4507_v9 = vrot.slane %v4506_v52, 1 }
 0x4b0   : > { %v4494_v39 = vmax.f32 %v4492_v51, %v4493_v62  ;;  %v4501_v43 = vmax.f32 %v4499_v48, %v4500_v0  ;;  %v4508_v37 = vmax.f32 %v4506_v52, %v4507_v9  ;;  %v4591_v33 = vsel %vm4565_vm14, %v4487_v2, -inf  ;;  %v4273_v16 = vpop.f32.mrf.mxu2 }
 0x4b1   : > { %v4592_v8 = vmax.f32 %v4590_v26, %v4591_v33 }
 0x4b2   : > { %v4594_v63 = vsel %vm4565_vm14, %v4494_v39, -inf  ;;  %v4597_v54 = vsel %vm4565_vm14, %v4501_v43, -inf  ;;  %v4600_v29 = vsel %vm4565_vm14, %v4508_v37, -inf }
 0x4b3   : > { %v4595_v12 = vmax.f32 %v4593_v53, %v4594_v63  ;;  %v4598_v36 = vmax.f32 %v4596_v60, %v4597_v54  ;;  %v4601_v13 = vmax.f32 %v4599_v35, %v4600_v29 }
 0x4b5   : > { %v4643_v10 = vsel %vm14427_vm5, %v4595_v12, %v4592_v8  ;;  %vm4872_vm5 = vcmask 162816  }
 0x4b6   : > { %v4644_v7 = vsel %vm14428_vm6, %v4598_v36, %v4643_v10  ;;  %vm4877_vm6 = vcmask 228352  }
 0x4b7   : > { %v4645_v46 = vsel %vm14429_vm7, %v4601_v13, %v4644_v7  ;;  %vm4891_vm7 = vcmask 293888  }
 0x4b8   : > { %4657 = vst.msk [vmem:[#allocation3 + $0x19] sm:$0xf] %vm4654_vm0, %v4645_v46 }
 0x4bf   : > { %v4662_v22 = vld [vmem:[#allocation3 + $0x18] sm:$0xf] }
 0x4c0   : > { %v4685_v50 = vld [vmem:[#allocation3 + $0x18] sm:$0xf]  ;;  %4706 = vst [vmem:[#allocation1 + $0x11] ss:$2 sm:$0xff] %v4662_v22 }
 0x4c1   : > { %4812 = vst [vmem:[#allocation1 + $0x1] ss:$2 sm:$0xff] %v4685_v50  ;;  %v4666_v5 = vld [vmem:[#allocation3 + $0x19] sm:$0xf] }
 0x4c2   : > { %v4689_v44 = vld [vmem:[#allocation3 + $0x19] sm:$0xf] }
 0x4c3   : > { %v4670_v14 = vld [vmem:[#allocation3 + $0x1a] sm:$0xf] }
 0x4c4   : > { %v4693_v59 = vld [vmem:[#allocation3 + $0x1a] sm:$0xf] }
 0x4c5   : > { %v4673_v45 = vld [vmem:[#allocation3 + $0x18] sm:$0xf] }
 0x4c7   : > { %v11736_v61 = vld.sshfl [vmem:[#allocation1 + $0x10] sm:$0xff pattern:$0x75316420] }
 0x4c8   : > { %4719 = vst [vmem:[#allocation1 + $0x10] ss:$2 sm:$0xff] %v4665_v56  ;;  %v4817_v21 = vld.sshfl [vmem:[#allocation1] sm:$0xff pattern:$0x75316420] }
 0x4c9   : > { %4721 = vst [vmem:[#allocation1 + $0x11] ss:$2 sm:$0xff] %v4666_v5  ;;  %4819 = vrot.lane.b32.xlu1 %v4817_v21, %s14341_s28 }
 0x4ca   : > { %4829 = vst [vmem:[#allocation1] ss:$2 sm:$0xff] %v4688_v1 }
 0x4cb   : > { %4831 = vst [vmem:[#allocation1 + $0x1] ss:$2 sm:$0xff] %v4689_v44 }
 0x4d0   : > { %v4723_v40 = vld.sshfl [vmem:[#allocation1 + $0x10] sm:$0xff pattern:$0x75316420] }
 0x4d1   : > { %4738 = vst [vmem:[#allocation1 + $0x10] ss:$2 sm:$0xff] %v4669_v34  ;;  %4726 = vrot.lane.b32.xlu1 %v4723_v40, %s9429_s21 }
 0x4d2   : > { %4740 = vst [vmem:[#allocation1 + $0x11] ss:$2 sm:$0xff] %v4670_v14  ;;  %v4836_v47 = vld.sshfl [vmem:[#allocation1] sm:$0xff pattern:$0x75316420] }
 0x4d3   : > { %4848 = vst [vmem:[#allocation1] ss:$2 sm:$0xff] %v4692_v57  ;;  %4838 = vrot.lane.b32.xlu2 %v4836_v47, %s9432_s19 }
 0x4d4   : > { %4850 = vst [vmem:[#allocation1 + $0x1] ss:$2 sm:$0xff] %v4693_v59 }
 0x4d9   : > { %v4742_v32 = vld.sshfl [vmem:[#allocation1 + $0x10] sm:$0xff pattern:$0x75316420] }
 0x4da   : > { %4757 = vst [vmem:[#allocation1 + $0x10] ss:$2 sm:$0xff] %v4673_v45 }
 0x4db   : > { %v4855_v31 = vld.sshfl [vmem:[#allocation1] sm:$0xff pattern:$0x75316420]  ;;  %4745 = vrot.lane.b32.xlu2 %v4742_v32, %s9430_s26 }
 0x4dc   : > { %4857 = vrot.lane.b32.xlu0 %v4855_v31, %s14406_s22 }
 0x4de   : > { %v4229_v28 = vpop.f32.mrf.mxu1 }
 0x4df   : > { %v4230_v41 = vadd.f32 %v11581_v11, %v4229_v28 }
 0x4e1   : > { %v4271_v42 = vadd.f32 %v4270_v55, %v4230_v41 }
 0x4e3   : > { %v4282_v20 = vmax.f32 %v4271_v42, 0.0 }
 0x4e5   : > { %v4310_v23 = vrot.slane %v4282_v20, 2  ;;  %v4311_v3 = vrot.slane %v4282_v20, 4  ;;  %v4312_v38 = vrot.slane %v4282_v20, 6  ;;  %v4509_v6 = vsel %vm4340_vm15, %v4282_v20, -inf }
 0x4e6   : > { %v4510_v30 = vrot.slane %v4509_v6, 4  ;;  %v4232_v58 = vpop.f32.mrf.mxu1 }
 0x4e7   : > { %v4516_v18 = vsel %vm4340_vm15, %v4310_v23, -inf  ;;  %v4523_v24 = vsel %vm4340_vm15, %v4311_v3, -inf  ;;  %v4530_v15 = vsel %vm4340_vm15, %v4312_v38, -inf  ;;  %v4233_v4 = vadd.f32 %v11581_v11, %v4232_v58 }
 0x4e8   : > { %v4511_v51 = vmax.f32 %v4509_v6, %v4510_v30  ;;  %v4517_v48 = vrot.slane %v4516_v18, 4  ;;  %v4524_v52 = vrot.slane %v4523_v24, 4  ;;  %v4531_v27 = vrot.slane %v4530_v15, 4 }
 0x4e9   : > { %v4274_v49 = vadd.f32 %v4273_v16, %v4233_v4 }
 0x4ea   : > { %v4518_v19 = vmax.f32 %v4516_v18, %v4517_v48  ;;  %v4525_v2 = vmax.f32 %v4523_v24, %v4524_v52  ;;  %v4532_v62 = vmax.f32 %v4530_v15, %v4531_v27  ;;  %v4512_v9 = vrot.slane %v4511_v51, 2 }
 0x4eb   : > { %v4283_v0 = vmax.f32 %v4274_v49, 0.0 }
 0x4ec   : > { %v4519_v25 = vrot.slane %v4518_v19, 2  ;;  %v4526_v39 = vrot.slane %v4525_v2, 2  ;;  %v4533_v53 = vrot.slane %v4532_v62, 2  ;;  %v4513_v29 = vmax.f32 %v4511_v51, %v4512_v9 }
 0x4ed   : > { %v4313_v43 = vrot.slane %v4283_v0, 2  ;;  %v4314_v37 = vrot.slane %v4283_v0, 4  ;;  %v4315_v33 = vrot.slane %v4283_v0, 6  ;;  %v4537_v26 = vsel %vm4340_vm15, %v4283_v0, -inf }
 0x4ee   : > { %v4538_v60 = vrot.slane %v4537_v26, 4  ;;  %v4520_v8 = vmax.f32 %v4518_v19, %v4519_v25  ;;  %v4527_v12 = vmax.f32 %v4525_v2, %v4526_v39  ;;  %v4534_v7 = vmax.f32 %v4532_v62, %v4533_v53  ;;  %v4677_v25 = vld [vmem:[#allocation3 + $0x19] sm:$0xf] }
 0x4ef   : > { %v4544_v11 = vsel %vm4340_vm15, %v4313_v43, -inf  ;;  %v4551_v63 = vsel %vm4340_vm15, %v4314_v37, -inf  ;;  %v4558_v54 = vsel %vm4340_vm15, %v4315_v33, -inf  ;;  %v4514_v5 = vrot.slane %v4513_v29, 1  ;;  %v4681_v37 = vld [vmem:[#allocation3 + $0x1a] sm:$0xf] }
 0x4f0   : > { %v4539_v36 = vmax.f32 %v4537_v26, %v4538_v60  ;;  %v4545_v35 = vrot.slane %v4544_v11, 4  ;;  %v4552_v13 = vrot.slane %v4551_v63, 4  ;;  %v4559_v10 = vrot.slane %v4558_v54, 4  ;;  %v4886_v53 = vld [vmem:[%s14276_s5 + $0x20] sm:$0xf]  ;;  %v4885_v60 = vld [vmem:[%s14276_s5 + $0x18] sm:$0xff] }
 0x4f1   : > { %v4521_v21 = vrot.slane %v4520_v8, 1  ;;  %v4528_v1 = vrot.slane %v4527_v12, 1  ;;  %v4535_v14 = vrot.slane %v4534_v7, 1  ;;  %v4515_v31 = vmax.f32 %v4513_v29, %v4514_v5  ;;  %8752 = vmatpush.msk.msrb.mxu2 %vm4898_vm2, %v4886_v53  ;;  %v8757_v53 = vld [vmem:[%s14278_s7 + $0x4] sm:$0xf] }
 0x4f2   : > { %v4540_v46 = vrot.slane %v4539_v36, 2  ;;  %v4546_v22 = vmax.f32 %v4544_v11, %v4545_v35  ;;  %v4553_v50 = vmax.f32 %v4551_v63, %v4552_v13  ;;  %v4560_v56 = vmax.f32 %v4558_v54, %v4559_v10  ;;  %v4884_v11 = vld [vmem:[%s14276_s5 + $0x10] sm:$0xff] }
 0x4f3   : > { %v4522_v55 = vmax.f32 %v4520_v8, %v4521_v21  ;;  %v4529_v28 = vmax.f32 %v4527_v12, %v4528_v1  ;;  %v4536_v3 = vmax.f32 %v4534_v7, %v4535_v14  ;;  %v4602_v16 = vsel %vm4565_vm14, %v4515_v31, -inf  ;;  %v4687_v63 = vld [vmem:[#allocation3 + $0x28] sm:$0xf]  ;;  %4914 = vmatpush.msrb.mxu2 %v4885_v60  ;;  %v4883_v8 = vld [vmem:[%s14276_s5 + $0x8] sm:$0xff]  ;;  %v4882_v12 = vld [vmem:[%s14276_s5] sm:$0xff] }
 0x4f4   : > { %v4541_v44 = vmax.f32 %v4539_v36, %v4540_v46  ;;  %v4547_v34 = vrot.slane %v4546_v22, 2  ;;  %v4554_v40 = vrot.slane %v4553_v50, 2  ;;  %v4561_v57 = vrot.slane %v4560_v56, 2  ;;  %v4691_v36 = vld [vmem:[#allocation3 + $0x29] sm:$0xf] }
 0x4f5   : > { %v4605_v18 = vsel %vm4565_vm14, %v4522_v55, -inf  ;;  %v4608_v15 = vsel %vm4565_vm14, %v4529_v28, -inf  ;;  %v4611_v49 = vsel %vm4565_vm14, %v4536_v3, -inf  ;;  %4915 = vmatpush.msrb.mxu2 %v4884_v11  ;;  %v4695_v10 = vld [vmem:[#allocation3 + $0x2a] sm:$0xf] }
 0x4f6   : > { %v4542_v47 = vrot.slane %v4541_v44, 1  ;;  %v4548_v59 = vmax.f32 %v4546_v22, %v4547_v34  ;;  %v4555_v45 = vmax.f32 %v4553_v50, %v4554_v40  ;;  %v4562_v32 = vmax.f32 %v4560_v56, %v4561_v57  ;;  %v4725_v22 = vpop.permute.xlu2 %4724  ;;  %v4744_v50 = vpop.permute.xlu0 %4743 }
 0x4f7   : > { %4916 = vmatpush.msrb.mxu2 %v4883_v8  ;;  %v4763_v56 = vpop.permute.xlu1 %4762  ;;  %v4863_v21 = vsel %vm4565_vm14, %v11657_v17, %v4725_v22 }
 0x4f8   : > { %v4543_v41 = vmax.f32 %v4541_v44, %v4542_v47  ;;  %v4549_v42 = vrot.slane %v4548_v59, 1  ;;  %v4556_v20 = vrot.slane %v4555_v45, 1  ;;  %v4563_v23 = vrot.slane %v4562_v32, 1 }
 0x4f9   : > { %4917 = vmatpush.msrb.mxu2 %v4882_v12  ;;  %v4866_v44 = vsel %vm4865_vm12, %v4863_v21, %v4744_v50 }
 0x4fa   : > { %v4550_v38 = vmax.f32 %v4548_v59, %v4549_v42  ;;  %v4557_v6 = vmax.f32 %v4555_v45, %v4556_v20  ;;  %v4564_v30 = vmax.f32 %v4562_v32, %v4563_v23  ;;  %v4603_v58 = vsel %vm4565_vm14, %v4543_v41, -inf }
 0x4fb   : > { %v4604_v48 = vmax.f32 %v4602_v16, %v4603_v58  ;;  %v4868_v34 = vsel %vm1892_vm4, %v4866_v44, %v4763_v56 }
 0x4fc   : > { %v4606_v24 = vsel %vm4565_vm14, %v4550_v38, -inf  ;;  %v4609_v4 = vsel %vm4565_vm14, %v4557_v6, -inf  ;;  %v4612_v51 = vsel %vm4565_vm14, %v4564_v30, -inf }
 0x4fd   : > { %v4607_v52 = vmax.f32 %v4605_v18, %v4606_v24  ;;  %v4610_v27 = vmax.f32 %v4608_v15, %v4609_v4  ;;  %v4613_v19 = vmax.f32 %v4611_v49, %v4612_v51 }
 0x4fe   : > { %v4782_v1 = vpop.permute.xlu2 %4781  ;;  %v4801_v40 = vpop.permute.xlu0 %4800 }
 0x4ff   : > { %v4646_v2 = vsel %vm14430_vm9, %v4607_v52, %v4604_v48  ;;  %v4870_v14 = vsel %vm3432_vm11, %v4868_v34, %v4782_v1 }
 0x500   : > { %v4647_v62 = vsel %vm14431_vm10, %v4610_v27, %v4646_v2  ;;  %v4873_v47 = vsel %vm4872_vm5, %v4870_v14, %v4801_v40  ;;  %v5018_v2 = vld [vmem:[%s14278_s7] sm:$0xf] }
 0x501   : > { %v4648_v0 = vsel %vm14432_vm13, %v4613_v19, %v4647_v62  ;;  %8755 = vmatpush.msk.msra.mxu3 %vm4898_vm2, %v5018_v2 }
 0x502   : > { %4658 = vst.msk [vmem:[#allocation3 + $0x21] sm:$0xf] %vm4654_vm0, %v4648_v0 }
 0x503   : > { %8758 = vmatpush.msk.msrb.mxu3 %vm4898_vm2, %v8757_v53 }
 0x509   : > { %v4674_v9 = vld [vmem:[#allocation3 + $0x20] sm:$0xf] }
 0x50a   : > { %4759 = vst [vmem:[#allocation1 + $0x11] ss:$2 sm:$0xff] %v4674_v9  ;;  %v4678_v43 = vld [vmem:[#allocation3 + $0x21] sm:$0xf] }
 0x50b   : > { %v4682_v26 = vld [vmem:[#allocation3 + $0x22] sm:$0xf] }
 0x50c   : > { %v4686_v54 = vld [vmem:[#allocation3 + $0x20] sm:$0xf] }
 0x50d   : > { %v4690_v35 = vld [vmem:[#allocation3 + $0x21] sm:$0xf] }
 0x50e   : > { %v4694_v7 = vld [vmem:[#allocation3 + $0x22] sm:$0xf] }
 0x511   : > { %v4761_v39 = vld.sshfl [vmem:[#allocation1 + $0x10] sm:$0xff pattern:$0x75316420] }
 0x512   : > { %4776 = vst [vmem:[#allocation1 + $0x10] ss:$2 sm:$0xff] %v4677_v25  ;;  %4764 = vrot.lane.b32.xlu0 %v4761_v39, %s14342_s15  ;;  %s466_s15 = sand.u32 1, %s9403_s30  }
 0x513   : > { %4778 = vst [vmem:[#allocation1 + $0x11] ss:$2 sm:$0xff] %v4678_v43  ;;  %s11891_s29 = sshll.u32 %s466_s15, 2 }
 0x51a   : > { %v4780_v33 = vld.sshfl [vmem:[#allocation1 + $0x10] sm:$0xff pattern:$0x75316420] }
 0x51b   : > { %4795 = vst [vmem:[#allocation1 + $0x10] ss:$2 sm:$0xff] %v4681_v37  ;;  %4783 = vrot.lane.b32.xlu1 %v4780_v33, %s14401_s0  ;;  %s468_s0 = scalar_lea.vmem [#allocation4], %s11891_s29  ;;  %s8409_s29 = scalar_lea.sflag [#allocation5], %s466_s15 }
 0x51c   : > { %4797 = vst [vmem:[#allocation1 + $0x11] ss:$2 sm:$0xff] %v4682_v26  ;;  %s13724_s17 = sshll.u32 %s468_s0, 4  ;;  %s8425_s17 = int_to_ptr.vmem [resolvable:$true] %s13724_s17 }
 0x523   : > { %v4799_v29 = vld.sshfl [vmem:[#allocation1 + $0x10] sm:$0xff pattern:$0x75316420] }
 0x524   : > { %4814 = vst [vmem:[#allocation1 + $0x10] ss:$2 sm:$0xff] %v4686_v54  ;;  %4802 = vrot.lane.b32.xlu2 %v4799_v29, %s9431_s27 }
 0x525   : > { %4816 = vst [vmem:[#allocation1 + $0x11] ss:$2 sm:$0xff] %v4687_v63 }
 0x52c   : > { %v4818_v13 = vld.sshfl [vmem:[#allocation1 + $0x10] sm:$0xff pattern:$0x75316420] }
 0x52d   : > { %4833 = vst [vmem:[#allocation1 + $0x10] ss:$2 sm:$0xff] %v4690_v35  ;;  %4821 = vrot.lane.b32.xlu0 %v4818_v13, %s14341_s28  ;;  %v4839_v45 = vpop.permute.xlu2 %4838 }
 0x52e   : > { %4835 = vst [vmem:[#allocation1 + $0x11] ss:$2 sm:$0xff] %v4691_v36 }
 0x535   : > { %v4837_v46 = vld.sshfl [vmem:[#allocation1 + $0x10] sm:$0xff pattern:$0x75316420]  ;;  %v4746_v28 = vpop.permute.xlu2 %4745 }
 0x536   : > { %4852 = vst [vmem:[#allocation1 + $0x10] ss:$2 sm:$0xff] %v4694_v7  ;;  %4840 = vrot.lane.b32.xlu1 %v4837_v46, %s9432_s19 }
 0x537   : > { %4854 = vst [vmem:[#allocation1 + $0x11] ss:$2 sm:$0xff] %v4695_v10 }
 0x53b   : > { %v4820_v57 = vpop.permute.xlu1 %4819 }
 0x53c   : > { %v4875_v59 = vsel %vm2024_vm8, %v4873_v47, %v4820_v57 }
 0x53d   : > { %v4878_v17 = vsel %vm4877_vm6, %v4875_v59, %v4839_v45 }
 0x53e   : > { %v4856_v5 = vld.sshfl [vmem:[#allocation1 + $0x10] sm:$0xff pattern:$0x75316420] }
 0x53f   : > { %4859 = vrot.lane.b32.xlu2 %v4856_v5, %s14406_s22  ;;  %s12711_s22 = scalar_lea.vmem %s14284_s13, %s8888_s18  ;;  %s8422_s18 = scalar_lea.hbm %s14285_s14, %s8885_s1 }
 0x540   : > { %s8426_s25 = sshll.u32 %s8422_s18, 4  ;;  %s8427_s25 = int_to_ptr.hbm [resolvable:$true] %s8426_s25 }
 0x543   : > { %v4727_v55 = vpop.permute.xlu1 %4726 }
 0x544   : > { %v4864_v42 = vsel %vm4565_vm14, %v11736_v61, %v4727_v55  ;;  %v9080_v61 = vld [vmem:[%s14277_s6] ss:$0 sm:$0xff] }
 0x545   : > { %v4867_v3 = vsel %vm4865_vm12, %v4864_v42, %v4746_v28 }
 0x54e   : > { %v4858_v32 = vpop.permute.xlu0 %4857 }
 0x54f   : > { %v4880_v31 = vsel %vm4094_vm3, %v4878_v17, %v4858_v32 }
 0x550   : > { %8753 = vmatmul.msk.f32.vlgmr.msrb.gmra.mxu2 %vm4891_vm7, %v4880_v31 }
 0x57e   : > { %v4803_v23 = vpop.permute.xlu2 %4802 }
 0x584   : > { %v4765_v41 = vpop.permute.xlu0 %4764 }
 0x585   : > { %v4869_v38 = vsel %vm1892_vm4, %v4867_v3, %v4765_v41  ;;  %vm14433_vm4 = vmmov %vm14430_vm9  ;;  %vm14436_vm9 = vcmask 1042432  }
 0x586   : > { %vm14439_vm12 = vmmov %vm14436_vm9 }
 0x58d   : > { %v4784_v20 = vpop.permute.xlu1 %4783 }
 0x58e   : > { %v4871_v6 = vsel %vm3432_vm11, %v4869_v38, %v4784_v20  ;;  %vm14435_vm11 = vmmov %vm14432_vm13 }
 0x58f   : > { %v4874_v58 = vsel %vm4872_vm5, %v4871_v6, %v4803_v23  ;;  %vm14438_vm13 = vmmov %vm14436_vm9 }
 0x599   : > { %v4860_v24 = vpop.permute.xlu2 %4859 }
 0x59f   : > { %v4822_v30 = vpop.permute.xlu0 %4821 }
 0x5a0   : > { %v4876_v16 = vsel %vm2024_vm8, %v4874_v58, %v4822_v30  ;;  %vm14434_vm8 = vmmov %vm14431_vm10 }
 0x5a1   : > { %vm14437_vm10 = vmmov %vm14436_vm9 }
 0x5a8   : > { %v4841_v18 = vpop.permute.xlu1 %4840 }
 0x5a9   : > { %v4879_v15 = vsel %vm4877_vm6, %v4876_v16, %v4841_v18 }
 0x5aa   : > { %v4881_v4 = vsel %vm4094_vm3, %v4879_v15, %v4860_v24  ;;  %vm14325_vm3 = vcmask 1040384  }
 0x5ab   : > { %8754 = vmatmul.msk.f32.gmra.mxu2 %vm4891_vm7, %v4881_v4 }
 0x5d3   : > { %v4919_v51 = vpop.f32.mrf.mxu2 }
 0x5d4   : > { %v4920_v48 = vadd.f32 %v9080_v61, %v4919_v51 }
 0x5d6   : > { %v4925_v52 = vmax.f32 %v4920_v48, 0.0 }
 0x5d8   : > { %v4930_v27 = vrot.slane %v4925_v52, 4  ;;  %v4929_v49 = vrot.slane %v4925_v52, 2  ;;  %v4931_v19 = vrot.slane %v4925_v52, 6  ;;  %v4941_v0 = vsel %vm4340_vm15, %v4925_v52, -inf }
 0x5d9   : > { %v4942_v43 = vrot.slane %v4941_v0, 4 }
 0x5da   : > { %v4955_v62 = vsel %vm4340_vm15, %v4930_v27, -inf  ;;  %v4948_v9 = vsel %vm4340_vm15, %v4929_v49, -inf  ;;  %v4962_v39 = vsel %vm4340_vm15, %v4931_v19, -inf }
 0x5db   : > { %v4956_v25 = vrot.slane %v4955_v62, 4  ;;  %v4949_v37 = vrot.slane %v4948_v9, 4  ;;  %v4963_v33 = vrot.slane %v4962_v39, 4  ;;  %v4943_v60 = vmax.f32 %v4941_v0, %v4942_v43 }
 0x5dd   : > { %v4957_v26 = vmax.f32 %v4955_v62, %v4956_v25  ;;  %v4950_v11 = vmax.f32 %v4948_v9, %v4949_v37  ;;  %v4964_v63 = vmax.f32 %v4962_v39, %v4963_v33  ;;  %v4944_v29 = vrot.slane %v4943_v60, 2 }
 0x5df   : > { %v4958_v54 = vrot.slane %v4957_v26, 2  ;;  %v4951_v8 = vrot.slane %v4950_v11, 2  ;;  %v4965_v12 = vrot.slane %v4964_v63, 2  ;;  %v4945_v10 = vmax.f32 %v4943_v60, %v4944_v29 }
 0x5e1   : > { %v4959_v36 = vmax.f32 %v4957_v26, %v4958_v54  ;;  %v4952_v7 = vmax.f32 %v4950_v11, %v4951_v8  ;;  %v4966_v46 = vmax.f32 %v4964_v63, %v4965_v12  ;;  %v4946_v44 = vrot.slane %v4945_v10, 1  ;;  %v8760_v54 = vld [vmem:[%s14278_s7 + $0x8] sm:$0xf]  ;;  %v8763_v8 = vld [vmem:[%s14278_s7 + $0xc] sm:$0xf] }
 0x5e3   : > { %v4960_v50 = vrot.slane %v4959_v36, 1  ;;  %v4953_v34 = vrot.slane %v4952_v7, 1  ;;  %v4967_v57 = vrot.slane %v4966_v46, 1  ;;  %v4947_v23 = vmax.f32 %v4945_v10, %v4946_v44 }
 0x5e5   : > { %v4961_v55 = vmax.f32 %v4959_v36, %v4960_v50  ;;  %v4954_v3 = vmax.f32 %v4952_v7, %v4953_v34  ;;  %v4968_v38 = vmax.f32 %v4966_v46, %v4967_v57  ;;  %v4997_v51 = vsel %vm4565_vm14, %v4947_v23, -inf }
 0x5e7   : > { %v4998_v18 = vsel %vm4565_vm14, %v4961_v55, -inf  ;;  %v5000_v48 = vsel %vm4565_vm14, %v4954_v3, -inf  ;;  %v5001_v52 = vsel %vm4565_vm14, %v4968_v38, -inf  ;;  %v9081_v55 = vld [vmem:[%s14279_s8] ss:$0 sm:$0xff] }
 0x5e8   : > { %v4999_v62 = vmax.f32 %v4997_v51, %v4998_v18  ;;  %v5002_v39 = vmax.f32 %v5000_v48, %v5001_v52 }
 0x5ea   : > { %v5013_v11 = vsel %vm14433_vm4, %v5002_v39, %v4999_v62  ;;  %v8777_v39 = vld [vmem:[%s14280_s9 + $0xc] sm:$0xf] }
 0x62e   : > { %v4922_v35 = vpop.f32.mrf.mxu2 }
 0x62f   : > { %v4923_v13 = vadd.f32 %v9080_v61, %v4922_v35  ;;  %v5188_v35 = vld [vmem:[%s14280_s9] sm:$0xf] }
 0x631   : > { %v4926_v22 = vmax.f32 %v4923_v13, 0.0 }
 0x633   : > { %v4932_v56 = vrot.slane %v4926_v22, 2  ;;  %v4933_v5 = vrot.slane %v4926_v22, 4  ;;  %v4934_v21 = vrot.slane %v4926_v22, 6  ;;  %v4969_v1 = vsel %vm4340_vm15, %v4926_v22, -inf }
 0x634   : > { %v4970_v40 = vrot.slane %v4969_v1, 4 }
 0x635   : > { %v4976_v14 = vsel %vm4340_vm15, %v4932_v56, -inf  ;;  %v4983_v47 = vsel %vm4340_vm15, %v4933_v5, -inf  ;;  %v4990_v59 = vsel %vm4340_vm15, %v4934_v21, -inf  ;;  %v8769_v21 = vld [vmem:[%s14280_s9 + $0x4] sm:$0xf]  ;;  %vm14324_vm15 = vcmask 1041408  }
 0x636   : > { %v4971_v45 = vmax.f32 %v4969_v1, %v4970_v40  ;;  %v4977_v17 = vrot.slane %v4976_v14, 4  ;;  %v4984_v32 = vrot.slane %v4983_v47, 4  ;;  %v4991_v31 = vrot.slane %v4990_v59, 4  ;;  %8770 = vmatpush.msk.msra.mxu2 %vm4898_vm2, %v8769_v21 }
 0x638   : > { %v4972_v28 = vrot.slane %v4971_v45, 2  ;;  %v4978_v41 = vmax.f32 %v4976_v14, %v4977_v17  ;;  %v4985_v42 = vmax.f32 %v4983_v47, %v4984_v32  ;;  %v4992_v20 = vmax.f32 %v4990_v59, %v4991_v31  ;;  %8778 = vmatpush.msk.msrb.mxu2 %vm4898_vm2, %v8777_v39 }
 0x63a   : > { %v4973_v6 = vmax.f32 %v4971_v45, %v4972_v28  ;;  %v4979_v30 = vrot.slane %v4978_v41, 2  ;;  %v4986_v58 = vrot.slane %v4985_v42, 2  ;;  %v4993_v16 = vrot.slane %v4992_v20, 2 }
 0x63c   : > { %v4974_v24 = vrot.slane %v4973_v6, 1  ;;  %v4980_v15 = vmax.f32 %v4978_v41, %v4979_v30  ;;  %v4987_v4 = vmax.f32 %v4985_v42, %v4986_v58  ;;  %v4994_v61 = vmax.f32 %v4992_v20, %v4993_v16 }
 0x63e   : > { %v4975_v27 = vmax.f32 %v4973_v6, %v4974_v24  ;;  %v4988_v49 = vrot.slane %v4987_v4, 1  ;;  %v4981_v19 = vrot.slane %v4980_v15, 1  ;;  %v4995_v2 = vrot.slane %v4994_v61, 1 }
 0x640   : > { %v4982_v0 = vmax.f32 %v4980_v15, %v4981_v19  ;;  %v4989_v9 = vmax.f32 %v4987_v4, %v4988_v49  ;;  %v4996_v25 = vmax.f32 %v4994_v61, %v4995_v2  ;;  %v5003_v43 = vsel %vm4565_vm14, %v4975_v27, -inf  ;;  %v8773_v27 = vld [vmem:[%s14280_s9 + $0x8] sm:$0xf] }
 0x642   : > { %v5004_v37 = vsel %vm4565_vm14, %v4989_v9, -inf  ;;  %v5006_v33 = vsel %vm4565_vm14, %v4982_v0, -inf  ;;  %v5007_v26 = vsel %vm4565_vm14, %v4996_v25, -inf }
 0x643   : > { %v5005_v53 = vmax.f32 %v5003_v43, %v5004_v37  ;;  %v5008_v60 = vmax.f32 %v5006_v33, %v5007_v26 }
 0x645   : > { %v5014_v63 = vsel %vm14434_vm8, %v5005_v53, %v5013_v11 }
 0x646   : > { %v11840_v29 = vsel %vm14435_vm11, %v5008_v60, %v5014_v63 }
 0x647   : > { %8756 = vmatmul.msk.f32.vlgmr.msra.gmra.mxu3 %vm4565_vm14, %v11840_v29  ;;  %5017 = vst.msk [vmem:[%s468_s0] sm:$0xf] %vm4654_vm0, %v11840_v29  ;;  %vm14440_vm0 = vmmov %vm14436_vm9  ;;  %s9363_s0 = sshra.s32 %s8427_s25, 4  ;;  %s9364_s0 = int_to_ptr.hbm [resolvable:$true] %s9363_s0 }
 0x648   : > { %8761 = vmatpush.msk.msra.mxu3 %vm4898_vm2, %v8760_v54  ;;  %vm14441_vm5 = vmmov %vm14440_vm0  ;;  %s9365_s28 = scalar_lea.hbm %s9364_s0, 4  ;;  %p9370_p0 = scmp.lt.s32.totalorder %s9364_s0, %s14285_s14 }
 0x649   : > { %vm14442_vm6 = vmmov %vm14440_vm0  ;;  %p9366_p11 = scmp.ne.s32.totalorder %s9364_s0, %s9365_s28  ;;  %p9371_p1 = scmp.lt.s32.totalorder %s9369_s20, %s9365_s28 }
 0x64a   : > { %vm14443_vm7 = vmmov %vm14440_vm0 }
 0x64b   : > { %vm14444_vm4 = vmmov %vm14440_vm0  ;;  %p9367_p12 = pnand %p9366_p11, %p9546_p5  ;;  %p9372_p2 = por %p9371_p1, %p9370_p0 }
 0x64c   : > { %vm14445_vm8 = vmmov %vm14440_vm0 }
 0x64d   : > { %vm14446_vm11 = vmmov %vm14440_vm0  ;;  %p9368_p13 = pneg %p9367_p12 }
 0x64f   : > { %8759 = vmatmul.msk.f32.vlgmr.msrb.gmra.mxu3 %vm4565_vm14, %v11840_v29  ;;  %p9373_p3 = pnand %p9372_p2, %p9368_p13 }
 0x650   : > { %8764 = vmatpush.msk.msrb.mxu3 %vm4898_vm2, %v8763_v8 }
 0x657   : > { %8762 = vmatmul.msk.f32.vlgmr.msra.gmra.mxu3 %vm4565_vm14, %v11840_v29 }
 0x658   : > { %8766 = vmatpush.msk.msra.mxu3 %vm4898_vm2, %v5188_v35 }
 0x65f   : > { %8765 = vmatmul.msk.f32.vlgmr.msrb.gmra.mxu3 %vm4565_vm14, %v11840_v29 }
 0x660   : > { %8774 = vmatpush.msk.msrb.mxu3 %vm4898_vm2, %v8773_v27 }
 0x6ca   : > { %v5041_v12 = vpop.f32.mrf.mxu3 }
 0x6cb   : > { %v5120_v57 = vrot.slane %v5041_v12, 1  ;;  %v5121_v14 = vrot.slane %v5041_v12, 2  ;;  %v5122_v47 = vrot.slane %v5041_v12, 3 }
 0x6d2   : > { %v5066_v36 = vpop.f32.mrf.mxu3 }
 0x6d3   : > { %v5127_v10 = vrot.slane %v5066_v36, 1  ;;  %v5128_v7 = vrot.slane %v5066_v36, 2  ;;  %v5129_v46 = vrot.slane %v5066_v36, 3  ;;  %v5138_v22 = vperm.slane %v5066_v36, 0 }
 0x6d5   : > { %v5139_v1 = vperm.slane %v5127_v10, 0  ;;  %v5140_v44 = vperm.slane %v5128_v7, 0  ;;  %v5141_v34 = vperm.slane %v5129_v46, 0  ;;  %v5163_v59 = vsel %vm14325_vm3, %v5041_v12, %v5138_v22 }
 0x6d7   : > { %v5164_v23 = vsel %vm14325_vm3, %v5120_v57, %v5139_v1  ;;  %v5165_v3 = vsel %vm14325_vm3, %v5121_v14, %v5140_v44  ;;  %v5166_v38 = vsel %vm14325_vm3, %v5122_v47, %v5141_v34 }
 0x6da   : > { %v5091_v13 = vpop.f32.mrf.mxu3 }
 0x6db   : > { %v5131_v50 = vrot.slane %v5091_v13, 1  ;;  %v5132_v56 = vrot.slane %v5091_v13, 2  ;;  %v5133_v5 = vrot.slane %v5091_v13, 3  ;;  %v5146_v40 = vperm.slane %v5091_v13, 0 }
 0x6dd   : > { %v5147_v45 = vperm.slane %v5131_v50, 0  ;;  %v5148_v17 = vperm.slane %v5132_v56, 0  ;;  %v5149_v32 = vperm.slane %v5133_v5, 0  ;;  %v5168_v6 = vsel %vm14324_vm15, %v5163_v59, %v5146_v40 }
 0x6df   : > { %v5169_v24 = vsel %vm14324_vm15, %v5164_v23, %v5147_v45  ;;  %v5170_v15 = vsel %vm14324_vm15, %v5165_v3, %v5148_v17  ;;  %v5171_v4 = vsel %vm14324_vm15, %v5166_v38, %v5149_v32 }
 0x6e2   : > { %v5116_v31 = vpop.f32.mrf.mxu3 }
 0x6e3   : > { %v5135_v28 = vrot.slane %v5116_v31, 1  ;;  %v5136_v41 = vrot.slane %v5116_v31, 2  ;;  %v5137_v42 = vrot.slane %v5116_v31, 3  ;;  %v5154_v20 = vperm.slane %v5116_v31, 0 }
 0x6e5   : > { %v5155_v30 = vperm.slane %v5135_v28, 0  ;;  %v5156_v58 = vperm.slane %v5136_v41, 0  ;;  %v5157_v16 = vperm.slane %v5137_v42, 0  ;;  %v5172_v18 = vsel %vm14436_vm9, %v5168_v6, %v5154_v20  ;;  %vm14447_vm9 = vmmov %vm14440_vm0 }
 0x6e6   : > { %v5180_v61 = vadd.f32 %v9081_v55, %v5172_v18 }
 0x6e7   : > { %v5173_v51 = vsel %vm14437_vm10, %v5169_v24, %v5155_v30  ;;  %v5174_v48 = vsel %vm14438_vm13, %v5170_v15, %v5156_v58  ;;  %v5175_v52 = vsel %vm14439_vm12, %v5171_v4, %v5157_v16  ;;  %vm14448_vm10 = vmmov %vm14440_vm0 }
 0x6e8   : > { %v5181_v49 = vadd.f32 %v9081_v55, %v5173_v51  ;;  %v5182_v19 = vadd.f32 %v9081_v55, %v5174_v48  ;;  %v5183_v2 = vadd.f32 %v9081_v55, %v5175_v52  ;;  %v5184_v62 = vmax.f32 %v5180_v61, 0.0  ;;  %vm14449_vm13 = vmmov %vm14440_vm0 }
 0x6e9   : > { %vm14450_vm12 = vmmov %vm14440_vm0 }
 0x6ea   : > { %v5185_v0 = vmax.f32 %v5181_v49, 0.0  ;;  %v5186_v9 = vmax.f32 %v5182_v19, 0.0  ;;  %v5187_v25 = vmax.f32 %v5183_v2, 0.0  ;;  %5193 = vst [vmem:[#allocation1] ss:$2 sm:$0xff] %v5184_v62 }
 0x6ec   : > { %5195 = vst [vmem:[#allocation1 + $0x1] ss:$2 sm:$0xff] %v5185_v0 }
 0x6ed   : > { %5197 = vst [vmem:[#allocation1 + $0x10] ss:$2 sm:$0xff] %v5186_v9 }
 0x6ee   : > { %5199 = vst [vmem:[#allocation1 + $0x11] ss:$2 sm:$0xff] %v5187_v25 }
 0x6f3   : > { %v5200_v43 = vld.sshfl [vmem:[#allocation1] sm:$0xff pattern:$0x75316420] }
 0x6f4   : > { %5234 = vst [vmem:[#allocation1] ss:$2 sm:$0xff] %v5184_v62  ;;  %8767 = vmatmul.msk.f32.vlgmr.msra.gmra.mxu3 %vm4565_vm14, %v5200_v43 }
 0x6f5   : > { %v5201_v37 = vld.sshfl [vmem:[#allocation1 + $0x10] sm:$0xff pattern:$0x75316420]  ;;  %5236 = vst [vmem:[#allocation1 + $0x1] ss:$2 sm:$0xff] %v5185_v0 }
 0x6f6   : > { %5238 = vst [vmem:[#allocation1 + $0x10] ss:$2 sm:$0xff] %v5186_v9 }
 0x6f7   : > { %5240 = vst [vmem:[#allocation1 + $0x11] ss:$2 sm:$0xff] %v5187_v25 }
 0x6fc   : > { %v5241_v33 = vld.sshfl [vmem:[#allocation1] sm:$0xff pattern:$0x75316420]  ;;  %8768 = vmatmul.msk.f32.gmra.mxu3 %vm4565_vm14, %v5201_v37 }
 0x6fd   : > { %5275 = vst [vmem:[#allocation1] ss:$2 sm:$0xff] %v5184_v62  ;;  %8771 = vmatmul.msk.f32.vlgmr.msra.gmra.mxu2 %vm4565_vm14, %v5241_v33 }
 0x6fe   : > { %v5242_v26 = vld.sshfl [vmem:[#allocation1 + $0x10] sm:$0xff pattern:$0x75316420]  ;;  %5277 = vst [vmem:[#allocation1 + $0x1] ss:$2 sm:$0xff] %v5185_v0 }
 0x6ff   : > { %5279 = vst [vmem:[#allocation1 + $0x10] ss:$2 sm:$0xff] %v5186_v9 }
 0x700   : > { %5281 = vst [vmem:[#allocation1 + $0x11] ss:$2 sm:$0xff] %v5187_v25 }
 0x705   : > { %v5282_v53 = vld.sshfl [vmem:[#allocation1] sm:$0xff pattern:$0x75316420]  ;;  %8772 = vmatmul.msk.f32.gmra.mxu2 %vm4565_vm14, %v5242_v26 }
 0x706   : > { %5316 = vst [vmem:[#allocation1] ss:$2 sm:$0xff] %v5184_v62  ;;  %8775 = vmatmul.msk.f32.vlgmr.msrb.gmra.mxu3 %vm4565_vm14, %v5282_v53 }
 0x707   : > { %v5283_v60 = vld.sshfl [vmem:[#allocation1 + $0x10] sm:$0xff pattern:$0x75316420]  ;;  %5318 = vst [vmem:[#allocation1 + $0x1] ss:$2 sm:$0xff] %v5185_v0 }
 0x708   : > { %5320 = vst [vmem:[#allocation1 + $0x10] ss:$2 sm:$0xff] %v5186_v9 }
 0x709   : > { %5322 = vst [vmem:[#allocation1 + $0x11] ss:$2 sm:$0xff] %v5187_v25 }
 0x70e   : > { %v5323_v11 = vld.sshfl [vmem:[#allocation1] sm:$0xff pattern:$0x75316420]  ;;  %8776 = vmatmul.msk.f32.gmra.mxu3 %vm4565_vm14, %v5283_v60 }
 0x70f   : > { %8779 = vmatmul.msk.f32.vlgmr.msrb.gmra.mxu2 %vm4565_vm14, %v5323_v11 }
 0x710   : > { %v5324_v63 = vld.sshfl [vmem:[#allocation1 + $0x10] sm:$0xff pattern:$0x75316420] }
 0x717   : > { %8780 = vmatmul.msk.f32.gmra.mxu2 %vm4565_vm14, %v5324_v63 }
 0x777   : > { %v5226_v54 = vpop.f32.mrf.mxu3 }
 0x778   : > { %v5357_v29 = vrot.slane %v5226_v54, 1  ;;  %v5358_v12 = vrot.slane %v5226_v54, 2  ;;  %v5359_v36 = vrot.slane %v5226_v54, 3  ;;  %v5360_v35 = vrot.slane %v5226_v54, 4 }
 0x779   : > { %v5361_v13 = vrot.slane %v5226_v54, 5  ;;  %v5362_v7 = vrot.slane %v5226_v54, 6  ;;  %v5363_v46 = vrot.slane %v5226_v54, 7 }
 0x77f   : > { %v11904_v8 = vpop.f32.mrf.mxu3 }
 0x780   : > { %v5267_v10 = vpop.f32.mrf.mxu2  ;;  %v5364_v22 = vrot.slane %v11904_v8, 1  ;;  %v5365_v17 = vrot.slane %v11904_v8, 2  ;;  %v5366_v32 = vrot.slane %v11904_v8, 3  ;;  %v5367_v28 = vrot.slane %v11904_v8, 4 }
 0x781   : > { %v5387_v50 = vrot.slane %v5267_v10, 1  ;;  %v5388_v56 = vrot.slane %v5267_v10, 2  ;;  %v5389_v5 = vrot.slane %v5267_v10, 3  ;;  %v5390_v21 = vrot.slane %v5267_v10, 4 }
 0x782   : > { %v5391_v1 = vrot.slane %v5267_v10, 5  ;;  %v5392_v44 = vrot.slane %v5267_v10, 6  ;;  %v5393_v34 = vrot.slane %v5267_v10, 7  ;;  %v5433_v40 = vperm.slane %v5267_v10, 0 }
 0x783   : > { %v5434_v57 = vperm.slane %v5387_v50, 0  ;;  %v5435_v14 = vperm.slane %v5388_v56, 0  ;;  %v5436_v47 = vperm.slane %v5389_v5, 0  ;;  %v5437_v59 = vperm.slane %v5390_v21, 0 }
 0x784   : > { %v5438_v45 = vperm.slane %v5391_v1, 0  ;;  %v5439_v31 = vperm.slane %v5392_v44, 0  ;;  %v5440_v55 = vperm.slane %v5393_v34, 0  ;;  %v5368_v41 = vrot.slane %v11904_v8, 5  ;;  %v5613_v1 = vld [vmem:[%s14282_s11] sm:$0xf] }
 0x785   : > { %v5369_v42 = vrot.slane %v11904_v8, 6  ;;  %v5370_v20 = vrot.slane %v11904_v8, 7  ;;  %v5529_v23 = vsel %vm14325_vm3, %v5226_v54, %v5433_v40  ;;  %v5530_v3 = vsel %vm14325_vm3, %v5357_v29, %v5434_v57  ;;  %8781 = vmatpush.msk.msra.mxu3 %vm4898_vm2, %v5613_v1 }
 0x786   : > { %v5531_v38 = vsel %vm14325_vm3, %v5358_v12, %v5435_v14  ;;  %v5532_v6 = vsel %vm14325_vm3, %v5359_v36, %v5436_v47  ;;  %v5533_v30 = vsel %vm14325_vm3, %v5360_v35, %v5437_v59  ;;  %v5534_v58 = vsel %vm14325_vm3, %v5361_v13, %v5438_v45 }
 0x787   : > { %v5535_v16 = vsel %vm14325_vm3, %v5362_v7, %v5439_v31  ;;  %v5536_v18 = vsel %vm14325_vm3, %v5363_v46, %v5440_v55 }
 0x788   : > { %v5270_v24 = vpop.f32.mrf.mxu2 }
 0x789   : > { %v5394_v15 = vrot.slane %v5270_v24, 1  ;;  %v5395_v4 = vrot.slane %v5270_v24, 2  ;;  %v5396_v61 = vrot.slane %v5270_v24, 3  ;;  %v5397_v51 = vrot.slane %v5270_v24, 4  ;;  %v5308_v48 = vpop.f32.mrf.mxu3 }
 0x78a   : > { %v5398_v52 = vrot.slane %v5270_v24, 5  ;;  %v5399_v27 = vrot.slane %v5270_v24, 6  ;;  %v5400_v49 = vrot.slane %v5270_v24, 7  ;;  %v5441_v19 = vperm.slane %v5270_v24, 0 }
 0x78b   : > { %v5442_v2 = vperm.slane %v5394_v15, 0  ;;  %v5443_v62 = vperm.slane %v5395_v4, 0  ;;  %v5444_v0 = vperm.slane %v5396_v61, 0  ;;  %v5445_v9 = vperm.slane %v5397_v51, 0 }
 0x78c   : > { %v5446_v25 = vperm.slane %v5398_v52, 0  ;;  %v5447_v39 = vperm.slane %v5399_v27, 0  ;;  %v5448_v43 = vperm.slane %v5400_v49, 0  ;;  %v5537_v37 = vsel %vm14325_vm3, %v11904_v8, %v5441_v19 }
 0x78d   : > { %v5538_v33 = vsel %vm14325_vm3, %v5364_v22, %v5442_v2  ;;  %v5539_v26 = vsel %vm14325_vm3, %v5365_v17, %v5443_v62  ;;  %v5540_v53 = vsel %vm14325_vm3, %v5366_v32, %v5444_v0  ;;  %v5541_v60 = vsel %vm14325_vm3, %v5367_v28, %v5445_v9 }
 0x78e   : > { %v5542_v11 = vsel %vm14325_vm3, %v5368_v41, %v5446_v25  ;;  %v5543_v63 = vsel %vm14325_vm3, %v5369_v42, %v5447_v39  ;;  %v5544_v54 = vsel %vm14325_vm3, %v5370_v20, %v5448_v43  ;;  %v5403_v29 = vrot.slane %v5308_v48, 1 }
 0x78f   : > { %v5404_v12 = vrot.slane %v5308_v48, 2  ;;  %v5405_v36 = vrot.slane %v5308_v48, 3  ;;  %v5406_v35 = vrot.slane %v5308_v48, 4  ;;  %v5407_v13 = vrot.slane %v5308_v48, 5 }
 0x790   : > { %v5408_v8 = vrot.slane %v5308_v48, 6  ;;  %v5409_v10 = vrot.slane %v5308_v48, 7  ;;  %v5465_v7 = vperm.slane %v5308_v48, 0  ;;  %v5466_v46 = vperm.slane %v5403_v29, 0 }
 0x791   : > { %v5467_v22 = vperm.slane %v5404_v12, 0  ;;  %v5468_v50 = vperm.slane %v5405_v36, 0  ;;  %v5469_v56 = vperm.slane %v5406_v35, 0  ;;  %v5470_v5 = vperm.slane %v5407_v13, 0  ;;  %v5311_v21 = vpop.f32.mrf.mxu3 }
 0x792   : > { %v5471_v44 = vperm.slane %v5408_v8, 0  ;;  %v5472_v34 = vperm.slane %v5409_v10, 0  ;;  %v5545_v40 = vsel %vm14324_vm15, %v5529_v23, %v5465_v7  ;;  %v5546_v57 = vsel %vm14324_vm15, %v5530_v3, %v5466_v46  ;;  %v5349_v61 = vpop.f32.mrf.mxu2 }
 0x793   : > { %v5547_v14 = vsel %vm14324_vm15, %v5531_v38, %v5467_v22  ;;  %v5548_v47 = vsel %vm14324_vm15, %v5532_v6, %v5468_v50  ;;  %v5549_v59 = vsel %vm14324_vm15, %v5533_v30, %v5469_v56  ;;  %v5550_v45 = vsel %vm14324_vm15, %v5534_v58, %v5470_v5 }
 0x794   : > { %v5551_v17 = vsel %vm14324_vm15, %v5535_v16, %v5471_v44  ;;  %v5552_v32 = vsel %vm14324_vm15, %v5536_v18, %v5472_v34  ;;  %v5410_v31 = vrot.slane %v5311_v21, 1  ;;  %v5411_v55 = vrot.slane %v5311_v21, 2 }
 0x795   : > { %v5412_v28 = vrot.slane %v5311_v21, 3  ;;  %v5413_v41 = vrot.slane %v5311_v21, 4  ;;  %v5414_v42 = vrot.slane %v5311_v21, 5  ;;  %v5415_v20 = vrot.slane %v5311_v21, 6 }
 0x796   : > { %v5416_v23 = vrot.slane %v5311_v21, 7  ;;  %v5473_v3 = vperm.slane %v5311_v21, 0  ;;  %v5474_v24 = vperm.slane %v5410_v31, 0  ;;  %v5475_v38 = vperm.slane %v5411_v55, 0 }
 0x797   : > { %v5476_v15 = vperm.slane %v5412_v28, 0  ;;  %v5477_v6 = vperm.slane %v5413_v41, 0  ;;  %v5478_v4 = vperm.slane %v5414_v42, 0  ;;  %v5479_v30 = vperm.slane %v5415_v20, 0 }
 0x798   : > { %v5480_v58 = vperm.slane %v5416_v23, 0  ;;  %v11943_v16 = vsel %vm14324_vm15, %v5537_v37, %v5473_v3  ;;  %v11946_v18 = vsel %vm14324_vm15, %v5538_v33, %v5474_v24  ;;  %v11949_v51 = vsel %vm14324_vm15, %v5539_v26, %v5475_v38 }
 0x799   : > { %v11952_v48 = vsel %vm14324_vm15, %v5540_v53, %v5476_v15  ;;  %v11955_v52 = vsel %vm14324_vm15, %v5541_v60, %v5477_v6  ;;  %v11958_v27 = vsel %vm14324_vm15, %v5542_v11, %v5478_v4  ;;  %v11961_v49 = vsel %vm14324_vm15, %v5543_v63, %v5479_v30  ;;  %v11969_v60 = vld [vmem:[%s14281_s10] ss:$0 sm:$0xff] }
 0x79a   : > { %v11964_v19 = vsel %vm14324_vm15, %v5544_v54, %v5480_v58  ;;  %v5419_v2 = vrot.slane %v5349_v61, 1  ;;  %v5420_v62 = vrot.slane %v5349_v61, 2  ;;  %v5421_v0 = vrot.slane %v5349_v61, 3 }
 0x79b   : > { %v5422_v9 = vrot.slane %v5349_v61, 4  ;;  %v5423_v25 = vrot.slane %v5349_v61, 5  ;;  %v5424_v39 = vrot.slane %v5349_v61, 6  ;;  %v5425_v43 = vrot.slane %v5349_v61, 7 }
 0x79c   : > { %v5497_v37 = vperm.slane %v5349_v61, 0  ;;  %v5498_v33 = vperm.slane %v5419_v2, 0  ;;  %v5499_v26 = vperm.slane %v5420_v62, 0  ;;  %v5500_v53 = vperm.slane %v5421_v0, 0 }
 0x79d   : > { %v5501_v11 = vperm.slane %v5422_v9, 0  ;;  %v5502_v63 = vperm.slane %v5423_v25, 0  ;;  %v5503_v54 = vperm.slane %v5424_v39, 0  ;;  %v5504_v29 = vperm.slane %v5425_v43, 0  ;;  %v8790_v39 = vld [vmem:[%s14282_s11 + $0x4] sm:$0xf] }
 0x79e   : > { %v5561_v12 = vsel %vm14440_vm0, %v5545_v40, %v5497_v37  ;;  %v5562_v36 = vsel %vm14441_vm5, %v5546_v57, %v5498_v33  ;;  %v5563_v35 = vsel %vm14442_vm6, %v5547_v14, %v5499_v26  ;;  %v5564_v13 = vsel %vm14443_vm7, %v5548_v47, %v5500_v53  ;;  %v5352_v40 = vpop.f32.mrf.mxu2  ;;  %vm14451_vm5 = vmmov %vm14440_vm0  ;;  %8791 = vmatpush.msk.msra.mxu1 %vm4898_vm2, %v8790_v39 }
 0x79f   : > { %v5565_v8 = vsel %vm14444_vm4, %v5549_v59, %v5501_v11  ;;  %v5566_v10 = vsel %vm14445_vm8, %v5550_v45, %v5502_v63  ;;  %v5567_v7 = vsel %vm14446_vm11, %v5551_v17, %v5503_v54  ;;  %v5568_v46 = vsel %vm14447_vm9, %v5552_v32, %v5504_v29  ;;  %vm14452_vm6 = vmmov %vm14440_vm0 }
 0x7a0   : > { %v5581_v22 = vadd.f32 %v11969_v60, %v5561_v12  ;;  %v5582_v50 = vadd.f32 %v11969_v60, %v5562_v36  ;;  %v5583_v56 = vadd.f32 %v11969_v60, %v5563_v35  ;;  %v5584_v5 = vadd.f32 %v11969_v60, %v5564_v13  ;;  %vm14453_vm7 = vmmov %vm14440_vm0 }
 0x7a1   : > { %v5585_v21 = vadd.f32 %v11969_v60, %v5565_v8  ;;  %v5586_v1 = vadd.f32 %v11969_v60, %v5566_v10  ;;  %v5587_v44 = vadd.f32 %v11969_v60, %v5567_v7  ;;  %v5588_v34 = vadd.f32 %v11969_v60, %v5568_v46  ;;  %vm14454_vm4 = vmmov %vm14440_vm0  ;;  %v8800_v46 = vld [vmem:[%s14282_s11 + $0x8] sm:$0xf] }
 0x7a2   : > { %v11987_v57 = vmax.f32 %v5581_v22, 0.0  ;;  %v11989_v14 = vmax.f32 %v5582_v50, 0.0  ;;  %v11991_v47 = vmax.f32 %v5583_v56, 0.0  ;;  %v11993_v59 = vmax.f32 %v5584_v5, 0.0  ;;  %8801 = vmatpush.msk.msra.mxu2 %vm4898_vm2, %v8800_v46  ;;  %vm14486_vm8 = vmmov %vm14440_vm0 }
 0x7a3   : > { %v11995_v45 = vmax.f32 %v5585_v21, 0.0  ;;  %v11997_v17 = vmax.f32 %v5586_v1, 0.0  ;;  %v11999_v32 = vmax.f32 %v5587_v44, 0.0  ;;  %v12001_v31 = vmax.f32 %v5588_v34, 0.0  ;;  %vm14487_vm11 = vmmov %vm14440_vm0 }
 0x7a4   : > { %5630 = vst [vmem:[#allocation1] ss:$2 sm:$0xff] %v11987_v57  ;;  %v5426_v55 = vrot.slane %v5352_v40, 1  ;;  %v5427_v28 = vrot.slane %v5352_v40, 2  ;;  %v5428_v41 = vrot.slane %v5352_v40, 3  ;;  %v5429_v42 = vrot.slane %v5352_v40, 4  ;;  %vm14488_vm9 = vmmov %vm14440_vm0 }
 0x7a5   : > { %5632 = vst [vmem:[#allocation1 + $0x1] ss:$2 sm:$0xff] %v11989_v14  ;;  %v5430_v20 = vrot.slane %v5352_v40, 5  ;;  %v5431_v23 = vrot.slane %v5352_v40, 6  ;;  %v5432_v3 = vrot.slane %v5352_v40, 7  ;;  %v5505_v24 = vperm.slane %v5352_v40, 0 }
 0x7a6   : > { %5634 = vst [vmem:[#allocation1 + $0x10] ss:$2 sm:$0xff] %v11991_v47  ;;  %v5506_v38 = vperm.slane %v5426_v55, 0  ;;  %v5507_v15 = vperm.slane %v5427_v28, 0  ;;  %v5508_v6 = vperm.slane %v5428_v41, 0  ;;  %v5509_v4 = vperm.slane %v5429_v42, 0 }
 0x7a7   : > { %5636 = vst [vmem:[#allocation1 + $0x11] ss:$2 sm:$0xff] %v11993_v59  ;;  %v5510_v30 = vperm.slane %v5430_v20, 0  ;;  %v5511_v61 = vperm.slane %v5431_v23, 0  ;;  %v5512_v58 = vperm.slane %v5432_v3, 0  ;;  %v5569_v2 = vsel %vm14448_vm10, %v11943_v16, %v5505_v24  ;;  %vm14489_vm10 = vmmov %vm14440_vm0 }
 0x7a8   : > { %5638 = vst [vmem:[#allocation1 + $0x20] ss:$2 sm:$0xff] %v11995_v45  ;;  %v5570_v62 = vsel %vm14449_vm13, %v11946_v18, %v5506_v38  ;;  %v5571_v0 = vsel %vm14450_vm12, %v11949_v51, %v5507_v15  ;;  %v5572_v9 = vsel %vm14440_vm0, %v11952_v48, %v5508_v6  ;;  %v5573_v25 = vsel %vm14451_vm5, %v11955_v52, %v5509_v4  ;;  %v8810_v40 = vld [vmem:[%s14282_s11 + $0xc] sm:$0xf]  ;;  %vm14490_vm13 = vmmov %vm14440_vm0 }
 0x7a9   : > { %5640 = vst [vmem:[#allocation1 + $0x21] ss:$2 sm:$0xff] %v11997_v17  ;;  %v5574_v16 = vsel %vm14452_vm6, %v11958_v27, %v5510_v30  ;;  %v5575_v18 = vsel %vm14453_vm7, %v11961_v49, %v5511_v61  ;;  %v5576_v51 = vsel %vm14454_vm4, %v11964_v19, %v5512_v58  ;;  %v5589_v48 = vadd.f32 %v11969_v60, %v5569_v2  ;;  %vm14491_vm12 = vmmov %vm14440_vm0 }
 0x7aa   : > { %5642 = vst [vmem:[#allocation1 + $0x30] ss:$2 sm:$0xff] %v11999_v32  ;;  %v5590_v52 = vadd.f32 %v11969_v60, %v5570_v62  ;;  %v5591_v43 = vadd.f32 %v11969_v60, %v5571_v0  ;;  %v5592_v37 = vadd.f32 %v11969_v60, %v5572_v9  ;;  %v5593_v33 = vadd.f32 %v11969_v60, %v5573_v25 }
 0x7ab   : > { %5644 = vst [vmem:[#allocation1 + $0x31] ss:$2 sm:$0xff] %v12001_v31  ;;  %v5594_v27 = vadd.f32 %v11969_v60, %v5574_v16  ;;  %v5595_v49 = vadd.f32 %v11969_v60, %v5575_v18  ;;  %v12037_v26 = vmax.f32 %v5589_v48, 0.0  ;;  %v5596_v53 = vadd.f32 %v11969_v60, %v5576_v51  ;;  %8811 = vmatpush.msk.msrb.mxu3 %vm4898_vm2, %v8810_v40  ;;  %vm14485_vm2 = vmmov %vm14440_vm0 }
 0x7ac   : > { %v5645_v19 = vld.sshfl [vmem:[#allocation1] sm:$0xff pattern:$0x75316420]  ;;  %v12041_v11 = vmax.f32 %v5590_v52, 0.0  ;;  %v12043_v63 = vmax.f32 %v5591_v43, 0.0  ;;  %v12045_v54 = vmax.f32 %v5592_v37, 0.0 }
 0x7ad   : > { %v12047_v29 = vmax.f32 %v5593_v33, 0.0  ;;  %5649 = vst [vmem:[#allocation1] ss:$2 sm:$0xff] %v12037_v26  ;;  %8782 = vmatmul.msk.f32.vlgmr.msra.gmra.mxu3 %vm4565_vm14, %v5645_v19  ;;  %v12051_v36 = vmax.f32 %v5594_v27, 0.0  ;;  %v12054_v35 = vmax.f32 %v5595_v49, 0.0  ;;  %v12057_v13 = vmax.f32 %v5596_v53, 0.0 }
 0x7ae   : > { %v5646_v12 = vld.sshfl [vmem:[#allocation1 + $0x10] sm:$0xff pattern:$0x75316420]  ;;  %5650 = vst [vmem:[#allocation1 + $0x1] ss:$2 sm:$0xff] %v12041_v11 }
 0x7af   : > { %5651 = vst [vmem:[#allocation1 + $0x10] ss:$2 sm:$0xff] %v12043_v63 }
 0x7b0   : > { %v5647_v60 = vld.sshfl [vmem:[#allocation1 + $0x20] sm:$0xff pattern:$0x75316420]  ;;  %5652 = vst [vmem:[#allocation1 + $0x11] ss:$2 sm:$0xff] %v12045_v54 }
 0x7b1   : > { %5653 = vst [vmem:[#allocation1 + $0x20] ss:$2 sm:$0xff] %v12047_v29 }
 0x7b2   : > { %v5648_v8 = vld.sshfl [vmem:[#allocation1 + $0x30] sm:$0xff pattern:$0x75316420]  ;;  %5654 = vst [vmem:[#allocation1 + $0x21] ss:$2 sm:$0xff] %v12051_v36 }
 0x7b3   : > { %5655 = vst [vmem:[#allocation1 + $0x30] ss:$2 sm:$0xff] %v12054_v35 }
 0x7b4   : > { %5656 = vst [vmem:[#allocation1 + $0x31] ss:$2 sm:$0xff] %v12057_v13 }
 0x7b5   : > { %v5657_v10 = vld.sshfl [vmem:[#allocation1] sm:$0xff pattern:$0x75316420]  ;;  %8783 = vmatmul.msk.f32.gmra.mxu3 %vm4565_vm14, %v5646_v12 }
 0x7b6   : > { %5723 = vst [vmem:[#allocation1] ss:$2 sm:$0xff] %v11987_v57 }
 0x7b7   : > { %v5658_v7 = vld.sshfl [vmem:[#allocation1 + $0x10] sm:$0xff pattern:$0x75316420]  ;;  %5725 = vst [vmem:[#allocation1 + $0x1] ss:$2 sm:$0xff] %v11989_v14 }
 0x7b8   : > { %5727 = vst [vmem:[#allocation1 + $0x10] ss:$2 sm:$0xff] %v11991_v47 }
 0x7b9   : > { %v5659_v22 = vld.sshfl [vmem:[#allocation1 + $0x20] sm:$0xff pattern:$0x75316420]  ;;  %5729 = vst [vmem:[#allocation1 + $0x11] ss:$2 sm:$0xff] %v11993_v59 }
 0x7ba   : > { %5731 = vst [vmem:[#allocation1 + $0x20] ss:$2 sm:$0xff] %v11995_v45 }
 0x7bb   : > { %v12074_v50 = vld.sshfl [vmem:[#allocation1 + $0x30] sm:$0xff pattern:$0x75316420]  ;;  %5733 = vst [vmem:[#allocation1 + $0x21] ss:$2 sm:$0xff] %v11997_v17 }
 0x7bc   : > { %5735 = vst [vmem:[#allocation1 + $0x30] ss:$2 sm:$0xff] %v11999_v32 }
 0x7bd   : > { %5737 = vst [vmem:[#allocation1 + $0x31] ss:$2 sm:$0xff] %v12001_v31  ;;  %8784 = vmatmul.msk.f32.gmra.mxu3 %vm4565_vm14, %v5647_v60 }
 0x7be   : > { %v5738_v56 = vld.sshfl [vmem:[#allocation1] sm:$0xff pattern:$0x75316420] }
 0x7bf   : > { %8792 = vmatmul.msk.f32.vlgmr.msra.gmra.mxu1 %vm4565_vm14, %v5738_v56  ;;  %5742 = vst [vmem:[#allocation1] ss:$2 sm:$0xff] %v12037_v26 }
 0x7c0   : > { %5743 = vst [vmem:[#allocation1 + $0x1] ss:$2 sm:$0xff] %v12041_v11  ;;  %v5739_v5 = vld.sshfl [vmem:[#allocation1 + $0x10] sm:$0xff pattern:$0x75316420] }
 0x7c1   : > { %5744 = vst [vmem:[#allocation1 + $0x10] ss:$2 sm:$0xff] %v12043_v63 }
 0x7c2   : > { %v5740_v21 = vld.sshfl [vmem:[#allocation1 + $0x20] sm:$0xff pattern:$0x75316420]  ;;  %5745 = vst [vmem:[#allocation1 + $0x11] ss:$2 sm:$0xff] %v12045_v54 }
 0x7c3   : > { %5746 = vst [vmem:[#allocation1 + $0x20] ss:$2 sm:$0xff] %v12047_v29 }
 0x7c4   : > { %v5741_v1 = vld.sshfl [vmem:[#allocation1 + $0x30] sm:$0xff pattern:$0x75316420]  ;;  %5747 = vst [vmem:[#allocation1 + $0x21] ss:$2 sm:$0xff] %v12051_v36 }
 0x7c5   : > { %5748 = vst [vmem:[#allocation1 + $0x30] ss:$2 sm:$0xff] %v12054_v35  ;;  %8785 = vmatmul.msk.f32.gmra.mxu3 %vm4565_vm14, %v5648_v8 }
 0x7c6   : > { %5749 = vst [vmem:[#allocation1 + $0x31] ss:$2 sm:$0xff] %v12057_v13 }
 0x7c7   : > { %8793 = vmatmul.msk.f32.gmra.mxu1 %vm4565_vm14, %v5739_v5  ;;  %v5750_v44 = vld.sshfl [vmem:[#allocation1] sm:$0xff pattern:$0x75316420] }
 0x7c8   : > { %5816 = vst [vmem:[#allocation1] ss:$2 sm:$0xff] %v11987_v57 }
 0x7c9   : > { %5818 = vst [vmem:[#allocation1 + $0x1] ss:$2 sm:$0xff] %v11989_v14  ;;  %v5751_v34 = vld.sshfl [vmem:[#allocation1 + $0x10] sm:$0xff pattern:$0x75316420] }
 0x7ca   : > { %5820 = vst [vmem:[#allocation1 + $0x10] ss:$2 sm:$0xff] %v11991_v47 }
 0x7cb   : > { %v5752_v55 = vld.sshfl [vmem:[#allocation1 + $0x20] sm:$0xff pattern:$0x75316420]  ;;  %5822 = vst [vmem:[#allocation1 + $0x11] ss:$2 sm:$0xff] %v11993_v59 }
 0x7cc   : > { %5824 = vst [vmem:[#allocation1 + $0x20] ss:$2 sm:$0xff] %v11995_v45 }
 0x7cd   : > { %v5753_v28 = vld.sshfl [vmem:[#allocation1 + $0x30] sm:$0xff pattern:$0x75316420]  ;;  %5826 = vst [vmem:[#allocation1 + $0x21] ss:$2 sm:$0xff] %v11997_v17  ;;  %8786 = vmatmul.msk.f32.gmra.mxu3 %vm4565_vm14, %v5657_v10 }
 0x7ce   : > { %5828 = vst [vmem:[#allocation1 + $0x30] ss:$2 sm:$0xff] %v11999_v32 }
 0x7cf   : > { %5830 = vst [vmem:[#allocation1 + $0x31] ss:$2 sm:$0xff] %v12001_v31  ;;  %8794 = vmatmul.msk.f32.gmra.mxu1 %vm4565_vm14, %v5740_v21 }
 0x7d0   : > { %v5831_v41 = vld.sshfl [vmem:[#allocation1] sm:$0xff pattern:$0x75316420] }
 0x7d1   : > { %8802 = vmatmul.msk.f32.vlgmr.msra.gmra.mxu2 %vm4565_vm14, %v5831_v41  ;;  %5835 = vst [vmem:[#allocation1] ss:$2 sm:$0xff] %v12037_v26 }
 0x7d2   : > { %5836 = vst [vmem:[#allocation1 + $0x1] ss:$2 sm:$0xff] %v12041_v11  ;;  %v5832_v42 = vld.sshfl [vmem:[#allocation1 + $0x10] sm:$0xff pattern:$0x75316420] }
 0x7d3   : > { %5837 = vst [vmem:[#allocation1 + $0x10] ss:$2 sm:$0xff] %v12043_v63 }
 0x7d4   : > { %v5833_v20 = vld.sshfl [vmem:[#allocation1 + $0x20] sm:$0xff pattern:$0x75316420]  ;;  %5838 = vst [vmem:[#allocation1 + $0x11] ss:$2 sm:$0xff] %v12045_v54 }
 0x7d5   : > { %5839 = vst [vmem:[#allocation1 + $0x20] ss:$2 sm:$0xff] %v12047_v29  ;;  %8787 = vmatmul.msk.f32.gmra.mxu3 %vm4565_vm14, %v5658_v7 }
 0x7d6   : > { %v5834_v23 = vld.sshfl [vmem:[#allocation1 + $0x30] sm:$0xff pattern:$0x75316420]  ;;  %5840 = vst [vmem:[#allocation1 + $0x21] ss:$2 sm:$0xff] %v12051_v36 }
 0x7d7   : > { %5841 = vst [vmem:[#allocation1 + $0x30] ss:$2 sm:$0xff] %v12054_v35  ;;  %8795 = vmatmul.msk.f32.gmra.mxu1 %vm4565_vm14, %v5741_v1 }
 0x7d8   : > { %5842 = vst [vmem:[#allocation1 + $0x31] ss:$2 sm:$0xff] %v12057_v13 }
 0x7d9   : > { %8803 = vmatmul.msk.f32.gmra.mxu2 %vm4565_vm14, %v5832_v42  ;;  %v5843_v3 = vld.sshfl [vmem:[#allocation1] sm:$0xff pattern:$0x75316420] }
 0x7da   : > { %5909 = vst [vmem:[#allocation1] ss:$2 sm:$0xff] %v11987_v57 }
 0x7db   : > { %5911 = vst [vmem:[#allocation1 + $0x1] ss:$2 sm:$0xff] %v11989_v14  ;;  %v5844_v24 = vld.sshfl [vmem:[#allocation1 + $0x10] sm:$0xff pattern:$0x75316420] }
 0x7dc   : > { %5913 = vst [vmem:[#allocation1 + $0x10] ss:$2 sm:$0xff] %v11991_v47 }
 0x7dd   : > { %v5845_v38 = vld.sshfl [vmem:[#allocation1 + $0x20] sm:$0xff pattern:$0x75316420]  ;;  %8788 = vmatmul.msk.f32.gmra.mxu3 %vm4565_vm14, %v5659_v22  ;;  %5915 = vst [vmem:[#allocation1 + $0x11] ss:$2 sm:$0xff] %v11993_v59 }
 0x7de   : > { %5917 = vst [vmem:[#allocation1 + $0x20] ss:$2 sm:$0xff] %v11995_v45 }
 0x7df   : > { %v5846_v15 = vld.sshfl [vmem:[#allocation1 + $0x30] sm:$0xff pattern:$0x75316420]  ;;  %5919 = vst [vmem:[#allocation1 + $0x21] ss:$2 sm:$0xff] %v11997_v17  ;;  %8796 = vmatmul.msk.f32.gmra.mxu1 %vm4565_vm14, %v5750_v44 }
 0x7e0   : > { %5921 = vst [vmem:[#allocation1 + $0x30] ss:$2 sm:$0xff] %v11999_v32 }
 0x7e1   : > { %5923 = vst [vmem:[#allocation1 + $0x31] ss:$2 sm:$0xff] %v12001_v31  ;;  %8804 = vmatmul.msk.f32.gmra.mxu2 %vm4565_vm14, %v5833_v20 }
 0x7e2   : > { %v5924_v57 = vld.sshfl [vmem:[#allocation1] sm:$0xff pattern:$0x75316420] }
 0x7e3   : > { %5928 = vst [vmem:[#allocation1] ss:$2 sm:$0xff] %v12037_v26 }
 0x7e4   : > { %5929 = vst [vmem:[#allocation1 + $0x1] ss:$2 sm:$0xff] %v12041_v11  ;;  %v5925_v14 = vld.sshfl [vmem:[#allocation1 + $0x10] sm:$0xff pattern:$0x75316420] }
 0x7e5   : > { %8789 = vmatmul.msk.f32.gmra.mxu3 %vm4565_vm14, %v12074_v50  ;;  %5930 = vst [vmem:[#allocation1 + $0x10] ss:$2 sm:$0xff] %v12043_v63 }
 0x7e6   : > { %v5926_v47 = vld.sshfl [vmem:[#allocation1 + $0x20] sm:$0xff pattern:$0x75316420]  ;;  %5931 = vst [vmem:[#allocation1 + $0x11] ss:$2 sm:$0xff] %v12045_v54 }
 0x7e7   : > { %5932 = vst [vmem:[#allocation1 + $0x20] ss:$2 sm:$0xff] %v12047_v29  ;;  %8797 = vmatmul.msk.f32.gmra.mxu1 %vm4565_vm14, %v5751_v34 }
 0x7e8   : > { %v5927_v59 = vld.sshfl [vmem:[#allocation1 + $0x30] sm:$0xff pattern:$0x75316420]  ;;  %5933 = vst [vmem:[#allocation1 + $0x21] ss:$2 sm:$0xff] %v12051_v36 }
 0x7e9   : > { %5934 = vst [vmem:[#allocation1 + $0x30] ss:$2 sm:$0xff] %v12054_v35  ;;  %8805 = vmatmul.msk.f32.gmra.mxu2 %vm4565_vm14, %v5834_v23 }
 0x7ea   : > { %5935 = vst [vmem:[#allocation1 + $0x31] ss:$2 sm:$0xff] %v12057_v13 }
 0x7eb   : > { %v5936_v45 = vld.sshfl [vmem:[#allocation1] sm:$0xff pattern:$0x75316420] }
 0x7ed   : > { %8812 = vmatmul.msk.f32.vlgmr.msrb.gmra.mxu3 %vm4565_vm14, %v5924_v57  ;;  %v5937_v17 = vld.sshfl [vmem:[#allocation1 + $0x10] sm:$0xff pattern:$0x75316420] }
 0x7ef   : > { %8798 = vmatmul.msk.f32.gmra.mxu1 %vm4565_vm14, %v5752_v55  ;;  %v5938_v32 = vld.sshfl [vmem:[#allocation1 + $0x20] sm:$0xff pattern:$0x75316420] }
 0x7f1   : > { %8806 = vmatmul.msk.f32.gmra.mxu2 %vm4565_vm14, %v5843_v3  ;;  %v5939_v31 = vld.sshfl [vmem:[#allocation1 + $0x30] sm:$0xff pattern:$0x75316420] }
 0x7f5   : > { %8813 = vmatmul.msk.f32.gmra.mxu3 %vm4565_vm14, %v5925_v14 }
 0x7f7   : > { %8799 = vmatmul.msk.f32.gmra.mxu1 %vm4565_vm14, %v5753_v28 }
 0x7f9   : > { %8807 = vmatmul.msk.f32.gmra.mxu2 %vm4565_vm14, %v5844_v24 }
 0x7fd   : > { %8814 = vmatmul.msk.f32.gmra.mxu3 %vm4565_vm14, %v5926_v47 }
 0x801   : > { %8808 = vmatmul.msk.f32.gmra.mxu2 %vm4565_vm14, %v5845_v38 }
 0x805   : > { %8815 = vmatmul.msk.f32.gmra.mxu3 %vm4565_vm14, %v5927_v59 }
 0x809   : > { %8809 = vmatmul.msk.f32.gmra.mxu2 %vm4565_vm14, %v5846_v15 }
 0x80d   : > { %8816 = vmatmul.msk.f32.gmra.mxu3 %vm4565_vm14, %v5936_v45 }
 0x815   : > { %8817 = vmatmul.msk.f32.gmra.mxu3 %vm4565_vm14, %v5937_v17 }
 0x81d   : > { %8818 = vmatmul.msk.f32.gmra.mxu3 %vm4565_vm14, %v5938_v32 }
 0x825   : > { %8819 = vmatmul.msk.f32.gmra.mxu3 %vm4565_vm14, %v5939_v31  ;;  %vm14484_vm14 = vmmov %vm14440_vm0 }
 0x830   : > { %v5697_v6 = vpop.f32.mrf.mxu3 }
 0x831   : > { %v6008_v9 = vrot.slane %v5697_v6, 1  ;;  %v6009_v25 = vrot.slane %v5697_v6, 2  ;;  %v6010_v39 = vrot.slane %v5697_v6, 3  ;;  %v6011_v16 = vrot.slane %v5697_v6, 4 }
 0x832   : > { %v6012_v48 = vrot.slane %v5697_v6, 5  ;;  %v6013_v52 = vrot.slane %v5697_v6, 6  ;;  %v6014_v19 = vrot.slane %v5697_v6, 7 }
 0x838   : > { %v12154_v4 = vpop.f32.mrf.mxu3 }
 0x839   : > { %v6015_v53 = vrot.slane %v12154_v4, 1  ;;  %v6016_v54 = vrot.slane %v12154_v4, 2  ;;  %v6017_v29 = vrot.slane %v12154_v4, 3  ;;  %v6018_v12 = vrot.slane %v12154_v4, 4 }
 0x83a   : > { %v6019_v36 = vrot.slane %v12154_v4, 5  ;;  %v6020_v35 = vrot.slane %v12154_v4, 6  ;;  %v6021_v60 = vrot.slane %v12154_v4, 7 }
 0x83c   : > { %v5790_v30 = vpop.f32.mrf.mxu1 }
 0x83d   : > { %v6128_v61 = vrot.slane %v5790_v30, 1  ;;  %v6129_v58 = vrot.slane %v5790_v30, 2  ;;  %v6130_v2 = vrot.slane %v5790_v30, 3  ;;  %v6131_v62 = vrot.slane %v5790_v30, 4 }
 0x83e   : > { %v6132_v0 = vrot.slane %v5790_v30, 5  ;;  %v6133_v43 = vrot.slane %v5790_v30, 6  ;;  %v6134_v37 = vrot.slane %v5790_v30, 7  ;;  %v6312_v33 = vperm.slane %v5790_v30, 0 }
 0x83f   : > { %v6313_v27 = vperm.slane %v6128_v61, 0  ;;  %v6314_v49 = vperm.slane %v6129_v58, 0  ;;  %v6315_v26 = vperm.slane %v6130_v2, 0  ;;  %v6316_v11 = vperm.slane %v6131_v62, 0 }
 0x840   : > { %v12156_v18 = vpop.f32.mrf.mxu3  ;;  %v6317_v63 = vperm.slane %v6132_v0, 0  ;;  %v6318_v13 = vperm.slane %v6133_v43, 0  ;;  %v6319_v8 = vperm.slane %v6134_v37, 0  ;;  %v12166_v10 = vsel %vm14325_vm3, %v5697_v6, %v6312_v33 }
 0x841   : > { %v12169_v7 = vsel %vm14325_vm3, %v6008_v9, %v6313_v27  ;;  %v12172_v46 = vsel %vm14325_vm3, %v6009_v25, %v6314_v49  ;;  %v12175_v22 = vsel %vm14325_vm3, %v6010_v39, %v6315_v26  ;;  %v12178_v50 = vsel %vm14325_vm3, %v6011_v16, %v6316_v11 }
 0x842   : > { %v12181_v56 = vsel %vm14325_vm3, %v6012_v48, %v6317_v63  ;;  %v12184_v55 = vsel %vm14325_vm3, %v6013_v52, %v6318_v13  ;;  %v12187_v28 = vsel %vm14325_vm3, %v6014_v19, %v6319_v8  ;;  %v6022_v41 = vrot.slane %v12156_v18, 1 }
 0x843   : > { %v6023_v42 = vrot.slane %v12156_v18, 2  ;;  %v6024_v20 = vrot.slane %v12156_v18, 3  ;;  %v6025_v23 = vrot.slane %v12156_v18, 4  ;;  %v6026_v3 = vrot.slane %v12156_v18, 5 }
 0x844   : > { %v5793_v51 = vpop.f32.mrf.mxu1  ;;  %v6027_v24 = vrot.slane %v12156_v18, 6  ;;  %v6028_v6 = vrot.slane %v12156_v18, 7 }
 0x845   : > { %v6135_v5 = vrot.slane %v5793_v51, 1  ;;  %v6136_v21 = vrot.slane %v5793_v51, 2  ;;  %v6137_v1 = vrot.slane %v5793_v51, 3  ;;  %v6138_v44 = vrot.slane %v5793_v51, 4 }
 0x846   : > { %v6139_v34 = vrot.slane %v5793_v51, 5  ;;  %v6140_v40 = vrot.slane %v5793_v51, 6  ;;  %v6141_v57 = vrot.slane %v5793_v51, 7  ;;  %v6320_v14 = vperm.slane %v5793_v51, 0 }
 0x847   : > { %v6321_v47 = vperm.slane %v6135_v5, 0  ;;  %v6322_v59 = vperm.slane %v6136_v21, 0  ;;  %v6323_v45 = vperm.slane %v6137_v1, 0  ;;  %v6324_v17 = vperm.slane %v6138_v44, 0 }
 0x848   : > { %v12195_v38 = vpop.f32.mrf.mxu3  ;;  %v6325_v32 = vperm.slane %v6139_v34, 0  ;;  %v6326_v31 = vperm.slane %v6140_v40, 0  ;;  %v6327_v25 = vperm.slane %v6141_v57, 0  ;;  %v12200_v39 = vsel %vm14325_vm3, %v12154_v4, %v6320_v14 }
 0x849   : > { %v12203_v16 = vsel %vm14325_vm3, %v6015_v53, %v6321_v47  ;;  %v12206_v51 = vsel %vm14325_vm3, %v6016_v54, %v6322_v59  ;;  %v12209_v48 = vsel %vm14325_vm3, %v6017_v29, %v6323_v45  ;;  %v12212_v52 = vsel %vm14325_vm3, %v6018_v12, %v6324_v17 }
 0x84a   : > { %v12215_v43 = vsel %vm14325_vm3, %v6019_v36, %v6325_v32  ;;  %v12218_v37 = vsel %vm14325_vm3, %v6020_v35, %v6326_v31  ;;  %v12221_v63 = vsel %vm14325_vm3, %v6021_v60, %v6327_v25  ;;  %v6029_v54 = vrot.slane %v12195_v38, 1 }
 0x84b   : > { %v6030_v29 = vrot.slane %v12195_v38, 2  ;;  %v6031_v12 = vrot.slane %v12195_v38, 3  ;;  %v6032_v36 = vrot.slane %v12195_v38, 4  ;;  %v6033_v35 = vrot.slane %v12195_v38, 5 }
 0x84c   : > { %v5796_v15 = vpop.f32.mrf.mxu1  ;;  %v6034_v13 = vrot.slane %v12195_v38, 6 }
 0x84d   : > { %v6142_v30 = vrot.slane %v5796_v15, 1  ;;  %v6143_v61 = vrot.slane %v5796_v15, 2  ;;  %v6144_v58 = vrot.slane %v5796_v15, 3  ;;  %v6145_v2 = vrot.slane %v5796_v15, 4 }
 0x84e   : > { %v6146_v62 = vrot.slane %v5796_v15, 5  ;;  %v6147_v0 = vrot.slane %v5796_v15, 6  ;;  %v6148_v9 = vrot.slane %v5796_v15, 7  ;;  %v6328_v4 = vperm.slane %v5796_v15, 0 }
 0x84f   : > { %v6329_v33 = vperm.slane %v6142_v30, 0  ;;  %v6330_v27 = vperm.slane %v6143_v61, 0  ;;  %v6331_v49 = vperm.slane %v6144_v58, 0  ;;  %v6332_v26 = vperm.slane %v6145_v2, 0 }
 0x850   : > { %v6333_v19 = vperm.slane %v6146_v62, 0  ;;  %v6334_v53 = vperm.slane %v6147_v0, 0  ;;  %v6335_v11 = vperm.slane %v6148_v9, 0  ;;  %v12230_v5 = vpop.f32.mrf.mxu3  ;;  %v12234_v60 = vsel %vm14325_vm3, %v12156_v18, %v6328_v4 }
 0x851   : > { %v12237_v21 = vsel %vm14325_vm3, %v6022_v41, %v6329_v33  ;;  %v12240_v1 = vsel %vm14325_vm3, %v6023_v42, %v6330_v27  ;;  %v12243_v44 = vsel %vm14325_vm3, %v6024_v20, %v6331_v49  ;;  %v12246_v40 = vsel %vm14325_vm3, %v6025_v23, %v6332_v26 }
 0x852   : > { %v12249_v15 = vsel %vm14325_vm3, %v6026_v3, %v6333_v19  ;;  %v12252_v57 = vsel %vm14325_vm3, %v6027_v24, %v6334_v53  ;;  %v12255_v18 = vsel %vm14325_vm3, %v6028_v6, %v6335_v11 }
 0x854   : > { %v5883_v34 = vpop.f32.mrf.mxu2  ;;  %v5799_v47 = vpop.f32.mrf.mxu1 }
 0x855   : > { %v6192_v59 = vrot.slane %v5883_v34, 1  ;;  %v6193_v45 = vrot.slane %v5883_v34, 2  ;;  %v6194_v24 = vrot.slane %v5883_v34, 3  ;;  %v6195_v17 = vrot.slane %v5883_v34, 4 }
 0x856   : > { %v6196_v32 = vrot.slane %v5883_v34, 5  ;;  %v6197_v31 = vrot.slane %v5883_v34, 6  ;;  %v6198_v30 = vrot.slane %v5883_v34, 7  ;;  %v6149_v61 = vrot.slane %v5799_v47, 1 }
 0x857   : > { %v6150_v58 = vrot.slane %v5799_v47, 2  ;;  %v6151_v2 = vrot.slane %v5799_v47, 3  ;;  %v6152_v62 = vrot.slane %v5799_v47, 4  ;;  %v6153_v0 = vrot.slane %v5799_v47, 5 }
 0x858   : > { %v6154_v9 = vrot.slane %v5799_v47, 6  ;;  %v6440_v25 = vperm.slane %v5883_v34, 0  ;;  %v6441_v4 = vperm.slane %v6192_v59, 0  ;;  %v6442_v33 = vperm.slane %v6193_v45, 0 }
 0x859   : > { %v6155_v27 = vrot.slane %v5799_v47, 7  ;;  %v6443_v49 = vperm.slane %v6194_v24, 0  ;;  %v6444_v26 = vperm.slane %v6195_v17, 0  ;;  %v6445_v19 = vperm.slane %v6196_v32, 0  ;;  %v12292_v17 = vpop.f32.mrf.mxu3 }
 0x85a   : > { %v6446_v53 = vperm.slane %v6197_v31, 0  ;;  %v6447_v11 = vperm.slane %v6198_v30, 0  ;;  %v6336_v3 = vperm.slane %v5799_v47, 0  ;;  %v6337_v23 = vperm.slane %v6149_v61, 0 }
 0x85b   : > { %v6338_v14 = vperm.slane %v6150_v58, 0  ;;  %v6339_v6 = vperm.slane %v6151_v2, 0  ;;  %v6340_v20 = vperm.slane %v6152_v62, 0  ;;  %v6341_v42 = vperm.slane %v6153_v0, 0 }
 0x85c   : > { %v6342_v41 = vperm.slane %v6154_v9, 0  ;;  %v12266_v8 = vsel %vm14324_vm15, %v12166_v10, %v6440_v25  ;;  %v12270_v34 = vsel %vm14324_vm15, %v12169_v7, %v6441_v4  ;;  %v12274_v59 = vsel %vm14324_vm15, %v12172_v46, %v6442_v33  ;;  %v5802_v32 = vpop.f32.mrf.mxu1 }
 0x85d   : > { %v6343_v45 = vperm.slane %v6155_v27, 0  ;;  %v12278_v47 = vsel %vm14324_vm15, %v12175_v22, %v6443_v49  ;;  %v12282_v24 = vsel %vm14324_vm15, %v12178_v50, %v6444_v26  ;;  %v12286_v10 = vsel %vm14324_vm15, %v12181_v56, %v6445_v19 }
 0x85e   : > { %v12290_v7 = vsel %vm14324_vm15, %v12184_v55, %v6446_v53  ;;  %v12296_v46 = vsel %vm14324_vm15, %v12187_v28, %v6447_v11  ;;  %v12300_v22 = vsel %vm14325_vm3, %v12195_v38, %v6336_v3  ;;  %v12305_v50 = vsel %vm14325_vm3, %v6029_v54, %v6337_v23  ;;  %v5886_v55 = vpop.f32.mrf.mxu2 }
 0x85f   : > { %v12310_v56 = vsel %vm14325_vm3, %v6030_v29, %v6338_v14  ;;  %v12315_v28 = vsel %vm14325_vm3, %v6031_v12, %v6339_v6  ;;  %v12320_v3 = vsel %vm14325_vm3, %v6032_v36, %v6340_v20  ;;  %v12325_v54 = vsel %vm14325_vm3, %v6033_v35, %v6341_v42 }
 0x860   : > { %v12330_v29 = vsel %vm14325_vm3, %v6034_v13, %v6342_v41  ;;  %v14455_v14 = vrot.slane %v12195_v38, 7  ;;  %v6199_v13 = vrot.slane %v5886_v55, 1  ;;  %v6200_v41 = vrot.slane %v5886_v55, 2 }
 0x861   : > { %v6201_v6 = vrot.slane %v5886_v55, 3  ;;  %v6202_v38 = vrot.slane %v5886_v55, 4  ;;  %v6203_v30 = vrot.slane %v5886_v55, 5  ;;  %v6204_v58 = vrot.slane %v5886_v55, 6 }
 0x862   : > { %v12335_v12 = vsel %vm14325_vm3, %v14455_v14, %v6343_v45  ;;  %v6205_v2 = vrot.slane %v5886_v55, 7  ;;  %v6156_v62 = vrot.slane %v5802_v32, 1  ;;  %v6157_v0 = vrot.slane %v5802_v32, 2 }
 0x863   : > { %14456 = vst [vmem:[#allocation12_spill] sm:$0xff] %v12335_v12  ;;  %v6158_v9 = vrot.slane %v5802_v32, 3  ;;  %v6159_v25 = vrot.slane %v5802_v32, 4  ;;  %v6160_v4 = vrot.slane %v5802_v32, 5  ;;  %v6448_v33 = vperm.slane %v5886_v55, 0  ;;  %v12344_v12 = vpop.f32.mrf.mxu3 }
 0x864   : > { %v6449_v27 = vperm.slane %v6199_v13, 0  ;;  %v6161_v49 = vrot.slane %v5802_v32, 6  ;;  %v6162_v26 = vrot.slane %v5802_v32, 7  ;;  %v6450_v19 = vperm.slane %v6200_v41, 0 }
 0x865   : > { %v6451_v53 = vperm.slane %v6201_v6, 0  ;;  %v6452_v11 = vperm.slane %v6202_v38, 0  ;;  %v6453_v45 = vperm.slane %v6203_v30, 0  ;;  %v6454_v14 = vperm.slane %v6204_v58, 0 }
 0x866   : > { %v6455_v31 = vperm.slane %v6205_v2, 0  ;;  %v6344_v42 = vperm.slane %v5802_v32, 0  ;;  %v6345_v35 = vperm.slane %v6156_v62, 0  ;;  %v6346_v61 = vperm.slane %v6157_v0, 0  ;;  %v5889_v2 = vpop.f32.mrf.mxu2 }
 0x867   : > { %v6347_v20 = vperm.slane %v6158_v9, 0  ;;  %v6348_v36 = vperm.slane %v6159_v25, 0  ;;  %v6349_v23 = vperm.slane %v6160_v4, 0  ;;  %v12348_v55 = vsel %vm14324_vm15, %v12200_v39, %v6448_v33 }
 0x868   : > { %v12352_v13 = vsel %vm14324_vm15, %v12203_v16, %v6449_v27  ;;  %v6350_v41 = vperm.slane %v6161_v49, 0  ;;  %v6351_v6 = vperm.slane %v6162_v26, 0  ;;  %v12356_v32 = vsel %vm14324_vm15, %v12206_v51, %v6450_v19  ;;  %v5805_v26 = vpop.f32.mrf.mxu1 }
 0x869   : > { %v12360_v38 = vsel %vm14324_vm15, %v12209_v48, %v6451_v53  ;;  %v12364_v30 = vsel %vm14324_vm15, %v12212_v52, %v6452_v11  ;;  %v12368_v39 = vsel %vm14324_vm15, %v12215_v43, %v6453_v45  ;;  %v12372_v16 = vsel %vm14324_vm15, %v12218_v37, %v6454_v14 }
 0x86a   : > { %v12376_v51 = vsel %vm14324_vm15, %v12221_v63, %v6455_v31  ;;  %v12380_v48 = vsel %vm14325_vm3, %v12230_v5, %v6344_v42  ;;  %v14457_v58 = vrot.slane %v12230_v5, 1  ;;  %v14459_v43 = vrot.slane %v12230_v5, 2 }
 0x86b   : > { %v14461_v37 = vrot.slane %v12230_v5, 3  ;;  %v14463_v31 = vrot.slane %v12230_v5, 4  ;;  %v14465_v0 = vrot.slane %v12230_v5, 5  ;;  %v14467_v9 = vrot.slane %v12230_v5, 6  ;;  %v12424_v27 = vpop.f32.mrf.mxu3 }
 0x86c   : > { %v12385_v52 = vsel %vm14325_vm3, %v14457_v58, %v6345_v35  ;;  %v12390_v62 = vsel %vm14325_vm3, %v14459_v43, %v6346_v61  ;;  %v14469_v25 = vrot.slane %v12230_v5, 7  ;;  %v6206_v49 = vrot.slane %v5889_v2, 1 }
 0x86d   : > { %14458 = vst [vmem:[#allocation13_spill] sm:$0xff] %v12385_v52  ;;  %v12395_v63 = vsel %vm14325_vm3, %v14461_v37, %v6347_v20  ;;  %v12400_v42 = vsel %vm14325_vm3, %v14463_v31, %v6348_v36  ;;  %v12405_v35 = vsel %vm14325_vm3, %v14465_v0, %v6349_v23  ;;  %v12410_v61 = vsel %vm14325_vm3, %v14467_v9, %v6350_v41 }
 0x86e   : > { %14460 = vst [vmem:[#allocation14_spill] sm:$0xff] %v12390_v62  ;;  %v12415_v20 = vsel %vm14325_vm3, %v14469_v25, %v6351_v6  ;;  %v6207_v53 = vrot.slane %v5889_v2, 2  ;;  %v6208_v11 = vrot.slane %v5889_v2, 3  ;;  %v6209_v5 = vrot.slane %v5889_v2, 4 }
 0x86f   : > { %14462 = vst [vmem:[#allocation15_spill] sm:$0xff] %v12395_v63  ;;  %v6210_v14 = vrot.slane %v5889_v2, 5  ;;  %v6211_v41 = vrot.slane %v5889_v2, 6  ;;  %v6212_v6 = vrot.slane %v5889_v2, 7  ;;  %v6163_v58 = vrot.slane %v5805_v26, 1 }
 0x870   : > { %14464 = vst [vmem:[#allocation16_spill] sm:$0xff] %v12400_v42  ;;  %v6164_v43 = vrot.slane %v5805_v26, 2  ;;  %v6165_v37 = vrot.slane %v5805_v26, 3  ;;  %v6166_v31 = vrot.slane %v5805_v26, 4  ;;  %v6456_v0 = vperm.slane %v5889_v2, 0 }
 0x871   : > { %14466 = vst [vmem:[#allocation17_spill] sm:$0xff] %v12405_v35  ;;  %v6457_v9 = vperm.slane %v6206_v49, 0  ;;  %v6167_v25 = vrot.slane %v5805_v26, 5  ;;  %v6168_v23 = vrot.slane %v5805_v26, 6  ;;  %v6458_v33 = vperm.slane %v6207_v53, 0 }
 0x872   : > { %14468 = vst [vmem:[#allocation18_spill] sm:$0xff] %v12410_v61  ;;  %v6459_v19 = vperm.slane %v6208_v11, 0  ;;  %v6460_v36 = vperm.slane %v6209_v5, 0  ;;  %v6169_v4 = vrot.slane %v5805_v26, 7  ;;  %v6462_v61 = vperm.slane %v6211_v41, 0  ;;  %v12446_v41 = vpop.f32.mrf.mxu2 }
 0x873   : > { %14470 = vst [vmem:[#allocation19_spill] sm:$0xff] %v12415_v20  ;;  %v6461_v20 = vperm.slane %v6210_v14, 0  ;;  %v6463_v45 = vperm.slane %v6212_v6, 0  ;;  %v6352_v35 = vperm.slane %v5805_v26, 0  ;;  %v6353_v42 = vperm.slane %v6163_v58, 0 }
 0x874   : > { %v6354_v63 = vperm.slane %v6164_v43, 0  ;;  %v6355_v62 = vperm.slane %v6165_v37, 0  ;;  %v6356_v52 = vperm.slane %v6166_v31, 0  ;;  %v12428_v2 = vsel %vm14324_vm15, %v12234_v60, %v6456_v0  ;;  %v12517_v58 = vld [vmem:[%s14283_s12] ss:$0 sm:$0xff] }
 0x875   : > { %v12432_v49 = vsel %vm14324_vm15, %v12237_v21, %v6457_v9  ;;  %v6357_v53 = vperm.slane %v6167_v25, 0  ;;  %v6358_v11 = vperm.slane %v6168_v23, 0  ;;  %v12436_v5 = vsel %vm14324_vm15, %v12240_v1, %v6458_v33  ;;  %v5976_v25 = vpop.f32.mrf.mxu3 }
 0x876   : > { %v12440_v26 = vsel %vm14324_vm15, %v12243_v44, %v6459_v19  ;;  %v12444_v14 = vsel %vm14324_vm15, %v12246_v40, %v6460_v36  ;;  %v6359_v60 = vperm.slane %v6169_v4, 0  ;;  %v12450_v21 = vsel %vm14324_vm15, %v12249_v15, %v6461_v20 }
 0x877   : > { %v12454_v23 = vsel %vm14324_vm15, %v12252_v57, %v6462_v61  ;;  %v12458_v1 = vsel %vm14324_vm15, %v12255_v18, %v6463_v45  ;;  %v12462_v44 = vsel %vm14325_vm3, %v12292_v17, %v6352_v35  ;;  %v14471_v40 = vrot.slane %v12292_v17, 1 }
 0x878   : > { %v14472_v15 = vrot.slane %v12292_v17, 2  ;;  %v14474_v57 = vrot.slane %v12292_v17, 3  ;;  %v14476_v18 = vrot.slane %v12292_v17, 4  ;;  %v14478_v36 = vrot.slane %v12292_v17, 5 }
 0x879   : > { %v12467_v4 = vsel %vm14325_vm3, %v14471_v40, %v6353_v42  ;;  %v14480_v33 = vrot.slane %v12292_v17, 6  ;;  %v6213_v19 = vrot.slane %v12446_v41, 1  ;;  %v14482_v45 = vrot.slane %v12292_v17, 7 }
 0x87a   : > { %v12472_v20 = vsel %vm14325_vm3, %v14472_v15, %v6354_v63  ;;  %v12477_v61 = vsel %vm14325_vm3, %v14474_v57, %v6355_v62  ;;  %v12482_v35 = vsel %vm14325_vm3, %v14476_v18, %v6356_v52  ;;  %v12487_v42 = vsel %vm14325_vm3, %v14478_v36, %v6357_v53 }
 0x87b   : > { %14473 = vst [vmem:[#allocation20_spill] sm:$0xff] %v12472_v20  ;;  %v12492_v63 = vsel %vm14325_vm3, %v14480_v33, %v6358_v11  ;;  %v6214_v62 = vrot.slane %v12446_v41, 2  ;;  %v12499_v6 = vsel %vm14325_vm3, %v14482_v45, %v6359_v60  ;;  %v6215_v17 = vrot.slane %v12446_v41, 3 }
 0x87c   : > { %14475 = vst [vmem:[#allocation21_spill] sm:$0xff] %v12477_v61  ;;  %v6216_v53 = vrot.slane %v12446_v41, 4  ;;  %v6217_v11 = vrot.slane %v12446_v41, 5  ;;  %v6218_v60 = vrot.slane %v12446_v41, 6  ;;  %v6219_v40 = vrot.slane %v12446_v41, 7 }
 0x87d   : > { %14477 = vst [vmem:[#allocation22_spill] sm:$0xff] %v12482_v35  ;;  %v6464_v15 = vperm.slane %v12446_v41, 0  ;;  %v6465_v57 = vperm.slane %v6213_v19, 0  ;;  %v6466_v18 = vperm.slane %v6214_v62, 0  ;;  %v6256_v36 = vrot.slane %v5976_v25, 1 }
 0x87e   : > { %14479 = vst [vmem:[#allocation23_spill] sm:$0xff] %v12487_v42  ;;  %v6257_v33 = vrot.slane %v5976_v25, 2  ;;  %v6258_v45 = vrot.slane %v5976_v25, 3  ;;  %v6259_v0 = vrot.slane %v5976_v25, 4  ;;  %v6260_v9 = vrot.slane %v5976_v25, 5 }
 0x87f   : > { %14481 = vst [vmem:[#allocation24_spill] sm:$0xff] %v12492_v63  ;;  %v6261_v31 = vrot.slane %v5976_v25, 6  ;;  %v6262_v37 = vrot.slane %v5976_v25, 7  ;;  %v6568_v43 = vperm.slane %v5976_v25, 0  ;;  %v6569_v52 = vperm.slane %v6256_v36, 0 }
 0x880   : > { %14483 = vst [vmem:[#allocation25_spill] sm:$0xff] %v12499_v6  ;;  %v6570_v6 = vperm.slane %v6257_v33, 0  ;;  %v6571_v63 = vperm.slane %v6258_v45, 0  ;;  %v6572_v42 = vperm.slane %v6259_v0, 0  ;;  %v6573_v41 = vperm.slane %v6260_v9, 0 }
 0x881   : > { %v6574_v19 = vperm.slane %v6261_v31, 0  ;;  %v6575_v62 = vperm.slane %v6262_v37, 0  ;;  %v6824_v35 = vsel %vm14484_vm14, %v12266_v8, %v6568_v43  ;;  %v6825_v61 = vsel %vm14485_vm2, %v12270_v34, %v6569_v52 }
 0x882   : > { %v6826_v25 = vsel %vm14486_vm8, %v12274_v59, %v6570_v6  ;;  %v6827_v20 = vsel %vm14487_vm11, %v12278_v47, %v6571_v63  ;;  %v6828_v36 = vsel %vm14488_vm9, %v12282_v24, %v6572_v42  ;;  %v6829_v0 = vsel %vm14489_vm10, %v12286_v10, %v6573_v41 }
 0x883   : > { %v6830_v37 = vsel %vm14490_vm13, %v12290_v7, %v6574_v19  ;;  %v6831_v8 = vsel %vm14491_vm12, %v12296_v46, %v6575_v62  ;;  %v6892_v34 = vadd.f32 %v12517_v58, %v6824_v35  ;;  %v6893_v52 = vadd.f32 %v12517_v58, %v6825_v61  ;;  %v5808_v35 = vpop.f32.mrf.mxu1 }
 0x884   : > { %v6894_v59 = vadd.f32 %v12517_v58, %v6826_v25  ;;  %v6895_v47 = vadd.f32 %v12517_v58, %v6827_v20  ;;  %v6896_v63 = vadd.f32 %v12517_v58, %v6828_v36  ;;  %v6467_v24 = vperm.slane %v6215_v17, 0 }
 0x885   : > { %v6468_v42 = vperm.slane %v6216_v53, 0  ;;  %v6897_v10 = vadd.f32 %v12517_v58, %v6829_v0  ;;  %v8820_v6 = vmul.f32 -1.442695, %v6892_v34  ;;  %v6898_v7 = vadd.f32 %v12517_v58, %v6830_v37 }
 0x886   : > { %v8821_v43 = vmul.f32 -1.442695, %v6893_v52  ;;  %v8822_v31 = vmul.f32 -1.442695, %v6894_v59  ;;  %v8823_v46 = vmul.f32 -1.442695, %v6895_v47  ;;  %v6899_v61 = vadd.f32 %v12517_v58, %v6831_v8 }
 0x887   : > { %v6469_v9 = vperm.slane %v6217_v11, 0  ;;  %9084 = vpow2.f32 %v8820_v6  ;;  %v8824_v33 = vmul.f32 -1.442695, %v6896_v63  ;;  %v6470_v45 = vperm.slane %v6218_v60, 0  ;;  %v14497_v6 = vld [vmem:[#allocation12_spill] sm:$0xff] }
 0x888   : > { %v6471_v20 = vperm.slane %v6219_v40, 0  ;;  %9086 = vpow2.f32 %v8821_v43  ;;  %v8825_v41 = vmul.f32 -1.442695, %v6897_v10  ;;  %v12545_v17 = vsel %vm14324_vm15, %v12300_v22, %v6464_v15 }
 0x889   : > { %v12549_v53 = vsel %vm14324_vm15, %v12305_v50, %v6465_v57  ;;  %v12553_v11 = vsel %vm14324_vm15, %v12310_v56, %v6466_v18  ;;  %9088 = vpow2.f32 %v8822_v31  ;;  %v12557_v19 = vsel %vm14324_vm15, %v12315_v28, %v6467_v24 }
 0x88a   : > { %14492 = vst [vmem:[#allocation26_spill] sm:$0xff] %v12553_v11  ;;  %v6170_v60 = vrot.slane %v5808_v35, 1  ;;  %9090 = vpow2.f32 %v8823_v46  ;;  %v8826_v40 = vmul.f32 -1.442695, %v6898_v7  ;;  %v6171_v62 = vrot.slane %v5808_v35, 2 }
 0x88b   : > { %14493 = vst [vmem:[#allocation27_spill] sm:$0xff] %v12557_v19  ;;  %v6172_v25 = vrot.slane %v5808_v35, 3  ;;  %9092 = vpow2.f32 %v8824_v33  ;;  %v8827_v22 = vmul.f32 -1.442695, %v6899_v61  ;;  %v12561_v50 = vsel %vm14324_vm15, %v12320_v3, %v6468_v42 }
 0x88c   : > { %14494 = vst [vmem:[#allocation28_spill] sm:$0xff] %v12561_v50  ;;  %v6173_v15 = vrot.slane %v5808_v35, 4  ;;  %v6174_v57 = vrot.slane %v5808_v35, 5  ;;  %9094 = vpow2.f32 %v8825_v41  ;;  %v12565_v18 = vsel %vm14324_vm15, %v12325_v54, %v6469_v9 }
 0x88d   : > { %v9085_v56 = vpop.eup %9084  ;;  %14495 = vst [vmem:[#allocation29_spill] sm:$0xff] %v12565_v18  ;;  %v12569_v28 = vsel %vm14324_vm15, %v12330_v29, %v6470_v45  ;;  %v6175_v36 = vrot.slane %v5808_v35, 6  ;;  %v6176_v0 = vrot.slane %v5808_v35, 7  ;;  %v6360_v8 = vperm.slane %v5808_v35, 0  ;;  %v12598_v45 = vpop.f32.mrf.mxu2 }
 0x88e   : > { %14496 = vst [vmem:[#allocation30_spill] sm:$0xff] %v12569_v28  ;;  %v9087_v37 = vpop.eup %9086  ;;  %v6361_v34 = vperm.slane %v6170_v60, 0  ;;  %9096 = vpow2.f32 %v8826_v40  ;;  %v12571_v3 = vadd.f32 1.0, %v9085_v56  ;;  %v6362_v59 = vperm.slane %v6171_v62, 0 }
 0x88f   : > { %v9089_v52 = vpop.eup %9088  ;;  %v6363_v47 = vperm.slane %v6172_v25, 0  ;;  %9098 = vpow2.f32 %v8827_v22  ;;  %v12573_v63 = vadd.f32 1.0, %v9087_v37  ;;  %v6364_v24 = vperm.slane %v6173_v15, 0 }
 0x890   : > { %v9091_v54 = vpop.eup %9090  ;;  %v6365_v42 = vperm.slane %v6174_v57, 0  ;;  %v12575_v10 = vadd.f32 1.0, %v9089_v52  ;;  %9100 = vrcp.f32 %v12571_v3  ;;  %v12580_v7 = vsel %vm14324_vm15, %v14497_v6, %v6471_v20 }
 0x891   : > { %v9093_v29 = vpop.eup %9092  ;;  %14498 = vst [vmem:[#allocation12_spill] sm:$0xff] %v12580_v7  ;;  %v12582_v43 = vperm.slane %v6175_v36, 0  ;;  %v12584_v31 = vadd.f32 1.0, %v9091_v54  ;;  %9102 = vrcp.f32 %v12573_v63  ;;  %v12587_v9 = vperm.slane %v6176_v0, 0 }
 0x892   : > { %v9095_v46 = vpop.eup %9094  ;;  %v12591_v35 = vsel %vm14325_vm3, %v12344_v12, %v6360_v8  ;;  %v14500_v61 = vrot.slane %v12344_v12, 1  ;;  %v12600_v20 = vadd.f32 1.0, %v9093_v29  ;;  %v14502_v41 = vrot.slane %v12344_v12, 2 }
 0x893   : > { %14499 = vst [vmem:[#allocation31_spill] sm:$0xff] %v12591_v35  ;;  %v7221_v40 = vand.u32 2147483647, %v12571_v3  ;;  %v7223_v62 = vand.u32 2147483648, %v12571_v3  ;;  %9104 = vrcp.f32 %v12575_v10  ;;  %v14504_v22 = vrot.slane %v12344_v12, 3 }
 0x894   : > { %v12596_v33 = vsel %vm14325_vm3, %v14500_v61, %v6361_v34  ;;  %v12605_v60 = vsel %vm14325_vm3, %v14502_v41, %v6362_v59  ;;  %v9097_v25 = vpop.eup %9096  ;;  %v14506_v57 = vrot.slane %v12344_v12, 4  ;;  %v14508_v36 = vrot.slane %v12344_v12, 5 }
 0x895   : > { %14501 = vst [vmem:[#allocation32_spill] sm:$0xff] %v12596_v33  ;;  %v12613_v15 = vsel %vm14325_vm3, %v14504_v22, %v6363_v47  ;;  %v7236_v37 = vand.u32 2147483647, %v12573_v63  ;;  %v9099_v8 = vpop.eup %9098  ;;  %v12627_v52 = vadd.f32 1.0, %v9095_v46  ;;  %v7238_v59 = vand.u32 2147483648, %v12573_v63 }
 0x896   : > { %14503 = vst [vmem:[#allocation33_spill] sm:$0xff] %v12605_v60  ;;  %v12618_v56 = vsel %vm14325_vm3, %v14506_v57, %v6364_v24  ;;  %v12623_v0 = vsel %vm14325_vm3, %v14508_v36, %v6365_v42  ;;  %9106 = vrcp.f32 %v12584_v31  ;;  %v9101_v47 = vpop.eup %9100  ;;  %vm7217_vm0 = vweird.f32 %v12571_v3 }
 0x897   : > { %14505 = vst [vmem:[#allocation34_spill] sm:$0xff] %v12613_v15  ;;  %vm7232_vm5 = vweird.f32 %v12573_v63  ;;  %v7251_v54 = vand.u32 2147483647, %v12575_v10  ;;  %9108 = vrcp.f32 %v12600_v20  ;;  %v9103_v24 = vpop.eup %9102  ;;  %v7213_v42 = vmul.f32 %v9101_v47, %v12571_v3 }
 0x898   : > { %14507 = vst [vmem:[#allocation35_spill] sm:$0xff] %v12618_v56  ;;  %vm12636_vm6 = vcmp.eq.f32.partialorder %v7221_v40, 8.507059e+37  ;;  %v7224_v6 = vor.u32 1.1754944e-38, %v7223_v62  ;;  %v7253_v46 = vand.u32 2147483648, %v12575_v10  ;;  %v12641_v61 = vadd.f32 1.0, %v9097_v25 }
 0x899   : > { %14509 = vst [vmem:[#allocation36_spill] sm:$0xff] %v12623_v0  ;;  %v7228_v41 = vmul.f32 %v9103_v24, %v12573_v63  ;;  %vm12644_vm7 = vcmp.eq.f32.partialorder %v7236_v37, 8.507059e+37  ;;  %vm7247_vm4 = vweird.f32 %v12575_v10  ;;  %v7266_v57 = vand.u32 2147483647, %v12584_v31  ;;  %v9105_v36 = vpop.eup %9104 }
 0x89a   : > { %v12650_v40 = vadd.f32 1.0, %v9099_v8  ;;  %v7214_v34 = vsub.f32 1.0, %v7213_v42  ;;  %v7239_v0 = vor.u32 1.1754944e-38, %v7238_v59  ;;  %9110 = vrcp.f32 %v12627_v52 }
 0x89b   : > { %vm7218_vm14 = vweird.f32 %v9101_v47  ;;  %v7229_v62 = vsub.f32 1.0, %v7228_v41  ;;  %v7243_v25 = vmul.f32 %v9105_v36, %v12575_v10  ;;  %vm12654_vm2 = vcmp.eq.f32.partialorder %v7251_v54, 8.507059e+37 }
 0x89c   : > { %vm7262_vm8 = vweird.f32 %v12584_v31  ;;  %v7268_v56 = vand.u32 2147483648, %v12584_v31  ;;  %v9107_v15 = vpop.eup %9106  ;;  %v7215_v60 = vmul.f32 %v9101_v47, %v7214_v34  ;;  %vm7233_vm11 = vweird.f32 %v9103_v24  ;;  %vm7219_vm13 = vmor %vm7217_vm0, %vm7218_vm14 }
 0x89d   : > { %v7254_v8 = vor.u32 1.1754944e-38, %v7253_v46  ;;  %vm7277_vm9 = vweird.f32 %v12600_v20  ;;  %v9109_v59 = vpop.eup %9108  ;;  %v7230_v42 = vmul.f32 %v9103_v24, %v7229_v62  ;;  %v7244_v33 = vsub.f32 1.0, %v7243_v25  ;;  %vm7234_vm15 = vmor %vm7232_vm5, %vm7233_vm11 }
 0x89e   : > { %v7258_v41 = vmul.f32 %v9107_v15, %v12584_v31  ;;  %vm12662_vm10 = vcmp.eq.f32.partialorder %v7266_v57, 8.507059e+37  ;;  %v7216_v35 = vadd.f32 %v9101_v47, %v7215_v60  ;;  %v7273_v7 = vmul.f32 %v9109_v59, %v12600_v20 }
 0x89f   : > { %v7281_v28 = vand.u32 2147483647, %v12600_v20  ;;  %v7283_v34 = vand.u32 2147483648, %v12600_v20  ;;  %v7231_v46 = vadd.f32 %v9103_v24, %v7230_v42  ;;  %v7245_v62 = vmul.f32 %v9105_v36, %v7244_v33 }
 0x8a0   : > { %vm7248_vm12 = vweird.f32 %v9105_v36  ;;  %v7259_v25 = vsub.f32 1.0, %v7258_v41  ;;  %v9111_v18 = vpop.eup %9110  ;;  %v7220_v57 = vsel %vm7219_vm13, %v9101_v47, %v7216_v35  ;;  %vm7263_vm3 = vweird.f32 %v9107_v15 }
 0x8a1   : > { %v7274_v60 = vsub.f32 1.0, %v7273_v7  ;;  %9112 = vrcp.f32 %v12641_v61  ;;  %v7225_v50 = vsel %vm12636_vm6, %v7224_v6, %v7220_v57  ;;  %v7235_v19 = vsel %vm7234_vm15, %v9103_v24, %v7231_v46  ;;  %vm7249_vm0 = vmor %vm7247_vm4, %vm7248_vm12 }
 0x8a2   : > { %v7246_v3 = vadd.f32 %v9105_v36, %v7245_v62  ;;  %v7260_v11 = vmul.f32 %v9107_v15, %v7259_v25  ;;  %v7240_v33 = vsel %vm12644_vm7, %v7239_v0, %v7235_v19  ;;  %vm7278_vm14 = vweird.f32 %v9109_v59  ;;  %8236 = vst [vmem:[#allocation1] ss:$2 sm:$0xff] %v7225_v50  ;;  %vm7264_vm15 = vmor %vm7262_vm8, %vm7263_vm3 }
 0x8a3   : > { %v7275_v35 = vmul.f32 %v9109_v59, %v7274_v60  ;;  %v7288_v63 = vmul.f32 %v9111_v18, %v12627_v52  ;;  %v7269_v42 = vor.u32 1.1754944e-38, %v7268_v56  ;;  %vm12683_vm5 = vcmp.eq.f32.partialorder %v7281_v28, 8.507059e+37  ;;  %8238 = vst [vmem:[#allocation1 + $0x1] ss:$2 sm:$0xff] %v7240_v33  ;;  %vm7279_vm6 = vmor %vm7277_vm9, %vm7278_vm14 }
 0x8a4   : > { %v7250_v7 = vsel %vm7249_vm0, %v9105_v36, %v7246_v3  ;;  %v7261_v47 = vadd.f32 %v9107_v15, %v7260_v11  ;;  %v7284_v0 = vor.u32 1.1754944e-38, %v7283_v34  ;;  %v7296_v11 = vand.u32 2147483647, %v12627_v52 }
 0x8a5   : > { %v7255_v19 = vsel %vm12654_vm2, %v7254_v8, %v7250_v7  ;;  %v7276_v10 = vadd.f32 %v9109_v59, %v7275_v35  ;;  %v7289_v24 = vsub.f32 1.0, %v7288_v63  ;;  %v7298_v28 = vand.u32 2147483648, %v12627_v52 }
 0x8a6   : > { %v7265_v50 = vsel %vm7264_vm15, %v9107_v15, %v7261_v47  ;;  %9114 = vrcp.f32 %v12650_v40  ;;  %8240 = vst [vmem:[#allocation1 + $0x10] ss:$2 sm:$0xff] %v7255_v19  ;;  %vm7293_vm3 = vweird.f32 %v9111_v18  ;;  %v6221_v15 = vrot.slane %v12598_v45, 2 }
 0x8a7   : > { %v9113_v56 = vpop.eup %9112  ;;  %v7270_v31 = vsel %vm12662_vm10, %v7269_v42, %v7265_v50  ;;  %v7280_v6 = vsel %vm7279_vm6, %v9109_v59, %v7276_v10  ;;  %v7290_v22 = vmul.f32 %v9111_v18, %v7289_v24  ;;  %v6222_v36 = vrot.slane %v12598_v45, 3 }
 0x8a8   : > { %v7285_v20 = vsel %vm12683_vm5, %v7284_v0, %v7280_v6  ;;  %v7303_v37 = vmul.f32 %v9113_v56, %v12641_v61  ;;  %8242 = vst [vmem:[#allocation1 + $0x11] ss:$2 sm:$0xff] %v7270_v31  ;;  %v6223_v8 = vrot.slane %v12598_v45, 4  ;;  %v6224_v41 = vrot.slane %v12598_v45, 5 }
 0x8a9   : > { %v7291_v59 = vadd.f32 %v9111_v18, %v7290_v22  ;;  %vm7292_vm7 = vweird.f32 %v12627_v52  ;;  %8244 = vst [vmem:[#allocation1 + $0x20] ss:$2 sm:$0xff] %v7285_v20  ;;  %v6225_v54 = vrot.slane %v12598_v45, 6  ;;  %v6226_v34 = vrot.slane %v12598_v45, 7  ;;  %v5979_v22 = vpop.f32.mrf.mxu3 }
 0x8aa   : > { %vm7294_vm4 = vmor %vm7292_vm7, %vm7293_vm3  ;;  %v7299_v46 = vor.u32 1.1754944e-38, %v7298_v28  ;;  %v7304_v62 = vsub.f32 1.0, %v7303_v37  ;;  %v6472_v25 = vperm.slane %v12598_v45, 0  ;;  %vm7297_vm2 = vcmp.eq.f32.partialorder %v7296_v11, 8.507059e+37 }
 0x8ab   : > { %v7295_v57 = vsel %vm7294_vm4, %v9111_v18, %v7291_v59  ;;  %v7313_v60 = vand.u32 2147483648, %v12641_v61  ;;  %v8251_v3 = vld.sshfl [vmem:[#allocation1] sm:$0xff pattern:$0x75316420]  ;;  %vm7308_vm8 = vweird.f32 %v9113_v56  ;;  %v7311_v52 = vand.u32 2147483647, %v12641_v61 }
 0x8ac   : > { %v9115_v33 = vpop.eup %9114  ;;  %v7300_v35 = vsel %vm7297_vm2, %v7299_v46, %v7295_v57  ;;  %v7305_v63 = vmul.f32 %v9113_v56, %v7304_v62  ;;  %8371 = vst.msk [vmem:[%s12711_s22] sm:$0xff] %vm14326_vm1, %v8251_v3  ;;  %v14520_v7 = vrot.slane %v12598_v45, 1  ;;  %v12725_v42 = vperm.slane %v6221_v15, 0 }
 0x8ad   : > { %v12727_v29 = vperm.slane %v6222_v36, 0  ;;  %v7318_v18 = vmul.f32 %v9115_v33, %v12650_v40  ;;  %8246 = vst [vmem:[#allocation1 + $0x21] ss:$2 sm:$0xff] %v7300_v35  ;;  %vm7307_vm11 = vweird.f32 %v12641_v61  ;;  %v7326_v10 = vand.u32 2147483647, %v12650_v40 }
 0x8ae   : > { %v12723_v47 = vperm.slane %v14520_v7, 0  ;;  %v7306_v19 = vadd.f32 %v9113_v56, %v7305_v63  ;;  %v7328_v0 = vand.u32 2147483648, %v12650_v40  ;;  %v14521_v24 = vrot.slane %v12344_v12, 6  ;;  %vm7309_vm10 = vmor %vm7307_vm11, %vm7308_vm8 }
 0x8af   : > { %vm14522_vm9 = vcmask 1040384   ;;  %v12739_v11 = vperm.slane %v6223_v8, 0  ;;  %v7314_v28 = vor.u32 1.1754944e-38, %v7313_v60  ;;  %v7319_v31 = vsub.f32 1.0, %v7318_v18 }
 0x8b0   : > { %v12737_v50 = vsel %vm14522_vm9, %v14521_v24, %v12582_v43  ;;  %v8252_v6 = vld.sshfl [vmem:[#allocation1 + $0x10] sm:$0xff pattern:$0x75316420]  ;;  %v12741_v15 = vperm.slane %v6224_v41, 0  ;;  %v12743_v61 = vperm.slane %v6225_v54, 0  ;;  %v7310_v36 = vsel %vm7309_vm10, %v9113_v56, %v7306_v19  ;;  %vm14526_vm5 = vmmov %vm14522_vm9 }
 0x8b1   : > { %vm7312_vm13 = vcmp.eq.f32.partialorder %v7311_v52, 8.507059e+37  ;;  %8372 = vst.msk [vmem:[%s12711_s22 + $0x8] sm:$0xff] %vm14326_vm1, %v8252_v6  ;;  %v12747_v20 = vperm.slane %v6226_v34, 0  ;;  %v7320_v43 = vmul.f32 %v9115_v33, %v7319_v31  ;;  %vm7323_vm12 = vweird.f32 %v9115_v33 }
 0x8b2   : > { %v7315_v37 = vsel %vm7312_vm13, %v7314_v28, %v7310_v36  ;;  %vm7322_vm0 = vweird.f32 %v12650_v40  ;;  %vm12750_vm14 = vcmp.eq.f32.partialorder %v7326_v10, 8.507059e+37  ;;  %v7329_v41 = vor.u32 1.1754944e-38, %v7328_v0 }
 0x8b3   : > { %8248 = vst [vmem:[#allocation1 + $0x30] ss:$2 sm:$0xff] %v7315_v37  ;;  %v6263_v59 = vrot.slane %v5979_v22, 1  ;;  %v7321_v54 = vadd.f32 %v9115_v33, %v7320_v43  ;;  %v6264_v56 = vrot.slane %v5979_v22, 2  ;;  %v6265_v46 = vrot.slane %v5979_v22, 3  ;;  %vm7324_vm15 = vmor %vm7322_vm0, %vm7323_vm12 }
 0x8b4   : > { %v6266_v62 = vrot.slane %v5979_v22, 4  ;;  %v14525_v34 = vrot.slane %v12344_v12, 7  ;;  %v8253_v40 = vld.sshfl [vmem:[#allocation1 + $0x20] sm:$0xff pattern:$0x75316420]  ;;  %v6267_v60 = vrot.slane %v5979_v22, 5 }
 0x8b5   : > { %v6268_v3 = vrot.slane %v5979_v22, 6  ;;  %v6269_v35 = vrot.slane %v5979_v22, 7  ;;  %v7325_v63 = vsel %vm7324_vm15, %v9115_v33, %v7321_v54  ;;  %8373 = vst.msk [vmem:[%s12711_s22 + $0x10] sm:$0xff] %vm14326_vm1, %v8253_v40  ;;  %v6576_v52 = vperm.slane %v5979_v22, 0 }
 0x8b6   : > { %v12758_v57 = vsel %vm14526_vm5, %v14525_v34, %v12587_v9  ;;  %v6577_v7 = vperm.slane %v6263_v59, 0  ;;  %v6578_v18 = vperm.slane %v6264_v56, 0  ;;  %v7330_v19 = vsel %vm12750_vm14, %v7329_v41, %v7325_v63  ;;  %v14538_v56 = vld [vmem:[#allocation14_spill] sm:$0xff] }
 0x8b7   : > { %v6579_v10 = vperm.slane %v6265_v46, 0  ;;  %v6580_v0 = vperm.slane %v6266_v62, 0  ;;  %v6581_v12 = vperm.slane %v6267_v60, 0  ;;  %8250 = vst [vmem:[#allocation1 + $0x31] ss:$2 sm:$0xff] %v7330_v19  ;;  %v6582_v9 = vperm.slane %v6268_v3, 0 }
 0x8b8   : > { %v6583_v24 = vperm.slane %v6269_v35, 0  ;;  %vm14527_vm6 = vcmask 1042432   ;;  %vm14535_vm10 = vcmask 1041408  }
 0x8b9   : > { %v6832_v28 = vsel %vm14527_vm6, %v12348_v55, %v6576_v52  ;;  %vm14528_vm3 = vmmov %vm14527_vm6 }
 0x8ba   : > { %v6833_v33 = vsel %vm14528_vm3, %v12352_v13, %v6577_v7  ;;  %vm14529_vm7 = vmmov %vm14528_vm3  ;;  %v6900_v13 = vadd.f32 %v12517_v58, %v6832_v28 }
 0x8bb   : > { %v6834_v31 = vsel %vm14529_vm7, %v12356_v32, %v6578_v18  ;;  %vm14530_vm4 = vmmov %vm14528_vm3  ;;  %v6901_v43 = vadd.f32 %v12517_v58, %v6833_v33  ;;  %v5811_v32 = vpop.f32.mrf.mxu1 }
 0x8bc   : > { %v6835_v6 = vsel %vm14530_vm4, %v12360_v38, %v6579_v10  ;;  %vm14531_vm2 = vmmov %vm14528_vm3  ;;  %v6902_v8 = vadd.f32 %v12517_v58, %v6834_v31  ;;  %v8828_v59 = vmul.f32 -1.442695, %v6900_v13  ;;  %v6177_v40 = vrot.slane %v5811_v32, 1 }
 0x8bd   : > { %v6836_v22 = vsel %vm14531_vm2, %v12364_v30, %v6580_v0  ;;  %vm14532_vm8 = vmmov %vm14531_vm2  ;;  %v6903_v38 = vadd.f32 %v12517_v58, %v6835_v6  ;;  %v8829_v54 = vmul.f32 -1.442695, %v6901_v43  ;;  %v6178_v35 = vrot.slane %v5811_v32, 2  ;;  %v14546_v6 = vld [vmem:[#allocation18_spill] sm:$0xff] }
 0x8be   : > { %v6837_v36 = vsel %vm14532_vm8, %v12368_v39, %v6581_v12  ;;  %vm14533_vm11 = vmmov %vm14531_vm2  ;;  %v6904_v30 = vadd.f32 %v12517_v58, %v6836_v22  ;;  %v12790_v39 = vsel %vm14535_vm10, %v12380_v48, %v6472_v25  ;;  %v8830_v45 = vmul.f32 -1.442695, %v6902_v8  ;;  %v8254_v3 = vld.sshfl [vmem:[#allocation1 + $0x30] sm:$0xff pattern:$0x75316420] }
 0x8bf   : > { %v6838_v37 = vsel %vm14533_vm11, %v12372_v16, %v6582_v9  ;;  %vm14534_vm9 = vmmov %vm14531_vm2  ;;  %v6905_v41 = vadd.f32 %v12517_v58, %v6837_v36  ;;  %v14536_v16 = vld [vmem:[#allocation13_spill] sm:$0xff]  ;;  %v8831_v34 = vmul.f32 -1.442695, %v6903_v38  ;;  %9116 = vpow2.f32 %v8828_v59  ;;  %8374 = vst.msk [vmem:[%s12711_s22 + $0x18] sm:$0xff] %vm14326_vm1, %v8254_v3  ;;  %v14548_v36 = vld [vmem:[#allocation19_spill] sm:$0xff] }
 0x8c0   : > { %v6839_v55 = vsel %vm14534_vm9, %v12376_v51, %v6583_v24  ;;  %vm14537_vm13 = vmmov %vm14535_vm10  ;;  %v6906_v62 = vadd.f32 %v12517_v58, %v6838_v37  ;;  %v8832_v25 = vmul.f32 -1.442695, %v6904_v30  ;;  %9118 = vpow2.f32 %v8829_v54  ;;  %v14544_v24 = vld [vmem:[#allocation17_spill] sm:$0xff] }
 0x8c1   : > { %v12795_v51 = vsel %vm14537_vm13, %v14536_v16, %v12723_v47  ;;  %vm14539_vm12 = vmmov %vm14535_vm10  ;;  %v6907_v48 = vadd.f32 %v12517_v58, %v6839_v55  ;;  %v14540_v47 = vld [vmem:[#allocation15_spill] sm:$0xff]  ;;  %v8833_v63 = vmul.f32 -1.442695, %v6905_v41  ;;  %v6179_v7 = vrot.slane %v5811_v32, 3  ;;  %v12843_v41 = vpop.f32.mrf.mxu2 }
 0x8c2   : > { %v12800_v46 = vsel %vm14539_vm12, %v14538_v56, %v12725_v42  ;;  %vm14541_vm0 = vmmov %vm14535_vm10  ;;  %v14542_v42 = vld [vmem:[#allocation16_spill] sm:$0xff]  ;;  %v6180_v18 = vrot.slane %v5811_v32, 4  ;;  %9120 = vpow2.f32 %v8830_v45  ;;  %v6181_v19 = vrot.slane %v5811_v32, 5 }
 0x8c3   : > { %v12807_v60 = vsel %vm14541_vm0, %v14540_v47, %v12727_v29  ;;  %vm14543_vm14 = vmmov %vm14541_vm0  ;;  %v6182_v10 = vrot.slane %v5811_v32, 6  ;;  %9122 = vpow2.f32 %v8831_v34  ;;  %v8834_v0 = vmul.f32 -1.442695, %v6906_v62 }
 0x8c4   : > { %v12812_v52 = vsel %vm14543_vm14, %v14542_v42, %v12739_v11  ;;  %v6183_v29 = vrot.slane %v5811_v32, 7  ;;  %v6368_v12 = vperm.slane %v5811_v32, 0  ;;  %9124 = vpow2.f32 %v8832_v25  ;;  %vm14545_vm5 = vmmov %vm14541_vm0 }
 0x8c5   : > { %v8835_v9 = vmul.f32 -1.442695, %v6907_v48  ;;  %v12819_v28 = vsel %vm14545_vm5, %v14544_v24, %v12741_v15  ;;  %v6369_v11 = vperm.slane %v6177_v40, 0  ;;  %v6370_v33 = vperm.slane %v6178_v35, 0  ;;  %v9117_v31 = vpop.eup %9116  ;;  %vm14547_vm15 = vmmov %vm14541_vm0 }
 0x8c6   : > { %9126 = vpow2.f32 %v8833_v63  ;;  %v12824_v22 = vsel %vm14547_vm15, %v14546_v6, %v12743_v61  ;;  %vm14549_vm6 = vmmov %vm14541_vm0  ;;  %v6371_v55 = vperm.slane %v6179_v7, 0  ;;  %v6372_v13 = vperm.slane %v6180_v18, 0  ;;  %v9119_v43 = vpop.eup %9118 }
 0x8c7   : > { %v12829_v37 = vsel %vm14549_vm6, %v14548_v36, %v12747_v20  ;;  %v12831_v32 = vperm.slane %v6181_v19, 0  ;;  %v12833_v15 = vperm.slane %v6182_v10, 0  ;;  %9128 = vpow2.f32 %v8834_v0  ;;  %v5982_v19 = vpop.f32.mrf.mxu3 }
 0x8c8   : > { %v12835_v8 = vadd.f32 1.0, %v9117_v31  ;;  %v9121_v38 = vpop.eup %9120  ;;  %v12837_v30 = vperm.slane %v6183_v29, 0  ;;  %vm14550_vm3 = vcmask 1040384   ;;  %9130 = vpow2.f32 %v8835_v9 }
 0x8c9   : > { %v12841_v61 = vsel %vm14550_vm3, %v12424_v27, %v6368_v12  ;;  %v12845_v20 = vadd.f32 1.0, %v9119_v43  ;;  %v9123_v16 = vpop.eup %9122  ;;  %v14552_v59 = vrot.slane %v12424_v27, 1  ;;  %vm14553_vm7 = vmmov %vm14550_vm3  ;;  %v14555_v56 = vrot.slane %v12424_v27, 2 }
 0x8ca   : > { %14551 = vst [vmem:[#allocation13_spill] sm:$0xff] %v12841_v61  ;;  %vm14556_vm4 = vmmov %vm14550_vm3  ;;  %v12857_v45 = vadd.f32 1.0, %v9121_v38  ;;  %9132 = vrcp.f32 %v12835_v8  ;;  %v9125_v34 = vpop.eup %9124  ;;  %v14558_v40 = vrot.slane %v12424_v27, 3  ;;  %v14561_v25 = vrot.slane %v12424_v27, 4 }
 0x8cb   : > { %v12850_v54 = vsel %vm14553_vm7, %v14552_v59, %v6369_v11  ;;  %v12855_v62 = vsel %vm14556_vm4, %v14555_v56, %v6370_v33  ;;  %vm14559_vm2 = vmmov %vm14550_vm3  ;;  %v12870_v3 = vadd.f32 1.0, %v9123_v16  ;;  %9134 = vrcp.f32 %v12845_v20 }
 0x8cc   : > { %14554 = vst [vmem:[#allocation14_spill] sm:$0xff] %v12850_v54  ;;  %v12863_v48 = vsel %vm14559_vm2, %v14558_v40, %v6371_v55  ;;  %vm14562_vm8 = vmmov %vm14559_vm2  ;;  %v9127_v35 = vpop.eup %9126  ;;  %v12876_v18 = vadd.f32 1.0, %v9125_v34  ;;  %v7341_v10 = vand.u32 2147483647, %v12835_v8  ;;  %v7343_v0 = vand.u32 2147483648, %v12835_v8 }
 0x8cd   : > { %14557 = vst [vmem:[#allocation15_spill] sm:$0xff] %v12855_v62  ;;  %v12868_v47 = vsel %vm14562_vm8, %v14561_v25, %v6372_v13  ;;  %9136 = vrcp.f32 %v12857_v45  ;;  %v9129_v29 = vpop.eup %9128  ;;  %v7356_v24 = vand.u32 2147483647, %v12845_v20  ;;  %v7358_v11 = vand.u32 2147483648, %v12845_v20 }
 0x8ce   : > { %14560 = vst [vmem:[#allocation16_spill] sm:$0xff] %v12863_v48  ;;  %v9131_v33 = vpop.eup %9130  ;;  %v12887_v6 = vadd.f32 1.0, %v9127_v35  ;;  %vm7337_vm11 = vweird.f32 %v12835_v8  ;;  %9138 = vrcp.f32 %v12870_v3  ;;  %vm7352_vm9 = vweird.f32 %v12845_v20 }
 0x8cf   : > { %14563 = vst [vmem:[#allocation17_spill] sm:$0xff] %v12868_v47  ;;  %v7371_v55 = vand.u32 2147483647, %v12857_v45  ;;  %v7373_v13 = vand.u32 2147483648, %v12857_v45  ;;  %9140 = vrcp.f32 %v12876_v18  ;;  %v12895_v38 = vadd.f32 1.0, %v9129_v29 }
 0x8d0   : > { %v9133_v36 = vpop.eup %9132  ;;  %vm12898_vm10 = vcmp.eq.f32.partialorder %v7341_v10, 8.507059e+37  ;;  %v7344_v56 = vor.u32 1.1754944e-38, %v7343_v0  ;;  %v7388_v34 = vand.u32 2147483648, %v12870_v3  ;;  %v12903_v40 = vadd.f32 1.0, %v9131_v33 }
 0x8d1   : > { %v9135_v43 = vpop.eup %9134  ;;  %v7333_v16 = vmul.f32 %v9133_v36, %v12835_v8  ;;  %vm12906_vm13 = vcmp.eq.f32.partialorder %v7356_v24, 8.507059e+37  ;;  %v7359_v31 = vor.u32 1.1754944e-38, %v7358_v11  ;;  %vm7367_vm12 = vweird.f32 %v12857_v45 }
 0x8d2   : > { %v7348_v25 = vmul.f32 %v9135_v43, %v12845_v20  ;;  %v7386_v29 = vand.u32 2147483647, %v12870_v3  ;;  %v7401_v12 = vand.u32 2147483647, %v12876_v18  ;;  %v7403_v0 = vand.u32 2147483648, %v12876_v18 }
 0x8d3   : > { %v9137_v10 = vpop.eup %9136  ;;  %v7334_v9 = vsub.f32 1.0, %v7333_v16  ;;  %9142 = vrcp.f32 %v12887_v6  ;;  %vm7338_vm0 = vweird.f32 %v9133_v36  ;;  %vm12916_vm14 = vcmp.eq.f32.partialorder %v7371_v55, 8.507059e+37 }
 0x8d4   : > { %v7349_v33 = vsub.f32 1.0, %v7348_v25  ;;  %v7363_v24 = vmul.f32 %v9137_v10, %v12857_v45  ;;  %v7374_v11 = vor.u32 1.1754944e-38, %v7373_v13  ;;  %v9139_v7 = vpop.eup %9138  ;;  %vm7353_vm15 = vweird.f32 %v9135_v43  ;;  %vm7339_vm2 = vmor %vm7337_vm11, %vm7338_vm0 }
 0x8d5   : > { %v7335_v42 = vmul.f32 %v9133_v36, %v7334_v9  ;;  %v7389_v16 = vor.u32 1.1754944e-38, %v7388_v34  ;;  %v9141_v63 = vpop.eup %9140  ;;  %vm7368_vm3 = vweird.f32 %v9137_v10  ;;  %v7378_v25 = vmul.f32 %v9139_v7, %v12870_v3  ;;  %vm7354_vm1 = vmor %vm7352_vm9, %vm7353_vm15 }
 0x8d6   : > { %v7350_v47 = vmul.f32 %v9135_v43, %v7349_v33  ;;  %v7364_v48 = vsub.f32 1.0, %v7363_v24  ;;  %vm12923_vm7 = vcmp.eq.f32.partialorder %v7386_v29, 8.507059e+37  ;;  %v7393_v13 = vmul.f32 %v9141_v63, %v12876_v18  ;;  %vm7369_vm11 = vmor %vm7367_vm12, %vm7368_vm3 }
 0x8d7   : > { %v7336_v62 = vadd.f32 %v9133_v36, %v7335_v42  ;;  %vm12928_vm4 = vcmp.eq.f32.partialorder %v7401_v12, 8.507059e+37  ;;  %v7404_v9 = vor.u32 1.1754944e-38, %v7403_v0  ;;  %v7416_v34 = vand.u32 2147483647, %v12887_v6 }
 0x8d8   : > { %v7351_v33 = vadd.f32 %v9135_v43, %v7350_v47  ;;  %v7365_v24 = vmul.f32 %v9137_v10, %v7364_v48  ;;  %v7379_v29 = vsub.f32 1.0, %v7378_v25  ;;  %vm7383_vm8 = vweird.f32 %v9139_v7 }
 0x8d9   : > { %v12936_v61 = vpop.eup %9142  ;;  %v7340_v42 = vsel %vm7339_vm2, %v9133_v36, %v7336_v62  ;;  %v7394_v12 = vsub.f32 1.0, %v7393_v13  ;;  %vm7398_vm6 = vweird.f32 %v9141_v63  ;;  %vm7412_vm5 = vweird.f32 %v12887_v6 }
 0x8da   : > { %9144 = vrcp.f32 %v12895_v38  ;;  %v7345_v8 = vsel %vm12898_vm10, %v7344_v56, %v7340_v42  ;;  %v7355_v47 = vsel %vm7354_vm1, %v9135_v43, %v7351_v33  ;;  %v7366_v48 = vadd.f32 %v9137_v10, %v7365_v24 }
 0x8db   : > { %v7380_v0 = vmul.f32 %v9139_v7, %v7379_v29  ;;  %v7360_v25 = vsel %vm12906_vm13, %v7359_v31, %v7355_v47  ;;  %v7395_v20 = vmul.f32 %v9141_v63, %v7394_v12  ;;  %v7408_v62 = vmul.f32 %v12936_v61, %v12887_v6  ;;  %8255 = vst [vmem:[#allocation1] ss:$2 sm:$0xff] %v7345_v8 }
 0x8dc   : > { %v7418_v36 = vand.u32 2147483648, %v12887_v6  ;;  %v7370_v13 = vsel %vm7369_vm11, %v9137_v10, %v7366_v48  ;;  %vm12953_vm9 = vcmp.eq.f32.partialorder %v7416_v34, 8.507059e+37  ;;  %v7431_v56 = vand.u32 2147483647, %v12895_v38  ;;  %8256 = vst [vmem:[#allocation1 + $0x1] ss:$2 sm:$0xff] %v7360_v25 }
 0x8dd   : > { %v7381_v59 = vadd.f32 %v9139_v7, %v7380_v0  ;;  %v7375_v45 = vsel %vm12916_vm14, %v7374_v11, %v7370_v13  ;;  %vm14576_vm1 = vweird.f32 %v12870_v3  ;;  %v7396_v31 = vadd.f32 %v9141_v63, %v7395_v20 }
 0x8de   : > { %vm7384_vm10 = vmor %vm14576_vm1, %vm7383_vm8  ;;  %v7409_v35 = vsub.f32 1.0, %v7408_v62  ;;  %v7433_v33 = vand.u32 2147483648, %v12895_v38  ;;  %vm14577_vm13 = vweird.f32 %v12876_v18  ;;  %vm7413_vm0 = vweird.f32 %v12936_v61  ;;  %8257 = vst [vmem:[#allocation1 + $0x10] ss:$2 sm:$0xff] %v7375_v45 }
 0x8df   : > { %v7385_v10 = vsel %vm7384_vm10, %v9139_v7, %v7381_v59  ;;  %vm7399_vm12 = vmor %vm14577_vm13, %vm7398_vm6  ;;  %vm7427_vm15 = vweird.f32 %v12895_v38  ;;  %9146 = vrcp.f32 %v12903_v40  ;;  %v7419_v7 = vor.u32 1.1754944e-38, %v7418_v36 }
 0x8e0   : > { %v9145_v11 = vpop.eup %9144  ;;  %v7390_v3 = vsel %vm12923_vm7, %v7389_v16, %v7385_v10  ;;  %v7400_v34 = vsel %vm7399_vm12, %v9141_v63, %v7396_v31  ;;  %v7410_v24 = vmul.f32 %v12936_v61, %v7409_v35  ;;  %vm12976_vm14 = vcmp.eq.f32.partialorder %v7431_v56, 8.507059e+37  ;;  %vm7414_vm6 = vmor %vm7412_vm5, %vm7413_vm0 }
 0x8e1   : > { %v7405_v18 = vsel %vm12928_vm4, %v7404_v9, %v7400_v34  ;;  %v7423_v29 = vmul.f32 %v9145_v11, %v12895_v38  ;;  %v7434_v12 = vor.u32 1.1754944e-38, %v7433_v33  ;;  %8258 = vst [vmem:[#allocation1 + $0x11] ss:$2 sm:$0xff] %v7390_v3  ;;  %v7446_v55 = vand.u32 2147483647, %v12903_v40 }
 0x8e2   : > { %v7411_v8 = vadd.f32 %v12936_v61, %v7410_v24  ;;  %8259 = vst [vmem:[#allocation1 + $0x20] ss:$2 sm:$0xff] %v7405_v18  ;;  %v6270_v63 = vrot.slane %v5982_v19, 1  ;;  %v6271_v16 = vrot.slane %v5982_v19, 2  ;;  %vm7428_vm3 = vweird.f32 %v9145_v11 }
 0x8e3   : > { %v7424_v54 = vsub.f32 1.0, %v7423_v29  ;;  %v6272_v9 = vrot.slane %v5982_v19, 3  ;;  %v6273_v47 = vrot.slane %v5982_v19, 4  ;;  %vm7442_vm7 = vweird.f32 %v12903_v40  ;;  %v8263_v25 = vld.sshfl [vmem:[#allocation1] sm:$0xff pattern:$0x75316420]  ;;  %vm7429_vm8 = vmor %vm7427_vm15, %vm7428_vm3 }
 0x8e4   : > { %v7415_v48 = vsel %vm7414_vm6, %v12936_v61, %v7411_v8  ;;  %v7448_v0 = vand.u32 2147483648, %v12903_v40  ;;  %v6274_v20 = vrot.slane %v5982_v19, 5  ;;  %v6275_v62 = vrot.slane %v5982_v19, 6 }
 0x8e5   : > { %v9147_v36 = vpop.eup %9146  ;;  %v7420_v13 = vsel %vm12953_vm9, %v7419_v7, %v7415_v48  ;;  %v7425_v59 = vmul.f32 %v9145_v11, %v7424_v54  ;;  %vm14580_vm4 = vcmask 23552   ;;  %v6276_v6 = vrot.slane %v5982_v19, 7 }
 0x8e6   : > { %8375 = vst.msk [vmem:[%s12711_s22 + $0x20] sm:$0xff] %vm14580_vm4, %v8263_v25  ;;  %v6584_v56 = vperm.slane %v5982_v19, 0  ;;  %v7438_v45 = vmul.f32 %v9147_v36, %v12903_v40  ;;  %vm7443_vm5 = vweird.f32 %v9147_v36  ;;  %vm12994_vm2 = vcmp.eq.f32.partialorder %v7446_v55, 8.507059e+37  ;;  %vm14584_vm9 = vmmov %vm14580_vm4 }
 0x8e7   : > { %8260 = vst [vmem:[#allocation1 + $0x21] ss:$2 sm:$0xff] %v7420_v13  ;;  %v6585_v31 = vperm.slane %v6270_v63, 0  ;;  %v6586_v35 = vperm.slane %v6271_v16, 0  ;;  %v7426_v33 = vadd.f32 %v9145_v11, %v7425_v59  ;;  %v6587_v10 = vperm.slane %v6272_v9, 0  ;;  %vm14592_vm3 = vmmov %vm14580_vm4 }
 0x8e8   : > { %v6588_v43 = vperm.slane %v6273_v47, 0  ;;  %v6589_v3 = vperm.slane %v6274_v20, 0  ;;  %v7439_v19 = vsub.f32 1.0, %v7438_v45  ;;  %v8264_v34 = vld.sshfl [vmem:[#allocation1 + $0x10] sm:$0xff pattern:$0x75316420] }
 0x8e9   : > { %v6590_v24 = vperm.slane %v6275_v62, 0  ;;  %v6591_v7 = vperm.slane %v6276_v6, 0  ;;  %vm14583_vm11 = vcmask 1042432   ;;  %v7430_v29 = vsel %vm7429_vm8, %v9145_v11, %v7426_v33  ;;  %8376 = vst.msk [vmem:[%s12711_s22 + $0x28] sm:$0xff] %vm14584_vm9, %v8264_v34  ;;  %v13036_v20 = vld [vmem:[%s14283_s12] ss:$0 sm:$0xff] }
 0x8ea   : > { %v6840_v18 = vsel %vm14583_vm11, %v12428_v2, %v6584_v56  ;;  %vm14585_vm1 = vmmov %vm14583_vm11  ;;  %v7435_v63 = vsel %vm12976_vm14, %v7434_v12, %v7430_v29  ;;  %v7440_v16 = vmul.f32 %v9147_v36, %v7439_v19  ;;  %v14595_v33 = vrot.slane %v12843_v41, 3 }
 0x8eb   : > { %v6841_v8 = vsel %vm14585_vm1, %v12432_v49, %v6585_v31  ;;  %vm14586_vm10 = vmmov %vm14585_vm1  ;;  %8261 = vst [vmem:[#allocation1 + $0x30] ss:$2 sm:$0xff] %v7435_v63  ;;  %v14594_v31 = vrot.slane %v12843_v41, 2  ;;  %v14596_v61 = vrot.slane %v12843_v41, 4  ;;  %v14598_v34 = vrot.slane %v12843_v41, 6 }
 0x8ec   : > { %v6842_v55 = vsel %vm14586_vm10, %v12436_v5, %v6586_v35  ;;  %vm14587_vm13 = vmmov %vm14585_vm1  ;;  %v6909_v11 = vadd.f32 %v12517_v58, %v6841_v8  ;;  %v7441_v42 = vadd.f32 %v9147_v36, %v7440_v16  ;;  %v14601_v8 = vrot.slane %v12424_v27, 6 }
 0x8ed   : > { %v6843_v38 = vsel %vm14587_vm13, %v12440_v26, %v6587_v10  ;;  %vm14588_vm12 = vmmov %vm14585_vm1  ;;  %v6908_v26 = vadd.f32 %v12517_v58, %v6840_v18  ;;  %v6910_v12 = vadd.f32 %v12517_v58, %v6842_v55  ;;  %v6482_v35 = vperm.slane %v14594_v31, 0 }
 0x8ee   : > { %v6844_v54 = vsel %vm14588_vm12, %v12444_v14, %v6588_v43  ;;  %vm14589_vm0 = vmmov %vm14585_vm1  ;;  %v6911_v14 = vadd.f32 %v12517_v58, %v6843_v38  ;;  %v8837_v13 = vmul.f32 -1.442695, %v6909_v11  ;;  %v6483_v10 = vperm.slane %v14595_v33, 0  ;;  %v14614_v11 = vld [vmem:[#allocation22_spill] sm:$0xff] }
 0x8ef   : > { %v6845_v2 = vsel %vm14589_vm0, %v12450_v21, %v6589_v3  ;;  %vm14590_vm15 = vmmov %vm14589_vm0  ;;  %v6912_v9 = vadd.f32 %v12517_v58, %v6844_v54  ;;  %v7449_v21 = vor.u32 1.1754944e-38, %v7448_v0  ;;  %v8836_v48 = vmul.f32 -1.442695, %v6908_v26  ;;  %v14610_v26 = vld [vmem:[#allocation20_spill] sm:$0xff] }
 0x8f0   : > { %v6846_v49 = vsel %vm14590_vm15, %v12454_v23, %v6590_v24  ;;  %vm14591_vm6 = vmmov %vm14589_vm0  ;;  %v8265_v23 = vld.sshfl [vmem:[#allocation1 + $0x20] sm:$0xff pattern:$0x75316420]  ;;  %v6913_v47 = vadd.f32 %v12517_v58, %v6845_v2  ;;  %v8838_v40 = vmul.f32 -1.442695, %v6910_v12  ;;  %v6484_v43 = vperm.slane %v14596_v61, 0 }
 0x8f1   : > { %v6847_v5 = vsel %vm14591_vm6, %v12458_v1, %v6591_v7  ;;  %vm7444_vm14 = vmor %vm7442_vm7, %vm7443_vm5  ;;  %v6914_v1 = vadd.f32 %v12517_v58, %v6846_v49  ;;  %8377 = vst.msk [vmem:[%s12711_s22 + $0x30] sm:$0xff] %vm14592_vm3, %v8265_v23  ;;  %9148 = vpow2.f32 %v8836_v48  ;;  %v8839_v59 = vmul.f32 -1.442695, %v6911_v14  ;;  %v13078_v49 = vpop.f32.mrf.mxu2  ;;  %v14616_v12 = vld [vmem:[#allocation23_spill] sm:$0xff] }
 0x8f2   : > { %v7445_v25 = vsel %vm7444_vm14, %v9147_v36, %v7441_v42  ;;  %v6915_v62 = vadd.f32 %v13036_v20, %v6847_v5  ;;  %v8840_v6 = vmul.f32 -1.442695, %v6912_v9  ;;  %v6480_v58 = vperm.slane %v12843_v41, 0  ;;  %vm14620_vm12 = vmmov %vm14592_vm3 }
 0x8f3   : > { %v7450_v0 = vsel %vm12994_vm2, %v7449_v21, %v7445_v25  ;;  %v14593_v36 = vrot.slane %v12843_v41, 1  ;;  %9150 = vpow2.f32 %v8837_v13  ;;  %v8841_v45 = vmul.f32 -1.442695, %v6913_v47 }
 0x8f4   : > { %8262 = vst [vmem:[#allocation1 + $0x31] ss:$2 sm:$0xff] %v7450_v0  ;;  %9152 = vpow2.f32 %v8838_v40  ;;  %v14597_v3 = vrot.slane %v12843_v41, 5  ;;  %v6486_v24 = vperm.slane %v14598_v34, 0  ;;  %v8842_v7 = vmul.f32 -1.442695, %v6914_v1 }
 0x8f5   : > { %v6481_v56 = vperm.slane %v14593_v36, 0  ;;  %9154 = vpow2.f32 %v8839_v59  ;;  %v14599_v18 = vrot.slane %v12424_v27, 5  ;;  %vm14600_vm7 = vcmask 1040384  }
 0x8f6   : > { %v6485_v19 = vperm.slane %v14597_v3, 0  ;;  %vm14602_vm4 = vmmov %vm14600_vm7  ;;  %9156 = vpow2.f32 %v8840_v6  ;;  %v8843_v38 = vmul.f32 -1.442695, %v6915_v62  ;;  %v14604_v63 = vrot.slane %v12424_v27, 7  ;;  %v14621_v6 = vld [vmem:[#allocation25_spill] sm:$0xff] }
 0x8f7   : > { %v13058_v29 = vsel %vm14600_vm7, %v14599_v18, %v12831_v32  ;;  %v13064_v55 = vsel %vm14602_vm4, %v14601_v8, %v12833_v15  ;;  %vm14605_vm5 = vmmov %vm14602_vm4  ;;  %v14607_v54 = vrot.slane %v12843_v41, 7  ;;  %vm14608_vm2 = vcmask 1041408   ;;  %v9149_v15 = vpop.eup %9148 }
 0x8f8   : > { %14603 = vst [vmem:[#allocation18_spill] sm:$0xff] %v13064_v55  ;;  %v13070_v16 = vsel %vm14605_vm5, %v14604_v63, %v12837_v30  ;;  %v13076_v32 = vsel %vm14608_vm2, %v12462_v44, %v6480_v58  ;;  %9158 = vpow2.f32 %v8841_v45  ;;  %vm14609_vm8 = vmmov %vm14608_vm2  ;;  %v14612_v30 = vld [vmem:[#allocation21_spill] sm:$0xff]  ;;  %v13104_v21 = vadd.f32 1.0, %v9149_v15 }
 0x8f9   : > { %14606 = vst [vmem:[#allocation19_spill] sm:$0xff] %v13070_v16  ;;  %v6487_v2 = vperm.slane %v14607_v54, 0  ;;  %v13082_v5 = vsel %vm14609_vm8, %v12467_v4, %v6481_v56  ;;  %vm14611_vm11 = vmmov %vm14608_vm2  ;;  %v9151_v42 = vpop.eup %9150  ;;  %v14618_v4 = vld [vmem:[#allocation24_spill] sm:$0xff]  ;;  %9160 = vpow2.f32 %v8842_v7  ;;  %v6234_v1 = vrot.slane %v13078_v49, 1 }
 0x8fa   : > { %v13086_v27 = vsel %vm14611_vm11, %v14610_v26, %v6482_v35  ;;  %vm14613_vm9 = vmmov %vm14608_vm2  ;;  %v9153_v23 = vpop.eup %9152  ;;  %v6235_v48 = vrot.slane %v13078_v49, 2  ;;  %9162 = vpow2.f32 %v8843_v38  ;;  %v13108_v25 = vadd.f32 1.0, %v9151_v42 }
 0x8fb   : > { %v13090_v41 = vsel %vm14613_vm9, %v14612_v30, %v6483_v10  ;;  %vm14615_vm1 = vmmov %vm14608_vm2  ;;  %v8266_v47 = vld.sshfl [vmem:[#allocation1 + $0x30] sm:$0xff pattern:$0x75316420]  ;;  %v9155_v62 = vpop.eup %9154  ;;  %v6236_v13 = vrot.slane %v13078_v49, 3  ;;  %v6237_v40 = vrot.slane %v13078_v49, 4  ;;  %v13114_v0 = vadd.f32 1.0, %v9153_v23 }
 0x8fc   : > { %v13094_v44 = vsel %vm14615_vm1, %v14614_v11, %v6484_v43  ;;  %vm14617_vm10 = vmmov %vm14615_vm1  ;;  %8378 = vst.msk [vmem:[%s12711_s22 + $0x38] sm:$0xff] %vm14620_vm12, %v8266_v47  ;;  %9164 = vrcp.f32 %v13104_v21  ;;  %v9157_v59 = vpop.eup %9156  ;;  %v6238_v36 = vrot.slane %v13078_v49, 5  ;;  %v13122_v56 = vadd.f32 1.0, %v9155_v62 }
 0x8fd   : > { %v13098_v14 = vsel %vm14617_vm10, %v14616_v12, %v6485_v19  ;;  %vm14619_vm13 = vmmov %vm14615_vm1  ;;  %9166 = vrcp.f32 %v13108_v25  ;;  %v13128_v10 = vadd.f32 1.0, %v9157_v59  ;;  %v13130_v61 = vperm.slane %v6234_v1, 0 }
 0x8fe   : > { %v13102_v9 = vsel %vm14619_vm13, %v14618_v4, %v6486_v24  ;;  %vm14622_vm0 = vmmov %vm14615_vm1  ;;  %v9159_v45 = vpop.eup %9158  ;;  %v7461_v43 = vand.u32 2147483647, %v13104_v21  ;;  %v7463_v3 = vand.u32 2147483648, %v13104_v21  ;;  %9168 = vrcp.f32 %v13114_v0 }
 0x8ff   : > { %v13119_v58 = vsel %vm14622_vm0, %v14621_v6, %v6487_v2  ;;  %v9161_v19 = vpop.eup %9160  ;;  %v13135_v34 = vperm.slane %v6235_v48, 0  ;;  %v13137_v24 = vperm.slane %v6236_v13, 0  ;;  %v13139_v7 = vperm.slane %v6237_v40, 0 }
 0x900   : > { %v7476_v18 = vand.u32 2147483647, %v13108_v25  ;;  %v9163_v8 = vpop.eup %9162  ;;  %v13142_v38 = vperm.slane %v6238_v36, 0  ;;  %v13144_v63 = vadd.f32 1.0, %v9159_v45  ;;  %v7478_v54 = vand.u32 2147483648, %v13108_v25 }
 0x901   : > { %9170 = vrcp.f32 %v13122_v56  ;;  %vm7457_vm15 = vweird.f32 %v13104_v21  ;;  %vm7472_vm6 = vweird.f32 %v13108_v25  ;;  %v7491_v15 = vand.u32 2147483647, %v13114_v0 }
 0x902   : > { %v9165_v2 = vpop.eup %9164  ;;  %9172 = vrcp.f32 %v13128_v10  ;;  %v13152_v30 = vadd.f32 1.0, %v9161_v19  ;;  %vm13155_vm14 = vcmp.eq.f32.partialorder %v7461_v43, 8.507059e+37  ;;  %v7464_v12 = vor.u32 1.1754944e-38, %v7463_v3 }
 0x903   : > { %v9167_v26 = vpop.eup %9166  ;;  %v7453_v11 = vmul.f32 %v9165_v2, %v13104_v21  ;;  %v7493_v4 = vand.u32 2147483648, %v13114_v0  ;;  %vm13161_vm3 = vcmp.eq.f32.partialorder %v7476_v18, 8.507059e+37  ;;  %vm7487_vm7 = vweird.f32 %v13114_v0 }
 0x904   : > { %v7468_v23 = vmul.f32 %v9167_v26, %v13108_v25  ;;  %v7506_v1 = vand.u32 2147483647, %v13122_v56  ;;  %v7508_v48 = vand.u32 2147483648, %v13122_v56  ;;  %v9169_v62 = vpop.eup %9168  ;;  %v13168_v13 = vadd.f32 1.0, %v9163_v8 }
 0x905   : > { %v7454_v40 = vsub.f32 1.0, %v7453_v11  ;;  %v7479_v59 = vor.u32 1.1754944e-38, %v7478_v54  ;;  %9174 = vrcp.f32 %v13144_v63  ;;  %vm7458_vm4 = vweird.f32 %v9165_v2 }
 0x906   : > { %v7469_v6 = vsub.f32 1.0, %v7468_v23  ;;  %v7483_v36 = vmul.f32 %v9169_v62, %v13114_v0  ;;  %vm13172_vm5 = vcmp.eq.f32.partialorder %v7491_v15, 8.507059e+37  ;;  %vm7502_vm2 = vweird.f32 %v13122_v56  ;;  %vm7459_vm10 = vmor %vm7457_vm15, %vm7458_vm4 }
 0x907   : > { %v7521_v43 = vand.u32 2147483647, %v13128_v10  ;;  %v9171_v3 = vpop.eup %9170  ;;  %v7455_v19 = vmul.f32 %v9165_v2, %v7454_v40  ;;  %vm7473_vm8 = vweird.f32 %v9167_v26  ;;  %v7494_v18 = vor.u32 1.1754944e-38, %v7493_v4 }
 0x908   : > { %vm7517_vm11 = vweird.f32 %v13128_v10  ;;  %v9173_v8 = vpop.eup %9172  ;;  %v7470_v54 = vmul.f32 %v9167_v26, %v7469_v6  ;;  %v7484_v11 = vsub.f32 1.0, %v7483_v36  ;;  %v7498_v23 = vmul.f32 %v9171_v3, %v13122_v56  ;;  %vm7474_vm12 = vmor %vm7472_vm6, %vm7473_vm8 }
 0x909   : > { %vm13180_vm9 = vcmp.eq.f32.partialorder %v7506_v1, 8.507059e+37  ;;  %v7509_v33 = vor.u32 1.1754944e-38, %v7508_v48  ;;  %v7456_v35 = vadd.f32 %v9165_v2, %v7455_v19  ;;  %vm7488_vm1 = vweird.f32 %v9169_v62 }
 0x90a   : > { %v7513_v31 = vmul.f32 %v9173_v8, %v13128_v10  ;;  %v7523_v40 = vand.u32 2147483648, %v13128_v10  ;;  %v7471_v4 = vadd.f32 %v9167_v26, %v7470_v54  ;;  %v7485_v6 = vmul.f32 %v9169_v62, %v7484_v11  ;;  %vm7489_vm15 = vmor %vm7487_vm7, %vm7488_vm1 }
 0x90b   : > { %v7499_v36 = vsub.f32 1.0, %v7498_v23  ;;  %vm13189_vm13 = vcmp.eq.f32.partialorder %v7521_v43, 8.507059e+37  ;;  %v9175_v1 = vpop.eup %9174  ;;  %v7460_v55 = vsel %vm7459_vm10, %v9165_v2, %v7456_v35  ;;  %vm7503_vm0 = vweird.f32 %v9171_v3 }
 0x90c   : > { %v7514_v48 = vsub.f32 1.0, %v7513_v31  ;;  %9176 = vrcp.f32 %v13152_v30  ;;  %v7465_v21 = vsel %vm13155_vm14, %v7464_v12, %v7460_v55  ;;  %v7475_v19 = vsel %vm7474_vm12, %v9167_v26, %v7471_v4  ;;  %vm7504_vm6 = vmor %vm7502_vm2, %vm7503_vm0 }
 0x90d   : > { %v7486_v54 = vadd.f32 %v9169_v62, %v7485_v6  ;;  %v7500_v11 = vmul.f32 %v9171_v3, %v7499_v36  ;;  %v7480_v43 = vsel %vm13161_vm3, %v7479_v59, %v7475_v19  ;;  %vm7518_vm4 = vweird.f32 %v9173_v8  ;;  %8267 = vst [vmem:[#allocation1] ss:$2 sm:$0xff] %v7465_v21  ;;  %v5985_v6 = vpop.f32.mrf.mxu3 }
 0x90e   : > { %v7515_v35 = vmul.f32 %v9173_v8, %v7514_v48  ;;  %v7528_v25 = vmul.f32 %v9175_v1, %v13144_v63  ;;  %v7536_v42 = vand.u32 2147483647, %v13144_v63  ;;  %v7538_v55 = vand.u32 2147483648, %v13144_v63  ;;  %8268 = vst [vmem:[#allocation1 + $0x1] ss:$2 sm:$0xff] %v7480_v43  ;;  %vm7519_vm14 = vmor %vm7517_vm11, %vm7518_vm4 }
 0x90f   : > { %v7490_v31 = vsel %vm7489_vm15, %v9169_v62, %v7486_v54  ;;  %v7501_v2 = vadd.f32 %v9171_v3, %v7500_v11  ;;  %v7551_v47 = vand.u32 2147483647, %v13152_v30  ;;  %v7524_v62 = vor.u32 1.1754944e-38, %v7523_v40 }
 0x910   : > { %v7495_v26 = vsel %vm13172_vm5, %v7494_v18, %v7490_v31  ;;  %v7516_v0 = vadd.f32 %v9173_v8, %v7515_v35  ;;  %v7529_v12 = vsub.f32 1.0, %v7528_v25  ;;  %v7553_v23 = vand.u32 2147483648, %v13152_v30 }
 0x911   : > { %v7505_v59 = vsel %vm7504_vm6, %v9171_v3, %v7501_v2  ;;  %9178 = vrcp.f32 %v13168_v13  ;;  %8269 = vst [vmem:[#allocation1 + $0x10] ss:$2 sm:$0xff] %v7495_v26  ;;  %vm7533_vm3 = vweird.f32 %v9175_v1  ;;  %vm7532_vm7 = vweird.f32 %v13144_v63 }
 0x912   : > { %v9177_v45 = vpop.eup %9176  ;;  %v7510_v18 = vsel %vm13180_vm9, %v7509_v33, %v7505_v59  ;;  %v7520_v56 = vsel %vm7519_vm14, %v9173_v8, %v7516_v0  ;;  %v7530_v4 = vmul.f32 %v9175_v1, %v7529_v12  ;;  %vm13222_vm5 = vcmp.eq.f32.partialorder %v7536_v42, 8.507059e+37  ;;  %vm7534_vm11 = vmor %vm7532_vm7, %vm7533_vm3  ;;  %v14647_v33 = vld [vmem:[#allocation29_spill] sm:$0xff] }
 0x913   : > { %v7525_v3 = vsel %vm13189_vm13, %v7524_v62, %v7520_v56  ;;  %v7543_v40 = vmul.f32 %v9177_v45, %v13152_v30  ;;  %8270 = vst [vmem:[#allocation1 + $0x11] ss:$2 sm:$0xff] %v7510_v18  ;;  %v7539_v48 = vor.u32 1.1754944e-38, %v7538_v55  ;;  %vm7547_vm2 = vweird.f32 %v13152_v30 }
 0x914   : > { %v7531_v36 = vadd.f32 %v9175_v1, %v7530_v4  ;;  %vm13228_vm8 = vcmp.eq.f32.partialorder %v7551_v47, 8.507059e+37  ;;  %8271 = vst [vmem:[#allocation1 + $0x20] ss:$2 sm:$0xff] %v7525_v3  ;;  %v7554_v63 = vor.u32 1.1754944e-38, %v7553_v23  ;;  %v7566_v8 = vand.u32 2147483647, %v13168_v13 }
 0x915   : > { %v7544_v16 = vsub.f32 1.0, %v7543_v40  ;;  %v6277_v15 = vrot.slane %v5985_v6, 1  ;;  %vm7548_vm9 = vweird.f32 %v9177_v45  ;;  %vm7562_vm1 = vweird.f32 %v13168_v13  ;;  %v8275_v19 = vld.sshfl [vmem:[#allocation1] sm:$0xff pattern:$0x75316420] }
 0x916   : > { %v7535_v21 = vsel %vm7534_vm11, %v9175_v1, %v7531_v36  ;;  %v6278_v54 = vrot.slane %v5985_v6, 2  ;;  %v6279_v11 = vrot.slane %v5985_v6, 3  ;;  %vm14637_vm10 = vcmask 23552   ;;  %vm7549_vm13 = vmor %vm7547_vm2, %vm7548_vm9 }
 0x917   : > { %v9179_v43 = vpop.eup %9178  ;;  %v7540_v35 = vsel %vm13222_vm5, %v7539_v48, %v7535_v21  ;;  %v7545_v25 = vmul.f32 %v9177_v45, %v7544_v16  ;;  %8379 = vst.msk [vmem:[%s12711_s22 + $0x40] sm:$0xff] %vm14637_vm10, %v8275_v19  ;;  %v6280_v31 = vrot.slane %v5985_v6, 4  ;;  %v6281_v2 = vrot.slane %v5985_v6, 5  ;;  %vm14638_vm0 = vmmov %vm14637_vm10  ;;  %v14641_v16 = vld [vmem:[#allocation26_spill] sm:$0xff]  ;;  %v14645_v19 = vld [vmem:[#allocation28_spill] sm:$0xff] }
 0x918   : > { %v7558_v42 = vmul.f32 %v9179_v43, %v13168_v13  ;;  %v7568_v1 = vand.u32 2147483648, %v13168_v13  ;;  %8272 = vst [vmem:[#allocation1 + $0x21] ss:$2 sm:$0xff] %v7540_v35  ;;  %v6282_v55 = vrot.slane %v5985_v6, 6  ;;  %v6283_v26 = vrot.slane %v5985_v6, 7  ;;  %vm14651_vm11 = vmmov %vm14638_vm0 }
 0x919   : > { %v7546_v0 = vadd.f32 %v9177_v45, %v7545_v25  ;;  %v6592_v12 = vperm.slane %v5985_v6, 0  ;;  %v6593_v47 = vperm.slane %v6277_v15, 0  ;;  %v6594_v59 = vperm.slane %v6278_v54, 0 }
 0x91a   : > { %v7559_v62 = vsub.f32 1.0, %v7558_v42  ;;  %vm7563_vm12 = vweird.f32 %v9179_v43  ;;  %v8276_v23 = vld.sshfl [vmem:[#allocation1 + $0x10] sm:$0xff pattern:$0x75316420]  ;;  %v6595_v18 = vperm.slane %v6279_v11, 0  ;;  %v6596_v56 = vperm.slane %v6280_v31, 0 }
 0x91b   : > { %v7550_v4 = vsel %vm7549_vm13, %v9177_v45, %v7546_v0  ;;  %8380 = vst.msk [vmem:[%s12711_s22 + $0x48] sm:$0xff] %vm14638_vm0, %v8276_v23  ;;  %v6597_v3 = vperm.slane %v6281_v2, 0  ;;  %v6598_v10 = vperm.slane %v6282_v55, 0  ;;  %v6599_v40 = vperm.slane %v6283_v26, 0  ;;  %v14643_v45 = vld [vmem:[#allocation27_spill] sm:$0xff]  ;;  %vm7564_vm2 = vmor %vm7562_vm1, %vm7563_vm12 }
 0x91c   : > { %v7555_v6 = vsel %vm13228_vm8, %v7554_v63, %v7550_v4  ;;  %v7560_v36 = vmul.f32 %v9179_v43, %v7559_v62  ;;  %vm14639_vm15 = vcmask 1042432   ;;  %v7569_v35 = vor.u32 1.1754944e-38, %v7568_v1  ;;  %v14652_v1 = vld [vmem:[#allocation12_spill] sm:$0xff] }
 0x91d   : > { %v6848_v48 = vsel %vm14639_vm15, %v12545_v17, %v6592_v12  ;;  %vm14640_vm4 = vmmov %vm14639_vm15  ;;  %8273 = vst [vmem:[#allocation1 + $0x30] ss:$2 sm:$0xff] %v7555_v6  ;;  %v14649_v17 = vld [vmem:[#allocation30_spill] sm:$0xff]  ;;  %vm7567_vm8 = vcmp.eq.f32.partialorder %v7566_v8, 8.507059e+37  ;;  %v14655_v4 = vrot.slane %v13078_v49, 7  ;;  %v14657_v6 = vld [vmem:[#allocation31_spill] sm:$0xff] }
 0x91e   : > { %v6849_v30 = vsel %vm14640_vm4, %v12549_v53, %v6593_v47  ;;  %vm14642_vm6 = vmmov %vm14640_vm4  ;;  %v7561_v11 = vadd.f32 %v9179_v43, %v7560_v36  ;;  %v6916_v53 = vadd.f32 %v13036_v20, %v6848_v48  ;;  %vm14658_vm1 = vcmask 1041408  }
 0x91f   : > { %v6850_v15 = vsel %vm14642_vm6, %v14641_v16, %v6594_v59  ;;  %vm14644_vm14 = vmmov %vm14640_vm4  ;;  %v8277_v31 = vld.sshfl [vmem:[#allocation1 + $0x20] sm:$0xff pattern:$0x75316420]  ;;  %v6917_v2 = vadd.f32 %v13036_v20, %v6849_v30  ;;  %v5988_v30 = vpop.f32.mrf.mxu3 }
 0x920   : > { %v6851_v21 = vsel %vm14644_vm14, %v14643_v45, %v6595_v18  ;;  %vm14646_vm3 = vmmov %vm14640_vm4  ;;  %v6918_v42 = vadd.f32 %v13036_v20, %v6850_v15  ;;  %v7565_v0 = vsel %vm7564_vm2, %v9179_v43, %v7561_v11  ;;  %8381 = vst.msk [vmem:[%s12711_s22 + $0x50] sm:$0xff] %vm14651_vm11, %v8277_v31  ;;  %v8844_v59 = vmul.f32 -1.442695, %v6916_v53  ;;  %v14659_v16 = vld [vmem:[#allocation32_spill] sm:$0xff]  ;;  %v14661_v45 = vld [vmem:[#allocation33_spill] sm:$0xff] }
 0x921   : > { %v6852_v54 = vsel %vm14646_vm3, %v14645_v19, %v6596_v56  ;;  %vm14648_vm7 = vmmov %vm14646_vm3  ;;  %v6919_v55 = vadd.f32 %v13036_v20, %v6851_v21  ;;  %v7570_v13 = vsel %vm7567_vm8, %v7569_v35, %v7565_v0  ;;  %v8845_v62 = vmul.f32 -1.442695, %v6917_v2  ;;  %v14663_v19 = vld [vmem:[#allocation34_spill] sm:$0xff] }
 0x922   : > { %v6853_v63 = vsel %vm14648_vm7, %v14647_v33, %v6597_v3  ;;  %vm14650_vm5 = vmmov %vm14646_vm3  ;;  %v6920_v26 = vadd.f32 %v13036_v20, %v6852_v54  ;;  %v8846_v23 = vmul.f32 -1.442695, %v6918_v42  ;;  %v14654_v18 = vrot.slane %v13078_v49, 6  ;;  %8274 = vst [vmem:[#allocation1 + $0x31] ss:$2 sm:$0xff] %v7570_v13  ;;  %v14665_v33 = vld [vmem:[#allocation35_spill] sm:$0xff] }
 0x923   : > { %v6854_v25 = vsel %vm14650_vm5, %v14649_v17, %v6598_v10  ;;  %vm14653_vm9 = vmmov %vm14646_vm3  ;;  %v6921_v47 = vadd.f32 %v13036_v20, %v6853_v63  ;;  %v6495_v3 = vperm.slane %v14655_v4, 0  ;;  %v8847_v43 = vmul.f32 -1.442695, %v6919_v55 }
 0x924   : > { %v6855_v12 = vsel %vm14653_vm9, %v14652_v1, %v6599_v40  ;;  %v6494_v56 = vperm.slane %v14654_v18, 0  ;;  %v6922_v8 = vadd.f32 %v13036_v20, %v6854_v25  ;;  %v14656_v10 = vperm.slane %v13078_v49, 0  ;;  %vm14660_vm10 = vmmov %vm14658_vm1 }
 0x925   : > { %v6923_v36 = vadd.f32 %v13036_v20, %v6855_v12  ;;  %9180 = vpow2.f32 %v8844_v59  ;;  %v8848_v48 = vmul.f32 -1.442695, %v6920_v26  ;;  %v13289_v15 = vsel %vm14660_vm10, %v14659_v16, %v13130_v61  ;;  %vm14662_vm13 = vmmov %vm14658_vm1  ;;  %v14667_v61 = vld [vmem:[#allocation36_spill] sm:$0xff] }
 0x926   : > { %v13283_v40 = vsel %vm14658_vm1, %v14657_v6, %v14656_v10  ;;  %v13294_v21 = vsel %vm14662_vm13, %v14661_v45, %v13135_v34  ;;  %9182 = vpow2.f32 %v8845_v62  ;;  %v8849_v49 = vmul.f32 -1.442695, %v6921_v47  ;;  %vm14664_vm12 = vmmov %vm14658_vm1  ;;  %v13311_v34 = vpop.f32.mrf.mxu2 }
 0x927   : > { %v13299_v54 = vsel %vm14664_vm12, %v14663_v19, %v13137_v24  ;;  %vm14666_vm0 = vmmov %vm14658_vm1  ;;  %9184 = vpow2.f32 %v8846_v23  ;;  %v8850_v35 = vmul.f32 -1.442695, %v6922_v8  ;;  %v6284_v17 = vrot.slane %v5988_v30, 1 }
 0x928   : > { %v13304_v63 = vsel %vm14666_vm0, %v14665_v33, %v13139_v7  ;;  %vm14668_vm15 = vmmov %vm14666_vm0  ;;  %9186 = vpow2.f32 %v8847_v43  ;;  %v6285_v25 = vrot.slane %v5988_v30, 2  ;;  %v8851_v24 = vmul.f32 -1.442695, %v6923_v36 }
 0x929   : > { %v13309_v11 = vsel %vm14668_vm15, %v14667_v61, %v13142_v38  ;;  %9188 = vpow2.f32 %v8848_v48  ;;  %v6286_v53 = vrot.slane %v5988_v30, 3  ;;  %v6287_v31 = vrot.slane %v5988_v30, 4  ;;  %vm14669_vm4 = vmmov %vm14666_vm0  ;;  %v8278_v26 = vld.sshfl [vmem:[#allocation1 + $0x30] sm:$0xff pattern:$0x75316420] }
 0x92a   : > { %v13315_v7 = vsel %vm14669_vm4, %v12737_v50, %v6494_v56  ;;  %9190 = vpow2.f32 %v8849_v49  ;;  %v6288_v2 = vrot.slane %v5988_v30, 5  ;;  %v6289_v38 = vrot.slane %v5988_v30, 6  ;;  %vm14670_vm6 = vmmov %vm14666_vm0 }
 0x92b   : > { %v9181_v42 = vpop.eup %9180  ;;  %v13319_v55 = vsel %vm14670_vm6, %v12758_v57, %v6495_v3  ;;  %v6290_v1 = vrot.slane %v5988_v30, 7  ;;  %v6600_v12 = vperm.slane %v5988_v30, 0  ;;  %vm14671_vm14 = vmmov %vm14651_vm11  ;;  %9192 = vpow2.f32 %v8850_v35 }
 0x92c   : > { %v9183_v47 = vpop.eup %9182  ;;  %8382 = vst.msk [vmem:[%s12711_s22 + $0x58] sm:$0xff] %vm14671_vm14, %v8278_v26  ;;  %v13324_v13 = vadd.f32 1.0, %v9181_v42  ;;  %v6601_v50 = vperm.slane %v6284_v17, 0  ;;  %v6602_v59 = vperm.slane %v6285_v25, 0  ;;  %9194 = vpow2.f32 %v8851_v24  ;;  %vm14672_vm7 = vmmov %vm14646_vm3 }
 0x92d   : > { %v9185_v62 = vpop.eup %9184  ;;  %v13326_v23 = vadd.f32 1.0, %v9183_v47  ;;  %v6603_v18 = vperm.slane %v6286_v53, 0  ;;  %v6604_v57 = vperm.slane %v6287_v31, 0  ;;  %v6605_v3 = vperm.slane %v6288_v2, 0  ;;  %vm14673_vm5 = vmmov %vm14646_vm3 }
 0x92e   : > { %v9187_v56 = vpop.eup %9186  ;;  %v13328_v4 = vadd.f32 1.0, %v9185_v62  ;;  %9196 = vrcp.f32 %v13324_v13  ;;  %v6606_v8 = vperm.slane %v6289_v38, 0  ;;  %v6607_v36 = vperm.slane %v6290_v1, 0  ;;  %vm14674_vm2 = vmmov %vm14646_vm3 }
 0x92f   : > { %v9189_v43 = vpop.eup %9188  ;;  %v13332_v6 = vadd.f32 1.0, %v9187_v56  ;;  %9198 = vrcp.f32 %v13326_v23  ;;  %v13339_v16 = vsel %vm14646_vm3, %v12790_v39, %v6600_v12  ;;  %v13343_v45 = vsel %vm14672_vm7, %v12795_v51, %v6601_v50  ;;  %vm14675_vm8 = vmmov %vm14674_vm2 }
 0x930   : > { %v9191_v48 = vpop.eup %9190  ;;  %v13335_v30 = vadd.f32 1.0, %v9189_v43  ;;  %v13347_v49 = vsel %vm14673_vm5, %v12800_v46, %v6602_v59  ;;  %v7581_v19 = vand.u32 2147483647, %v13324_v13  ;;  %v7583_v33 = vand.u32 2147483648, %v13324_v13  ;;  %vm14676_vm11 = vmmov %vm14674_vm2 }
 0x931   : > { %9200 = vrcp.f32 %v13328_v4  ;;  %v13354_v61 = vsel %vm14674_vm2, %v12807_v60, %v6603_v18  ;;  %v9193_v39 = vpop.eup %9192  ;;  %v7596_v35 = vand.u32 2147483647, %v13326_v23  ;;  %v13359_v51 = vsel %vm14675_vm8, %v12812_v52, %v6604_v57  ;;  %vm14677_vm9 = vmmov %vm14674_vm2 }
 0x932   : > { %v13363_v46 = vsel %vm14676_vm11, %v12819_v28, %v6605_v3  ;;  %v13367_v17 = vsel %vm14677_vm9, %v12824_v22, %v6606_v8  ;;  %v9195_v25 = vpop.eup %9194  ;;  %v13369_v24 = vadd.f32 1.0, %v9191_v48  ;;  %v7598_v60 = vand.u32 2147483648, %v13326_v23  ;;  %vm14678_vm1 = vmmov %vm14674_vm2 }
 0x933   : > { %9202 = vrcp.f32 %v13332_v6  ;;  %v13375_v53 = vsel %vm14678_vm1, %v12829_v37, %v6607_v36  ;;  %vm7577_vm10 = vweird.f32 %v13324_v13  ;;  %vm7592_vm13 = vweird.f32 %v13326_v23 }
 0x934   : > { %v9197_v52 = vpop.eup %9196  ;;  %v7611_v28 = vand.u32 2147483647, %v13328_v4  ;;  %9204 = vrcp.f32 %v13335_v30  ;;  %v13381_v31 = vadd.f32 1.0, %v9193_v39  ;;  %vm13384_vm12 = vcmp.eq.f32.partialorder %v7581_v19, 8.507059e+37 }
 0x935   : > { %v9199_v22 = vpop.eup %9198  ;;  %v7573_v2 = vmul.f32 %v9197_v52, %v13324_v13  ;;  %v7584_v37 = vor.u32 1.1754944e-38, %v7583_v33  ;;  %v7613_v42 = vand.u32 2147483648, %v13328_v4  ;;  %vm13390_vm0 = vcmp.eq.f32.partialorder %v7596_v35, 8.507059e+37 }
 0x936   : > { %v7588_v26 = vmul.f32 %v9199_v22, %v13326_v23  ;;  %vm7607_vm15 = vweird.f32 %v13328_v4  ;;  %v7626_v12 = vand.u32 2147483647, %v13332_v6  ;;  %v7628_v47 = vand.u32 2147483648, %v13332_v6 }
 0x937   : > { %v9201_v50 = vpop.eup %9200  ;;  %v13397_v59 = vadd.f32 1.0, %v9195_v25  ;;  %v7574_v62 = vsub.f32 1.0, %v7573_v2  ;;  %v7599_v18 = vor.u32 1.1754944e-38, %v7598_v60  ;;  %9206 = vrcp.f32 %v13369_v24 }
 0x938   : > { %vm7578_vm4 = vweird.f32 %v9197_v52  ;;  %v7589_v57 = vsub.f32 1.0, %v7588_v26  ;;  %v7603_v56 = vmul.f32 %v9201_v50, %v13328_v4  ;;  %vm13401_vm6 = vcmp.eq.f32.partialorder %v7611_v28, 8.507059e+37 }
 0x939   : > { %vm7622_vm14 = vweird.f32 %v13332_v6  ;;  %v7641_v8 = vand.u32 2147483647, %v13335_v30  ;;  %v9203_v43 = vpop.eup %9202  ;;  %v7575_v36 = vmul.f32 %v9197_v52, %v7574_v62  ;;  %vm7593_vm3 = vweird.f32 %v9199_v22  ;;  %vm7579_vm8 = vmor %vm7577_vm10, %vm7578_vm4 }
 0x93a   : > { %v7614_v48 = vor.u32 1.1754944e-38, %v7613_v42  ;;  %vm7637_vm7 = vweird.f32 %v13335_v30  ;;  %v9205_v19 = vpop.eup %9204  ;;  %v7590_v33 = vmul.f32 %v9199_v22, %v7589_v57  ;;  %v7604_v39 = vsub.f32 1.0, %v7603_v56  ;;  %vm7594_vm9 = vmor %vm7592_vm13, %vm7593_vm3 }
 0x93b   : > { %v7618_v35 = vmul.f32 %v9203_v43, %v13332_v6  ;;  %vm13409_vm5 = vcmp.eq.f32.partialorder %v7626_v12, 8.507059e+37  ;;  %v7629_v60 = vor.u32 1.1754944e-38, %v7628_v47  ;;  %v7576_v28 = vadd.f32 %v9197_v52, %v7575_v36 }
 0x93c   : > { %vm7608_vm2 = vweird.f32 %v9201_v50  ;;  %v7633_v2 = vmul.f32 %v9205_v19, %v13335_v30  ;;  %v7643_v26 = vand.u32 2147483648, %v13335_v30  ;;  %v7591_v42 = vadd.f32 %v9199_v22, %v7590_v33 }
 0x93d   : > { %v7605_v62 = vmul.f32 %v9201_v50, %v7604_v39  ;;  %v7619_v57 = vsub.f32 1.0, %v7618_v35  ;;  %vm13418_vm11 = vcmp.eq.f32.partialorder %v7641_v8, 8.507059e+37  ;;  %v9207_v12 = vpop.eup %9206  ;;  %v7580_v10 = vsel %vm7579_vm8, %v9197_v52, %v7576_v28  ;;  %vm7609_vm10 = vmor %vm7607_vm15, %vm7608_vm2 }
 0x93e   : > { %vm7623_vm1 = vweird.f32 %v9203_v43  ;;  %v7634_v47 = vsub.f32 1.0, %v7633_v2  ;;  %9208 = vrcp.f32 %v13381_v31  ;;  %v7585_v13 = vsel %vm13384_vm12, %v7584_v37, %v7580_v10 }
 0x93f   : > { %v7595_v36 = vsel %vm7594_vm9, %v9199_v22, %v7591_v42  ;;  %v7606_v33 = vadd.f32 %v9201_v50, %v7605_v62  ;;  %v7620_v39 = vmul.f32 %v9203_v43, %v7619_v57  ;;  %vm7638_vm4 = vweird.f32 %v9205_v19  ;;  %8279 = vst [vmem:[#allocation1] ss:$2 sm:$0xff] %v7585_v13  ;;  %vm7624_vm13 = vmor %vm7622_vm14, %vm7623_vm1 }
 0x940   : > { %v7600_v8 = vsel %vm13390_vm0, %v7599_v18, %v7595_v36  ;;  %v7635_v52 = vmul.f32 %v9205_v19, %v7634_v47  ;;  %v7648_v23 = vmul.f32 %v9207_v12, %v13369_v24  ;;  %v7644_v2 = vor.u32 1.1754944e-38, %v7643_v26  ;;  %vm7639_vm12 = vmor %vm7637_vm7, %vm7638_vm4 }
 0x941   : > { %v7610_v35 = vsel %vm7609_vm10, %v9201_v50, %v7606_v33  ;;  %v7621_v28 = vadd.f32 %v9203_v43, %v7620_v39  ;;  %v7656_v10 = vand.u32 2147483647, %v13369_v24  ;;  %8280 = vst [vmem:[#allocation1 + $0x1] ss:$2 sm:$0xff] %v7600_v8  ;;  %v7658_v37 = vand.u32 2147483648, %v13369_v24 }
 0x942   : > { %v7615_v22 = vsel %vm13401_vm6, %v7614_v48, %v7610_v35  ;;  %v7636_v4 = vadd.f32 %v9205_v19, %v7635_v52  ;;  %v7649_v38 = vsub.f32 1.0, %v7648_v23  ;;  %vm7653_vm0 = vweird.f32 %v9207_v12 }
 0x943   : > { %v7625_v1 = vsel %vm7624_vm13, %v9203_v43, %v7621_v28  ;;  %v7671_v50 = vand.u32 2147483647, %v13381_v31  ;;  %9210 = vrcp.f32 %v13397_v59  ;;  %8281 = vst [vmem:[#allocation1 + $0x10] ss:$2 sm:$0xff] %v7615_v22  ;;  %v7673_v26 = vand.u32 2147483648, %v13381_v31 }
 0x944   : > { %v9209_v18 = vpop.eup %9208  ;;  %v7630_v3 = vsel %vm13409_vm5, %v7629_v60, %v7625_v1  ;;  %v7640_v6 = vsel %vm7639_vm12, %v9205_v19, %v7636_v4  ;;  %v7650_v48 = vmul.f32 %v9207_v12, %v7649_v38  ;;  %vm7652_vm15 = vweird.f32 %v13369_v24 }
 0x945   : > { %v7645_v43 = vsel %vm13418_vm11, %v7644_v2, %v7640_v6  ;;  %vm13451_vm6 = vcmp.eq.f32.partialorder %v7656_v10, 8.507059e+37  ;;  %v7663_v42 = vmul.f32 %v9209_v18, %v13381_v31  ;;  %8282 = vst [vmem:[#allocation1 + $0x11] ss:$2 sm:$0xff] %v7630_v3  ;;  %v7659_v57 = vor.u32 1.1754944e-38, %v7658_v37  ;;  %vm7654_vm14 = vmor %vm7652_vm15, %vm7653_vm0 }
 0x946   : > { %v7651_v62 = vadd.f32 %v9207_v12, %v7650_v48  ;;  %8283 = vst [vmem:[#allocation1 + $0x20] ss:$2 sm:$0xff] %v7645_v43  ;;  %v6924_v19 = vadd.f32 %v13036_v20, %v13339_v16  ;;  %v6925_v25 = vadd.f32 %v13036_v20, %v13343_v45  ;;  %vm13461_vm3 = vcmp.eq.f32.partialorder %v7671_v50, 8.507059e+37 }
 0x947   : > { %v7664_v24 = vsub.f32 1.0, %v7663_v42  ;;  %v6926_v56 = vadd.f32 %v13036_v20, %v13347_v49  ;;  %v6927_v47 = vadd.f32 %v13036_v20, %v13354_v61  ;;  %vm7668_vm7 = vweird.f32 %v9209_v18 }
 0x948   : > { %v7655_v13 = vsel %vm7654_vm14, %v9207_v12, %v7651_v62  ;;  %v7674_v16 = vor.u32 1.1754944e-38, %v7673_v26  ;;  %v8287_v36 = vld.sshfl [vmem:[#allocation1] sm:$0xff pattern:$0x75316420]  ;;  %v6928_v45 = vadd.f32 %v13036_v20, %v13359_v51  ;;  %v7686_v52 = vand.u32 2147483647, %v13397_v59 }
 0x949   : > { %v9211_v33 = vpop.eup %9210  ;;  %v7660_v39 = vsel %vm13451_vm6, %v7659_v57, %v7655_v13  ;;  %v7665_v8 = vmul.f32 %v9209_v18, %v7664_v24  ;;  %vm14693_vm5 = vcmask 23552   ;;  %v6929_v49 = vadd.f32 %v13036_v20, %v13363_v46 }
 0x94a   : > { %8383 = vst.msk [vmem:[%s12711_s22 + $0x60] sm:$0xff] %vm14693_vm5, %v8287_v36  ;;  %vm7667_vm2 = vweird.f32 %v13381_v31  ;;  %v7678_v61 = vmul.f32 %v9211_v33, %v13397_v59  ;;  %v8852_v12 = vmul.f32 -1.442695, %v6924_v19  ;;  %v8853_v51 = vmul.f32 -1.442695, %v6925_v25  ;;  %vm14694_vm11 = vmmov %vm14693_vm5 }
 0x94b   : > { %8284 = vst [vmem:[#allocation1 + $0x21] ss:$2 sm:$0xff] %v7660_v39  ;;  %v7666_v23 = vadd.f32 %v9209_v18, %v7665_v8  ;;  %v6930_v35 = vadd.f32 %v13036_v20, %v13367_v17  ;;  %v8854_v28 = vmul.f32 -1.442695, %v6926_v56  ;;  %v8855_v2 = vmul.f32 -1.442695, %v6927_v47  ;;  %vm7669_vm8 = vmor %vm7667_vm2, %vm7668_vm7 }
 0x94c   : > { %v7679_v10 = vsub.f32 1.0, %v7678_v61  ;;  %v8288_v22 = vld.sshfl [vmem:[#allocation1 + $0x10] sm:$0xff pattern:$0x75316420]  ;;  %v6931_v46 = vadd.f32 %v13036_v20, %v13375_v53  ;;  %9212 = vpow2.f32 %v8852_v12  ;;  %v8856_v31 = vmul.f32 -1.442695, %v6928_v45  ;;  %v13492_v53 = vpop.f32.mrf.mxu3  ;;  %vm14695_vm13 = vmmov %vm14693_vm5 }
 0x94d   : > { %v7670_v4 = vsel %vm7669_vm8, %v9209_v18, %v7666_v23  ;;  %v7688_v38 = vand.u32 2147483648, %v13397_v59  ;;  %8384 = vst.msk [vmem:[%s12711_s22 + $0x68] sm:$0xff] %vm14694_vm11, %v8288_v22  ;;  %9214 = vpow2.f32 %v8853_v51  ;;  %v8857_v37 = vmul.f32 -1.442695, %v6929_v49  ;;  %vm14696_vm15 = vmmov %vm14693_vm5 }
 0x94e   : > { %v7675_v17 = vsel %vm13461_vm3, %v7674_v16, %v7670_v4  ;;  %v7680_v1 = vmul.f32 %v9211_v33, %v7679_v10  ;;  %vm7683_vm9 = vweird.f32 %v9211_v33  ;;  %9216 = vpow2.f32 %v8854_v28 }
 0x94f   : > { %8285 = vst [vmem:[#allocation1 + $0x30] ss:$2 sm:$0xff] %v7675_v17  ;;  %9218 = vpow2.f32 %v8855_v2  ;;  %v8858_v20 = vmul.f32 -1.442695, %v6930_v35  ;;  %vm7682_vm1 = vweird.f32 %v13397_v59  ;;  %v8859_v6 = vmul.f32 -1.442695, %v6931_v46 }
 0x950   : > { %v7681_v18 = vadd.f32 %v9211_v33, %v7680_v1  ;;  %9220 = vpow2.f32 %v8856_v31  ;;  %vm7684_vm10 = vmor %vm7682_vm1, %vm7683_vm9  ;;  %v7689_v43 = vor.u32 1.1754944e-38, %v7688_v38  ;;  %vm7687_vm4 = vcmp.eq.f32.partialorder %v7686_v52, 8.507059e+37 }
 0x951   : > { %9222 = vpow2.f32 %v8857_v37  ;;  %v6291_v19 = vrot.slane %v13492_v53, 1  ;;  %v6292_v60 = vrot.slane %v13492_v53, 2  ;;  %v6293_v13 = vrot.slane %v13492_v53, 3 }
 0x952   : > { %v8289_v30 = vld.sshfl [vmem:[#allocation1 + $0x20] sm:$0xff pattern:$0x75316420]  ;;  %v9213_v42 = vpop.eup %9212  ;;  %v7685_v57 = vsel %vm7684_vm10, %v9211_v33, %v7681_v18  ;;  %9224 = vpow2.f32 %v8858_v20  ;;  %v6294_v16 = vrot.slane %v13492_v53, 4  ;;  %v6295_v33 = vrot.slane %v13492_v53, 5 }
 0x953   : > { %8385 = vst.msk [vmem:[%s12711_s22 + $0x70] sm:$0xff] %vm14695_vm13, %v8289_v30  ;;  %v9215_v59 = vpop.eup %9214  ;;  %v7690_v25 = vsel %vm7687_vm4, %v7689_v43, %v7685_v57  ;;  %v13501_v24 = vadd.f32 1.0, %v9213_v42  ;;  %9226 = vpow2.f32 %v8859_v6  ;;  %v6296_v39 = vrot.slane %v13492_v53, 6 }
 0x954   : > { %v9217_v56 = vpop.eup %9216  ;;  %8286 = vst [vmem:[#allocation1 + $0x31] ss:$2 sm:$0xff] %v7690_v25  ;;  %v13504_v47 = vadd.f32 1.0, %v9215_v59  ;;  %v6297_v49 = vrot.slane %v13492_v53, 7  ;;  %v6608_v61 = vperm.slane %v13492_v53, 0  ;;  %v13521_v35 = vperm.slane %v6291_v19, 0 }
 0x955   : > { %v9219_v36 = vpop.eup %9218  ;;  %v13508_v45 = vadd.f32 1.0, %v9217_v56  ;;  %9228 = vrcp.f32 %v13501_v24  ;;  %v7703_v23 = vand.u32 2147483648, %v13501_v24  ;;  %v13523_v28 = vperm.slane %v6292_v60, 0 }
 0x956   : > { %v9221_v8 = vpop.eup %9220  ;;  %v13513_v52 = vadd.f32 1.0, %v9219_v36  ;;  %9230 = vrcp.f32 %v13504_v47  ;;  %v7701_v2 = vand.u32 2147483647, %v13501_v24  ;;  %v13527_v10 = vperm.slane %v6293_v13, 0 }
 0x957   : > { %v9223_v12 = vpop.eup %9222  ;;  %v13518_v51 = vadd.f32 1.0, %v9221_v8  ;;  %9232 = vrcp.f32 %v13508_v45  ;;  %v13529_v22 = vperm.slane %v6294_v16, 0  ;;  %v7716_v31 = vand.u32 2147483647, %v13504_v47 }
 0x958   : > { %v9225_v46 = vpop.eup %9224  ;;  %v7718_v4 = vand.u32 2147483648, %v13504_v47  ;;  %v13533_v38 = vperm.slane %v6295_v33, 0  ;;  %v13535_v37 = vperm.slane %v6296_v39, 0  ;;  %v13537_v1 = vadd.f32 1.0, %v9223_v12 }
 0x959   : > { %v9227_v17 = vpop.eup %9226  ;;  %vm7697_vm12 = vweird.f32 %v13501_v24  ;;  %9234 = vrcp.f32 %v13513_v52  ;;  %v13541_v20 = vperm.slane %v6297_v49, 0  ;;  %v7704_v43 = vor.u32 1.1754944e-38, %v7703_v23 }
 0x95a   : > { %vm7712_vm0 = vweird.f32 %v13504_v47  ;;  %v7731_v30 = vand.u32 2147483647, %v13508_v45  ;;  %9236 = vrcp.f32 %v13518_v51  ;;  %v13548_v57 = vadd.f32 1.0, %v9225_v46 }
 0x95b   : > { %v9229_v18 = vpop.eup %9228  ;;  %v8290_v6 = vld.sshfl [vmem:[#allocation1 + $0x30] sm:$0xff pattern:$0x75316420]  ;;  %vm13551_vm6 = vcmp.eq.f32.partialorder %v7701_v2, 8.507059e+37  ;;  %v7733_v25 = vand.u32 2147483648, %v13508_v45  ;;  %v7748_v60 = vand.u32 2147483648, %v13513_v52  ;;  %vm7727_vm3 = vweird.f32 %v13508_v45 }
 0x95c   : > { %v9231_v42 = vpop.eup %9230  ;;  %8386 = vst.msk [vmem:[%s12711_s22 + $0x78] sm:$0xff] %vm14696_vm15, %v8290_v6  ;;  %v7693_v19 = vmul.f32 %v9229_v18, %v13501_v24  ;;  %v13557_v56 = vadd.f32 1.0, %v9227_v17  ;;  %vm13560_vm14 = vcmp.eq.f32.partialorder %v7716_v31, 8.507059e+37  ;;  %v7719_v36 = vor.u32 1.1754944e-38, %v7718_v4 }
 0x95d   : > { %v7708_v13 = vmul.f32 %v9231_v42, %v13504_v47  ;;  %v7746_v33 = vand.u32 2147483647, %v13513_v52  ;;  %v9233_v39 = vpop.eup %9232  ;;  %v7761_v49 = vand.u32 2147483647, %v13518_v51  ;;  %v7763_v12 = vand.u32 2147483648, %v13518_v51 }
 0x95e   : > { %v7694_v8 = vsub.f32 1.0, %v7693_v19  ;;  %9238 = vrcp.f32 %v13537_v1  ;;  %vm7698_vm7 = vweird.f32 %v9229_v18  ;;  %v7723_v2 = vmul.f32 %v9233_v39, %v13508_v45 }
 0x95f   : > { %v7709_v23 = vsub.f32 1.0, %v7708_v13  ;;  %vm13570_vm5 = vcmp.eq.f32.partialorder %v7731_v30, 8.507059e+37  ;;  %vm7742_vm2 = vweird.f32 %v13513_v52  ;;  %v9235_v31 = vpop.eup %9234  ;;  %vm7713_vm8 = vweird.f32 %v9231_v42  ;;  %vm7699_vm4 = vmor %vm7697_vm12, %vm7698_vm7 }
 0x960   : > { %v7695_v4 = vmul.f32 %v9229_v18, %v7694_v8  ;;  %v7734_v17 = vor.u32 1.1754944e-38, %v7733_v25  ;;  %v7749_v6 = vor.u32 1.1754944e-38, %v7748_v60  ;;  %vm7757_vm11 = vweird.f32 %v13518_v51  ;;  %v9237_v19 = vpop.eup %9236  ;;  %vm7714_vm13 = vmor %vm7712_vm0, %vm7713_vm8 }
 0x961   : > { %v7710_v62 = vmul.f32 %v9231_v42, %v7709_v23  ;;  %v7724_v26 = vsub.f32 1.0, %v7723_v2  ;;  %vm7728_vm9 = vweird.f32 %v9233_v39  ;;  %v7738_v13 = vmul.f32 %v9235_v31, %v13513_v52 }
 0x962   : > { %vm13577_vm1 = vcmp.eq.f32.partialorder %v7746_v33, 8.507059e+37  ;;  %v7696_v48 = vadd.f32 %v9229_v18, %v7695_v4  ;;  %v7753_v3 = vmul.f32 %v9237_v19, %v13518_v51  ;;  %vm13582_vm10 = vcmp.eq.f32.partialorder %v7761_v49, 8.507059e+37  ;;  %vm7729_vm12 = vmor %vm7727_vm3, %vm7728_vm9 }
 0x963   : > { %v7764_v25 = vor.u32 1.1754944e-38, %v7763_v12  ;;  %v7711_v60 = vadd.f32 %v9231_v42, %v7710_v62  ;;  %v7725_v23 = vmul.f32 %v9233_v39, %v7724_v26  ;;  %v7739_v2 = vsub.f32 1.0, %v7738_v13 }
 0x964   : > { %v7776_v33 = vand.u32 2147483647, %v13537_v1  ;;  %v9239_v50 = vpop.eup %9238  ;;  %v7700_v0 = vsel %vm7699_vm4, %v9229_v18, %v7696_v48  ;;  %vm7743_vm15 = vweird.f32 %v9235_v31  ;;  %v7754_v49 = vsub.f32 1.0, %v7753_v3 }
 0x965   : > { %9240 = vrcp.f32 %v13548_v57  ;;  %v7705_v12 = vsel %vm13551_vm6, %v7704_v43, %v7700_v0  ;;  %v7715_v24 = vsel %vm7714_vm13, %v9231_v42, %v7711_v60  ;;  %v7726_v4 = vadd.f32 %v9233_v39, %v7725_v23  ;;  %vm7744_vm0 = vmor %vm7742_vm2, %vm7743_vm15 }
 0x966   : > { %v7740_v62 = vmul.f32 %v9235_v31, %v7739_v2  ;;  %v7720_v26 = vsel %vm13560_vm14, %v7719_v36, %v7715_v24  ;;  %v7755_v48 = vmul.f32 %v9237_v19, %v7754_v49  ;;  %vm7758_vm7 = vweird.f32 %v9237_v19  ;;  %8291 = vst [vmem:[#allocation1] ss:$2 sm:$0xff] %v7705_v12 }
 0x967   : > { %v7768_v47 = vmul.f32 %v9239_v50, %v13537_v1  ;;  %v7730_v3 = vsel %vm7729_vm12, %v9233_v39, %v7726_v4  ;;  %v7778_v59 = vand.u32 2147483648, %v13537_v1  ;;  %v7791_v0 = vand.u32 2147483647, %v13548_v57  ;;  %8292 = vst [vmem:[#allocation1 + $0x1] ss:$2 sm:$0xff] %v7720_v26  ;;  %vm7759_vm6 = vmor %vm7757_vm11, %vm7758_vm7 }
 0x968   : > { %v7741_v18 = vadd.f32 %v9235_v31, %v7740_v62  ;;  %v7735_v43 = vsel %vm13570_vm5, %v7734_v17, %v7730_v3  ;;  %v7756_v45 = vadd.f32 %v9237_v19, %v7755_v48  ;;  %v7793_v16 = vand.u32 2147483648, %v13548_v57 }
 0x969   : > { %v7769_v42 = vsub.f32 1.0, %v7768_v47  ;;  %vm7772_vm14 = vweird.f32 %v13537_v1  ;;  %vm13613_vm3 = vcmp.eq.f32.partialorder %v7776_v33, 8.507059e+37  ;;  %9242 = vrcp.f32 %v13557_v56  ;;  %8293 = vst [vmem:[#allocation1 + $0x10] ss:$2 sm:$0xff] %v7735_v43 }
 0x96a   : > { %v7745_v36 = vsel %vm7744_vm0, %v9235_v31, %v7741_v18  ;;  %v7760_v17 = vsel %vm7759_vm6, %v9237_v19, %v7756_v45  ;;  %vm7773_vm5 = vweird.f32 %v9239_v50  ;;  %v7779_v31 = vor.u32 1.1754944e-38, %v7778_v59 }
 0x96b   : > { %v9241_v46 = vpop.eup %9240  ;;  %v7750_v52 = vsel %vm13577_vm1, %v7749_v6, %v7745_v36  ;;  %v7770_v13 = vmul.f32 %v9239_v50, %v7769_v42  ;;  %v7765_v51 = vsel %vm13582_vm10, %v7764_v25, %v7760_v17  ;;  %vm7787_vm2 = vweird.f32 %v13548_v57  ;;  %vm7774_vm9 = vmor %vm7772_vm14, %vm7773_vm5 }
 0x96c   : > { %v7783_v60 = vmul.f32 %v9241_v46, %v13548_v57  ;;  %8294 = vst [vmem:[#allocation1 + $0x11] ss:$2 sm:$0xff] %v7750_v52  ;;  %vm7788_vm8 = vweird.f32 %v9241_v46  ;;  %vm13624_vm11 = vcmp.eq.f32.partialorder %v7791_v0, 8.507059e+37  ;;  %v7794_v30 = vor.u32 1.1754944e-38, %v7793_v16 }
 0x96d   : > { %v7771_v23 = vadd.f32 %v9239_v50, %v7770_v13  ;;  %8295 = vst [vmem:[#allocation1 + $0x20] ss:$2 sm:$0xff] %v7765_v51  ;;  %v7806_v19 = vand.u32 2147483647, %v13557_v56  ;;  %vm14711_vm1 = vcmask 1042432   ;;  %vm14716_vm12 = vcmask 23552   ;;  %vm7789_vm6 = vmor %vm7787_vm2, %vm7788_vm8  ;;  %v13693_v13 = vpop.f32.mrf.mxu3 }
 0x96e   : > { %v7784_v6 = vsub.f32 1.0, %v7783_v60  ;;  %v6864_v8 = vsel %vm14711_vm1, %v13076_v32, %v6608_v61  ;;  %vm14712_vm10 = vmmov %vm14711_vm1  ;;  %v8299_v49 = vld.sshfl [vmem:[#allocation1] sm:$0xff pattern:$0x75316420]  ;;  %v6496_v43 = vperm.slane %v13311_v34, 0  ;;  %vm7802_vm2 = vweird.f32 %v13557_v56 }
 0x96f   : > { %v6865_v25 = vsel %vm14712_vm10, %v13082_v5, %v13521_v35  ;;  %v7775_v33 = vsel %vm7774_vm9, %v9239_v50, %v7771_v23  ;;  %vm14713_vm4 = vmmov %vm14711_vm1  ;;  %v9243_v24 = vpop.eup %9242  ;;  %v7808_v5 = vand.u32 2147483648, %v13557_v56  ;;  %8387 = vst.msk [vmem:[%s12711_s22 + $0x80] sm:$0xff] %vm14716_vm12, %v8299_v49  ;;  %v14721_v16 = vrot.slane %v13311_v34, 1 }
 0x970   : > { %v6866_v12 = vsel %vm14713_vm4, %v13086_v27, %v13523_v28  ;;  %vm14714_vm13 = vmmov %vm14711_vm1  ;;  %v7780_v32 = vsel %vm13613_vm3, %v7779_v31, %v7775_v33  ;;  %v7785_v61 = vmul.f32 %v9241_v46, %v7784_v6  ;;  %v7798_v50 = vmul.f32 %v9243_v24, %v13557_v56 }
 0x971   : > { %v6867_v1 = vsel %vm14714_vm13, %v13090_v41, %v13527_v10  ;;  %vm14715_vm15 = vmmov %vm14711_vm1  ;;  %8296 = vst [vmem:[#allocation1 + $0x21] ss:$2 sm:$0xff] %v7780_v32  ;;  %vm7803_vm14 = vweird.f32 %v9243_v24  ;;  %v13686_v36 = vperm.slane %v14721_v16, 0  ;;  %v14722_v39 = vrot.slane %v13311_v34, 2 }
 0x972   : > { %v6868_v53 = vsel %vm14715_vm15, %v13094_v44, %v13529_v22  ;;  %vm14717_vm7 = vmmov %vm14711_vm1  ;;  %v13662_v44 = vld [vmem:[%s14283_s12] ss:$0 sm:$0xff]  ;;  %v7786_v10 = vadd.f32 %v9241_v46, %v7785_v61  ;;  %v7809_v52 = vor.u32 1.1754944e-38, %v7808_v5  ;;  %v14724_v31 = vrot.slane %v13311_v34, 3 }
 0x973   : > { %v6869_v27 = vsel %vm14717_vm7, %v13098_v14, %v13533_v38  ;;  %vm14718_vm0 = vmmov %vm14711_vm1  ;;  %v6932_v35 = vadd.f32 %v13662_v44, %v6864_v8  ;;  %v6933_v28 = vadd.f32 %v13662_v44, %v6865_v25  ;;  %v6934_v14 = vadd.f32 %v13662_v44, %v6866_v12 }
 0x974   : > { %v6870_v41 = vsel %vm14718_vm0, %v13102_v9, %v13535_v37  ;;  %v6935_v22 = vadd.f32 %v13662_v44, %v6867_v1  ;;  %v6936_v38 = vadd.f32 %v13662_v44, %v6868_v53  ;;  %v7799_v9 = vsub.f32 1.0, %v7798_v50  ;;  %v8300_v37 = vld.sshfl [vmem:[#allocation1 + $0x10] sm:$0xff pattern:$0x75316420]  ;;  %vm14719_vm3 = vmmov %vm14718_vm0 }
 0x975   : > { %v6871_v4 = vsel %vm14719_vm3, %v13119_v58, %v13541_v20  ;;  %v6937_v62 = vadd.f32 %v13662_v44, %v6869_v27  ;;  %v7790_v26 = vsel %vm7789_vm6, %v9241_v46, %v7786_v10  ;;  %vm14720_vm5 = vmmov %vm14716_vm12  ;;  %v6938_v48 = vadd.f32 %v13662_v44, %v6870_v41 }
 0x976   : > { %8388 = vst.msk [vmem:[%s12711_s22 + $0x88] sm:$0xff] %vm14720_vm5, %v8300_v37  ;;  %v8860_v47 = vmul.f32 -1.442695, %v6932_v35  ;;  %v8861_v3 = vmul.f32 -1.442695, %v6933_v28  ;;  %v7795_v57 = vsel %vm13624_vm11, %v7794_v30, %v7790_v26  ;;  %v7800_v18 = vmul.f32 %v9243_v24, %v7799_v9  ;;  %vm7804_vm8 = vmor %vm7802_vm2, %vm7803_vm14 }
 0x977   : > { %v8862_v59 = vmul.f32 -1.442695, %v6934_v14  ;;  %v8863_v0 = vmul.f32 -1.442695, %v6935_v22  ;;  %8297 = vst [vmem:[#allocation1 + $0x30] ss:$2 sm:$0xff] %v7795_v57  ;;  %v6939_v58 = vadd.f32 %v13662_v44, %v6871_v4  ;;  %vm14723_vm9 = vmmov %vm14720_vm5 }
 0x978   : > { %9244 = vpow2.f32 %v8860_v47  ;;  %v8864_v20 = vmul.f32 -1.442695, %v6936_v38  ;;  %v7801_v45 = vadd.f32 %v9243_v24, %v7800_v18  ;;  %v8865_v42 = vmul.f32 -1.442695, %v6937_v62 }
 0x979   : > { %9246 = vpow2.f32 %v8861_v3  ;;  %v13690_v46 = vperm.slane %v14722_v39, 0  ;;  %v8301_v17 = vld.sshfl [vmem:[#allocation1 + $0x20] sm:$0xff pattern:$0x75316420]  ;;  %vm7807_vm11 = vcmp.eq.f32.partialorder %v7806_v19, 8.507059e+37  ;;  %v13699_v60 = vperm.slane %v14724_v31, 0 }
 0x97a   : > { %9248 = vpow2.f32 %v8862_v59  ;;  %v7805_v51 = vsel %vm7804_vm8, %v9243_v24, %v7801_v45  ;;  %8389 = vst.msk [vmem:[%s12711_s22 + $0x90] sm:$0xff] %vm14723_vm9, %v8301_v17  ;;  %v8866_v56 = vmul.f32 -1.442695, %v6938_v48  ;;  %v8867_v2 = vmul.f32 -1.442695, %v6939_v58 }
 0x97b   : > { %9250 = vpow2.f32 %v8863_v0  ;;  %v7810_v23 = vsel %vm7807_vm11, %v7809_v52, %v7805_v51  ;;  %v14725_v30 = vrot.slane %v13311_v34, 4  ;;  %v6298_v19 = vrot.slane %v13693_v13, 1 }
 0x97c   : > { %9252 = vpow2.f32 %v8864_v20  ;;  %8298 = vst [vmem:[#allocation1 + $0x31] ss:$2 sm:$0xff] %v7810_v23  ;;  %v6299_v8 = vrot.slane %v13693_v13, 2  ;;  %v14726_v33 = vrot.slane %v13311_v34, 5  ;;  %v6300_v12 = vrot.slane %v13693_v13, 3 }
 0x97d   : > { %v13703_v6 = vperm.slane %v14725_v30, 0  ;;  %9254 = vpow2.f32 %v8865_v42  ;;  %v6301_v1 = vrot.slane %v13693_v13, 4  ;;  %v6302_v53 = vrot.slane %v13693_v13, 5 }
 0x97e   : > { %v9245_v25 = vpop.eup %9244  ;;  %v13710_v49 = vperm.slane %v14726_v33, 0  ;;  %9256 = vpow2.f32 %v8866_v56  ;;  %v6303_v61 = vrot.slane %v13693_v13, 6  ;;  %v6304_v5 = vrot.slane %v13693_v13, 7 }
 0x97f   : > { %v9247_v24 = vpop.eup %9246  ;;  %v13718_v32 = vadd.f32 1.0, %v9245_v25  ;;  %v14727_v50 = vrot.slane %v13311_v34, 6  ;;  %9258 = vpow2.f32 %v8867_v2  ;;  %v6616_v28 = vperm.slane %v13693_v13, 0 }
 0x980   : > { %v9249_v27 = vpop.eup %9248  ;;  %v13730_v35 = vadd.f32 1.0, %v9247_v24  ;;  %v6617_v22 = vperm.slane %v6298_v19, 0  ;;  %v6618_v38 = vperm.slane %v6299_v8, 0 }
 0x981   : > { %v13728_v41 = vperm.slane %v14727_v50, 0  ;;  %v9251_v10 = vpop.eup %9250  ;;  %v13734_v14 = vadd.f32 1.0, %v9249_v27  ;;  %9260 = vrcp.f32 %v13718_v32 }
 0x982   : > { %9376 = shalt.err (!%p9373_p3)
}
 0x983   : > { %8894 = dma.vmem_to_hbm [thread:$0]  (%p9546_p5), %s8425_s17, 64, %s8427_s25, %s8409_s29   ;;  %v9253_v9 = vpop.eup %9252  ;;  %v13749_v37 = vadd.f32 1.0, %v9251_v10  ;;  %9262 = vrcp.f32 %v13730_v35  ;;  %v6619_v4 = vperm.slane %v6300_v12, 0  ;;  %v13752_v62 = vperm.slane %v6301_v1, 0  ;;  %vm14728_vm1 = vmmov %vm14718_vm0 }
 0x984   : > { %v9255_v26 = vpop.eup %9254  ;;  %v13754_v48 = vadd.f32 1.0, %v9253_v9  ;;  %v13756_v47 = vperm.slane %v6302_v53, 0  ;;  %v13758_v3 = vperm.slane %v6303_v61, 0  ;;  %v13760_v57 = vperm.slane %v6304_v5, 0  ;;  %vm14729_vm10 = vmmov %vm14720_vm5 }
 0x985   : > { %v8302_v18 = vld.sshfl [vmem:[#allocation1 + $0x30] sm:$0xff pattern:$0x75316420]  ;;  %v7821_v59 = vand.u32 2147483647, %v13718_v32  ;;  %v7823_v0 = vand.u32 2147483648, %v13718_v32  ;;  %9264 = vrcp.f32 %v13734_v14  ;;  %v13767_v58 = vsel %vm14728_vm1, %v13283_v40, %v6616_v28  ;;  %v9257_v20 = vpop.eup %9256  ;;  %vm14730_vm4 = vmmov %vm14718_vm0 }
 0x986   : > { %8390 = vst.msk [vmem:[%s12711_s22 + $0x98] sm:$0xff] %vm14729_vm10, %v8302_v18  ;;  %v7836_v45 = vand.u32 2147483647, %v13730_v35  ;;  %v7838_v42 = vand.u32 2147483648, %v13730_v35  ;;  %v13775_v16 = vsel %vm14730_vm4, %v13289_v15, %v6617_v22  ;;  %vm14731_vm13 = vmmov %vm14718_vm0  ;;  %v9259_v52 = vpop.eup %9258  ;;  %v13781_v17 = vadd.f32 1.0, %v9255_v26 }
 0x987   : > { %v13779_v39 = vsel %vm14731_vm13, %v13294_v21, %v6618_v38  ;;  %vm7817_vm15 = vweird.f32 %v13718_v32  ;;  %9266 = vrcp.f32 %v13749_v37  ;;  %vm14732_vm12 = vmmov %vm14718_vm0  ;;  %v9261_v13 = vpop.eup %9260  ;;  %vm7832_vm7 = vweird.f32 %v13730_v35 }
 0x988   : > { %v13787_v40 = vsel %vm14732_vm12, %v13299_v54, %v6619_v4  ;;  %v7851_v15 = vand.u32 2147483647, %v13734_v14  ;;  %v7853_v51 = vand.u32 2147483648, %v13734_v14  ;;  %9268 = vrcp.f32 %v13754_v48 }
 0x989   : > { %v9263_v21 = vpop.eup %9262  ;;  %v13793_v56 = vadd.f32 1.0, %v9257_v20  ;;  %v7813_v31 = vmul.f32 %v9261_v13, %v13718_v32  ;;  %vm13796_vm0 = vcmp.eq.f32.partialorder %v7821_v59, 8.507059e+37  ;;  %v7824_v54 = vor.u32 1.1754944e-38, %v7823_v0 }
 0x98a   : > { %v7868_v2 = vand.u32 2147483648, %v13749_v37  ;;  %v7828_v30 = vmul.f32 %v9263_v21, %v13730_v35  ;;  %vm13802_vm6 = vcmp.eq.f32.partialorder %v7836_v45, 8.507059e+37  ;;  %v7839_v8 = vor.u32 1.1754944e-38, %v7838_v42 }
 0x98b   : > { %vm7847_vm14 = vweird.f32 %v13734_v14  ;;  %v7866_v25 = vand.u32 2147483647, %v13749_v37  ;;  %v9265_v33 = vpop.eup %9264  ;;  %v13808_v12 = vadd.f32 1.0, %v9259_v52  ;;  %v7814_v1 = vsub.f32 1.0, %v7813_v31 }
 0x98c   : > { %v7881_v53 = vand.u32 2147483647, %v13754_v48  ;;  %9270 = vrcp.f32 %v13781_v17  ;;  %vm7818_vm3 = vweird.f32 %v9261_v13  ;;  %v7829_v24 = vsub.f32 1.0, %v7828_v30 }
 0x98d   : > { %v7843_v61 = vmul.f32 %v9265_v33, %v13734_v14  ;;  %vm13813_vm5 = vcmp.eq.f32.partialorder %v7851_v15, 8.507059e+37  ;;  %v7854_v27 = vor.u32 1.1754944e-38, %v7853_v51  ;;  %vm7862_vm2 = vweird.f32 %v13749_v37  ;;  %v9267_v50 = vpop.eup %9266  ;;  %vm7819_vm4 = vmor %vm7817_vm15, %vm7818_vm3 }
 0x98e   : > { %v7815_v28 = vmul.f32 %v9261_v13, %v7814_v1  ;;  %vm7833_vm8 = vweird.f32 %v9263_v21  ;;  %v7869_v10 = vor.u32 1.1754944e-38, %v7868_v2  ;;  %v9269_v22 = vpop.eup %9268  ;;  %v7830_v38 = vmul.f32 %v9263_v21, %v7829_v24 }
 0x98f   : > { %v7844_v9 = vsub.f32 1.0, %v7843_v61  ;;  %v7858_v4 = vmul.f32 %v9267_v50, %v13749_v37  ;;  %vm13820_vm9 = vcmp.eq.f32.partialorder %v7866_v25, 8.507059e+37  ;;  %v7883_v18 = vand.u32 2147483648, %v13754_v48  ;;  %vm7834_vm13 = vmor %vm7832_vm7, %vm7833_vm8 }
 0x990   : > { %v7816_v59 = vadd.f32 %v9261_v13, %v7815_v28  ;;  %vm7848_vm1 = vweird.f32 %v9265_v33  ;;  %v7873_v0 = vmul.f32 %v9269_v22, %v13754_v48  ;;  %vm13826_vm10 = vcmp.eq.f32.partialorder %v7881_v53, 8.507059e+37 }
 0x991   : > { %v7831_v45 = vadd.f32 %v9263_v21, %v7830_v38  ;;  %v7845_v42 = vmul.f32 %v9265_v33, %v7844_v9  ;;  %v7859_v52 = vsub.f32 1.0, %v7858_v4  ;;  %v7896_v15 = vand.u32 2147483647, %v13781_v17  ;;  %vm7849_vm15 = vmor %vm7847_vm14, %vm7848_vm1 }
 0x992   : > { %v9271_v51 = vpop.eup %9270  ;;  %v7820_v31 = vsel %vm7819_vm4, %v9261_v13, %v7816_v59  ;;  %vm7863_vm12 = vweird.f32 %v9267_v50  ;;  %v7874_v2 = vsub.f32 1.0, %v7873_v0  ;;  %vm7892_vm11 = vweird.f32 %v13781_v17 }
 0x993   : > { %9272 = vrcp.f32 %v13793_v56  ;;  %v7825_v32 = vsel %vm13796_vm0, %v7824_v54, %v7820_v31  ;;  %v7835_v30 = vsel %vm7834_vm13, %v9263_v21, %v7831_v45  ;;  %v7846_v25 = vadd.f32 %v9265_v33, %v7845_v42  ;;  %vm7864_vm0 = vmor %vm7862_vm2, %vm7863_vm12 }
 0x994   : > { %v7860_v1 = vmul.f32 %v9267_v50, %v7859_v52  ;;  %v7840_v53 = vsel %vm13802_vm6, %v7839_v8, %v7835_v30  ;;  %v7875_v35 = vmul.f32 %v9269_v22, %v7874_v2  ;;  %vm7878_vm7 = vweird.f32 %v9269_v22  ;;  %8303 = vst [vmem:[#allocation1] ss:$2 sm:$0xff] %v7825_v32 }
 0x995   : > { %v7888_v13 = vmul.f32 %v9271_v51, %v13781_v17  ;;  %v7850_v24 = vsel %vm7849_vm15, %v9265_v33, %v7846_v25  ;;  %v7898_v23 = vand.u32 2147483648, %v13781_v17  ;;  %v7911_v21 = vand.u32 2147483647, %v13793_v56  ;;  %8304 = vst [vmem:[#allocation1 + $0x1] ss:$2 sm:$0xff] %v7840_v53 }
 0x996   : > { %v7861_v61 = vadd.f32 %v9267_v50, %v7860_v1  ;;  %v7855_v54 = vsel %vm13813_vm5, %v7854_v27, %v7850_v24  ;;  %v7876_v14 = vadd.f32 %v9269_v22, %v7875_v35  ;;  %v7913_v8 = vand.u32 2147483648, %v13793_v56 }
 0x997   : > { %v7889_v19 = vsub.f32 1.0, %v7888_v13  ;;  %vm14743_vm6 = vweird.f32 %v13754_v48  ;;  %v7884_v33 = vor.u32 1.1754944e-38, %v7883_v18  ;;  %vm13857_vm3 = vcmp.eq.f32.partialorder %v7896_v15, 8.507059e+37  ;;  %8305 = vst [vmem:[#allocation1 + $0x10] ss:$2 sm:$0xff] %v7855_v54 }
 0x998   : > { %v7865_v28 = vsel %vm7864_vm0, %v9267_v50, %v7861_v61  ;;  %vm7879_vm14 = vmor %vm14743_vm6, %vm7878_vm7  ;;  %9274 = vrcp.f32 %v13808_v12  ;;  %vm7893_vm5 = vweird.f32 %v9271_v51  ;;  %v7899_v48 = vor.u32 1.1754944e-38, %v7898_v23  ;;  %v14755_v23 = vld [vmem:[#allocation13_spill] sm:$0xff] }
 0x999   : > { %v9273_v5 = vpop.eup %9272  ;;  %v7870_v37 = vsel %vm13820_vm9, %v7869_v10, %v7865_v28  ;;  %v7880_v27 = vsel %vm7879_vm14, %v9269_v22, %v7876_v14  ;;  %v7890_v9 = vmul.f32 %v9271_v51, %v7889_v19  ;;  %vm7907_vm2 = vweird.f32 %v13793_v56  ;;  %vm7894_vm9 = vmor %vm7892_vm11, %vm7893_vm5 }
 0x99a   : > { %v7885_v50 = vsel %vm13826_vm10, %v7884_v33, %v7880_v27  ;;  %v7903_v4 = vmul.f32 %v9273_v5, %v13793_v56  ;;  %8306 = vst [vmem:[#allocation1 + $0x11] ss:$2 sm:$0xff] %v7870_v37  ;;  %vm7908_vm8 = vweird.f32 %v9273_v5  ;;  %vm13868_vm1 = vcmp.eq.f32.partialorder %v7911_v21, 8.507059e+37 }
 0x99b   : > { %v7891_v18 = vadd.f32 %v9271_v51, %v7890_v9  ;;  %v7914_v10 = vor.u32 1.1754944e-38, %v7913_v8  ;;  %8307 = vst [vmem:[#allocation1 + $0x20] ss:$2 sm:$0xff] %v7885_v50  ;;  %vm14748_vm10 = vcmask 1042432   ;;  %v6940_v52 = vadd.f32 %v13662_v44, %v13767_v58  ;;  %vm7909_vm7 = vmor %vm7907_vm2, %vm7908_vm8  ;;  %v14757_v8 = vld [vmem:[#allocation14_spill] sm:$0xff]  ;;  %v14764_v9 = vld [vmem:[#allocation16_spill] sm:$0xff] }
 0x99c   : > { %v7904_v22 = vsub.f32 1.0, %v7903_v4  ;;  %v6876_v26 = vsel %vm14748_vm10, %v13304_v63, %v13752_v62  ;;  %vm14749_vm4 = vmmov %vm14748_vm10  ;;  %v8311_v42 = vld.sshfl [vmem:[#allocation1] sm:$0xff pattern:$0x75316420]  ;;  %v6941_v63 = vadd.f32 %v13662_v44, %v13775_v16  ;;  %vm14752_vm11 = vcmask 23552  }
 0x99d   : > { %v6877_v0 = vsel %vm14749_vm4, %v13309_v11, %v13756_v47  ;;  %vm14750_vm13 = vmmov %vm14749_vm4  ;;  %v7895_v45 = vsel %vm7894_vm9, %v9271_v51, %v7891_v18  ;;  %8391 = vst.msk [vmem:[%s12711_s22 + $0xa0] sm:$0xff] %vm14752_vm11, %v8311_v42  ;;  %v7928_v58 = vand.u32 2147483648, %v13808_v12  ;;  %v6944_v16 = vadd.f32 %v13662_v44, %v6876_v26 }
 0x99e   : > { %v6878_v20 = vsel %vm14750_vm13, %v13315_v7, %v13758_v3  ;;  %vm14751_vm12 = vmmov %vm14749_vm4  ;;  %v9275_v62 = vpop.eup %9274  ;;  %v7900_v11 = vsel %vm13857_vm3, %v7899_v48, %v7895_v45  ;;  %v7905_v47 = vmul.f32 %v9273_v5, %v7904_v22  ;;  %v6942_v7 = vadd.f32 %v13662_v44, %v13779_v39  ;;  %v14766_v48 = vld [vmem:[#allocation17_spill] sm:$0xff] }
 0x99f   : > { %v6879_v17 = vsel %vm14751_vm12, %v13319_v55, %v13760_v57  ;;  %v6943_v3 = vadd.f32 %v13662_v44, %v13787_v40  ;;  %v7918_v55 = vmul.f32 %v9275_v62, %v13808_v12  ;;  %v7926_v57 = vand.u32 2147483647, %v13808_v12  ;;  %8308 = vst [vmem:[#allocation1 + $0x21] ss:$2 sm:$0xff] %v7900_v11  ;;  %vm14753_vm0 = vmmov %vm14752_vm11 }
 0x9a0   : > { %v7906_v15 = vadd.f32 %v9273_v5, %v7905_v47  ;;  %vm7923_vm15 = vweird.f32 %v9275_v62  ;;  %v6945_v51 = vadd.f32 %v13662_v44, %v6877_v0  ;;  %v8868_v31 = vmul.f32 -1.442695, %v6940_v52  ;;  %v14771_v0 = vld [vmem:[#allocation19_spill] sm:$0xff] }
 0x9a1   : > { %v7919_v39 = vsub.f32 1.0, %v7918_v55  ;;  %v8312_v40 = vld.sshfl [vmem:[#allocation1 + $0x10] sm:$0xff pattern:$0x75316420]  ;;  %v6946_v2 = vadd.f32 %v13662_v44, %v6878_v20  ;;  %v6947_v32 = vadd.f32 %v13662_v44, %v6879_v17  ;;  %v8869_v30 = vmul.f32 -1.442695, %v6941_v63 }
 0x9a2   : > { %v7910_v25 = vsel %vm7909_vm7, %v9273_v5, %v7906_v15  ;;  %8392 = vst.msk [vmem:[%s12711_s22 + $0xa8] sm:$0xff] %vm14753_vm0, %v8312_v40  ;;  %9276 = vpow2.f32 %v8868_v31  ;;  %v8870_v1 = vmul.f32 -1.442695, %v6942_v7  ;;  %v8871_v53 = vmul.f32 -1.442695, %v6943_v3  ;;  %v13931_v5 = vpop.f32.mrf.mxu3 }
 0x9a3   : > { %v7915_v35 = vsel %vm13868_vm1, %v7914_v10, %v7910_v25  ;;  %v7920_v13 = vmul.f32 %v9275_v62, %v7919_v39  ;;  %9278 = vpow2.f32 %v8869_v30  ;;  %v8872_v56 = vmul.f32 -1.442695, %v6944_v16  ;;  %vm14763_vm1 = vmmov %vm14753_vm0  ;;  %v14769_v10 = vld [vmem:[#allocation18_spill] sm:$0xff] }
 0x9a4   : > { %v14754_v24 = vrot.slane %v13311_v34, 7  ;;  %vm14756_vm6 = vcmask 1041408   ;;  %8309 = vst [vmem:[#allocation1 + $0x30] ss:$2 sm:$0xff] %v7915_v35  ;;  %9280 = vpow2.f32 %v8870_v1  ;;  %v8873_v54 = vmul.f32 -1.442695, %v6945_v51 }
 0x9a5   : > { %v13918_v21 = vsel %vm14756_vm6, %v14755_v23, %v6496_v43  ;;  %v7921_v14 = vadd.f32 %v9275_v62, %v7920_v13  ;;  %vm7922_vm14 = vweird.f32 %v13808_v12  ;;  %9282 = vpow2.f32 %v8871_v53  ;;  %vm14758_vm3 = vmmov %vm14756_vm6  ;;  %v14761_v12 = vld [vmem:[#allocation15_spill] sm:$0xff] }
 0x9a6   : > { %v6503_v61 = vperm.slane %v14754_v24, 0  ;;  %v8874_v19 = vmul.f32 -1.442695, %v6946_v2  ;;  %v13924_v28 = vsel %vm14758_vm3, %v14757_v8, %v13686_v36  ;;  %vm13927_vm5 = vmor %vm7922_vm14, %vm7923_vm15  ;;  %v7929_v43 = vor.u32 1.1754944e-38, %v7928_v58 }
 0x9a7   : > { %v8313_v33 = vld.sshfl [vmem:[#allocation1 + $0x20] sm:$0xff pattern:$0x75316420]  ;;  %9284 = vpow2.f32 %v8872_v56  ;;  %v8875_v38 = vmul.f32 -1.442695, %v6947_v32  ;;  %vm14762_vm2 = vmmov %vm14758_vm3  ;;  %v7925_v36 = vsel %vm13927_vm5, %v9275_v62, %v7921_v14  ;;  %vm7927_vm8 = vcmp.eq.f32.partialorder %v7926_v57, 8.507059e+37 }
 0x9a8   : > { %v13936_v37 = vsel %vm14762_vm2, %v14761_v12, %v13690_v46  ;;  %8393 = vst.msk [vmem:[%s12711_s22 + $0xb0] sm:$0xff] %vm14763_vm1, %v8313_v33  ;;  %9286 = vpow2.f32 %v8873_v54  ;;  %v9277_v27 = vpop.eup %9276  ;;  %vm14765_vm9 = vmmov %vm14762_vm2  ;;  %v7930_v18 = vsel %vm7927_vm8, %v7929_v43, %v7925_v36  ;;  %v6305_v26 = vrot.slane %v13931_v5, 1 }
 0x9a9   : > { %v13945_v50 = vsel %vm14765_vm9, %v14764_v9, %v13699_v60  ;;  %vm14767_vm10 = vmmov %vm14762_vm2  ;;  %v9279_v59 = vpop.eup %9278  ;;  %8310 = vst [vmem:[#allocation1 + $0x31] ss:$2 sm:$0xff] %v7930_v18  ;;  %9288 = vpow2.f32 %v8874_v19  ;;  %v13962_v60 = vadd.f32 1.0, %v9277_v27  ;;  %v6308_v17 = vrot.slane %v13931_v5, 4 }
 0x9aa   : > { %v13950_v4 = vsel %vm14767_vm10, %v14766_v48, %v13703_v6  ;;  %vm14768_vm4 = vmmov %vm14762_vm2  ;;  %v9281_v6 = vpop.eup %9280  ;;  %9290 = vpow2.f32 %v8875_v38  ;;  %v6309_v62 = vrot.slane %v13931_v5, 5  ;;  %v6310_v11 = vrot.slane %v13931_v5, 6 }
 0x9ab   : > { %v13955_v46 = vsel %vm14768_vm4, %v13058_v29, %v13710_v49  ;;  %vm14770_vm13 = vmmov %vm14762_vm2  ;;  %v13969_v29 = vadd.f32 1.0, %v9279_v59  ;;  %v6306_v49 = vrot.slane %v13931_v5, 2  ;;  %v9283_v45 = vpop.eup %9282  ;;  %v13972_v42 = vadd.f32 1.0, %v9281_v6 }
 0x9ac   : > { %v13960_v22 = vsel %vm14770_vm13, %v14769_v10, %v13728_v41  ;;  %vm14772_vm12 = vmmov %vm14762_vm2  ;;  %9292 = vrcp.f32 %v13962_v60  ;;  %v6307_v41 = vrot.slane %v13931_v5, 3  ;;  %v13977_v63 = vadd.f32 1.0, %v9283_v45 }
 0x9ad   : > { %v13967_v20 = vsel %vm14772_vm12, %v14771_v0, %v6503_v61  ;;  %v9285_v52 = vpop.eup %9284  ;;  %9294 = vrcp.f32 %v13969_v29  ;;  %v6311_v3 = vrot.slane %v13931_v5, 7  ;;  %v6624_v55 = vperm.slane %v13931_v5, 0  ;;  %vm14773_vm15 = vmmov %vm14753_vm0 }
 0x9ae   : > { %v9287_v47 = vpop.eup %9286  ;;  %v13982_v7 = vadd.f32 1.0, %v9285_v52  ;;  %v13986_v57 = vperm.slane %v6305_v26, 0  ;;  %v7941_v58 = vand.u32 2147483647, %v13962_v60  ;;  %v7943_v16 = vand.u32 2147483648, %v13962_v60 }
 0x9af   : > { %9296 = vrcp.f32 %v13972_v42  ;;  %v13991_v15 = vperm.slane %v6306_v49, 0  ;;  %v9289_v51 = vpop.eup %9288  ;;  %v7956_v31 = vand.u32 2147483647, %v13969_v29  ;;  %v7958_v39 = vand.u32 2147483648, %v13969_v29 }
 0x9b0   : > { %v13995_v40 = vperm.slane %v6307_v41, 0  ;;  %v13997_v2 = vperm.slane %v6308_v17, 0  ;;  %v9291_v32 = vpop.eup %9290  ;;  %v8314_v30 = vld.sshfl [vmem:[#allocation1 + $0x30] sm:$0xff pattern:$0x75316420]  ;;  %v13999_v25 = vadd.f32 1.0, %v9287_v47  ;;  %vm7937_vm11 = vweird.f32 %v13962_v60 }
 0x9b1   : > { %9298 = vrcp.f32 %v13977_v63  ;;  %v14003_v1 = vperm.slane %v6309_v62, 0  ;;  %8394 = vst.msk [vmem:[%s12711_s22 + $0xb8] sm:$0xff] %vm14773_vm15, %v8314_v30  ;;  %vm7952_vm7 = vweird.f32 %v13969_v29  ;;  %v7971_v35 = vand.u32 2147483647, %v13972_v42 }
 0x9b2   : > { %v9293_v53 = vpop.eup %9292  ;;  %v7973_v13 = vand.u32 2147483648, %v13972_v42  ;;  %9300 = vrcp.f32 %v13982_v7  ;;  %v14011_v24 = vadd.f32 1.0, %v9289_v51  ;;  %vm14014_vm0 = vcmp.eq.f32.partialorder %v7941_v58, 8.507059e+37 }
 0x9b3   : > { %v9295_v56 = vpop.eup %9294  ;;  %v7933_v61 = vmul.f32 %v9293_v53, %v13962_v60  ;;  %v7944_v54 = vor.u32 1.1754944e-38, %v7943_v16  ;;  %v7988_v14 = vand.u32 2147483648, %v13977_v63  ;;  %v14019_v19 = vadd.f32 1.0, %v9291_v32 }
 0x9b4   : > { %v7948_v8 = vmul.f32 %v9295_v56, %v13969_v29  ;;  %vm14022_vm6 = vcmp.eq.f32.partialorder %v7956_v31, 8.507059e+37  ;;  %v7959_v43 = vor.u32 1.1754944e-38, %v7958_v39  ;;  %vm7967_vm14 = vweird.f32 %v13972_v42 }
 0x9b5   : > { %v7986_v33 = vand.u32 2147483647, %v13977_v63  ;;  %v9297_v38 = vpop.eup %9296  ;;  %v7934_v12 = vsub.f32 1.0, %v7933_v61  ;;  %v8001_v36 = vand.u32 2147483647, %v13982_v7  ;;  %v8003_v27 = vand.u32 2147483648, %v13982_v7 }
 0x9b6   : > { %9302 = vrcp.f32 %v13999_v25  ;;  %vm7938_vm3 = vweird.f32 %v9293_v53  ;;  %v7949_v9 = vsub.f32 1.0, %v7948_v8  ;;  %v7963_v48 = vmul.f32 %v9297_v38, %v13972_v42 }
 0x9b7   : > { %vm14032_vm5 = vcmp.eq.f32.partialorder %v7971_v35, 8.507059e+37  ;;  %v7974_v59 = vor.u32 1.1754944e-38, %v7973_v13  ;;  %vm7982_vm2 = vweird.f32 %v13977_v63  ;;  %v9299_v10 = vpop.eup %9298  ;;  %v7935_v26 = vmul.f32 %v9293_v53, %v7934_v12  ;;  %vm7939_vm13 = vmor %vm7937_vm11, %vm7938_vm3 }
 0x9b8   : > { %vm7953_vm8 = vweird.f32 %v9295_v56  ;;  %v7989_v6 = vor.u32 1.1754944e-38, %v7988_v14  ;;  %v9301_v0 = vpop.eup %9300  ;;  %v7950_v49 = vmul.f32 %v9295_v56, %v7949_v9  ;;  %v7964_v45 = vsub.f32 1.0, %v7963_v48 }
 0x9b9   : > { %vm7968_vm9 = vweird.f32 %v9297_v38  ;;  %v7978_v41 = vmul.f32 %v9299_v10, %v13977_v63  ;;  %vm14039_vm10 = vcmp.eq.f32.partialorder %v7986_v33, 8.507059e+37  ;;  %v7936_v52 = vadd.f32 %v9293_v53, %v7935_v26  ;;  %vm7954_vm12 = vmor %vm7952_vm7, %vm7953_vm8 }
 0x9ba   : > { %v7993_v62 = vmul.f32 %v9301_v0, %v13982_v7  ;;  %vm14044_vm4 = vcmp.eq.f32.partialorder %v8001_v36, 8.507059e+37  ;;  %v8004_v58 = vor.u32 1.1754944e-38, %v8003_v27  ;;  %v7951_v16 = vadd.f32 %v9295_v56, %v7950_v49  ;;  %vm7969_vm11 = vmor %vm7967_vm14, %vm7968_vm9 }
 0x9bb   : > { %v7965_v51 = vmul.f32 %v9297_v38, %v7964_v45  ;;  %v7979_v31 = vsub.f32 1.0, %v7978_v41  ;;  %v8016_v39 = vand.u32 2147483647, %v13999_v25  ;;  %v7940_v30 = vsel %vm7939_vm13, %v9293_v53, %v7936_v52 }
 0x9bc   : > { %v9303_v32 = vpop.eup %9302  ;;  %vm7983_vm15 = vweird.f32 %v9299_v10  ;;  %v7994_v35 = vsub.f32 1.0, %v7993_v62  ;;  %vm8012_vm1 = vweird.f32 %v13999_v25  ;;  %9304 = vrcp.f32 %v14011_v24 }
 0x9bd   : > { %v7945_v60 = vsel %vm14014_vm0, %v7944_v54, %v7940_v30  ;;  %v7955_v13 = vsel %vm7954_vm12, %v9295_v56, %v7951_v16  ;;  %v7966_v61 = vadd.f32 %v9297_v38, %v7965_v51  ;;  %v7980_v14 = vmul.f32 %v9299_v10, %v7979_v31  ;;  %vm7984_vm0 = vmor %vm7982_vm2, %vm7983_vm15 }
 0x9be   : > { %v7960_v8 = vsel %vm14022_vm6, %v7959_v43, %v7955_v13  ;;  %v7995_v29 = vmul.f32 %v9301_v0, %v7994_v35  ;;  %vm7998_vm7 = vweird.f32 %v9301_v0  ;;  %v8008_v53 = vmul.f32 %v9303_v32, %v13999_v25  ;;  %8315 = vst [vmem:[#allocation1] ss:$2 sm:$0xff] %v7945_v60 }
 0x9bf   : > { %v7970_v33 = vsel %vm7969_vm11, %v9297_v38, %v7966_v61  ;;  %v7981_v12 = vadd.f32 %v9299_v10, %v7980_v14  ;;  %v8018_v23 = vand.u32 2147483648, %v13999_v25  ;;  %v8031_v56 = vand.u32 2147483647, %v14011_v24  ;;  %8316 = vst [vmem:[#allocation1 + $0x1] ss:$2 sm:$0xff] %v7960_v8 }
 0x9c0   : > { %v7975_v54 = vsel %vm14032_vm5, %v7974_v59, %v7970_v33  ;;  %v7996_v42 = vadd.f32 %v9301_v0, %v7995_v29  ;;  %v8009_v34 = vsub.f32 1.0, %v8008_v53  ;;  %v8033_v43 = vand.u32 2147483648, %v14011_v24 }
 0x9c1   : > { %v7985_v36 = vsel %vm7984_vm0, %v9299_v10, %v7981_v12  ;;  %vm14784_vm6 = vweird.f32 %v13982_v7  ;;  %vm14075_vm3 = vcmp.eq.f32.partialorder %v8016_v39, 8.507059e+37  ;;  %vm8027_vm8 = vweird.f32 %v14011_v24  ;;  %8317 = vst [vmem:[#allocation1 + $0x10] ss:$2 sm:$0xff] %v7975_v54 }
 0x9c2   : > { %vm7999_vm14 = vmor %vm14784_vm6, %vm7998_vm7  ;;  %9306 = vrcp.f32 %v14019_v19  ;;  %v9305_v27 = vpop.eup %9304  ;;  %v7990_v63 = vsel %vm14039_vm10, %v7989_v6, %v7985_v36  ;;  %v8010_v48 = vmul.f32 %v9303_v32, %v8009_v34  ;;  %vm8013_vm5 = vweird.f32 %v9303_v32 }
 0x9c3   : > { %v8000_v9 = vsel %vm7999_vm14, %v9301_v0, %v7996_v42  ;;  %v8019_v18 = vor.u32 1.1754944e-38, %v8018_v23  ;;  %v8023_v59 = vmul.f32 %v9305_v27, %v14011_v24  ;;  %vm14086_vm2 = vcmp.eq.f32.partialorder %v8031_v56, 8.507059e+37  ;;  %8318 = vst [vmem:[#allocation1 + $0x11] ss:$2 sm:$0xff] %v7990_v63  ;;  %vm8014_vm9 = vmor %vm8012_vm1, %vm8013_vm5 }
 0x9c4   : > { %v8005_v7 = vsel %vm14044_vm4, %v8004_v58, %v8000_v9  ;;  %v8011_v26 = vadd.f32 %v9303_v32, %v8010_v48  ;;  %v8034_v49 = vor.u32 1.1754944e-38, %v8033_v43  ;;  %v6630_v6 = vperm.slane %v6310_v11, 0 }
 0x9c5   : > { %8319 = vst [vmem:[#allocation1 + $0x20] ss:$2 sm:$0xff] %v8005_v7  ;;  %v6631_v0 = vperm.slane %v6311_v3, 0  ;;  %v8024_v45 = vsub.f32 1.0, %v8023_v59  ;;  %vm8028_vm10 = vweird.f32 %v9305_v27  ;;  %v8046_v41 = vand.u32 2147483647, %v14019_v19 }
 0x9c6   : > { %vm14789_vm4 = vcmask 1042432   ;;  %v8015_v52 = vsel %vm8014_vm9, %v9303_v32, %v8011_v26  ;;  %v8323_v62 = vld.sshfl [vmem:[#allocation1] sm:$0xff pattern:$0x75316420]  ;;  %vm14793_vm15 = vcmask 23552   ;;  %vm8029_vm14 = vmor %vm8027_vm8, %vm8028_vm10  ;;  %vm8042_vm8 = vweird.f32 %v14019_v19 }
 0x9c7   : > { %v6880_v17 = vsel %vm14789_vm4, %v13918_v21, %v6624_v55  ;;  %vm14790_vm13 = vmmov %vm14789_vm4  ;;  %v8020_v5 = vsel %vm14075_vm3, %v8019_v18, %v8015_v52  ;;  %v8025_v58 = vmul.f32 %v9305_v27, %v8024_v45  ;;  %8395 = vst.msk [vmem:[%s12711_s22 + $0xc0] sm:$0xff] %vm14793_vm15, %v8323_v62  ;;  %v8048_v55 = vand.u32 2147483648, %v14019_v19 }
 0x9c8   : > { %v6881_v11 = vsel %vm14790_vm13, %v13924_v28, %v13986_v57  ;;  %vm14791_vm12 = vmmov %vm14789_vm4  ;;  %v9307_v47 = vpop.eup %9306  ;;  %8320 = vst [vmem:[#allocation1 + $0x21] ss:$2 sm:$0xff] %v8020_v5 }
 0x9c9   : > { %v6882_v3 = vsel %vm14791_vm12, %v13936_v37, %v13991_v15  ;;  %vm14792_vm1 = vmmov %vm14789_vm4  ;;  %v8038_v37 = vmul.f32 %v9307_v47, %v14019_v19  ;;  %v8026_v15 = vadd.f32 %v9305_v27, %v8025_v58  ;;  %vm8043_vm3 = vweird.f32 %v9307_v47 }
 0x9ca   : > { %v6883_v25 = vsel %vm14792_vm1, %v13945_v50, %v13995_v40  ;;  %vm14794_vm11 = vmmov %vm14792_vm1  ;;  %v6948_v40 = vadd.f32 %v13662_v44, %v6880_v17  ;;  %v8049_v29 = vor.u32 1.1754944e-38, %v8048_v55 }
 0x9cb   : > { %v6884_v21 = vsel %vm14794_vm11, %v13950_v4, %v13997_v2  ;;  %vm14795_vm7 = vmmov %vm14792_vm1  ;;  %v6949_v4 = vadd.f32 %v13662_v44, %v6881_v11  ;;  %v6950_v2 = vadd.f32 %v13662_v44, %v6882_v3  ;;  %v6951_v16 = vadd.f32 %v13662_v44, %v6883_v25 }
 0x9cc   : > { %v6885_v28 = vsel %vm14795_vm7, %v13955_v46, %v14003_v1  ;;  %vm14796_vm0 = vmmov %vm14792_vm1  ;;  %v8039_v46 = vsub.f32 1.0, %v8038_v37  ;;  %v8324_v1 = vld.sshfl [vmem:[#allocation1 + $0x10] sm:$0xff pattern:$0x75316420]  ;;  %v8876_v39 = vmul.f32 -1.442695, %v6948_v40 }
 0x9cd   : > { %v6886_v50 = vsel %vm14796_vm0, %v13960_v22, %v6630_v6  ;;  %vm14797_vm6 = vmmov %vm14796_vm0  ;;  %v6952_v22 = vadd.f32 %v13662_v44, %v6884_v21  ;;  %v6953_v51 = vadd.f32 %v13662_v44, %v6885_v28  ;;  %v8877_v30 = vmul.f32 -1.442695, %v6949_v4 }
 0x9ce   : > { %v6887_v57 = vsel %vm14797_vm6, %v13967_v20, %v6631_v0  ;;  %v8030_v20 = vsel %vm8029_vm14, %v9305_v27, %v8026_v15  ;;  %vm14798_vm5 = vmmov %vm14793_vm15  ;;  %v6954_v31 = vadd.f32 %v13662_v44, %v6886_v50  ;;  %v8040_v24 = vmul.f32 %v9307_v47, %v8039_v46 }
 0x9cf   : > { %8396 = vst.msk [vmem:[%s12711_s22 + $0xc8] sm:$0xff] %vm14798_vm5, %v8324_v1  ;;  %v8035_v32 = vsel %vm14086_vm2, %v8034_v49, %v8030_v20  ;;  %v8878_v35 = vmul.f32 -1.442695, %v6950_v2  ;;  %v6955_v60 = vadd.f32 %v13662_v44, %v6887_v57  ;;  %9308 = vpow2.f32 %v8876_v39  ;;  %vm8044_vm9 = vmor %vm8042_vm8, %vm8043_vm3  ;;  %v8325_v53 = vld.sshfl [vmem:[#allocation1 + $0x20] sm:$0xff pattern:$0x75316420] }
 0x9d0   : > { %8321 = vst [vmem:[#allocation1 + $0x30] ss:$2 sm:$0xff] %v8035_v32  ;;  %v8879_v13 = vmul.f32 -1.442695, %v6951_v16  ;;  %v8880_v61 = vmul.f32 -1.442695, %v6952_v22  ;;  %v8041_v14 = vadd.f32 %v9307_v47, %v8040_v24  ;;  %9310 = vpow2.f32 %v8877_v30  ;;  %vm14799_vm10 = vmmov %vm14798_vm5 }
 0x9d1   : > { %v8881_v8 = vmul.f32 -1.442695, %v6953_v51  ;;  %9312 = vpow2.f32 %v8878_v35  ;;  %vm8047_vm2 = vcmp.eq.f32.partialorder %v8046_v41, 8.507059e+37  ;;  %8397 = vst.msk [vmem:[%s12711_s22 + $0xd0] sm:$0xff] %vm14799_vm10, %v8325_v53  ;;  %v8882_v12 = vmul.f32 -1.442695, %v6954_v31  ;;  %vm14800_vm4 = vmmov %vm14798_vm5 }
 0x9d2   : > { %v8045_v33 = vsel %vm8044_vm9, %v9307_v47, %v8041_v14  ;;  %9314 = vpow2.f32 %v8879_v13  ;;  %v8883_v23 = vmul.f32 -1.442695, %v6955_v60 }
 0x9d3   : > { %v8050_v44 = vsel %vm8047_vm2, %v8049_v29, %v8045_v33  ;;  %9316 = vpow2.f32 %v8880_v61 }
 0x9d4   : > { %8322 = vst [vmem:[#allocation1 + $0x31] ss:$2 sm:$0xff] %v8050_v44  ;;  %9318 = vpow2.f32 %v8881_v8 }
 0x9d5   : > { %v9309_v56 = vpop.eup %9308  ;;  %9320 = vpow2.f32 %v8882_v12 }
 0x9d6   : > { %v9311_v19 = vpop.eup %9310  ;;  %v14145_v54 = vadd.f32 1.0, %v9309_v56  ;;  %9322 = vpow2.f32 %v8883_v23 }
 0x9d7   : > { %v9313_v42 = vpop.eup %9312  ;;  %v14147_v34 = vadd.f32 1.0, %v9311_v19 }
 0x9d8   : > { %v9315_v43 = vpop.eup %9314  ;;  %v14149_v36 = vadd.f32 1.0, %v9313_v42  ;;  %9324 = vrcp.f32 %v14145_v54  ;;  %v8061_v7 = vand.u32 2147483647, %v14145_v54  ;;  %v8063_v18 = vand.u32 2147483648, %v14145_v54 }
 0x9d9   : > { %v9317_v38 = vpop.eup %9316  ;;  %v14152_v27 = vadd.f32 1.0, %v9315_v43  ;;  %9326 = vrcp.f32 %v14147_v34  ;;  %v8076_v10 = vand.u32 2147483647, %v14147_v34  ;;  %v8078_v6 = vand.u32 2147483648, %v14147_v34 }
 0x9da   : > { %v9319_v63 = vpop.eup %9318  ;;  %v14155_v9 = vadd.f32 1.0, %v9317_v38  ;;  %9328 = vrcp.f32 %v14149_v36  ;;  %vm8057_vm13 = vweird.f32 %v14145_v54  ;;  %vm8072_vm12 = vweird.f32 %v14147_v34 }
 0x9db   : > { %v8326_v48 = vld.sshfl [vmem:[#allocation1 + $0x30] sm:$0xff pattern:$0x75316420]  ;;  %v9321_v59 = vpop.eup %9320  ;;  %v14163_v49 = vadd.f32 1.0, %v9319_v63  ;;  %9330 = vrcp.f32 %v14152_v27  ;;  %v8091_v45 = vand.u32 2147483647, %v14149_v36  ;;  %vm8087_vm11 = vweird.f32 %v14149_v36 }
 0x9dc   : > { %8398 = vst.msk [vmem:[%s12711_s22 + $0xd8] sm:$0xff] %vm14800_vm4, %v8326_v48  ;;  %v9323_v26 = vpop.eup %9322  ;;  %9332 = vrcp.f32 %v14155_v9  ;;  %vm14172_vm1 = vcmp.eq.f32.partialorder %v8061_v7, 8.507059e+37  ;;  %v8064_v62 = vor.u32 1.1754944e-38, %v8063_v18  ;;  %v8093_v11 = vand.u32 2147483648, %v14149_v36 }
 0x9dd   : > { %v14177_v3 = vadd.f32 1.0, %v9321_v59  ;;  %vm14180_vm15 = vcmp.eq.f32.partialorder %v8076_v10, 8.507059e+37  ;;  %v8106_v5 = vand.u32 2147483647, %v14152_v27  ;;  %v14186_v21 = vadd.f32 1.0, %v9323_v26 }
 0x9de   : > { %v9325_v0 = vpop.eup %9324  ;;  %v8079_v37 = vor.u32 1.1754944e-38, %v8078_v6  ;;  %9334 = vrcp.f32 %v14163_v49  ;;  %vm14190_vm0 = vcmp.eq.f32.partialorder %v8091_v45, 8.507059e+37  ;;  %vm8102_vm6 = vweird.f32 %v14152_v27 }
 0x9df   : > { %v9327_v41 = vpop.eup %9326  ;;  %v8053_v17 = vmul.f32 %v9325_v0, %v14145_v54  ;;  %vm8058_vm7 = vweird.f32 %v9325_v0  ;;  %v8108_v15 = vand.u32 2147483648, %v14152_v27  ;;  %v8094_v2 = vor.u32 1.1754944e-38, %v8093_v11 }
 0x9e0   : > { %v8068_v25 = vmul.f32 %v9327_v41, %v14147_v34  ;;  %v9329_v58 = vpop.eup %9328  ;;  %vm8073_vm14 = vweird.f32 %v9327_v41  ;;  %vm8117_vm3 = vweird.f32 %v14155_v9  ;;  %vm14198_vm5 = vcmp.eq.f32.partialorder %v8106_v5, 8.507059e+37  ;;  %vm8059_vm8 = vmor %vm8057_vm13, %vm8058_vm7 }
 0x9e1   : > { %v8054_v28 = vsub.f32 1.0, %v8053_v17  ;;  %v8083_v50 = vmul.f32 %v9329_v58, %v14149_v36  ;;  %v9331_v40 = vpop.eup %9330  ;;  %v8121_v39 = vand.u32 2147483647, %v14155_v9  ;;  %v8123_v32 = vand.u32 2147483648, %v14155_v9  ;;  %vm8074_vm2 = vmor %vm8072_vm12, %vm8073_vm14 }
 0x9e2   : > { %v8069_v55 = vsub.f32 1.0, %v8068_v25  ;;  %v9333_v46 = vpop.eup %9332  ;;  %v8098_v22 = vmul.f32 %v9331_v40, %v14152_v27  ;;  %vm8088_vm9 = vweird.f32 %v9329_v58  ;;  %vm8103_vm10 = vweird.f32 %v9331_v40 }
 0x9e3   : > { %v8055_v4 = vmul.f32 %v9325_v0, %v8054_v28  ;;  %v8084_v16 = vsub.f32 1.0, %v8083_v50  ;;  %v8113_v31 = vmul.f32 %v9333_v46, %v14155_v9  ;;  %9336 = vrcp.f32 %v14177_v3  ;;  %vm8089_vm4 = vmor %vm8087_vm11, %vm8088_vm9 }
 0x9e4   : > { %v8070_v1 = vmul.f32 %v9327_v41, %v8069_v55  ;;  %v8099_v35 = vsub.f32 1.0, %v8098_v22  ;;  %v9335_v60 = vpop.eup %9334  ;;  %vm8118_vm13 = vweird.f32 %v9333_v46  ;;  %v8109_v19 = vor.u32 1.1754944e-38, %v8108_v15 }
 0x9e5   : > { %v8056_v20 = vadd.f32 %v9325_v0, %v8055_v4  ;;  %v8085_v30 = vmul.f32 %v9329_v58, %v8084_v16  ;;  %v8114_v61 = vsub.f32 1.0, %v8113_v31  ;;  %v8128_v44 = vmul.f32 %v9335_v60, %v14163_v49 }
 0x9e6   : > { %v8071_v24 = vadd.f32 %v9327_v41, %v8070_v1  ;;  %v8100_v53 = vmul.f32 %v9331_v40, %v8099_v35  ;;  %vm14219_vm12 = vcmp.eq.f32.partialorder %v8121_v39, 8.507059e+37  ;;  %v8124_v43 = vor.u32 1.1754944e-38, %v8123_v32 }
 0x9e7   : > { %v8060_v13 = vsel %vm8059_vm8, %v9325_v0, %v8056_v20  ;;  %v8086_v29 = vadd.f32 %v9329_v58, %v8085_v30  ;;  %v8115_v12 = vmul.f32 %v9333_v46, %v8114_v61  ;;  %v8129_v36 = vsub.f32 1.0, %v8128_v44 }
 0x9e8   : > { %v8065_v14 = vsel %vm14172_vm1, %v8064_v62, %v8060_v13  ;;  %v8075_v8 = vsel %vm8074_vm2, %v9327_v41, %v8071_v24  ;;  %v8101_v56 = vadd.f32 %v9331_v40, %v8100_v53  ;;  %vm8104_vm1 = vmor %vm8102_vm6, %vm8103_vm10  ;;  %v8136_v63 = vand.u32 2147483647, %v14163_v49 }
 0x9e9   : > { %v8080_v33 = vsel %vm14180_vm15, %v8079_v37, %v8075_v8  ;;  %8327 = vst [vmem:[#allocation1] ss:$2 sm:$0xff] %v8065_v14  ;;  %v8090_v23 = vsel %vm8089_vm4, %v9329_v58, %v8086_v29  ;;  %v8116_v34 = vadd.f32 %v9333_v46, %v8115_v12  ;;  %vm8119_vm15 = vmor %vm8117_vm3, %vm8118_vm13  ;;  %v8138_v48 = vand.u32 2147483648, %v14163_v49  ;;  %v9337_v7 = vpop.eup %9336 }
 0x9ea   : > { %8328 = vst [vmem:[#allocation1 + $0x1] ss:$2 sm:$0xff] %v8080_v33  ;;  %v8095_v42 = vsel %vm14190_vm0, %v8094_v2, %v8090_v23  ;;  %v8105_v38 = vsel %vm8104_vm1, %v9331_v40, %v8101_v56  ;;  %9338 = vrcp.f32 %v14186_v21  ;;  %v8130_v59 = vmul.f32 %v9335_v60, %v8129_v36 }
 0x9eb   : > { %8329 = vst [vmem:[#allocation1 + $0x10] ss:$2 sm:$0xff] %v8095_v42  ;;  %v8110_v18 = vsel %vm14198_vm5, %v8109_v19, %v8105_v38  ;;  %v8120_v27 = vsel %vm8119_vm15, %v9333_v46, %v8116_v34  ;;  %vm8133_vm11 = vweird.f32 %v9335_v60  ;;  %v8143_v9 = vmul.f32 %v9337_v7, %v14177_v3 }
 0x9ec   : > { %v8125_v10 = vsel %vm14219_vm12, %v8124_v43, %v8120_v27  ;;  %8330 = vst [vmem:[#allocation1 + $0x11] ss:$2 sm:$0xff] %v8110_v18  ;;  %v8131_v26 = vadd.f32 %v9335_v60, %v8130_v59  ;;  %vm8132_vm7 = vweird.f32 %v14163_v49  ;;  %v8139_v6 = vor.u32 1.1754944e-38, %v8138_v48 }
 0x9ed   : > { %8331 = vst [vmem:[#allocation1 + $0x20] ss:$2 sm:$0xff] %v8125_v10  ;;  %vm8134_vm0 = vmor %vm8132_vm7, %vm8133_vm11  ;;  %v8144_v0 = vsub.f32 1.0, %v8143_v9  ;;  %vm8137_vm6 = vcmp.eq.f32.partialorder %v8136_v63, 8.507059e+37  ;;  %v8153_v41 = vand.u32 2147483648, %v14177_v3  ;;  %vm8148_vm14 = vweird.f32 %v9337_v7 }
 0x9ee   : > { %v8135_v45 = vsel %vm8134_vm0, %v9335_v60, %v8131_v26  ;;  %v8151_v25 = vand.u32 2147483647, %v14177_v3  ;;  %vm14811_vm3 = vcmask 23552   ;;  %vm8147_vm5 = vweird.f32 %v14177_v3 }
 0x9ef   : > { %v8140_v62 = vsel %vm8137_vm6, %v8139_v6, %v8135_v45  ;;  %v8145_v11 = vmul.f32 %v9337_v7, %v8144_v0  ;;  %vm8149_vm8 = vmor %vm8147_vm5, %vm8148_vm14  ;;  %v8154_v5 = vor.u32 1.1754944e-38, %v8153_v41  ;;  %v8168_v55 = vand.u32 2147483648, %v14186_v21 }
 0x9f0   : > { %v9339_v52 = vpop.eup %9338  ;;  %8332 = vst [vmem:[#allocation1 + $0x21] ss:$2 sm:$0xff] %v8140_v62  ;;  %vm8152_vm9 = vcmp.eq.f32.partialorder %v8151_v25, 8.507059e+37  ;;  %vm14812_vm2 = vmmov %vm14811_vm3  ;;  %v8166_v15 = vand.u32 2147483647, %v14186_v21  ;;  %vm8162_vm4 = vweird.f32 %v14186_v21 }
 0x9f1   : > { %v8335_v17 = vld.sshfl [vmem:[#allocation1] sm:$0xff pattern:$0x75316420]  ;;  %v8158_v49 = vmul.f32 %v9339_v52, %v14186_v21  ;;  %v8146_v47 = vadd.f32 %v9337_v7, %v8145_v11  ;;  %vm8163_vm10 = vweird.f32 %v9339_v52  ;;  %v8169_v3 = vor.u32 1.1754944e-38, %v8168_v55  ;;  %vm14813_vm1 = vmmov %vm14812_vm2 }
 0x9f2   : > { %8399 = vst.msk [vmem:[%s12711_s22 + $0xe0] sm:$0xff] %vm14811_vm3, %v8335_v17  ;;  %vm8164_vm13 = vmor %vm8162_vm4, %vm8163_vm10  ;;  %vm8167_vm12 = vcmp.eq.f32.partialorder %v8166_v15, 8.507059e+37 }
 0x9f3   : > { %v8159_v58 = vsub.f32 1.0, %v8158_v49  ;;  %v8336_v28 = vld.sshfl [vmem:[#allocation1 + $0x10] sm:$0xff pattern:$0x75316420]  ;;  %v8150_v37 = vsel %vm8149_vm8, %v9337_v7, %v8146_v47  ;;  %vm14814_vm15 = vmmov %vm14813_vm1 }
 0x9f4   : > { %8400 = vst.msk [vmem:[%s12711_s22 + $0xe8] sm:$0xff] %vm14812_vm2, %v8336_v28  ;;  %v8155_v50 = vsel %vm8152_vm9, %v8154_v5, %v8150_v37 }
 0x9f5   : > { %v8160_v57 = vmul.f32 %v9339_v52, %v8159_v58  ;;  %8333 = vst [vmem:[#allocation1 + $0x30] ss:$2 sm:$0xff] %v8155_v50 }
 0x9f7   : > { %v8161_v40 = vadd.f32 %v9339_v52, %v8160_v57  ;;  %v8337_v4 = vld.sshfl [vmem:[#allocation1 + $0x20] sm:$0xff pattern:$0x75316420] }
 0x9f8   : > { %8401 = vst.msk [vmem:[%s12711_s22 + $0xf0] sm:$0xff] %vm14813_vm1, %v8337_v4 }
 0x9f9   : > { %v8165_v2 = vsel %vm8164_vm13, %v9339_v52, %v8161_v40 }
 0x9fa   : > { %v8170_v46 = vsel %vm8167_vm12, %v8169_v3, %v8165_v2 }
 0x9fb   : > { %8334 = vst [vmem:[#allocation1 + $0x31] ss:$2 sm:$0xff] %v8170_v46 }
 0xa02   : > { %v8338_v1 = vld.sshfl [vmem:[#allocation1 + $0x30] sm:$0xff pattern:$0x75316420] }
 0xa03   : > { %8402 = vst.msk [vmem:[%s12711_s22 + $0xf8] sm:$0xff] %vm14814_vm15, %v8338_v1 }
 0xa04 PF: > { %s14815_s23 = sld [smem:[#allocation7_spill]]  ;;  %p8900_p4 = scmp.ge.s32.totalorder %s9411_s16, 2 }
 0xa06   : > { %p8897_p5 = pnand %p8900_p4, %p9550_p6 }
 0xa08   : > { %p8898_p7 = pneg %p8897_p5 }
 0xa0a   : > { %s8446_s21 = sand.u32 1, %s14815_s23  }
 0xa0b   : > { %s8447_s26 = scalar_lea.sflag [#allocation5], %s8446_s21 }
 0xa0c   : > { %9394 = dma.done.wait (%p8898_p7), %s8447_s26, 64  }
 0xa0d   : > { %9396 = vsyncadd (%p8898_p7), %s8447_s26, 4294967232  ;;  %s14817_s16 = sld [smem:[#allocation9_spill]]  ;;  %s14820_s29 = smov %s9403_s30 }
 0xa0e   : > { %s14818_s18 = sld [smem:[#allocation8_spill]] }
 0xa0f   : > { %s14819_s15 = sld [smem:[#allocation10_spill]] }
 0xa13   : > { %p25_p8 = scmp.ge.s32.totalorder %s14817_s16, 4  }
 0xa14   : > { %s14821_s30 = smov %s14818_s18 }
 0xa15   :  { %27 = sbr.rel (!%p25_p8) target bundleno = 6 (0x6), region = 208 }
 0xa1a   :  { %8453 = vsyncpa [#allocation5], 1 }
 0xa1b   :  { %8455 = vsyncpa [#allocation5 + $0x1], 1 }

</bundles_post_ra>
